<compile_context>
chip_gen: v5e
topology: v5e:2x2
jax: 0.10.0
libtpu: 0.0.40
codegen_flags: <defaults>
</compile_context>

<pallas_src>
import functools
import math
from types import SimpleNamespace

import jax
import jax.numpy as jnp
from jax.experimental import pallas as pl
from jax.experimental.pallas import tpu as pltpu


def _act(x, act):
    if act == "relu":
        return jnp.maximum(x, 0.0)
    if act in ("h_swish", "hswish", "hardswish"):
        return x * jnp.clip(x + 3.0, 0.0, 6.0) * (1.0 / 6.0)
    return x


# ----------------------------- fused segment kernel -----------------------------

def _zero_border(buf, n, p, h, w):
    """Zero only the padding border of a (n, h+2p, w+2p, c) scratch buffer."""
    if p == 0:
        return
    Hb, Wb, c = buf.shape[1], buf.shape[2], buf.shape[3]
    buf[:, 0:p, :, :] = jnp.zeros((n, p, Wb, c), buf.dtype)
    buf[:, p + h:Hb, :, :] = jnp.zeros((n, Hb - h - p, Wb, c), buf.dtype)
    buf[:, p:p + h, 0:p, :] = jnp.zeros((n, h, p, c), buf.dtype)
    buf[:, p:p + h, p + w:Wb, :] = jnp.zeros((n, h, Wb - w - p, c), buf.dtype)


def _segment_kernel(*refs, plan):
    n_in, n_out = plan["n_in"], plan["n_out"]
    in_refs = refs[:n_in]
    out_ref = refs[n_in]
    bufs = refs[n_in + n_out:]
    N = plan["batch"]

    r = 0
    cur = None                                            # [N*H*W, C] f32 value

    # ---- stem: dense 3x3 conv as ONE im2col matmul (+BN+act) ----
    if plan["stem"] is not None:
        st = plan["stem"]
        xcol = in_refs[r][...]                            # [N*Ho*Wo, k*k*cin] bf16
        w = in_refs[r + 1][...]                           # [k*k*cin, cout]   bf16
        b = in_refs[r + 2][...]                           # [1, cout]         f32
        r += 3
        cur = _act(jnp.dot(xcol, w, preferred_element_type=jnp.float32) + b, st["act"])

    # ---- MBConv blocks ----
    for bi, bp in enumerate(plan["blocks"]):
        buf = bufs[bi]
        k, s, p = bp["k"], bp["s"], bp["p"]
        Hin, Win, Ho, Wo = bp["h"], bp["w"], bp["ho"], bp["wo"]
        mid, act = bp["mid"], bp["act"]

        # -- 1x1 expand (+BN+act); batch*space flattened into M, ONE matmul --
        if bp["from_ref"]:
            # First block of the segment (possibly strided): the wrapper supplies the
            # input already in zero-padded stride-s parity-view layout
            # [N * s*s*Hv * Wv, cin] plus a [s*s*Hv, Wv, 1] validity mask so padding
            # stays exactly 0 (and not act(exp_b)) after the expansion.
            Hv, Wv = bp["hv"], bp["wv"]
            x2 = in_refs[r][...]                          # [N*s*s*Hv*Wv, cin] bf16
            mask = in_refs[r + 1][...]                    # [s*s*Hv, Wv, 1]    f32
            r += 2
            if bp["expand"] > 1:
                ew = in_refs[r][...]
                eb = in_refs[r + 1][...]
                r += 2
                y = _act(jnp.dot(x2, ew, preferred_element_type=jnp.float32) + eb, act)
            else:
                y = x2.astype(jnp.float32)
            # ONE masked store of the whole padded parity map (replaces scratch zeroing).
            buf[...] = (y.reshape(N, s * s * Hv, Wv, mid) * mask).astype(buf.dtype)
        else:
            # Inner (stride-1) block: input is the previous block's value; scatter the
            # expanded activation into the interior of a zero-padded VMEM buffer.
            if bp["expand"] > 1:
                ew = in_refs[r][...]
                eb = in_refs[r + 1][...]
                r += 2
                y = _act(jnp.dot(cur.astype(jnp.bfloat16), ew,
                                 preferred_element_type=jnp.float32) + eb, act)
            else:
                y = cur
            _zero_border(buf, N, p, Hin, Win)             # only the border, only once
            buf[:, p:p + Hin, p:p + Win, :] = y.reshape(N, Hin, Win, mid).astype(buf.dtype)

        dw_w = in_refs[r][...]                            # [k*k, mid]  f32 (one load)
        dw_b = in_refs[r + 1][...]                        # [1, mid]    f32
        pw_w = in_refs[r + 2][...]                        # [mid, cout] bf16
        pw_b = in_refs[r + 3][...]                        # [1, cout]   f32
        r += 4

        # -- kxk depthwise (+BN+act): every tap is a contiguous [N, Ho, Wo, mid] slab --
        acc = None
        for t in range(k * k):
            ki, kj = divmod(t, k)
            if bp["from_ref"]:
                v = (ki % s) * s + (kj % s)               # parity view of this tap
                r0 = v * bp["hv"] + ki // s
                c0 = kj // s
            else:
                r0, c0 = ki, kj                           # plain padded map (s == 1)
            slab = buf[:, r0:r0 + Ho, c0:c0 + Wo, :] * dw_w[t]
            acc = slab if acc is None else acc + slab
        z = _act(acc + dw_b, act)                         # [N, Ho, Wo, mid] f32

        # -- 1x1 project (+BN): ONE matmul over all pixels, f32 accumulation --
        cur = jnp.dot(z.reshape(N * Ho * Wo, mid).astype(jnp.bfloat16), pw_w,
                      preferred_element_type=jnp.float32) + pw_b

    out_ref[...] = cur.astype(out_ref.dtype)


# ----------------------------- wrapper-side layout helpers -----------------------------

def _space_to_depth_pad(x, k, s):
    """x: [N, H, W, C] -> zero-padded stride-s parity-view layout [N, s*s*Hv, Wv, C]
       with xv[n, (a*s+b)*Hv + i, j, :] == x_padded[n, s*i + a, s*j + b, :]."""
    N, H, W, C = x.shape
    p = k // 2
    Hp = -(-(H + 2 * p) // s) * s
    Wp = -(-(W + 2 * p) // s) * s
    xp = jnp.pad(x, ((0, 0), (p, Hp - H - p), (p, Wp - W - p), (0, 0)))
    Hv, Wv = Hp // s, Wp // s
    xv = (xp.reshape(N, Hv, s, Wv, s, C)
            .transpose(0, 2, 4, 1, 3, 5)
            .reshape(N, s * s * Hv, Wv, C))
    return xv, Hv, Wv


def _segment_call(blocks, batch, in_act=None, stem=None, stem_xcol=None, stem_hw=None,
                  out_dtype=jnp.float32):
    """Build and run ONE fused pallas_call for (optional stem) + a list of MBConv blocks.
       Returns the segment output as [N, Ho, Wo, Cout]."""
    operands = []
    plan_blocks = []
    scratch = []

    if stem is not None:
        operands += [stem_xcol, stem["w"], stem["b"]]
        plan_stem = dict(act=stem["act"])
        h, w = stem_hw
        c = stem["cout"]
    else:
        plan_stem = None
        _, h, w, c = in_act.shape

    for i, bp in enumerate(blocks):
        k, s = bp["k"], bp["stride"]
        p = k // 2
        ho = (h + 2 * p - k) // s + 1
        wo = (w + 2 * p - k) // s + 1
        from_ref = (stem is None and i == 0)
        pb = dict(k=k, s=s, p=p, h=h, w=w, ho=ho, wo=wo, cin=bp["cin"], mid=bp["mid"],
                  cout=bp["cout"], expand=bp["expand"], act=bp["act"], from_ref=from_ref)
        if from_ref:
            xv, hv, wv = _space_to_depth_pad(in_act.astype(jnp.bfloat16), k, s)
            mask = _space_to_depth_pad(jnp.ones((1, h, w, 1), jnp.float32), k, s)[0][0]
            operands += [xv.reshape(batch * s * s * hv * wv, bp["cin"]), mask]
            pb["hv"], pb["wv"] = hv, wv
            scratch.append(pltpu.VMEM((batch, s * s * hv, wv, bp["mid"]), jnp.float32))
        else:
            assert s == 1, "inner blocks are stride 1 (guaranteed by the module)"
            scratch.append(pltpu.VMEM((batch, h + 2 * p, w + 2 * p, bp["mid"]),
                                      jnp.float32))
        if bp["expand"] > 1:
            operands += [bp["exp_w"], bp["exp_b"]]
        operands += [bp["dw_w"], bp["dw_b"], bp["pw_w"], bp["pw_b"]]
        plan_blocks.append(pb)
        h, w, c = ho, wo, bp["cout"]

    plan = dict(batch=batch, stem=plan_stem, blocks=tuple(plan_blocks),
                n_in=len(operands), n_out=1)
    # Note: channel counts (16/32/48) keep the HBM stores sub-128-lane; at these toy
    # sizes the bytes are negligible -- pad channels to 128 at real resolutions.
    out = pl.pallas_call(
        functools.partial(_segment_kernel, plan=plan),
        out_shape=jax.ShapeDtypeStruct((batch * h * w, c), out_dtype),
        scratch_shapes=scratch,
    )(*operands)
    return out.reshape(batch, h, w, c)


# ----------------------------- parameter construction -----------------------------

class _KeyGen:
    def __init__(self, seed):
        self._key = jax.random.PRNGKey(seed)
        self._i = 0

    def __call__(self):
        self._i += 1
        return jax.random.fold_in(self._key, self._i)


def _fold_bn(kg, cout):
    gamma = 1.0 + 0.1 * jax.random.normal(kg(), (cout,), jnp.float32)
    beta = 0.1 * jax.random.normal(kg(), (cout,), jnp.float32)
    mean = 0.1 * jax.random.normal(kg(), (cout,), jnp.float32)
    var = 0.5 + jnp.abs(jax.random.normal(kg(), (cout,), jnp.float32))
    scale = gamma / jnp.sqrt(var + 1e-5)
    bias = beta - mean * scale
    return scale, bias


def _make_stem(kg, k, cin, cout):
    w = jax.random.normal(kg(), (k, k, cin, cout), jnp.float32) / math.sqrt(k * k * cin)
    scale, bias = _fold_bn(kg, cout)
    w = (w * scale).reshape(k * k * cin, cout)
    return w.astype(jnp.bfloat16), bias.reshape(1, cout).astype(jnp.float32)


def _make_pw(kg, cin, cout):
    w = jax.random.normal(kg(), (cin, cout), jnp.float32) / math.sqrt(cin)
    scale, bias = _fold_bn(kg, cout)
    return (w * scale[None, :]).astype(jnp.bfloat16), bias.reshape(1, cout).astype(jnp.float32)


def _make_dw(kg, k, c):
    w = jax.random.normal(kg(), (k, k, c), jnp.float32) / math.sqrt(k * k)
    scale, bias = _fold_bn(kg, c)
    w = (w * scale[None, None, :]).reshape(k * k, c)
    return w.astype(jnp.float32), bias.reshape(1, c).astype(jnp.float32)


def build_token_pyramid_params(supernet, stage_names, in_chans=3, seed=42):
    kg = _KeyGen(seed)
    stem_w, stem_b = _make_stem(kg, 3, in_chans, supernet.stem.c)
    params = dict(stem=dict(w=stem_w, b=stem_b, k=3, stride=supernet.stem.s,
                            cin=in_chans, cout=supernet.stem.c,
                            act=supernet.stem.act_func))
    stages = []
    feat = supernet.stem.c
    for name in stage_names:
        cfg = getattr(supernet, name)
        width = cfg.c
        n_block = max(cfg.d)      # runtime_depth == max depth (all blocks active)
        k = max(cfg.k)            # active kernel size = max of the search space
        expand = max(cfg.t)       # active expand ratio = max of the search space
        blocks = []
        for i in range(n_block):
            stride = cfg.s if i == 0 else 1
            mid = feat * expand   # make_divisible(., 8) is a no-op for this config
            bp = dict(k=k, stride=stride, cin=feat, cout=width, mid=mid,
                      expand=expand, act=cfg.act_func)
            if expand > 1:
                bp["exp_w"], bp["exp_b"] = _make_pw(kg, feat, mid)
            bp["dw_w"], bp["dw_b"] = _make_dw(kg, k, mid)
            bp["pw_w"], bp["pw_b"] = _make_pw(kg, mid, width)
            blocks.append(bp)
            feat = width
        stages.append(blocks)
    params["stages"] = stages
    return params


# ----------------------------- forward -----------------------------

def token_pyramid_forward(x_nchw, params, embed_out_indice):
    x = jnp.transpose(x_nchw, (0, 2, 3, 1)).astype(jnp.float32)   # NCHW -> NHWC
    N, H, W, _ = x.shape

    # Stem im2col in the wrapper (3 input channels -> negligible HBM expansion).
    # TODO(synk): at real resolutions do the im2col in-kernel via the parity-view trick.
    sp = params["stem"]
    k, s = sp["k"], sp["stride"]
    p = k // 2
    Ho = (H + 2 * p - k) // s + 1
    Wo = (W + 2 * p - k) // s + 1
    xp = jnp.pad(x, ((0, 0), (p, p), (p, p), (0, 0)))
    cols = [xp[:, ki:ki + (Ho - 1) * s + 1:s, kj:kj + (Wo - 1) * s + 1:s, :]
            for ki in range(k) for kj in range(k)]
    xcol = (jnp.stack(cols, axis=3)
              .reshape(N * Ho * Wo, k * k * sp["cin"])
              .astype(jnp.bfloat16))

    stages = params["stages"]
    n_stages = len(stages)
    outs_by_stage = {}

    # Fuse the stem into stage 0 when stage 0's first block is stride 1 (true here);
    # otherwise run the stem as its own segment.
    fuse_stage0 = n_stages > 0 and stages[0][0]["stride"] == 1
    if fuse_stage0:
        want0 = 0 in embed_out_indice
        cur = _segment_call(stages[0], N, stem=sp, stem_xcol=xcol, stem_hw=(Ho, Wo),
                            out_dtype=jnp.float32 if want0 else jnp.bfloat16)
        outs_by_stage[0] = cur
        first_stage = 1
    else:
        cur = _segment_call([], N, stem=sp, stem_xcol=xcol, stem_hw=(Ho, Wo),
                            out_dtype=jnp.bfloat16)
        first_stage = 0

    for sid in range(first_stage, n_stages):
        want = sid in embed_out_indice
        cur = _segment_call(stages[sid], N, in_act=cur,
                            out_dtype=jnp.float32 if want else jnp.bfloat16)
        outs_by_stage[sid] = cur

    return [jnp.transpose(outs_by_stage[sid], (0, 3, 1, 2)).astype(jnp.float32)
            for sid in sorted(embed_out_indice)]


# ----------------------------- main -----------------------------

if __name__ == "__main__":
    # Synthetic supernet config (SE disabled, relu activations).
    supernet = SimpleNamespace(
        stem=SimpleNamespace(c=16, s=2, act_func="relu"),
        layer1=SimpleNamespace(c=16, d=[1], k=[3], t=[1], s=1, act_func="relu", se=False),
        layer2=SimpleNamespace(c=32, d=[1, 2], k=[3, 5], t=[3, 4], s=2, act_func="relu", se=False),
        layer3=SimpleNamespace(c=48, d=[2], k=[3], t=[4], s=2, act_func="relu", se=False),
        channels_per_group=1,
    )
    stage_names = ["layer1", "layer2", "layer3"]
    embed_out_indice = (1, 2)

    params = build_token_pyramid_params(supernet, stage_names, in_chans=3, seed=42)

    x = jax.random.normal(jax.random.PRNGKey(0), (2, 3, 16, 16), jnp.float32)  # NCHW

    fwd = jax.jit(functools.partial(token_pyramid_forward,
                                    params=params,
                                    embed_out_indice=embed_out_indice))
    outs = jax.block_until_ready(fwd(x))

    # 16x16 -> stem /2 -> 8x8 -> layer2 /2 -> 4x4 -> layer3 /2 -> 2x2
    assert outs[0].shape == (2, 32, 4, 4), outs[0].shape
    assert outs[1].shape == (2, 48, 2, 2), outs[1].shape
    assert all(bool(jnp.isfinite(o).all()) for o in outs)
    print("KERNEL_OK")
</pallas_src>

<mosaic_0001>
module attributes {stable_mosaic.version = 11 : i64} {
  func.func @_segment_kernel(%arg0: memref<128x27xbf16, #tpu.memory_space<vmem>>, %arg1: memref<27x16xbf16, #tpu.memory_space<vmem>>, %arg2: memref<1x16xf32, #tpu.memory_space<vmem>>, %arg3: memref<9x16xf32, #tpu.memory_space<vmem>>, %arg4: memref<1x16xf32, #tpu.memory_space<vmem>>, %arg5: memref<16x16xbf16, #tpu.memory_space<vmem>>, %arg6: memref<1x16xf32, #tpu.memory_space<vmem>>, %arg7: memref<128x16xbf16, #tpu.memory_space<vmem>>, %arg8: memref<2x10x10x16xf32, #tpu.memory_space<vmem>>) attributes {dimension_semantics = [], scalar_prefetch = 0 : i64, scratch_operands = 1 : i64, tpu.core_type = #tpu.core_type<tc>} {
    %c0 = arith.constant 0 : index
    %c0_0 = arith.constant 0 : index
    %0 = vector.load %arg0[%c0, %c0_0] : memref<128x27xbf16, #tpu.memory_space<vmem>>, vector<128x27xbf16>
    %c0_1 = arith.constant 0 : index
    %c0_2 = arith.constant 0 : index
    %1 = vector.load %arg1[%c0_1, %c0_2] : memref<27x16xbf16, #tpu.memory_space<vmem>>, vector<27x16xbf16>
    %c0_3 = arith.constant 0 : index
    %c0_4 = arith.constant 0 : index
    %2 = vector.load %arg2[%c0_3, %c0_4] : memref<1x16xf32, #tpu.memory_space<vmem>>, vector<1x16xf32>
    %cst = arith.constant dense<0.000000e+00> : vector<128x16xf32>
    %3 = tpu.matmul %0, %1, %cst {dimension_numbers = #tpu.dot_dimension_numbers<[1], [0], [0], [1], [0, 0, 1, 1], [], []>} : vector<128x27xbf16>, vector<27x16xbf16>, vector<128x16xf32> -> vector<128x16xf32>
    %4 = vector.broadcast %2 : vector<1x16xf32> to vector<128x16xf32>
    %5 = arith.addf %3, %4 : vector<128x16xf32>
    %cst_5 = arith.constant 0.000000e+00 : f32
    %6 = vector.broadcast %cst_5 : f32 to vector<128x16xf32>
    %7 = arith.maximumf %5, %6 : vector<128x16xf32>
    %cst_6 = arith.constant 0.000000e+00 : f32
    %8 = vector.broadcast %cst_6 : f32 to vector<2x1x10x16xf32>
    %c0_7 = arith.constant 0 : index
    %c0_8 = arith.constant 0 : index
    %c0_9 = arith.constant 0 : index
    %c0_10 = arith.constant 0 : index
    %9 = vector.load %arg8[%c0_7, %c0_8, %c0_9, %c0_10] : memref<2x10x10x16xf32, #tpu.memory_space<vmem>>, vector<2x1x10x16xf32>
    tpu.vector_store %arg8[%c0_7, %c0_8, %c0_9, %c0_10], %8 {strides = array<i32>} : memref<2x10x10x16xf32, #tpu.memory_space<vmem>>, vector<2x1x10x16xf32>,
    %cst_11 = arith.constant 0.000000e+00 : f32
    %10 = vector.broadcast %cst_11 : f32 to vector<2x1x10x16xf32>
    %c0_12 = arith.constant 0 : index
    %c9 = arith.constant 9 : index
    %c0_13 = arith.constant 0 : index
    %c0_14 = arith.constant 0 : index
    %11 = vector.load %arg8[%c0_12, %c9, %c0_13, %c0_14] : memref<2x10x10x16xf32, #tpu.memory_space<vmem>>, vector<2x1x10x16xf32>
    tpu.vector_store %arg8[%c0_12, %c9, %c0_13, %c0_14], %10 {strides = array<i32>} : memref<2x10x10x16xf32, #tpu.memory_space<vmem>>, vector<2x1x10x16xf32>,
    %cst_15 = arith.constant 0.000000e+00 : f32
    %12 = vector.broadcast %cst_15 : f32 to vector<2x8x1x16xf32>
    %c0_16 = arith.constant 0 : index
    %c1 = arith.constant 1 : index
    %c0_17 = arith.constant 0 : index
    %c0_18 = arith.constant 0 : index
    %13 = vector.load %arg8[%c0_16, %c1, %c0_17, %c0_18] : memref<2x10x10x16xf32, #tpu.memory_space<vmem>>, vector<2x8x1x16xf32>
    tpu.vector_store %arg8[%c0_16, %c1, %c0_17, %c0_18], %12 {strides = array<i32>} : memref<2x10x10x16xf32, #tpu.memory_space<vmem>>, vector<2x8x1x16xf32>,
    %cst_19 = arith.constant 0.000000e+00 : f32
    %14 = vector.broadcast %cst_19 : f32 to vector<2x8x1x16xf32>
    %c0_20 = arith.constant 0 : index
    %c1_21 = arith.constant 1 : index
    %c9_22 = arith.constant 9 : index
    %c0_23 = arith.constant 0 : index
    %15 = vector.load %arg8[%c0_20, %c1_21, %c9_22, %c0_23] : memref<2x10x10x16xf32, #tpu.memory_space<vmem>>, vector<2x8x1x16xf32>
    tpu.vector_store %arg8[%c0_20, %c1_21, %c9_22, %c0_23], %14 {strides = array<i32>} : memref<2x10x10x16xf32, #tpu.memory_space<vmem>>, vector<2x8x1x16xf32>,
    %16 = vector.shape_cast %7 : vector<128x16xf32> to vector<2x8x8x16xf32>
    %c0_24 = arith.constant 0 : index
    %c1_25 = arith.constant 1 : index
    %c1_26 = arith.constant 1 : index
    %c0_27 = arith.constant 0 : index
    %17 = vector.load %arg8[%c0_24, %c1_25, %c1_26, %c0_27] : memref<2x10x10x16xf32, #tpu.memory_space<vmem>>, vector<2x8x8x16xf32>
    tpu.vector_store %arg8[%c0_24, %c1_25, %c1_26, %c0_27], %16 {strides = array<i32>} : memref<2x10x10x16xf32, #tpu.memory_space<vmem>>, vector<2x8x8x16xf32>,
    %c0_28 = arith.constant 0 : index
    %c0_29 = arith.constant 0 : index
    %18 = vector.load %arg3[%c0_28, %c0_29] : memref<9x16xf32, #tpu.memory_space<vmem>>, vector<9x16xf32>
    %c0_30 = arith.constant 0 : index
    %c0_31 = arith.constant 0 : index
    %19 = vector.load %arg4[%c0_30, %c0_31] : memref<1x16xf32, #tpu.memory_space<vmem>>, vector<1x16xf32>
    %c0_32 = arith.constant 0 : index
    %c0_33 = arith.constant 0 : index
    %20 = vector.load %arg5[%c0_32, %c0_33] : memref<16x16xbf16, #tpu.memory_space<vmem>>, vector<16x16xbf16>
    %c0_34 = arith.constant 0 : index
    %c0_35 = arith.constant 0 : index
    %21 = vector.load %arg6[%c0_34, %c0_35] : memref<1x16xf32, #tpu.memory_space<vmem>>, vector<1x16xf32>
    %c0_36 = arith.constant 0 : index
    %c0_37 = arith.constant 0 : index
    %c0_38 = arith.constant 0 : index
    %c0_39 = arith.constant 0 : index
    %22 = vector.load %arg8[%c0_36, %c0_37, %c0_38, %c0_39] : memref<2x10x10x16xf32, #tpu.memory_space<vmem>>, vector<2x8x8x16xf32>
    %23 = vector.extract_strided_slice %18 {offsets = [0, 0], sizes = [1, 16], strides = [1, 1]} : vector<9x16xf32> to vector<1x16xf32>
    %24 = vector.shape_cast %23 : vector<1x16xf32> to vector<16xf32>
    %25 = vector.shape_cast %24 : vector<16xf32> to vector<1x1x1x16xf32>
    %26 = vector.broadcast %25 : vector<1x1x1x16xf32> to vector<2x8x8x16xf32>
    %27 = arith.mulf %22, %26 : vector<2x8x8x16xf32>
    %c0_40 = arith.constant 0 : index
    %c0_41 = arith.constant 0 : index
    %c1_42 = arith.constant 1 : index
    %c0_43 = arith.constant 0 : index
    %28 = vector.load %arg8[%c0_40, %c0_41, %c1_42, %c0_43] : memref<2x10x10x16xf32, #tpu.memory_space<vmem>>, vector<2x8x8x16xf32>
    %29 = vector.extract_strided_slice %18 {offsets = [1, 0], sizes = [1, 16], strides = [1, 1]} : vector<9x16xf32> to vector<1x16xf32>
    %30 = vector.shape_cast %29 : vector<1x16xf32> to vector<16xf32>
    %31 = vector.shape_cast %30 : vector<16xf32> to vector<1x1x1x16xf32>
    %32 = vector.broadcast %31 : vector<1x1x1x16xf32> to vector<2x8x8x16xf32>
    %33 = arith.mulf %28, %32 : vector<2x8x8x16xf32>
    %34 = arith.addf %27, %33 : vector<2x8x8x16xf32>
    %c0_44 = arith.constant 0 : index
    %c0_45 = arith.constant 0 : index
    %c2 = arith.constant 2 : index
    %c0_46 = arith.constant 0 : index
    %35 = vector.load %arg8[%c0_44, %c0_45, %c2, %c0_46] : memref<2x10x10x16xf32, #tpu.memory_space<vmem>>, vector<2x8x8x16xf32>
    %36 = vector.extract_strided_slice %18 {offsets = [2, 0], sizes = [1, 16], strides = [1, 1]} : vector<9x16xf32> to vector<1x16xf32>
    %37 = vector.shape_cast %36 : vector<1x16xf32> to vector<16xf32>
    %38 = vector.shape_cast %37 : vector<16xf32> to vector<1x1x1x16xf32>
    %39 = vector.broadcast %38 : vector<1x1x1x16xf32> to vector<2x8x8x16xf32>
    %40 = arith.mulf %35, %39 : vector<2x8x8x16xf32>
    %41 = arith.addf %34, %40 : vector<2x8x8x16xf32>
    %c0_47 = arith.constant 0 : index
    %c1_48 = arith.constant 1 : index
    %c0_49 = arith.constant 0 : index
    %c0_50 = arith.constant 0 : index
    %42 = vector.load %arg8[%c0_47, %c1_48, %c0_49, %c0_50] : memref<2x10x10x16xf32, #tpu.memory_space<vmem>>, vector<2x8x8x16xf32>
    %43 = vector.extract_strided_slice %18 {offsets = [3, 0], sizes = [1, 16], strides = [1, 1]} : vector<9x16xf32> to vector<1x16xf32>
    %44 = vector.shape_cast %43 : vector<1x16xf32> to vector<16xf32>
    %45 = vector.shape_cast %44 : vector<16xf32> to vector<1x1x1x16xf32>
    %46 = vector.broadcast %45 : vector<1x1x1x16xf32> to vector<2x8x8x16xf32>
    %47 = arith.mulf %42, %46 : vector<2x8x8x16xf32>
    %48 = arith.addf %41, %47 : vector<2x8x8x16xf32>
    %c0_51 = arith.constant 0 : index
    %c1_52 = arith.constant 1 : index
    %c1_53 = arith.constant 1 : index
    %c0_54 = arith.constant 0 : index
    %49 = vector.load %arg8[%c0_51, %c1_52, %c1_53, %c0_54] : memref<2x10x10x16xf32, #tpu.memory_space<vmem>>, vector<2x8x8x16xf32>
    %50 = vector.extract_strided_slice %18 {offsets = [4, 0], sizes = [1, 16], strides = [1, 1]} : vector<9x16xf32> to vector<1x16xf32>
    %51 = vector.shape_cast %50 : vector<1x16xf32> to vector<16xf32>
    %52 = vector.shape_cast %51 : vector<16xf32> to vector<1x1x1x16xf32>
    %53 = vector.broadcast %52 : vector<1x1x1x16xf32> to vector<2x8x8x16xf32>
    %54 = arith.mulf %49, %53 : vector<2x8x8x16xf32>
    %55 = arith.addf %48, %54 : vector<2x8x8x16xf32>
    %c0_55 = arith.constant 0 : index
    %c1_56 = arith.constant 1 : index
    %c2_57 = arith.constant 2 : index
    %c0_58 = arith.constant 0 : index
    %56 = vector.load %arg8[%c0_55, %c1_56, %c2_57, %c0_58] : memref<2x10x10x16xf32, #tpu.memory_space<vmem>>, vector<2x8x8x16xf32>
    %57 = vector.extract_strided_slice %18 {offsets = [5, 0], sizes = [1, 16], strides = [1, 1]} : vector<9x16xf32> to vector<1x16xf32>
    %58 = vector.shape_cast %57 : vector<1x16xf32> to vector<16xf32>
    %59 = vector.shape_cast %58 : vector<16xf32> to vector<1x1x1x16xf32>
    %60 = vector.broadcast %59 : vector<1x1x1x16xf32> to vector<2x8x8x16xf32>
    %61 = arith.mulf %56, %60 : vector<2x8x8x16xf32>
    %62 = arith.addf %55, %61 : vector<2x8x8x16xf32>
    %c0_59 = arith.constant 0 : index
    %c2_60 = arith.constant 2 : index
    %c0_61 = arith.constant 0 : index
    %c0_62 = arith.constant 0 : index
    %63 = vector.load %arg8[%c0_59, %c2_60, %c0_61, %c0_62] : memref<2x10x10x16xf32, #tpu.memory_space<vmem>>, vector<2x8x8x16xf32>
    %64 = vector.extract_strided_slice %18 {offsets = [6, 0], sizes = [1, 16], strides = [1, 1]} : vector<9x16xf32> to vector<1x16xf32>
    %65 = vector.shape_cast %64 : vector<1x16xf32> to vector<16xf32>
    %66 = vector.shape_cast %65 : vector<16xf32> to vector<1x1x1x16xf32>
    %67 = vector.broadcast %66 : vector<1x1x1x16xf32> to vector<2x8x8x16xf32>
    %68 = arith.mulf %63, %67 : vector<2x8x8x16xf32>
    %69 = arith.addf %62, %68 : vector<2x8x8x16xf32>
    %c0_63 = arith.constant 0 : index
    %c2_64 = arith.constant 2 : index
    %c1_65 = arith.constant 1 : index
    %c0_66 = arith.constant 0 : index
    %70 = vector.load %arg8[%c0_63, %c2_64, %c1_65, %c0_66] : memref<2x10x10x16xf32, #tpu.memory_space<vmem>>, vector<2x8x8x16xf32>
    %71 = vector.extract_strided_slice %18 {offsets = [7, 0], sizes = [1, 16], strides = [1, 1]} : vector<9x16xf32> to vector<1x16xf32>
    %72 = vector.shape_cast %71 : vector<1x16xf32> to vector<16xf32>
    %73 = vector.shape_cast %72 : vector<16xf32> to vector<1x1x1x16xf32>
    %74 = vector.broadcast %73 : vector<1x1x1x16xf32> to vector<2x8x8x16xf32>
    %75 = arith.mulf %70, %74 : vector<2x8x8x16xf32>
    %76 = arith.addf %69, %75 : vector<2x8x8x16xf32>
    %c0_67 = arith.constant 0 : index
    %c2_68 = arith.constant 2 : index
    %c2_69 = arith.constant 2 : index
    %c0_70 = arith.constant 0 : index
    %77 = vector.load %arg8[%c0_67, %c2_68, %c2_69, %c0_70] : memref<2x10x10x16xf32, #tpu.memory_space<vmem>>, vector<2x8x8x16xf32>
    %78 = vector.extract_strided_slice %18 {offsets = [8, 0], sizes = [1, 16], strides = [1, 1]} : vector<9x16xf32> to vector<1x16xf32>
    %79 = vector.shape_cast %78 : vector<1x16xf32> to vector<16xf32>
    %80 = vector.shape_cast %79 : vector<16xf32> to vector<1x1x1x16xf32>
    %81 = vector.broadcast %80 : vector<1x1x1x16xf32> to vector<2x8x8x16xf32>
    %82 = arith.mulf %77, %81 : vector<2x8x8x16xf32>
    %83 = arith.addf %76, %82 : vector<2x8x8x16xf32>
    %84 = vector.shape_cast %19 : vector<1x16xf32> to vector<1x1x1x16xf32>
    %85 = vector.broadcast %84 : vector<1x1x1x16xf32> to vector<2x8x8x16xf32>
    %86 = arith.addf %83, %85 : vector<2x8x8x16xf32>
    %cst_71 = arith.constant 0.000000e+00 : f32
    %87 = vector.broadcast %cst_71 : f32 to vector<2x8x8x16xf32>
    %88 = arith.maximumf %86, %87 : vector<2x8x8x16xf32>
    %89 = vector.shape_cast %88 : vector<2x8x8x16xf32> to vector<128x16xf32>
    %90 = arith.truncf %89 : vector<128x16xf32> to vector<128x16xbf16>
    %cst_72 = arith.constant dense<0.000000e+00> : vector<128x16xf32>
    %91 = tpu.matmul %90, %20, %cst_72 {dimension_numbers = #tpu.dot_dimension_numbers<[1], [0], [0], [1], [0, 0, 1, 1], [], []>} : vector<128x16xbf16>, vector<16x16xbf16>, vector<128x16xf32> -> vector<128x16xf32>
    %92 = vector.broadcast %21 : vector<1x16xf32> to vector<128x16xf32>
    %93 = arith.addf %91, %92 : vector<128x16xf32>
    %94 = arith.truncf %93 : vector<128x16xf32> to vector<128x16xbf16>
    %c0_73 = arith.constant 0 : index
    %c0_74 = arith.constant 0 : index
    %95 = vector.load %arg7[%c0_73, %c0_74] : memref<128x16xbf16, #tpu.memory_space<vmem>>, vector<128x16xbf16>
    tpu.vector_store %arg7[%c0_73, %c0_74], %94 {strides = array<i32>} : memref<128x16xbf16, #tpu.memory_space<vmem>>, vector<128x16xbf16>,
    return
  }
}

module attributes {stable_mosaic.version = 11 : i64} {
  func.func @_segment_kernel(%arg0: memref<288x16xbf16, #tpu.memory_space<vmem>>, %arg1: memref<24x6x1xf32, #tpu.memory_space<vmem>>, %arg2: memref<16x64xbf16, #tpu.memory_space<vmem>>, %arg3: memref<1x64xf32, #tpu.memory_space<vmem>>, %arg4: memref<25x64xf32, #tpu.memory_space<vmem>>, %arg5: memref<1x64xf32, #tpu.memory_space<vmem>>, %arg6: memref<64x32xbf16, #tpu.memory_space<vmem>>, %arg7: memref<1x32xf32, #tpu.memory_space<vmem>>, %arg8: memref<32x128xbf16, #tpu.memory_space<vmem>>, %arg9: memref<1x128xf32, #tpu.memory_space<vmem>>, %arg10: memref<25x128xf32, #tpu.memory_space<vmem>>, %arg11: memref<1x128xf32, #tpu.memory_space<vmem>>, %arg12: memref<128x32xbf16, #tpu.memory_space<vmem>>, %arg13: memref<1x32xf32, #tpu.memory_space<vmem>>, %arg14: memref<32x32xf32, #tpu.memory_space<vmem>>, %arg15: memref<2x24x6x64xf32, #tpu.memory_space<vmem>>, %arg16: memref<2x8x8x128xf32, #tpu.memory_space<vmem>>) attributes {dimension_semantics = [], scalar_prefetch = 0 : i64, scratch_operands = 2 : i64, tpu.core_type = #tpu.core_type<tc>} {
    %c0 = arith.constant 0 : index
    %c0_0 = arith.constant 0 : index
    %0 = vector.load %arg0[%c0, %c0_0] : memref<288x16xbf16, #tpu.memory_space<vmem>>, vector<288x16xbf16>
    %c0_1 = arith.constant 0 : index
    %c0_2 = arith.constant 0 : index
    %c0_3 = arith.constant 0 : index
    %1 = vector.load %arg1[%c0_1, %c0_2, %c0_3] : memref<24x6x1xf32, #tpu.memory_space<vmem>>, vector<24x6x1xf32>
    %c0_4 = arith.constant 0 : index
    %c0_5 = arith.constant 0 : index
    %2 = vector.load %arg2[%c0_4, %c0_5] : memref<16x64xbf16, #tpu.memory_space<vmem>>, vector<16x64xbf16>
    %c0_6 = arith.constant 0 : index
    %c0_7 = arith.constant 0 : index
    %3 = vector.load %arg3[%c0_6, %c0_7] : memref<1x64xf32, #tpu.memory_space<vmem>>, vector<1x64xf32>
    %cst = arith.constant dense<0.000000e+00> : vector<288x64xf32>
    %4 = tpu.matmul %0, %2, %cst {dimension_numbers = #tpu.dot_dimension_numbers<[1], [0], [0], [1], [0, 0, 1, 1], [], []>} : vector<288x16xbf16>, vector<16x64xbf16>, vector<288x64xf32> -> vector<288x64xf32>
    %5 = vector.broadcast %3 : vector<1x64xf32> to vector<288x64xf32>
    %6 = arith.addf %4, %5 : vector<288x64xf32>
    %cst_8 = arith.constant 0.000000e+00 : f32
    %7 = vector.broadcast %cst_8 : f32 to vector<288x64xf32>
    %8 = arith.maximumf %6, %7 : vector<288x64xf32>
    %9 = vector.shape_cast %8 : vector<288x64xf32> to vector<2x24x6x64xf32>
    %10 = vector.shape_cast %1 : vector<24x6x1xf32> to vector<1x24x6x1xf32>
    %11 = vector.broadcast %10 : vector<1x24x6x1xf32> to vector<2x24x6x64xf32>
    %12 = arith.mulf %9, %11 : vector<2x24x6x64xf32>
    %c0_9 = arith.constant 0 : index
    %c0_10 = arith.constant 0 : index
    %c0_11 = arith.constant 0 : index
    %c0_12 = arith.constant 0 : index
    %13 = vector.load %arg15[%c0_9, %c0_10, %c0_11, %c0_12] : memref<2x24x6x64xf32, #tpu.memory_space<vmem>>, vector<2x24x6x64xf32>
    tpu.vector_store %arg15[%c0_9, %c0_10, %c0_11, %c0_12], %12 {strides = array<i32>} : memref<2x24x6x64xf32, #tpu.memory_space<vmem>>, vector<2x24x6x64xf32>,
    %c0_13 = arith.constant 0 : index
    %c0_14 = arith.constant 0 : index
    %14 = vector.load %arg4[%c0_13, %c0_14] : memref<25x64xf32, #tpu.memory_space<vmem>>, vector<25x64xf32>
    %c0_15 = arith.constant 0 : index
    %c0_16 = arith.constant 0 : index
    %15 = vector.load %arg5[%c0_15, %c0_16] : memref<1x64xf32, #tpu.memory_space<vmem>>, vector<1x64xf32>
    %c0_17 = arith.constant 0 : index
    %c0_18 = arith.constant 0 : index
    %16 = vector.load %arg6[%c0_17, %c0_18] : memref<64x32xbf16, #tpu.memory_space<vmem>>, vector<64x32xbf16>
    %c0_19 = arith.constant 0 : index
    %c0_20 = arith.constant 0 : index
    %17 = vector.load %arg7[%c0_19, %c0_20] : memref<1x32xf32, #tpu.memory_space<vmem>>, vector<1x32xf32>
    %c0_21 = arith.constant 0 : index
    %c0_22 = arith.constant 0 : index
    %c0_23 = arith.constant 0 : index
    %c0_24 = arith.constant 0 : index
    %18 = vector.load %arg15[%c0_21, %c0_22, %c0_23, %c0_24] : memref<2x24x6x64xf32, #tpu.memory_space<vmem>>, vector<2x4x4x64xf32>
    %19 = vector.extract_strided_slice %14 {offsets = [0, 0], sizes = [1, 64], strides = [1, 1]} : vector<25x64xf32> to vector<1x64xf32>
    %20 = vector.shape_cast %19 : vector<1x64xf32> to vector<64xf32>
    %21 = vector.shape_cast %20 : vector<64xf32> to vector<1x1x1x64xf32>
    %22 = vector.broadcast %21 : vector<1x1x1x64xf32> to vector<2x4x4x64xf32>
    %23 = arith.mulf %18, %22 : vector<2x4x4x64xf32>
    %c0_25 = arith.constant 0 : index
    %c6 = arith.constant 6 : index
    %c0_26 = arith.constant 0 : index
    %c0_27 = arith.constant 0 : index
    %24 = vector.load %arg15[%c0_25, %c6, %c0_26, %c0_27] : memref<2x24x6x64xf32, #tpu.memory_space<vmem>>, vector<2x4x4x64xf32>
    %25 = vector.extract_strided_slice %14 {offsets = [1, 0], sizes = [1, 64], strides = [1, 1]} : vector<25x64xf32> to vector<1x64xf32>
    %26 = vector.shape_cast %25 : vector<1x64xf32> to vector<64xf32>
    %27 = vector.shape_cast %26 : vector<64xf32> to vector<1x1x1x64xf32>
    %28 = vector.broadcast %27 : vector<1x1x1x64xf32> to vector<2x4x4x64xf32>
    %29 = arith.mulf %24, %28 : vector<2x4x4x64xf32>
    %30 = arith.addf %23, %29 : vector<2x4x4x64xf32>
    %c0_28 = arith.constant 0 : index
    %c0_29 = arith.constant 0 : index
    %c1 = arith.constant 1 : index
    %c0_30 = arith.constant 0 : index
    %31 = vector.load %arg15[%c0_28, %c0_29, %c1, %c0_30] : memref<2x24x6x64xf32, #tpu.memory_space<vmem>>, vector<2x4x4x64xf32>
    %32 = vector.extract_strided_slice %14 {offsets = [2, 0], sizes = [1, 64], strides = [1, 1]} : vector<25x64xf32> to vector<1x64xf32>
    %33 = vector.shape_cast %32 : vector<1x64xf32> to vector<64xf32>
    %34 = vector.shape_cast %33 : vector<64xf32> to vector<1x1x1x64xf32>
    %35 = vector.broadcast %34 : vector<1x1x1x64xf32> to vector<2x4x4x64xf32>
    %36 = arith.mulf %31, %35 : vector<2x4x4x64xf32>
    %37 = arith.addf %30, %36 : vector<2x4x4x64xf32>
    %c0_31 = arith.constant 0 : index
    %c6_32 = arith.constant 6 : index
    %c1_33 = arith.constant 1 : index
    %c0_34 = arith.constant 0 : index
    %38 = vector.load %arg15[%c0_31, %c6_32, %c1_33, %c0_34] : memref<2x24x6x64xf32, #tpu.memory_space<vmem>>, vector<2x4x4x64xf32>
    %39 = vector.extract_strided_slice %14 {offsets = [3, 0], sizes = [1, 64], strides = [1, 1]} : vector<25x64xf32> to vector<1x64xf32>
    %40 = vector.shape_cast %39 : vector<1x64xf32> to vector<64xf32>
    %41 = vector.shape_cast %40 : vector<64xf32> to vector<1x1x1x64xf32>
    %42 = vector.broadcast %41 : vector<1x1x1x64xf32> to vector<2x4x4x64xf32>
    %43 = arith.mulf %38, %42 : vector<2x4x4x64xf32>
    %44 = arith.addf %37, %43 : vector<2x4x4x64xf32>
    %c0_35 = arith.constant 0 : index
    %c0_36 = arith.constant 0 : index
    %c2 = arith.constant 2 : index
    %c0_37 = arith.constant 0 : index
    %45 = vector.load %arg15[%c0_35, %c0_36, %c2, %c0_37] : memref<2x24x6x64xf32, #tpu.memory_space<vmem>>, vector<2x4x4x64xf32>
    %46 = vector.extract_strided_slice %14 {offsets = [4, 0], sizes = [1, 64], strides = [1, 1]} : vector<25x64xf32> to vector<1x64xf32>
    %47 = vector.shape_cast %46 : vector<1x64xf32> to vector<64xf32>
    %48 = vector.shape_cast %47 : vector<64xf32> to vector<1x1x1x64xf32>
    %49 = vector.broadcast %48 : vector<1x1x1x64xf32> to vector<2x4x4x64xf32>
    %50 = arith.mulf %45, %49 : vector<2x4x4x64xf32>
    %51 = arith.addf %44, %50 : vector<2x4x4x64xf32>
    %c0_38 = arith.constant 0 : index
    %c12 = arith.constant 12 : index
    %c0_39 = arith.constant 0 : index
    %c0_40 = arith.constant 0 : index
    %52 = vector.load %arg15[%c0_38, %c12, %c0_39, %c0_40] : memref<2x24x6x64xf32, #tpu.memory_space<vmem>>, vector<2x4x4x64xf32>
    %53 = vector.extract_strided_slice %14 {offsets = [5, 0], sizes = [1, 64], strides = [1, 1]} : vector<25x64xf32> to vector<1x64xf32>
    %54 = vector.shape_cast %53 : vector<1x64xf32> to vector<64xf32>
    %55 = vector.shape_cast %54 : vector<64xf32> to vector<1x1x1x64xf32>
    %56 = vector.broadcast %55 : vector<1x1x1x64xf32> to vector<2x4x4x64xf32>
    %57 = arith.mulf %52, %56 : vector<2x4x4x64xf32>
    %58 = arith.addf %51, %57 : vector<2x4x4x64xf32>
    %c0_41 = arith.constant 0 : index
    %c18 = arith.constant 18 : index
    %c0_42 = arith.constant 0 : index
    %c0_43 = arith.constant 0 : index
    %59 = vector.load %arg15[%c0_41, %c18, %c0_42, %c0_43] : memref<2x24x6x64xf32, #tpu.memory_space<vmem>>, vector<2x4x4x64xf32>
    %60 = vector.extract_strided_slice %14 {offsets = [6, 0], sizes = [1, 64], strides = [1, 1]} : vector<25x64xf32> to vector<1x64xf32>
    %61 = vector.shape_cast %60 : vector<1x64xf32> to vector<64xf32>
    %62 = vector.shape_cast %61 : vector<64xf32> to vector<1x1x1x64xf32>
    %63 = vector.broadcast %62 : vector<1x1x1x64xf32> to vector<2x4x4x64xf32>
    %64 = arith.mulf %59, %63 : vector<2x4x4x64xf32>
    %65 = arith.addf %58, %64 : vector<2x4x4x64xf32>
    %c0_44 = arith.constant 0 : index
    %c12_45 = arith.constant 12 : index
    %c1_46 = arith.constant 1 : index
    %c0_47 = arith.constant 0 : index
    %66 = vector.load %arg15[%c0_44, %c12_45, %c1_46, %c0_47] : memref<2x24x6x64xf32, #tpu.memory_space<vmem>>, vector<2x4x4x64xf32>
    %67 = vector.extract_strided_slice %14 {offsets = [7, 0], sizes = [1, 64], strides = [1, 1]} : vector<25x64xf32> to vector<1x64xf32>
    %68 = vector.shape_cast %67 : vector<1x64xf32> to vector<64xf32>
    %69 = vector.shape_cast %68 : vector<64xf32> to vector<1x1x1x64xf32>
    %70 = vector.broadcast %69 : vector<1x1x1x64xf32> to vector<2x4x4x64xf32>
    %71 = arith.mulf %66, %70 : vector<2x4x4x64xf32>
    %72 = arith.addf %65, %71 : vector<2x4x4x64xf32>
    %c0_48 = arith.constant 0 : index
    %c18_49 = arith.constant 18 : index
    %c1_50 = arith.constant 1 : index
    %c0_51 = arith.constant 0 : index
    %73 = vector.load %arg15[%c0_48, %c18_49, %c1_50, %c0_51] : memref<2x24x6x64xf32, #tpu.memory_space<vmem>>, vector<2x4x4x64xf32>
    %74 = vector.extract_strided_slice %14 {offsets = [8, 0], sizes = [1, 64], strides = [1, 1]} : vector<25x64xf32> to vector<1x64xf32>
    %75 = vector.shape_cast %74 : vector<1x64xf32> to vector<64xf32>
    %76 = vector.shape_cast %75 : vector<64xf32> to vector<1x1x1x64xf32>
    %77 = vector.broadcast %76 : vector<1x1x1x64xf32> to vector<2x4x4x64xf32>
    %78 = arith.mulf %73, %77 : vector<2x4x4x64xf32>
    %79 = arith.addf %72, %78 : vector<2x4x4x64xf32>
    %c0_52 = arith.constant 0 : index
    %c12_53 = arith.constant 12 : index
    %c2_54 = arith.constant 2 : index
    %c0_55 = arith.constant 0 : index
    %80 = vector.load %arg15[%c0_52, %c12_53, %c2_54, %c0_55] : memref<2x24x6x64xf32, #tpu.memory_space<vmem>>, vector<2x4x4x64xf32>
    %81 = vector.extract_strided_slice %14 {offsets = [9, 0], sizes = [1, 64], strides = [1, 1]} : vector<25x64xf32> to vector<1x64xf32>
    %82 = vector.shape_cast %81 : vector<1x64xf32> to vector<64xf32>
    %83 = vector.shape_cast %82 : vector<64xf32> to vector<1x1x1x64xf32>
    %84 = vector.broadcast %83 : vector<1x1x1x64xf32> to vector<2x4x4x64xf32>
    %85 = arith.mulf %80, %84 : vector<2x4x4x64xf32>
    %86 = arith.addf %79, %85 : vector<2x4x4x64xf32>
    %c0_56 = arith.constant 0 : index
    %c1_57 = arith.constant 1 : index
    %c0_58 = arith.constant 0 : index
    %c0_59 = arith.constant 0 : index
    %87 = vector.load %arg15[%c0_56, %c1_57, %c0_58, %c0_59] : memref<2x24x6x64xf32, #tpu.memory_space<vmem>>, vector<2x4x4x64xf32>
    %88 = vector.extract_strided_slice %14 {offsets = [10, 0], sizes = [1, 64], strides = [1, 1]} : vector<25x64xf32> to vector<1x64xf32>
    %89 = vector.shape_cast %88 : vector<1x64xf32> to vector<64xf32>
    %90 = vector.shape_cast %89 : vector<64xf32> to vector<1x1x1x64xf32>
    %91 = vector.broadcast %90 : vector<1x1x1x64xf32> to vector<2x4x4x64xf32>
    %92 = arith.mulf %87, %91 : vector<2x4x4x64xf32>
    %93 = arith.addf %86, %92 : vector<2x4x4x64xf32>
    %c0_60 = arith.constant 0 : index
    %c7 = arith.constant 7 : index
    %c0_61 = arith.constant 0 : index
    %c0_62 = arith.constant 0 : index
    %94 = vector.load %arg15[%c0_60, %c7, %c0_61, %c0_62] : memref<2x24x6x64xf32, #tpu.memory_space<vmem>>, vector<2x4x4x64xf32>
    %95 = vector.extract_strided_slice %14 {offsets = [11, 0], sizes = [1, 64], strides = [1, 1]} : vector<25x64xf32> to vector<1x64xf32>
    %96 = vector.shape_cast %95 : vector<1x64xf32> to vector<64xf32>
    %97 = vector.shape_cast %96 : vector<64xf32> to vector<1x1x1x64xf32>
    %98 = vector.broadcast %97 : vector<1x1x1x64xf32> to vector<2x4x4x64xf32>
    %99 = arith.mulf %94, %98 : vector<2x4x4x64xf32>
    %100 = arith.addf %93, %99 : vector<2x4x4x64xf32>
    %c0_63 = arith.constant 0 : index
    %c1_64 = arith.constant 1 : index
    %c1_65 = arith.constant 1 : index
    %c0_66 = arith.constant 0 : index
    %101 = vector.load %arg15[%c0_63, %c1_64, %c1_65, %c0_66] : memref<2x24x6x64xf32, #tpu.memory_space<vmem>>, vector<2x4x4x64xf32>
    %102 = vector.extract_strided_slice %14 {offsets = [12, 0], sizes = [1, 64], strides = [1, 1]} : vector<25x64xf32> to vector<1x64xf32>
    %103 = vector.shape_cast %102 : vector<1x64xf32> to vector<64xf32>
    %104 = vector.shape_cast %103 : vector<64xf32> to vector<1x1x1x64xf32>
    %105 = vector.broadcast %104 : vector<1x1x1x64xf32> to vector<2x4x4x64xf32>
    %106 = arith.mulf %101, %105 : vector<2x4x4x64xf32>
    %107 = arith.addf %100, %106 : vector<2x4x4x64xf32>
    %c0_67 = arith.constant 0 : index
    %c7_68 = arith.constant 7 : index
    %c1_69 = arith.constant 1 : index
    %c0_70 = arith.constant 0 : index
    %108 = vector.load %arg15[%c0_67, %c7_68, %c1_69, %c0_70] : memref<2x24x6x64xf32, #tpu.memory_space<vmem>>, vector<2x4x4x64xf32>
    %109 = vector.extract_strided_slice %14 {offsets = [13, 0], sizes = [1, 64], strides = [1, 1]} : vector<25x64xf32> to vector<1x64xf32>
    %110 = vector.shape_cast %109 : vector<1x64xf32> to vector<64xf32>
    %111 = vector.shape_cast %110 : vector<64xf32> to vector<1x1x1x64xf32>
    %112 = vector.broadcast %111 : vector<1x1x1x64xf32> to vector<2x4x4x64xf32>
    %113 = arith.mulf %108, %112 : vector<2x4x4x64xf32>
    %114 = arith.addf %107, %113 : vector<2x4x4x64xf32>
    %c0_71 = arith.constant 0 : index
    %c1_72 = arith.constant 1 : index
    %c2_73 = arith.constant 2 : index
    %c0_74 = arith.constant 0 : index
    %115 = vector.load %arg15[%c0_71, %c1_72, %c2_73, %c0_74] : memref<2x24x6x64xf32, #tpu.memory_space<vmem>>, vector<2x4x4x64xf32>
    %116 = vector.extract_strided_slice %14 {offsets = [14, 0], sizes = [1, 64], strides = [1, 1]} : vector<25x64xf32> to vector<1x64xf32>
    %117 = vector.shape_cast %116 : vector<1x64xf32> to vector<64xf32>
    %118 = vector.shape_cast %117 : vector<64xf32> to vector<1x1x1x64xf32>
    %119 = vector.broadcast %118 : vector<1x1x1x64xf32> to vector<2x4x4x64xf32>
    %120 = arith.mulf %115, %119 : vector<2x4x4x64xf32>
    %121 = arith.addf %114, %120 : vector<2x4x4x64xf32>
    %c0_75 = arith.constant 0 : index
    %c13 = arith.constant 13 : index
    %c0_76 = arith.constant 0 : index
    %c0_77 = arith.constant 0 : index
    %122 = vector.load %arg15[%c0_75, %c13, %c0_76, %c0_77] : memref<2x24x6x64xf32, #tpu.memory_space<vmem>>, vector<2x4x4x64xf32>
    %123 = vector.extract_strided_slice %14 {offsets = [15, 0], sizes = [1, 64], strides = [1, 1]} : vector<25x64xf32> to vector<1x64xf32>
    %124 = vector.shape_cast %123 : vector<1x64xf32> to vector<64xf32>
    %125 = vector.shape_cast %124 : vector<64xf32> to vector<1x1x1x64xf32>
    %126 = vector.broadcast %125 : vector<1x1x1x64xf32> to vector<2x4x4x64xf32>
    %127 = arith.mulf %122, %126 : vector<2x4x4x64xf32>
    %128 = arith.addf %121, %127 : vector<2x4x4x64xf32>
    %c0_78 = arith.constant 0 : index
    %c19 = arith.constant 19 : index
    %c0_79 = arith.constant 0 : index
    %c0_80 = arith.constant 0 : index
    %129 = vector.load %arg15[%c0_78, %c19, %c0_79, %c0_80] : memref<2x24x6x64xf32, #tpu.memory_space<vmem>>, vector<2x4x4x64xf32>
    %130 = vector.extract_strided_slice %14 {offsets = [16, 0], sizes = [1, 64], strides = [1, 1]} : vector<25x64xf32> to vector<1x64xf32>
    %131 = vector.shape_cast %130 : vector<1x64xf32> to vector<64xf32>
    %132 = vector.shape_cast %131 : vector<64xf32> to vector<1x1x1x64xf32>
    %133 = vector.broadcast %132 : vector<1x1x1x64xf32> to vector<2x4x4x64xf32>
    %134 = arith.mulf %129, %133 : vector<2x4x4x64xf32>
    %135 = arith.addf %128, %134 : vector<2x4x4x64xf32>
    %c0_81 = arith.constant 0 : index
    %c13_82 = arith.constant 13 : index
    %c1_83 = arith.constant 1 : index
    %c0_84 = arith.constant 0 : index
    %136 = vector.load %arg15[%c0_81, %c13_82, %c1_83, %c0_84] : memref<2x24x6x64xf32, #tpu.memory_space<vmem>>, vector<2x4x4x64xf32>
    %137 = vector.extract_strided_slice %14 {offsets = [17, 0], sizes = [1, 64], strides = [1, 1]} : vector<25x64xf32> to vector<1x64xf32>
    %138 = vector.shape_cast %137 : vector<1x64xf32> to vector<64xf32>
    %139 = vector.shape_cast %138 : vector<64xf32> to vector<1x1x1x64xf32>
    %140 = vector.broadcast %139 : vector<1x1x1x64xf32> to vector<2x4x4x64xf32>
    %141 = arith.mulf %136, %140 : vector<2x4x4x64xf32>
    %142 = arith.addf %135, %141 : vector<2x4x4x64xf32>
    %c0_85 = arith.constant 0 : index
    %c19_86 = arith.constant 19 : index
    %c1_87 = arith.constant 1 : index
    %c0_88 = arith.constant 0 : index
    %143 = vector.load %arg15[%c0_85, %c19_86, %c1_87, %c0_88] : memref<2x24x6x64xf32, #tpu.memory_space<vmem>>, vector<2x4x4x64xf32>
    %144 = vector.extract_strided_slice %14 {offsets = [18, 0], sizes = [1, 64], strides = [1, 1]} : vector<25x64xf32> to vector<1x64xf32>
    %145 = vector.shape_cast %144 : vector<1x64xf32> to vector<64xf32>
    %146 = vector.shape_cast %145 : vector<64xf32> to vector<1x1x1x64xf32>
    %147 = vector.broadcast %146 : vector<1x1x1x64xf32> to vector<2x4x4x64xf32>
    %148 = arith.mulf %143, %147 : vector<2x4x4x64xf32>
    %149 = arith.addf %142, %148 : vector<2x4x4x64xf32>
    %c0_89 = arith.constant 0 : index
    %c13_90 = arith.constant 13 : index
    %c2_91 = arith.constant 2 : index
    %c0_92 = arith.constant 0 : index
    %150 = vector.load %arg15[%c0_89, %c13_90, %c2_91, %c0_92] : memref<2x24x6x64xf32, #tpu.memory_space<vmem>>, vector<2x4x4x64xf32>
    %151 = vector.extract_strided_slice %14 {offsets = [19, 0], sizes = [1, 64], strides = [1, 1]} : vector<25x64xf32> to vector<1x64xf32>
    %152 = vector.shape_cast %151 : vector<1x64xf32> to vector<64xf32>
    %153 = vector.shape_cast %152 : vector<64xf32> to vector<1x1x1x64xf32>
    %154 = vector.broadcast %153 : vector<1x1x1x64xf32> to vector<2x4x4x64xf32>
    %155 = arith.mulf %150, %154 : vector<2x4x4x64xf32>
    %156 = arith.addf %149, %155 : vector<2x4x4x64xf32>
    %c0_93 = arith.constant 0 : index
    %c2_94 = arith.constant 2 : index
    %c0_95 = arith.constant 0 : index
    %c0_96 = arith.constant 0 : index
    %157 = vector.load %arg15[%c0_93, %c2_94, %c0_95, %c0_96] : memref<2x24x6x64xf32, #tpu.memory_space<vmem>>, vector<2x4x4x64xf32>
    %158 = vector.extract_strided_slice %14 {offsets = [20, 0], sizes = [1, 64], strides = [1, 1]} : vector<25x64xf32> to vector<1x64xf32>
    %159 = vector.shape_cast %158 : vector<1x64xf32> to vector<64xf32>
    %160 = vector.shape_cast %159 : vector<64xf32> to vector<1x1x1x64xf32>
    %161 = vector.broadcast %160 : vector<1x1x1x64xf32> to vector<2x4x4x64xf32>
    %162 = arith.mulf %157, %161 : vector<2x4x4x64xf32>
    %163 = arith.addf %156, %162 : vector<2x4x4x64xf32>
    %c0_97 = arith.constant 0 : index
    %c8 = arith.constant 8 : index
    %c0_98 = arith.constant 0 : index
    %c0_99 = arith.constant 0 : index
    %164 = vector.load %arg15[%c0_97, %c8, %c0_98, %c0_99] : memref<2x24x6x64xf32, #tpu.memory_space<vmem>>, vector<2x4x4x64xf32>
    %165 = vector.extract_strided_slice %14 {offsets = [21, 0], sizes = [1, 64], strides = [1, 1]} : vector<25x64xf32> to vector<1x64xf32>
    %166 = vector.shape_cast %165 : vector<1x64xf32> to vector<64xf32>
    %167 = vector.shape_cast %166 : vector<64xf32> to vector<1x1x1x64xf32>
    %168 = vector.broadcast %167 : vector<1x1x1x64xf32> to vector<2x4x4x64xf32>
    %169 = arith.mulf %164, %168 : vector<2x4x4x64xf32>
    %170 = arith.addf %163, %169 : vector<2x4x4x64xf32>
    %c0_100 = arith.constant 0 : index
    %c2_101 = arith.constant 2 : index
    %c1_102 = arith.constant 1 : index
    %c0_103 = arith.constant 0 : index
    %171 = vector.load %arg15[%c0_100, %c2_101, %c1_102, %c0_103] : memref<2x24x6x64xf32, #tpu.memory_space<vmem>>, vector<2x4x4x64xf32>
    %172 = vector.extract_strided_slice %14 {offsets = [22, 0], sizes = [1, 64], strides = [1, 1]} : vector<25x64xf32> to vector<1x64xf32>
    %173 = vector.shape_cast %172 : vector<1x64xf32> to vector<64xf32>
    %174 = vector.shape_cast %173 : vector<64xf32> to vector<1x1x1x64xf32>
    %175 = vector.broadcast %174 : vector<1x1x1x64xf32> to vector<2x4x4x64xf32>
    %176 = arith.mulf %171, %175 : vector<2x4x4x64xf32>
    %177 = arith.addf %170, %176 : vector<2x4x4x64xf32>
    %c0_104 = arith.constant 0 : index
    %c8_105 = arith.constant 8 : index
    %c1_106 = arith.constant 1 : index
    %c0_107 = arith.constant 0 : index
    %178 = vector.load %arg15[%c0_104, %c8_105, %c1_106, %c0_107] : memref<2x24x6x64xf32, #tpu.memory_space<vmem>>, vector<2x4x4x64xf32>
    %179 = vector.extract_strided_slice %14 {offsets = [23, 0], sizes = [1, 64], strides = [1, 1]} : vector<25x64xf32> to vector<1x64xf32>
    %180 = vector.shape_cast %179 : vector<1x64xf32> to vector<64xf32>
    %181 = vector.shape_cast %180 : vector<64xf32> to vector<1x1x1x64xf32>
    %182 = vector.broadcast %181 : vector<1x1x1x64xf32> to vector<2x4x4x64xf32>
    %183 = arith.mulf %178, %182 : vector<2x4x4x64xf32>
    %184 = arith.addf %177, %183 : vector<2x4x4x64xf32>
    %c0_108 = arith.constant 0 : index
    %c2_109 = arith.constant 2 : index
    %c2_110 = arith.constant 2 : index
    %c0_111 = arith.constant 0 : index
    %185 = vector.load %arg15[%c0_108, %c2_109, %c2_110, %c0_111] : memref<2x24x6x64xf32, #tpu.memory_space<vmem>>, vector<2x4x4x64xf32>
    %186 = vector.extract_strided_slice %14 {offsets = [24, 0], sizes = [1, 64], strides = [1, 1]} : vector<25x64xf32> to vector<1x64xf32>
    %187 = vector.shape_cast %186 : vector<1x64xf32> to vector<64xf32>
    %188 = vector.shape_cast %187 : vector<64xf32> to vector<1x1x1x64xf32>
    %189 = vector.broadcast %188 : vector<1x1x1x64xf32> to vector<2x4x4x64xf32>
    %190 = arith.mulf %185, %189 : vector<2x4x4x64xf32>
    %191 = arith.addf %184, %190 : vector<2x4x4x64xf32>
    %192 = vector.shape_cast %15 : vector<1x64xf32> to vector<1x1x1x64xf32>
    %193 = vector.broadcast %192 : vector<1x1x1x64xf32> to vector<2x4x4x64xf32>
    %194 = arith.addf %191, %193 : vector<2x4x4x64xf32>
    %cst_112 = arith.constant 0.000000e+00 : f32
    %195 = vector.broadcast %cst_112 : f32 to vector<2x4x4x64xf32>
    %196 = arith.maximumf %194, %195 : vector<2x4x4x64xf32>
    %197 = vector.shape_cast %196 : vector<2x4x4x64xf32> to vector<32x64xf32>
    %198 = arith.truncf %197 : vector<32x64xf32> to vector<32x64xbf16>
    %cst_113 = arith.constant dense<0.000000e+00> : vector<32x32xf32>
    %199 = tpu.matmul %198, %16, %cst_113 {dimension_numbers = #tpu.dot_dimension_numbers<[1], [0], [0], [1], [0, 0, 1, 1], [], []>} : vector<32x64xbf16>, vector<64x32xbf16>, vector<32x32xf32> -> vector<32x32xf32>
    %200 = vector.broadcast %17 : vector<1x32xf32> to vector<32x32xf32>
    %201 = arith.addf %199, %200 : vector<32x32xf32>
    %c0_114 = arith.constant 0 : index
    %c0_115 = arith.constant 0 : index
    %202 = vector.load %arg8[%c0_114, %c0_115] : memref<32x128xbf16, #tpu.memory_space<vmem>>, vector<32x128xbf16>
    %c0_116 = arith.constant 0 : index
    %c0_117 = arith.constant 0 : index
    %203 = vector.load %arg9[%c0_116, %c0_117] : memref<1x128xf32, #tpu.memory_space<vmem>>, vector<1x128xf32>
    %204 = arith.truncf %201 : vector<32x32xf32> to vector<32x32xbf16>
    %cst_118 = arith.constant dense<0.000000e+00> : vector<32x128xf32>
    %205 = tpu.matmul %204, %202, %cst_118 {dimension_numbers = #tpu.dot_dimension_numbers<[1], [0], [0], [1], [0, 0, 1, 1], [], []>} : vector<32x32xbf16>, vector<32x128xbf16>, vector<32x128xf32> -> vector<32x128xf32>
    %206 = vector.broadcast %203 : vector<1x128xf32> to vector<32x128xf32>
    %207 = arith.addf %205, %206 : vector<32x128xf32>
    %cst_119 = arith.constant 0.000000e+00 : f32
    %208 = vector.broadcast %cst_119 : f32 to vector<32x128xf32>
    %209 = arith.maximumf %207, %208 : vector<32x128xf32>
    %cst_120 = arith.constant 0.000000e+00 : f32
    %210 = vector.broadcast %cst_120 : f32 to vector<2x2x8x128xf32>
    %c0_121 = arith.constant 0 : index
    %c0_122 = arith.constant 0 : index
    %c0_123 = arith.constant 0 : index
    %c0_124 = arith.constant 0 : index
    %211 = vector.load %arg16[%c0_121, %c0_122, %c0_123, %c0_124] : memref<2x8x8x128xf32, #tpu.memory_space<vmem>>, vector<2x2x8x128xf32>
    tpu.vector_store %arg16[%c0_121, %c0_122, %c0_123, %c0_124], %210 {strides = array<i32>} : memref<2x8x8x128xf32, #tpu.memory_space<vmem>>, vector<2x2x8x128xf32>,
    %cst_125 = arith.constant 0.000000e+00 : f32
    %212 = vector.broadcast %cst_125 : f32 to vector<2x2x8x128xf32>
    %c0_126 = arith.constant 0 : index
    %c6_127 = arith.constant 6 : index
    %c0_128 = arith.constant 0 : index
    %c0_129 = arith.constant 0 : index
    %213 = vector.load %arg16[%c0_126, %c6_127, %c0_128, %c0_129] : memref<2x8x8x128xf32, #tpu.memory_space<vmem>>, vector<2x2x8x128xf32>
    tpu.vector_store %arg16[%c0_126, %c6_127, %c0_128, %c0_129], %212 {strides = array<i32>} : memref<2x8x8x128xf32, #tpu.memory_space<vmem>>, vector<2x2x8x128xf32>,
    %cst_130 = arith.constant 0.000000e+00 : f32
    %214 = vector.broadcast %cst_130 : f32 to vector<2x4x2x128xf32>
    %c0_131 = arith.constant 0 : index
    %c2_132 = arith.constant 2 : index
    %c0_133 = arith.constant 0 : index
    %c0_134 = arith.constant 0 : index
    %215 = vector.load %arg16[%c0_131, %c2_132, %c0_133, %c0_134] : memref<2x8x8x128xf32, #tpu.memory_space<vmem>>, vector<2x4x2x128xf32>
    tpu.vector_store %arg16[%c0_131, %c2_132, %c0_133, %c0_134], %214 {strides = array<i32>} : memref<2x8x8x128xf32, #tpu.memory_space<vmem>>, vector<2x4x2x128xf32>,
    %cst_135 = arith.constant 0.000000e+00 : f32
    %216 = vector.broadcast %cst_135 : f32 to vector<2x4x2x128xf32>
    %c0_136 = arith.constant 0 : index
    %c2_137 = arith.constant 2 : index
    %c6_138 = arith.constant 6 : index
    %c0_139 = arith.constant 0 : index
    %217 = vector.load %arg16[%c0_136, %c2_137, %c6_138, %c0_139] : memref<2x8x8x128xf32, #tpu.memory_space<vmem>>, vector<2x4x2x128xf32>
    tpu.vector_store %arg16[%c0_136, %c2_137, %c6_138, %c0_139], %216 {strides = array<i32>} : memref<2x8x8x128xf32, #tpu.memory_space<vmem>>, vector<2x4x2x128xf32>,
    %218 = vector.shape_cast %209 : vector<32x128xf32> to vector<2x4x4x128xf32>
    %c0_140 = arith.constant 0 : index
    %c2_141 = arith.constant 2 : index
    %c2_142 = arith.constant 2 : index
    %c0_143 = arith.constant 0 : index
    %219 = vector.load %arg16[%c0_140, %c2_141, %c2_142, %c0_143] : memref<2x8x8x128xf32, #tpu.memory_space<vmem>>, vector<2x4x4x128xf32>
    tpu.vector_store %arg16[%c0_140, %c2_141, %c2_142, %c0_143], %218 {strides = array<i32>} : memref<2x8x8x128xf32, #tpu.memory_space<vmem>>, vector<2x4x4x128xf32>,
    %c0_144 = arith.constant 0 : index
    %c0_145 = arith.constant 0 : index
    %220 = vector.load %arg10[%c0_144, %c0_145] : memref<25x128xf32, #tpu.memory_space<vmem>>, vector<25x128xf32>
    %c0_146 = arith.constant 0 : index
    %c0_147 = arith.constant 0 : index
    %221 = vector.load %arg11[%c0_146, %c0_147] : memref<1x128xf32, #tpu.memory_space<vmem>>, vector<1x128xf32>
    %c0_148 = arith.constant 0 : index
    %c0_149 = arith.constant 0 : index
    %222 = vector.load %arg12[%c0_148, %c0_149] : memref<128x32xbf16, #tpu.memory_space<vmem>>, vector<128x32xbf16>
    %c0_150 = arith.constant 0 : index
    %c0_151 = arith.constant 0 : index
    %223 = vector.load %arg13[%c0_150, %c0_151] : memref<1x32xf32, #tpu.memory_space<vmem>>, vector<1x32xf32>
    %c0_152 = arith.constant 0 : index
    %c0_153 = arith.constant 0 : index
    %c0_154 = arith.constant 0 : index
    %c0_155 = arith.constant 0 : index
    %224 = vector.load %arg16[%c0_152, %c0_153, %c0_154, %c0_155] : memref<2x8x8x128xf32, #tpu.memory_space<vmem>>, vector<2x4x4x128xf32>
    %225 = vector.extract_strided_slice %220 {offsets = [0, 0], sizes = [1, 128], strides = [1, 1]} : vector<25x128xf32> to vector<1x128xf32>
    %226 = vector.shape_cast %225 : vector<1x128xf32> to vector<128xf32>
    %227 = vector.shape_cast %226 : vector<128xf32> to vector<1x1x1x128xf32>
    %228 = vector.broadcast %227 : vector<1x1x1x128xf32> to vector<2x4x4x128xf32>
    %229 = arith.mulf %224, %228 : vector<2x4x4x128xf32>
    %c0_156 = arith.constant 0 : index
    %c0_157 = arith.constant 0 : index
    %c1_158 = arith.constant 1 : index
    %c0_159 = arith.constant 0 : index
    %230 = vector.load %arg16[%c0_156, %c0_157, %c1_158, %c0_159] : memref<2x8x8x128xf32, #tpu.memory_space<vmem>>, vector<2x4x4x128xf32>
    %231 = vector.extract_strided_slice %220 {offsets = [1, 0], sizes = [1, 128], strides = [1, 1]} : vector<25x128xf32> to vector<1x128xf32>
    %232 = vector.shape_cast %231 : vector<1x128xf32> to vector<128xf32>
    %233 = vector.shape_cast %232 : vector<128xf32> to vector<1x1x1x128xf32>
    %234 = vector.broadcast %233 : vector<1x1x1x128xf32> to vector<2x4x4x128xf32>
    %235 = arith.mulf %230, %234 : vector<2x4x4x128xf32>
    %236 = arith.addf %229, %235 : vector<2x4x4x128xf32>
    %c0_160 = arith.constant 0 : index
    %c0_161 = arith.constant 0 : index
    %c2_162 = arith.constant 2 : index
    %c0_163 = arith.constant 0 : index
    %237 = vector.load %arg16[%c0_160, %c0_161, %c2_162, %c0_163] : memref<2x8x8x128xf32, #tpu.memory_space<vmem>>, vector<2x4x4x128xf32>
    %238 = vector.extract_strided_slice %220 {offsets = [2, 0], sizes = [1, 128], strides = [1, 1]} : vector<25x128xf32> to vector<1x128xf32>
    %239 = vector.shape_cast %238 : vector<1x128xf32> to vector<128xf32>
    %240 = vector.shape_cast %239 : vector<128xf32> to vector<1x1x1x128xf32>
    %241 = vector.broadcast %240 : vector<1x1x1x128xf32> to vector<2x4x4x128xf32>
    %242 = arith.mulf %237, %241 : vector<2x4x4x128xf32>
    %243 = arith.addf %236, %242 : vector<2x4x4x128xf32>
    %c0_164 = arith.constant 0 : index
    %c0_165 = arith.constant 0 : index
    %c3 = arith.constant 3 : index
    %c0_166 = arith.constant 0 : index
    %244 = vector.load %arg16[%c0_164, %c0_165, %c3, %c0_166] : memref<2x8x8x128xf32, #tpu.memory_space<vmem>>, vector<2x4x4x128xf32>
    %245 = vector.extract_strided_slice %220 {offsets = [3, 0], sizes = [1, 128], strides = [1, 1]} : vector<25x128xf32> to vector<1x128xf32>
    %246 = vector.shape_cast %245 : vector<1x128xf32> to vector<128xf32>
    %247 = vector.shape_cast %246 : vector<128xf32> to vector<1x1x1x128xf32>
    %248 = vector.broadcast %247 : vector<1x1x1x128xf32> to vector<2x4x4x128xf32>
    %249 = arith.mulf %244, %248 : vector<2x4x4x128xf32>
    %250 = arith.addf %243, %249 : vector<2x4x4x128xf32>
    %c0_167 = arith.constant 0 : index
    %c0_168 = arith.constant 0 : index
    %c4 = arith.constant 4 : index
    %c0_169 = arith.constant 0 : index
    %251 = vector.load %arg16[%c0_167, %c0_168, %c4, %c0_169] : memref<2x8x8x128xf32, #tpu.memory_space<vmem>>, vector<2x4x4x128xf32>
    %252 = vector.extract_strided_slice %220 {offsets = [4, 0], sizes = [1, 128], strides = [1, 1]} : vector<25x128xf32> to vector<1x128xf32>
    %253 = vector.shape_cast %252 : vector<1x128xf32> to vector<128xf32>
    %254 = vector.shape_cast %253 : vector<128xf32> to vector<1x1x1x128xf32>
    %255 = vector.broadcast %254 : vector<1x1x1x128xf32> to vector<2x4x4x128xf32>
    %256 = arith.mulf %251, %255 : vector<2x4x4x128xf32>
    %257 = arith.addf %250, %256 : vector<2x4x4x128xf32>
    %c0_170 = arith.constant 0 : index
    %c1_171 = arith.constant 1 : index
    %c0_172 = arith.constant 0 : index
    %c0_173 = arith.constant 0 : index
    %258 = vector.load %arg16[%c0_170, %c1_171, %c0_172, %c0_173] : memref<2x8x8x128xf32, #tpu.memory_space<vmem>>, vector<2x4x4x128xf32>
    %259 = vector.extract_strided_slice %220 {offsets = [5, 0], sizes = [1, 128], strides = [1, 1]} : vector<25x128xf32> to vector<1x128xf32>
    %260 = vector.shape_cast %259 : vector<1x128xf32> to vector<128xf32>
    %261 = vector.shape_cast %260 : vector<128xf32> to vector<1x1x1x128xf32>
    %262 = vector.broadcast %261 : vector<1x1x1x128xf32> to vector<2x4x4x128xf32>
    %263 = arith.mulf %258, %262 : vector<2x4x4x128xf32>
    %264 = arith.addf %257, %263 : vector<2x4x4x128xf32>
    %c0_174 = arith.constant 0 : index
    %c1_175 = arith.constant 1 : index
    %c1_176 = arith.constant 1 : index
    %c0_177 = arith.constant 0 : index
    %265 = vector.load %arg16[%c0_174, %c1_175, %c1_176, %c0_177] : memref<2x8x8x128xf32, #tpu.memory_space<vmem>>, vector<2x4x4x128xf32>
    %266 = vector.extract_strided_slice %220 {offsets = [6, 0], sizes = [1, 128], strides = [1, 1]} : vector<25x128xf32> to vector<1x128xf32>
    %267 = vector.shape_cast %266 : vector<1x128xf32> to vector<128xf32>
    %268 = vector.shape_cast %267 : vector<128xf32> to vector<1x1x1x128xf32>
    %269 = vector.broadcast %268 : vector<1x1x1x128xf32> to vector<2x4x4x128xf32>
    %270 = arith.mulf %265, %269 : vector<2x4x4x128xf32>
    %271 = arith.addf %264, %270 : vector<2x4x4x128xf32>
    %c0_178 = arith.constant 0 : index
    %c1_179 = arith.constant 1 : index
    %c2_180 = arith.constant 2 : index
    %c0_181 = arith.constant 0 : index
    %272 = vector.load %arg16[%c0_178, %c1_179, %c2_180, %c0_181] : memref<2x8x8x128xf32, #tpu.memory_space<vmem>>, vector<2x4x4x128xf32>
    %273 = vector.extract_strided_slice %220 {offsets = [7, 0], sizes = [1, 128], strides = [1, 1]} : vector<25x128xf32> to vector<1x128xf32>
    %274 = vector.shape_cast %273 : vector<1x128xf32> to vector<128xf32>
    %275 = vector.shape_cast %274 : vector<128xf32> to vector<1x1x1x128xf32>
    %276 = vector.broadcast %275 : vector<1x1x1x128xf32> to vector<2x4x4x128xf32>
    %277 = arith.mulf %272, %276 : vector<2x4x4x128xf32>
    %278 = arith.addf %271, %277 : vector<2x4x4x128xf32>
    %c0_182 = arith.constant 0 : index
    %c1_183 = arith.constant 1 : index
    %c3_184 = arith.constant 3 : index
    %c0_185 = arith.constant 0 : index
    %279 = vector.load %arg16[%c0_182, %c1_183, %c3_184, %c0_185] : memref<2x8x8x128xf32, #tpu.memory_space<vmem>>, vector<2x4x4x128xf32>
    %280 = vector.extract_strided_slice %220 {offsets = [8, 0], sizes = [1, 128], strides = [1, 1]} : vector<25x128xf32> to vector<1x128xf32>
    %281 = vector.shape_cast %280 : vector<1x128xf32> to vector<128xf32>
    %282 = vector.shape_cast %281 : vector<128xf32> to vector<1x1x1x128xf32>
    %283 = vector.broadcast %282 : vector<1x1x1x128xf32> to vector<2x4x4x128xf32>
    %284 = arith.mulf %279, %283 : vector<2x4x4x128xf32>
    %285 = arith.addf %278, %284 : vector<2x4x4x128xf32>
    %c0_186 = arith.constant 0 : index
    %c1_187 = arith.constant 1 : index
    %c4_188 = arith.constant 4 : index
    %c0_189 = arith.constant 0 : index
    %286 = vector.load %arg16[%c0_186, %c1_187, %c4_188, %c0_189] : memref<2x8x8x128xf32, #tpu.memory_space<vmem>>, vector<2x4x4x128xf32>
    %287 = vector.extract_strided_slice %220 {offsets = [9, 0], sizes = [1, 128], strides = [1, 1]} : vector<25x128xf32> to vector<1x128xf32>
    %288 = vector.shape_cast %287 : vector<1x128xf32> to vector<128xf32>
    %289 = vector.shape_cast %288 : vector<128xf32> to vector<1x1x1x128xf32>
    %290 = vector.broadcast %289 : vector<1x1x1x128xf32> to vector<2x4x4x128xf32>
    %291 = arith.mulf %286, %290 : vector<2x4x4x128xf32>
    %292 = arith.addf %285, %291 : vector<2x4x4x128xf32>
    %c0_190 = arith.constant 0 : index
    %c2_191 = arith.constant 2 : index
    %c0_192 = arith.constant 0 : index
    %c0_193 = arith.constant 0 : index
    %293 = vector.load %arg16[%c0_190, %c2_191, %c0_192, %c0_193] : memref<2x8x8x128xf32, #tpu.memory_space<vmem>>, vector<2x4x4x128xf32>
    %294 = vector.extract_strided_slice %220 {offsets = [10, 0], sizes = [1, 128], strides = [1, 1]} : vector<25x128xf32> to vector<1x128xf32>
    %295 = vector.shape_cast %294 : vector<1x128xf32> to vector<128xf32>
    %296 = vector.shape_cast %295 : vector<128xf32> to vector<1x1x1x128xf32>
    %297 = vector.broadcast %296 : vector<1x1x1x128xf32> to vector<2x4x4x128xf32>
    %298 = arith.mulf %293, %297 : vector<2x4x4x128xf32>
    %299 = arith.addf %292, %298 : vector<2x4x4x128xf32>
    %c0_194 = arith.constant 0 : index
    %c2_195 = arith.constant 2 : index
    %c1_196 = arith.constant 1 : index
    %c0_197 = arith.constant 0 : index
    %300 = vector.load %arg16[%c0_194, %c2_195, %c1_196, %c0_197] : memref<2x8x8x128xf32, #tpu.memory_space<vmem>>, vector<2x4x4x128xf32>
    %301 = vector.extract_strided_slice %220 {offsets = [11, 0], sizes = [1, 128], strides = [1, 1]} : vector<25x128xf32> to vector<1x128xf32>
    %302 = vector.shape_cast %301 : vector<1x128xf32> to vector<128xf32>
    %303 = vector.shape_cast %302 : vector<128xf32> to vector<1x1x1x128xf32>
    %304 = vector.broadcast %303 : vector<1x1x1x128xf32> to vector<2x4x4x128xf32>
    %305 = arith.mulf %300, %304 : vector<2x4x4x128xf32>
    %306 = arith.addf %299, %305 : vector<2x4x4x128xf32>
    %c0_198 = arith.constant 0 : index
    %c2_199 = arith.constant 2 : index
    %c2_200 = arith.constant 2 : index
    %c0_201 = arith.constant 0 : index
    %307 = vector.load %arg16[%c0_198, %c2_199, %c2_200, %c0_201] : memref<2x8x8x128xf32, #tpu.memory_space<vmem>>, vector<2x4x4x128xf32>
    %308 = vector.extract_strided_slice %220 {offsets = [12, 0], sizes = [1, 128], strides = [1, 1]} : vector<25x128xf32> to vector<1x128xf32>
    %309 = vector.shape_cast %308 : vector<1x128xf32> to vector<128xf32>
    %310 = vector.shape_cast %309 : vector<128xf32> to vector<1x1x1x128xf32>
    %311 = vector.broadcast %310 : vector<1x1x1x128xf32> to vector<2x4x4x128xf32>
    %312 = arith.mulf %307, %311 : vector<2x4x4x128xf32>
    %313 = arith.addf %306, %312 : vector<2x4x4x128xf32>
    %c0_202 = arith.constant 0 : index
    %c2_203 = arith.constant 2 : index
    %c3_204 = arith.constant 3 : index
    %c0_205 = arith.constant 0 : index
    %314 = vector.load %arg16[%c0_202, %c2_203, %c3_204, %c0_205] : memref<2x8x8x128xf32, #tpu.memory_space<vmem>>, vector<2x4x4x128xf32>
    %315 = vector.extract_strided_slice %220 {offsets = [13, 0], sizes = [1, 128], strides = [1, 1]} : vector<25x128xf32> to vector<1x128xf32>
    %316 = vector.shape_cast %315 : vector<1x128xf32> to vector<128xf32>
    %317 = vector.shape_cast %316 : vector<128xf32> to vector<1x1x1x128xf32>
    %318 = vector.broadcast %317 : vector<1x1x1x128xf32> to vector<2x4x4x128xf32>
    %319 = arith.mulf %314, %318 : vector<2x4x4x128xf32>
    %320 = arith.addf %313, %319 : vector<2x4x4x128xf32>
    %c0_206 = arith.constant 0 : index
    %c2_207 = arith.constant 2 : index
    %c4_208 = arith.constant 4 : index
    %c0_209 = arith.constant 0 : index
    %321 = vector.load %arg16[%c0_206, %c2_207, %c4_208, %c0_209] : memref<2x8x8x128xf32, #tpu.memory_space<vmem>>, vector<2x4x4x128xf32>
    %322 = vector.extract_strided_slice %220 {offsets = [14, 0], sizes = [1, 128], strides = [1, 1]} : vector<25x128xf32> to vector<1x128xf32>
    %323 = vector.shape_cast %322 : vector<1x128xf32> to vector<128xf32>
    %324 = vector.shape_cast %323 : vector<128xf32> to vector<1x1x1x128xf32>
    %325 = vector.broadcast %324 : vector<1x1x1x128xf32> to vector<2x4x4x128xf32>
    %326 = arith.mulf %321, %325 : vector<2x4x4x128xf32>
    %327 = arith.addf %320, %326 : vector<2x4x4x128xf32>
    %c0_210 = arith.constant 0 : index
    %c3_211 = arith.constant 3 : index
    %c0_212 = arith.constant 0 : index
    %c0_213 = arith.constant 0 : index
    %328 = vector.load %arg16[%c0_210, %c3_211, %c0_212, %c0_213] : memref<2x8x8x128xf32, #tpu.memory_space<vmem>>, vector<2x4x4x128xf32>
    %329 = vector.extract_strided_slice %220 {offsets = [15, 0], sizes = [1, 128], strides = [1, 1]} : vector<25x128xf32> to vector<1x128xf32>
    %330 = vector.shape_cast %329 : vector<1x128xf32> to vector<128xf32>
    %331 = vector.shape_cast %330 : vector<128xf32> to vector<1x1x1x128xf32>
    %332 = vector.broadcast %331 : vector<1x1x1x128xf32> to vector<2x4x4x128xf32>
    %333 = arith.mulf %328, %332 : vector<2x4x4x128xf32>
    %334 = arith.addf %327, %333 : vector<2x4x4x128xf32>
    %c0_214 = arith.constant 0 : index
    %c3_215 = arith.constant 3 : index
    %c1_216 = arith.constant 1 : index
    %c0_217 = arith.constant 0 : index
    %335 = vector.load %arg16[%c0_214, %c3_215, %c1_216, %c0_217] : memref<2x8x8x128xf32, #tpu.memory_space<vmem>>, vector<2x4x4x128xf32>
    %336 = vector.extract_strided_slice %220 {offsets = [16, 0], sizes = [1, 128], strides = [1, 1]} : vector<25x128xf32> to vector<1x128xf32>
    %337 = vector.shape_cast %336 : vector<1x128xf32> to vector<128xf32>
    %338 = vector.shape_cast %337 : vector<128xf32> to vector<1x1x1x128xf32>
    %339 = vector.broadcast %338 : vector<1x1x1x128xf32> to vector<2x4x4x128xf32>
    %340 = arith.mulf %335, %339 : vector<2x4x4x128xf32>
    %341 = arith.addf %334, %340 : vector<2x4x4x128xf32>
    %c0_218 = arith.constant 0 : index
    %c3_219 = arith.constant 3 : index
    %c2_220 = arith.constant 2 : index
    %c0_221 = arith.constant 0 : index
    %342 = vector.load %arg16[%c0_218, %c3_219, %c2_220, %c0_221] : memref<2x8x8x128xf32, #tpu.memory_space<vmem>>, vector<2x4x4x128xf32>
    %343 = vector.extract_strided_slice %220 {offsets = [17, 0], sizes = [1, 128], strides = [1, 1]} : vector<25x128xf32> to vector<1x128xf32>
    %344 = vector.shape_cast %343 : vector<1x128xf32> to vector<128xf32>
    %345 = vector.shape_cast %344 : vector<128xf32> to vector<1x1x1x128xf32>
    %346 = vector.broadcast %345 : vector<1x1x1x128xf32> to vector<2x4x4x128xf32>
    %347 = arith.mulf %342, %346 : vector<2x4x4x128xf32>
    %348 = arith.addf %341, %347 : vector<2x4x4x128xf32>
    %c0_222 = arith.constant 0 : index
    %c3_223 = arith.constant 3 : index
    %c3_224 = arith.constant 3 : index
    %c0_225 = arith.constant 0 : index
    %349 = vector.load %arg16[%c0_222, %c3_223, %c3_224, %c0_225] : memref<2x8x8x128xf32, #tpu.memory_space<vmem>>, vector<2x4x4x128xf32>
    %350 = vector.extract_strided_slice %220 {offsets = [18, 0], sizes = [1, 128], strides = [1, 1]} : vector<25x128xf32> to vector<1x128xf32>
    %351 = vector.shape_cast %350 : vector<1x128xf32> to vector<128xf32>
    %352 = vector.shape_cast %351 : vector<128xf32> to vector<1x1x1x128xf32>
    %353 = vector.broadcast %352 : vector<1x1x1x128xf32> to vector<2x4x4x128xf32>
    %354 = arith.mulf %349, %353 : vector<2x4x4x128xf32>
    %355 = arith.addf %348, %354 : vector<2x4x4x128xf32>
    %c0_226 = arith.constant 0 : index
    %c3_227 = arith.constant 3 : index
    %c4_228 = arith.constant 4 : index
    %c0_229 = arith.constant 0 : index
    %356 = vector.load %arg16[%c0_226, %c3_227, %c4_228, %c0_229] : memref<2x8x8x128xf32, #tpu.memory_space<vmem>>, vector<2x4x4x128xf32>
    %357 = vector.extract_strided_slice %220 {offsets = [19, 0], sizes = [1, 128], strides = [1, 1]} : vector<25x128xf32> to vector<1x128xf32>
    %358 = vector.shape_cast %357 : vector<1x128xf32> to vector<128xf32>
    %359 = vector.shape_cast %358 : vector<128xf32> to vector<1x1x1x128xf32>
    %360 = vector.broadcast %359 : vector<1x1x1x128xf32> to vector<2x4x4x128xf32>
    %361 = arith.mulf %356, %360 : vector<2x4x4x128xf32>
    %362 = arith.addf %355, %361 : vector<2x4x4x128xf32>
    %c0_230 = arith.constant 0 : index
    %c4_231 = arith.constant 4 : index
    %c0_232 = arith.constant 0 : index
    %c0_233 = arith.constant 0 : index
    %363 = vector.load %arg16[%c0_230, %c4_231, %c0_232, %c0_233] : memref<2x8x8x128xf32, #tpu.memory_space<vmem>>, vector<2x4x4x128xf32>
    %364 = vector.extract_strided_slice %220 {offsets = [20, 0], sizes = [1, 128], strides = [1, 1]} : vector<25x128xf32> to vector<1x128xf32>
    %365 = vector.shape_cast %364 : vector<1x128xf32> to vector<128xf32>
    %366 = vector.shape_cast %365 : vector<128xf32> to vector<1x1x1x128xf32>
    %367 = vector.broadcast %366 : vector<1x1x1x128xf32> to vector<2x4x4x128xf32>
    %368 = arith.mulf %363, %367 : vector<2x4x4x128xf32>
    %369 = arith.addf %362, %368 : vector<2x4x4x128xf32>
    %c0_234 = arith.constant 0 : index
    %c4_235 = arith.constant 4 : index
    %c1_236 = arith.constant 1 : index
    %c0_237 = arith.constant 0 : index
    %370 = vector.load %arg16[%c0_234, %c4_235, %c1_236, %c0_237] : memref<2x8x8x128xf32, #tpu.memory_space<vmem>>, vector<2x4x4x128xf32>
    %371 = vector.extract_strided_slice %220 {offsets = [21, 0], sizes = [1, 128], strides = [1, 1]} : vector<25x128xf32> to vector<1x128xf32>
    %372 = vector.shape_cast %371 : vector<1x128xf32> to vector<128xf32>
    %373 = vector.shape_cast %372 : vector<128xf32> to vector<1x1x1x128xf32>
    %374 = vector.broadcast %373 : vector<1x1x1x128xf32> to vector<2x4x4x128xf32>
    %375 = arith.mulf %370, %374 : vector<2x4x4x128xf32>
    %376 = arith.addf %369, %375 : vector<2x4x4x128xf32>
    %c0_238 = arith.constant 0 : index
    %c4_239 = arith.constant 4 : index
    %c2_240 = arith.constant 2 : index
    %c0_241 = arith.constant 0 : index
    %377 = vector.load %arg16[%c0_238, %c4_239, %c2_240, %c0_241] : memref<2x8x8x128xf32, #tpu.memory_space<vmem>>, vector<2x4x4x128xf32>
    %378 = vector.extract_strided_slice %220 {offsets = [22, 0], sizes = [1, 128], strides = [1, 1]} : vector<25x128xf32> to vector<1x128xf32>
    %379 = vector.shape_cast %378 : vector<1x128xf32> to vector<128xf32>
    %380 = vector.shape_cast %379 : vector<128xf32> to vector<1x1x1x128xf32>
    %381 = vector.broadcast %380 : vector<1x1x1x128xf32> to vector<2x4x4x128xf32>
    %382 = arith.mulf %377, %381 : vector<2x4x4x128xf32>
    %383 = arith.addf %376, %382 : vector<2x4x4x128xf32>
    %c0_242 = arith.constant 0 : index
    %c4_243 = arith.constant 4 : index
    %c3_244 = arith.constant 3 : index
    %c0_245 = arith.constant 0 : index
    %384 = vector.load %arg16[%c0_242, %c4_243, %c3_244, %c0_245] : memref<2x8x8x128xf32, #tpu.memory_space<vmem>>, vector<2x4x4x128xf32>
    %385 = vector.extract_strided_slice %220 {offsets = [23, 0], sizes = [1, 128], strides = [1, 1]} : vector<25x128xf32> to vector<1x128xf32>
    %386 = vector.shape_cast %385 : vector<1x128xf32> to vector<128xf32>
    %387 = vector.shape_cast %386 : vector<128xf32> to vector<1x1x1x128xf32>
    %388 = vector.broadcast %387 : vector<1x1x1x128xf32> to vector<2x4x4x128xf32>
    %389 = arith.mulf %384, %388 : vector<2x4x4x128xf32>
    %390 = arith.addf %383, %389 : vector<2x4x4x128xf32>
    %c0_246 = arith.constant 0 : index
    %c4_247 = arith.constant 4 : index
    %c4_248 = arith.constant 4 : index
    %c0_249 = arith.constant 0 : index
    %391 = vector.load %arg16[%c0_246, %c4_247, %c4_248, %c0_249] : memref<2x8x8x128xf32, #tpu.memory_space<vmem>>, vector<2x4x4x128xf32>
    %392 = vector.extract_strided_slice %220 {offsets = [24, 0], sizes = [1, 128], strides = [1, 1]} : vector<25x128xf32> to vector<1x128xf32>
    %393 = vector.shape_cast %392 : vector<1x128xf32> to vector<128xf32>
    %394 = vector.shape_cast %393 : vector<128xf32> to vector<1x1x1x128xf32>
    %395 = vector.broadcast %394 : vector<1x1x1x128xf32> to vector<2x4x4x128xf32>
    %396 = arith.mulf %391, %395 : vector<2x4x4x128xf32>
    %397 = arith.addf %390, %396 : vector<2x4x4x128xf32>
    %398 = vector.shape_cast %221 : vector<1x128xf32> to vector<1x1x1x128xf32>
    %399 = vector.broadcast %398 : vector<1x1x1x128xf32> to vector<2x4x4x128xf32>
    %400 = arith.addf %397, %399 : vector<2x4x4x128xf32>
    %cst_250 = arith.constant 0.000000e+00 : f32
    %401 = vector.broadcast %cst_250 : f32 to vector<2x4x4x128xf32>
    %402 = arith.maximumf %400, %401 : vector<2x4x4x128xf32>
    %403 = vector.shape_cast %402 : vector<2x4x4x128xf32> to vector<32x128xf32>
    %404 = arith.truncf %403 : vector<32x128xf32> to vector<32x128xbf16>
    %cst_251 = arith.constant dense<0.000000e+00> : vector<32x32xf32>
    %405 = tpu.matmul %404, %222, %cst_251 {dimension_numbers = #tpu.dot_dimension_numbers<[1], [0], [0], [1], [0, 0, 1, 1], [], []>} : vector<32x128xbf16>, vector<128x32xbf16>, vector<32x32xf32> -> vector<32x32xf32>
    %406 = vector.broadcast %223 : vector<1x32xf32> to vector<32x32xf32>
    %407 = arith.addf %405, %406 : vector<32x32xf32>
    %c0_252 = arith.constant 0 : index
    %c0_253 = arith.constant 0 : index
    %408 = vector.load %arg14[%c0_252, %c0_253] : memref<32x32xf32, #tpu.memory_space<vmem>>, vector<32x32xf32>
    tpu.vector_store %arg14[%c0_252, %c0_253], %407 {strides = array<i32>} : memref<32x32xf32, #tpu.memory_space<vmem>>, vector<32x32xf32>,
    return
  }
}

module attributes {stable_mosaic.version = 11 : i64} {
  func.func @_segment_kernel(%arg0: memref<72x32xbf16, #tpu.memory_space<vmem>>, %arg1: memref<12x3x1xf32, #tpu.memory_space<vmem>>, %arg2: memref<32x128xbf16, #tpu.memory_space<vmem>>, %arg3: memref<1x128xf32, #tpu.memory_space<vmem>>, %arg4: memref<9x128xf32, #tpu.memory_space<vmem>>, %arg5: memref<1x128xf32, #tpu.memory_space<vmem>>, %arg6: memref<128x48xbf16, #tpu.memory_space<vmem>>, %arg7: memref<1x48xf32, #tpu.memory_space<vmem>>, %arg8: memref<48x192xbf16, #tpu.memory_space<vmem>>, %arg9: memref<1x192xf32, #tpu.memory_space<vmem>>, %arg10: memref<9x192xf32, #tpu.memory_space<vmem>>, %arg11: memref<1x192xf32, #tpu.memory_space<vmem>>, %arg12: memref<192x48xbf16, #tpu.memory_space<vmem>>, %arg13: memref<1x48xf32, #tpu.memory_space<vmem>>, %arg14: memref<8x48xf32, #tpu.memory_space<vmem>>, %arg15: memref<2x12x3x128xf32, #tpu.memory_space<vmem>>, %arg16: memref<2x4x4x192xf32, #tpu.memory_space<vmem>>) attributes {dimension_semantics = [], scalar_prefetch = 0 : i64, scratch_operands = 2 : i64, tpu.core_type = #tpu.core_type<tc>} {
    %c0 = arith.constant 0 : index
    %c0_0 = arith.constant 0 : index
    %0 = vector.load %arg0[%c0, %c0_0] : memref<72x32xbf16, #tpu.memory_space<vmem>>, vector<72x32xbf16>
    %c0_1 = arith.constant 0 : index
    %c0_2 = arith.constant 0 : index
    %c0_3 = arith.constant 0 : index
    %1 = vector.load %arg1[%c0_1, %c0_2, %c0_3] : memref<12x3x1xf32, #tpu.memory_space<vmem>>, vector<12x3x1xf32>
    %c0_4 = arith.constant 0 : index
    %c0_5 = arith.constant 0 : index
    %2 = vector.load %arg2[%c0_4, %c0_5] : memref<32x128xbf16, #tpu.memory_space<vmem>>, vector<32x128xbf16>
    %c0_6 = arith.constant 0 : index
    %c0_7 = arith.constant 0 : index
    %3 = vector.load %arg3[%c0_6, %c0_7] : memref<1x128xf32, #tpu.memory_space<vmem>>, vector<1x128xf32>
    %cst = arith.constant dense<0.000000e+00> : vector<72x128xf32>
    %4 = tpu.matmul %0, %2, %cst {dimension_numbers = #tpu.dot_dimension_numbers<[1], [0], [0], [1], [0, 0, 1, 1], [], []>} : vector<72x32xbf16>, vector<32x128xbf16>, vector<72x128xf32> -> vector<72x128xf32>
    %5 = vector.broadcast %3 : vector<1x128xf32> to vector<72x128xf32>
    %6 = arith.addf %4, %5 : vector<72x128xf32>
    %cst_8 = arith.constant 0.000000e+00 : f32
    %7 = vector.broadcast %cst_8 : f32 to vector<72x128xf32>
    %8 = arith.maximumf %6, %7 : vector<72x128xf32>
    %9 = vector.shape_cast %8 : vector<72x128xf32> to vector<2x12x3x128xf32>
    %10 = vector.shape_cast %1 : vector<12x3x1xf32> to vector<1x12x3x1xf32>
    %11 = vector.broadcast %10 : vector<1x12x3x1xf32> to vector<2x12x3x128xf32>
    %12 = arith.mulf %9, %11 : vector<2x12x3x128xf32>
    %c0_9 = arith.constant 0 : index
    %c0_10 = arith.constant 0 : index
    %c0_11 = arith.constant 0 : index
    %c0_12 = arith.constant 0 : index
    %13 = vector.load %arg15[%c0_9, %c0_10, %c0_11, %c0_12] : memref<2x12x3x128xf32, #tpu.memory_space<vmem>>, vector<2x12x3x128xf32>
    tpu.vector_store %arg15[%c0_9, %c0_10, %c0_11, %c0_12], %12 {strides = array<i32>} : memref<2x12x3x128xf32, #tpu.memory_space<vmem>>, vector<2x12x3x128xf32>,
    %c0_13 = arith.constant 0 : index
    %c0_14 = arith.constant 0 : index
    %14 = vector.load %arg4[%c0_13, %c0_14] : memref<9x128xf32, #tpu.memory_space<vmem>>, vector<9x128xf32>
    %c0_15 = arith.constant 0 : index
    %c0_16 = arith.constant 0 : index
    %15 = vector.load %arg5[%c0_15, %c0_16] : memref<1x128xf32, #tpu.memory_space<vmem>>, vector<1x128xf32>
    %c0_17 = arith.constant 0 : index
    %c0_18 = arith.constant 0 : index
    %16 = vector.load %arg6[%c0_17, %c0_18] : memref<128x48xbf16, #tpu.memory_space<vmem>>, vector<128x48xbf16>
    %c0_19 = arith.constant 0 : index
    %c0_20 = arith.constant 0 : index
    %17 = vector.load %arg7[%c0_19, %c0_20] : memref<1x48xf32, #tpu.memory_space<vmem>>, vector<1x48xf32>
    %c0_21 = arith.constant 0 : index
    %c0_22 = arith.constant 0 : index
    %c0_23 = arith.constant 0 : index
    %c0_24 = arith.constant 0 : index
    %18 = vector.load %arg15[%c0_21, %c0_22, %c0_23, %c0_24] : memref<2x12x3x128xf32, #tpu.memory_space<vmem>>, vector<2x2x2x128xf32>
    %19 = vector.extract_strided_slice %14 {offsets = [0, 0], sizes = [1, 128], strides = [1, 1]} : vector<9x128xf32> to vector<1x128xf32>
    %20 = vector.shape_cast %19 : vector<1x128xf32> to vector<128xf32>
    %21 = vector.shape_cast %20 : vector<128xf32> to vector<1x1x1x128xf32>
    %22 = vector.broadcast %21 : vector<1x1x1x128xf32> to vector<2x2x2x128xf32>
    %23 = arith.mulf %18, %22 : vector<2x2x2x128xf32>
    %c0_25 = arith.constant 0 : index
    %c3 = arith.constant 3 : index
    %c0_26 = arith.constant 0 : index
    %c0_27 = arith.constant 0 : index
    %24 = vector.load %arg15[%c0_25, %c3, %c0_26, %c0_27] : memref<2x12x3x128xf32, #tpu.memory_space<vmem>>, vector<2x2x2x128xf32>
    %25 = vector.extract_strided_slice %14 {offsets = [1, 0], sizes = [1, 128], strides = [1, 1]} : vector<9x128xf32> to vector<1x128xf32>
    %26 = vector.shape_cast %25 : vector<1x128xf32> to vector<128xf32>
    %27 = vector.shape_cast %26 : vector<128xf32> to vector<1x1x1x128xf32>
    %28 = vector.broadcast %27 : vector<1x1x1x128xf32> to vector<2x2x2x128xf32>
    %29 = arith.mulf %24, %28 : vector<2x2x2x128xf32>
    %30 = arith.addf %23, %29 : vector<2x2x2x128xf32>
    %c0_28 = arith.constant 0 : index
    %c0_29 = arith.constant 0 : index
    %c1 = arith.constant 1 : index
    %c0_30 = arith.constant 0 : index
    %31 = vector.load %arg15[%c0_28, %c0_29, %c1, %c0_30] : memref<2x12x3x128xf32, #tpu.memory_space<vmem>>, vector<2x2x2x128xf32>
    %32 = vector.extract_strided_slice %14 {offsets = [2, 0], sizes = [1, 128], strides = [1, 1]} : vector<9x128xf32> to vector<1x128xf32>
    %33 = vector.shape_cast %32 : vector<1x128xf32> to vector<128xf32>
    %34 = vector.shape_cast %33 : vector<128xf32> to vector<1x1x1x128xf32>
    %35 = vector.broadcast %34 : vector<1x1x1x128xf32> to vector<2x2x2x128xf32>
    %36 = arith.mulf %31, %35 : vector<2x2x2x128xf32>
    %37 = arith.addf %30, %36 : vector<2x2x2x128xf32>
    %c0_31 = arith.constant 0 : index
    %c6 = arith.constant 6 : index
    %c0_32 = arith.constant 0 : index
    %c0_33 = arith.constant 0 : index
    %38 = vector.load %arg15[%c0_31, %c6, %c0_32, %c0_33] : memref<2x12x3x128xf32, #tpu.memory_space<vmem>>, vector<2x2x2x128xf32>
    %39 = vector.extract_strided_slice %14 {offsets = [3, 0], sizes = [1, 128], strides = [1, 1]} : vector<9x128xf32> to vector<1x128xf32>
    %40 = vector.shape_cast %39 : vector<1x128xf32> to vector<128xf32>
    %41 = vector.shape_cast %40 : vector<128xf32> to vector<1x1x1x128xf32>
    %42 = vector.broadcast %41 : vector<1x1x1x128xf32> to vector<2x2x2x128xf32>
    %43 = arith.mulf %38, %42 : vector<2x2x2x128xf32>
    %44 = arith.addf %37, %43 : vector<2x2x2x128xf32>
    %c0_34 = arith.constant 0 : index
    %c9 = arith.constant 9 : index
    %c0_35 = arith.constant 0 : index
    %c0_36 = arith.constant 0 : index
    %45 = vector.load %arg15[%c0_34, %c9, %c0_35, %c0_36] : memref<2x12x3x128xf32, #tpu.memory_space<vmem>>, vector<2x2x2x128xf32>
    %46 = vector.extract_strided_slice %14 {offsets = [4, 0], sizes = [1, 128], strides = [1, 1]} : vector<9x128xf32> to vector<1x128xf32>
    %47 = vector.shape_cast %46 : vector<1x128xf32> to vector<128xf32>
    %48 = vector.shape_cast %47 : vector<128xf32> to vector<1x1x1x128xf32>
    %49 = vector.broadcast %48 : vector<1x1x1x128xf32> to vector<2x2x2x128xf32>
    %50 = arith.mulf %45, %49 : vector<2x2x2x128xf32>
    %51 = arith.addf %44, %50 : vector<2x2x2x128xf32>
    %c0_37 = arith.constant 0 : index
    %c6_38 = arith.constant 6 : index
    %c1_39 = arith.constant 1 : index
    %c0_40 = arith.constant 0 : index
    %52 = vector.load %arg15[%c0_37, %c6_38, %c1_39, %c0_40] : memref<2x12x3x128xf32, #tpu.memory_space<vmem>>, vector<2x2x2x128xf32>
    %53 = vector.extract_strided_slice %14 {offsets = [5, 0], sizes = [1, 128], strides = [1, 1]} : vector<9x128xf32> to vector<1x128xf32>
    %54 = vector.shape_cast %53 : vector<1x128xf32> to vector<128xf32>
    %55 = vector.shape_cast %54 : vector<128xf32> to vector<1x1x1x128xf32>
    %56 = vector.broadcast %55 : vector<1x1x1x128xf32> to vector<2x2x2x128xf32>
    %57 = arith.mulf %52, %56 : vector<2x2x2x128xf32>
    %58 = arith.addf %51, %57 : vector<2x2x2x128xf32>
    %c0_41 = arith.constant 0 : index
    %c1_42 = arith.constant 1 : index
    %c0_43 = arith.constant 0 : index
    %c0_44 = arith.constant 0 : index
    %59 = vector.load %arg15[%c0_41, %c1_42, %c0_43, %c0_44] : memref<2x12x3x128xf32, #tpu.memory_space<vmem>>, vector<2x2x2x128xf32>
    %60 = vector.extract_strided_slice %14 {offsets = [6, 0], sizes = [1, 128], strides = [1, 1]} : vector<9x128xf32> to vector<1x128xf32>
    %61 = vector.shape_cast %60 : vector<1x128xf32> to vector<128xf32>
    %62 = vector.shape_cast %61 : vector<128xf32> to vector<1x1x1x128xf32>
    %63 = vector.broadcast %62 : vector<1x1x1x128xf32> to vector<2x2x2x128xf32>
    %64 = arith.mulf %59, %63 : vector<2x2x2x128xf32>
    %65 = arith.addf %58, %64 : vector<2x2x2x128xf32>
    %c0_45 = arith.constant 0 : index
    %c4 = arith.constant 4 : index
    %c0_46 = arith.constant 0 : index
    %c0_47 = arith.constant 0 : index
    %66 = vector.load %arg15[%c0_45, %c4, %c0_46, %c0_47] : memref<2x12x3x128xf32, #tpu.memory_space<vmem>>, vector<2x2x2x128xf32>
    %67 = vector.extract_strided_slice %14 {offsets = [7, 0], sizes = [1, 128], strides = [1, 1]} : vector<9x128xf32> to vector<1x128xf32>
    %68 = vector.shape_cast %67 : vector<1x128xf32> to vector<128xf32>
    %69 = vector.shape_cast %68 : vector<128xf32> to vector<1x1x1x128xf32>
    %70 = vector.broadcast %69 : vector<1x1x1x128xf32> to vector<2x2x2x128xf32>
    %71 = arith.mulf %66, %70 : vector<2x2x2x128xf32>
    %72 = arith.addf %65, %71 : vector<2x2x2x128xf32>
    %c0_48 = arith.constant 0 : index
    %c1_49 = arith.constant 1 : index
    %c1_50 = arith.constant 1 : index
    %c0_51 = arith.constant 0 : index
    %73 = vector.load %arg15[%c0_48, %c1_49, %c1_50, %c0_51] : memref<2x12x3x128xf32, #tpu.memory_space<vmem>>, vector<2x2x2x128xf32>
    %74 = vector.extract_strided_slice %14 {offsets = [8, 0], sizes = [1, 128], strides = [1, 1]} : vector<9x128xf32> to vector<1x128xf32>
    %75 = vector.shape_cast %74 : vector<1x128xf32> to vector<128xf32>
    %76 = vector.shape_cast %75 : vector<128xf32> to vector<1x1x1x128xf32>
    %77 = vector.broadcast %76 : vector<1x1x1x128xf32> to vector<2x2x2x128xf32>
    %78 = arith.mulf %73, %77 : vector<2x2x2x128xf32>
    %79 = arith.addf %72, %78 : vector<2x2x2x128xf32>
    %80 = vector.shape_cast %15 : vector<1x128xf32> to vector<1x1x1x128xf32>
    %81 = vector.broadcast %80 : vector<1x1x1x128xf32> to vector<2x2x2x128xf32>
    %82 = arith.addf %79, %81 : vector<2x2x2x128xf32>
    %cst_52 = arith.constant 0.000000e+00 : f32
    %83 = vector.broadcast %cst_52 : f32 to vector<2x2x2x128xf32>
    %84 = arith.maximumf %82, %83 : vector<2x2x2x128xf32>
    %85 = vector.shape_cast %84 : vector<2x2x2x128xf32> to vector<8x128xf32>
    %86 = arith.truncf %85 : vector<8x128xf32> to vector<8x128xbf16>
    %cst_53 = arith.constant dense<0.000000e+00> : vector<8x48xf32>
    %87 = tpu.matmul %86, %16, %cst_53 {dimension_numbers = #tpu.dot_dimension_numbers<[1], [0], [0], [1], [0, 0, 1, 1], [], []>} : vector<8x128xbf16>, vector<128x48xbf16>, vector<8x48xf32> -> vector<8x48xf32>
    %88 = vector.broadcast %17 : vector<1x48xf32> to vector<8x48xf32>
    %89 = arith.addf %87, %88 : vector<8x48xf32>
    %c0_54 = arith.constant 0 : index
    %c0_55 = arith.constant 0 : index
    %90 = vector.load %arg8[%c0_54, %c0_55] : memref<48x192xbf16, #tpu.memory_space<vmem>>, vector<48x192xbf16>
    %c0_56 = arith.constant 0 : index
    %c0_57 = arith.constant 0 : index
    %91 = vector.load %arg9[%c0_56, %c0_57] : memref<1x192xf32, #tpu.memory_space<vmem>>, vector<1x192xf32>
    %92 = arith.truncf %89 : vector<8x48xf32> to vector<8x48xbf16>
    %cst_58 = arith.constant dense<0.000000e+00> : vector<8x192xf32>
    %93 = tpu.matmul %92, %90, %cst_58 {dimension_numbers = #tpu.dot_dimension_numbers<[1], [0], [0], [1], [0, 0, 1, 1], [], []>} : vector<8x48xbf16>, vector<48x192xbf16>, vector<8x192xf32> -> vector<8x192xf32>
    %94 = vector.broadcast %91 : vector<1x192xf32> to vector<8x192xf32>
    %95 = arith.addf %93, %94 : vector<8x192xf32>
    %cst_59 = arith.constant 0.000000e+00 : f32
    %96 = vector.broadcast %cst_59 : f32 to vector<8x192xf32>
    %97 = arith.maximumf %95, %96 : vector<8x192xf32>
    %cst_60 = arith.constant 0.000000e+00 : f32
    %98 = vector.broadcast %cst_60 : f32 to vector<2x1x4x192xf32>
    %c0_61 = arith.constant 0 : index
    %c0_62 = arith.constant 0 : index
    %c0_63 = arith.constant 0 : index
    %c0_64 = arith.constant 0 : index
    %99 = vector.load %arg16[%c0_61, %c0_62, %c0_63, %c0_64] : memref<2x4x4x192xf32, #tpu.memory_space<vmem>>, vector<2x1x4x192xf32>
    tpu.vector_store %arg16[%c0_61, %c0_62, %c0_63, %c0_64], %98 {strides = array<i32>} : memref<2x4x4x192xf32, #tpu.memory_space<vmem>>, vector<2x1x4x192xf32>,
    %cst_65 = arith.constant 0.000000e+00 : f32
    %100 = vector.broadcast %cst_65 : f32 to vector<2x1x4x192xf32>
    %c0_66 = arith.constant 0 : index
    %c3_67 = arith.constant 3 : index
    %c0_68 = arith.constant 0 : index
    %c0_69 = arith.constant 0 : index
    %101 = vector.load %arg16[%c0_66, %c3_67, %c0_68, %c0_69] : memref<2x4x4x192xf32, #tpu.memory_space<vmem>>, vector<2x1x4x192xf32>
    tpu.vector_store %arg16[%c0_66, %c3_67, %c0_68, %c0_69], %100 {strides = array<i32>} : memref<2x4x4x192xf32, #tpu.memory_space<vmem>>, vector<2x1x4x192xf32>,
    %cst_70 = arith.constant 0.000000e+00 : f32
    %102 = vector.broadcast %cst_70 : f32 to vector<2x2x1x192xf32>
    %c0_71 = arith.constant 0 : index
    %c1_72 = arith.constant 1 : index
    %c0_73 = arith.constant 0 : index
    %c0_74 = arith.constant 0 : index
    %103 = vector.load %arg16[%c0_71, %c1_72, %c0_73, %c0_74] : memref<2x4x4x192xf32, #tpu.memory_space<vmem>>, vector<2x2x1x192xf32>
    tpu.vector_store %arg16[%c0_71, %c1_72, %c0_73, %c0_74], %102 {strides = array<i32>} : memref<2x4x4x192xf32, #tpu.memory_space<vmem>>, vector<2x2x1x192xf32>,
    %cst_75 = arith.constant 0.000000e+00 : f32
    %104 = vector.broadcast %cst_75 : f32 to vector<2x2x1x192xf32>
    %c0_76 = arith.constant 0 : index
    %c1_77 = arith.constant 1 : index
    %c3_78 = arith.constant 3 : index
    %c0_79 = arith.constant 0 : index
    %105 = vector.load %arg16[%c0_76, %c1_77, %c3_78, %c0_79] : memref<2x4x4x192xf32, #tpu.memory_space<vmem>>, vector<2x2x1x192xf32>
    tpu.vector_store %arg16[%c0_76, %c1_77, %c3_78, %c0_79], %104 {strides = array<i32>} : memref<2x4x4x192xf32, #tpu.memory_space<vmem>>, vector<2x2x1x192xf32>,
    %106 = vector.shape_cast %97 : vector<8x192xf32> to vector<2x2x2x192xf32>
    %c0_80 = arith.constant 0 : index
    %c1_81 = arith.constant 1 : index
    %c1_82 = arith.constant 1 : index
    %c0_83 = arith.constant 0 : index
    %107 = vector.load %arg16[%c0_80, %c1_81, %c1_82, %c0_83] : memref<2x4x4x192xf32, #tpu.memory_space<vmem>>, vector<2x2x2x192xf32>
    tpu.vector_store %arg16[%c0_80, %c1_81, %c1_82, %c0_83], %106 {strides = array<i32>} : memref<2x4x4x192xf32, #tpu.memory_space<vmem>>, vector<2x2x2x192xf32>,
    %c0_84 = arith.constant 0 : index
    %c0_85 = arith.constant 0 : index
    %108 = vector.load %arg10[%c0_84, %c0_85] : memref<9x192xf32, #tpu.memory_space<vmem>>, vector<9x192xf32>
    %c0_86 = arith.constant 0 : index
    %c0_87 = arith.constant 0 : index
    %109 = vector.load %arg11[%c0_86, %c0_87] : memref<1x192xf32, #tpu.memory_space<vmem>>, vector<1x192xf32>
    %c0_88 = arith.constant 0 : index
    %c0_89 = arith.constant 0 : index
    %110 = vector.load %arg12[%c0_88, %c0_89] : memref<192x48xbf16, #tpu.memory_space<vmem>>, vector<192x48xbf16>
    %c0_90 = arith.constant 0 : index
    %c0_91 = arith.constant 0 : index
    %111 = vector.load %arg13[%c0_90, %c0_91] : memref<1x48xf32, #tpu.memory_space<vmem>>, vector<1x48xf32>
    %c0_92 = arith.constant 0 : index
    %c0_93 = arith.constant 0 : index
    %c0_94 = arith.constant 0 : index
    %c0_95 = arith.constant 0 : index
    %112 = vector.load %arg16[%c0_92, %c0_93, %c0_94, %c0_95] : memref<2x4x4x192xf32, #tpu.memory_space<vmem>>, vector<2x2x2x192xf32>
    %113 = vector.extract_strided_slice %108 {offsets = [0, 0], sizes = [1, 192], strides = [1, 1]} : vector<9x192xf32> to vector<1x192xf32>
    %114 = vector.shape_cast %113 : vector<1x192xf32> to vector<192xf32>
    %115 = vector.shape_cast %114 : vector<192xf32> to vector<1x1x1x192xf32>
    %116 = vector.broadcast %115 : vector<1x1x1x192xf32> to vector<2x2x2x192xf32>
    %117 = arith.mulf %112, %116 : vector<2x2x2x192xf32>
    %c0_96 = arith.constant 0 : index
    %c0_97 = arith.constant 0 : index
    %c1_98 = arith.constant 1 : index
    %c0_99 = arith.constant 0 : index
    %118 = vector.load %arg16[%c0_96, %c0_97, %c1_98, %c0_99] : memref<2x4x4x192xf32, #tpu.memory_space<vmem>>, vector<2x2x2x192xf32>
    %119 = vector.extract_strided_slice %108 {offsets = [1, 0], sizes = [1, 192], strides = [1, 1]} : vector<9x192xf32> to vector<1x192xf32>
    %120 = vector.shape_cast %119 : vector<1x192xf32> to vector<192xf32>
    %121 = vector.shape_cast %120 : vector<192xf32> to vector<1x1x1x192xf32>
    %122 = vector.broadcast %121 : vector<1x1x1x192xf32> to vector<2x2x2x192xf32>
    %123 = arith.mulf %118, %122 : vector<2x2x2x192xf32>
    %124 = arith.addf %117, %123 : vector<2x2x2x192xf32>
    %c0_100 = arith.constant 0 : index
    %c0_101 = arith.constant 0 : index
    %c2 = arith.constant 2 : index
    %c0_102 = arith.constant 0 : index
    %125 = vector.load %arg16[%c0_100, %c0_101, %c2, %c0_102] : memref<2x4x4x192xf32, #tpu.memory_space<vmem>>, vector<2x2x2x192xf32>
    %126 = vector.extract_strided_slice %108 {offsets = [2, 0], sizes = [1, 192], strides = [1, 1]} : vector<9x192xf32> to vector<1x192xf32>
    %127 = vector.shape_cast %126 : vector<1x192xf32> to vector<192xf32>
    %128 = vector.shape_cast %127 : vector<192xf32> to vector<1x1x1x192xf32>
    %129 = vector.broadcast %128 : vector<1x1x1x192xf32> to vector<2x2x2x192xf32>
    %130 = arith.mulf %125, %129 : vector<2x2x2x192xf32>
    %131 = arith.addf %124, %130 : vector<2x2x2x192xf32>
    %c0_103 = arith.constant 0 : index
    %c1_104 = arith.constant 1 : index
    %c0_105 = arith.constant 0 : index
    %c0_106 = arith.constant 0 : index
    %132 = vector.load %arg16[%c0_103, %c1_104, %c0_105, %c0_106] : memref<2x4x4x192xf32, #tpu.memory_space<vmem>>, vector<2x2x2x192xf32>
    %133 = vector.extract_strided_slice %108 {offsets = [3, 0], sizes = [1, 192], strides = [1, 1]} : vector<9x192xf32> to vector<1x192xf32>
    %134 = vector.shape_cast %133 : vector<1x192xf32> to vector<192xf32>
    %135 = vector.shape_cast %134 : vector<192xf32> to vector<1x1x1x192xf32>
    %136 = vector.broadcast %135 : vector<1x1x1x192xf32> to vector<2x2x2x192xf32>
    %137 = arith.mulf %132, %136 : vector<2x2x2x192xf32>
    %138 = arith.addf %131, %137 : vector<2x2x2x192xf32>
    %c0_107 = arith.constant 0 : index
    %c1_108 = arith.constant 1 : index
    %c1_109 = arith.constant 1 : index
    %c0_110 = arith.constant 0 : index
    %139 = vector.load %arg16[%c0_107, %c1_108, %c1_109, %c0_110] : memref<2x4x4x192xf32, #tpu.memory_space<vmem>>, vector<2x2x2x192xf32>
    %140 = vector.extract_strided_slice %108 {offsets = [4, 0], sizes = [1, 192], strides = [1, 1]} : vector<9x192xf32> to vector<1x192xf32>
    %141 = vector.shape_cast %140 : vector<1x192xf32> to vector<192xf32>
    %142 = vector.shape_cast %141 : vector<192xf32> to vector<1x1x1x192xf32>
    %143 = vector.broadcast %142 : vector<1x1x1x192xf32> to vector<2x2x2x192xf32>
    %144 = arith.mulf %139, %143 : vector<2x2x2x192xf32>
    %145 = arith.addf %138, %144 : vector<2x2x2x192xf32>
    %c0_111 = arith.constant 0 : index
    %c1_112 = arith.constant 1 : index
    %c2_113 = arith.constant 2 : index
    %c0_114 = arith.constant 0 : index
    %146 = vector.load %arg16[%c0_111, %c1_112, %c2_113, %c0_114] : memref<2x4x4x192xf32, #tpu.memory_space<vmem>>, vector<2x2x2x192xf32>
    %147 = vector.extract_strided_slice %108 {offsets = [5, 0], sizes = [1, 192], strides = [1, 1]} : vector<9x192xf32> to vector<1x192xf32>
    %148 = vector.shape_cast %147 : vector<1x192xf32> to vector<192xf32>
    %149 = vector.shape_cast %148 : vector<192xf32> to vector<1x1x1x192xf32>
    %150 = vector.broadcast %149 : vector<1x1x1x192xf32> to vector<2x2x2x192xf32>
    %151 = arith.mulf %146, %150 : vector<2x2x2x192xf32>
    %152 = arith.addf %145, %151 : vector<2x2x2x192xf32>
    %c0_115 = arith.constant 0 : index
    %c2_116 = arith.constant 2 : index
    %c0_117 = arith.constant 0 : index
    %c0_118 = arith.constant 0 : index
    %153 = vector.load %arg16[%c0_115, %c2_116, %c0_117, %c0_118] : memref<2x4x4x192xf32, #tpu.memory_space<vmem>>, vector<2x2x2x192xf32>
    %154 = vector.extract_strided_slice %108 {offsets = [6, 0], sizes = [1, 192], strides = [1, 1]} : vector<9x192xf32> to vector<1x192xf32>
    %155 = vector.shape_cast %154 : vector<1x192xf32> to vector<192xf32>
    %156 = vector.shape_cast %155 : vector<192xf32> to vector<1x1x1x192xf32>
    %157 = vector.broadcast %156 : vector<1x1x1x192xf32> to vector<2x2x2x192xf32>
    %158 = arith.mulf %153, %157 : vector<2x2x2x192xf32>
    %159 = arith.addf %152, %158 : vector<2x2x2x192xf32>
    %c0_119 = arith.constant 0 : index
    %c2_120 = arith.constant 2 : index
    %c1_121 = arith.constant 1 : index
    %c0_122 = arith.constant 0 : index
    %160 = vector.load %arg16[%c0_119, %c2_120, %c1_121, %c0_122] : memref<2x4x4x192xf32, #tpu.memory_space<vmem>>, vector<2x2x2x192xf32>
    %161 = vector.extract_strided_slice %108 {offsets = [7, 0], sizes = [1, 192], strides = [1, 1]} : vector<9x192xf32> to vector<1x192xf32>
    %162 = vector.shape_cast %161 : vector<1x192xf32> to vector<192xf32>
    %163 = vector.shape_cast %162 : vector<192xf32> to vector<1x1x1x192xf32>
    %164 = vector.broadcast %163 : vector<1x1x1x192xf32> to vector<2x2x2x192xf32>
    %165 = arith.mulf %160, %164 : vector<2x2x2x192xf32>
    %166 = arith.addf %159, %165 : vector<2x2x2x192xf32>
    %c0_123 = arith.constant 0 : index
    %c2_124 = arith.constant 2 : index
    %c2_125 = arith.constant 2 : index
    %c0_126 = arith.constant 0 : index
    %167 = vector.load %arg16[%c0_123, %c2_124, %c2_125, %c0_126] : memref<2x4x4x192xf32, #tpu.memory_space<vmem>>, vector<2x2x2x192xf32>
    %168 = vector.extract_strided_slice %108 {offsets = [8, 0], sizes = [1, 192], strides = [1, 1]} : vector<9x192xf32> to vector<1x192xf32>
    %169 = vector.shape_cast %168 : vector<1x192xf32> to vector<192xf32>
    %170 = vector.shape_cast %169 : vector<192xf32> to vector<1x1x1x192xf32>
    %171 = vector.broadcast %170 : vector<1x1x1x192xf32> to vector<2x2x2x192xf32>
    %172 = arith.mulf %167, %171 : vector<2x2x2x192xf32>
    %173 = arith.addf %166, %172 : vector<2x2x2x192xf32>
    %174 = vector.shape_cast %109 : vector<1x192xf32> to vector<1x1x1x192xf32>
    %175 = vector.broadcast %174 : vector<1x1x1x192xf32> to vector<2x2x2x192xf32>
    %176 = arith.addf %173, %175 : vector<2x2x2x192xf32>
    %cst_127 = arith.constant 0.000000e+00 : f32
    %177 = vector.broadcast %cst_127 : f32 to vector<2x2x2x192xf32>
    %178 = arith.maximumf %176, %177 : vector<2x2x2x192xf32>
    %179 = vector.shape_cast %178 : vector<2x2x2x192xf32> to vector<8x192xf32>
    %180 = arith.truncf %179 : vector<8x192xf32> to vector<8x192xbf16>
    %cst_128 = arith.constant dense<0.000000e+00> : vector<8x48xf32>
    %181 = tpu.matmul %180, %110, %cst_128 {dimension_numbers = #tpu.dot_dimension_numbers<[1], [0], [0], [1], [0, 0, 1, 1], [], []>} : vector<8x192xbf16>, vector<192x48xbf16>, vector<8x48xf32> -> vector<8x48xf32>
    %182 = vector.broadcast %111 : vector<1x48xf32> to vector<8x48xf32>
    %183 = arith.addf %181, %182 : vector<8x48xf32>
    %c0_129 = arith.constant 0 : index
    %c0_130 = arith.constant 0 : index
    %184 = vector.load %arg14[%c0_129, %c0_130] : memref<8x48xf32, #tpu.memory_space<vmem>>, vector<8x48xf32>
    tpu.vector_store %arg14[%c0_129, %c0_130], %183 {strides = array<i32>} : memref<8x48xf32, #tpu.memory_space<vmem>>, vector<8x48xf32>,
    return
  }
}

</mosaic_0001>

<bundles_post_ra>
// kernel: token_pyramid_forward.3
= control target key start
LH: loop header
LB: loop body
LE: loop exit
PB: predicated region body
PF: predicated region fallthrough
CT: control target
= control target key end

     0   :  { %vm127_vm0 = vcmask 1044480   ;;  %vm128_vm1 = vcmask 1045504   ;;  %v934_v2 = vmov 65535   ;;  %vm102_vm2 = vcmask 220160   ;;  %s1550_s1 = inlined_call_operand.vmem [shape: bf16[27,16], index: 1, kind: input, shape index: {}]   ;;  %s1551_s2 = inlined_call_operand.vmem [shape: f32[1,16], index: 2, kind: input, shape index: {}]   ;;  %s1552_s0 = inlined_call_operand.vmem [shape: bf16[128,27], index: 0, kind: input, shape index: {}]   ;;  %s1553_s3 = inlined_call_operand.vmem [shape: f32[9,16], index: 3, kind: input, shape index: {}]   ;;  %s1554_s4 = inlined_call_operand.vmem [shape: f32[1,16], index: 4, kind: input, shape index: {}]   ;;  %s1555_s6 = inlined_call_operand.vmem [shape: f32[1,16], index: 6, kind: input, shape index: {}]   ;;  %s1556_s5 = inlined_call_operand.vmem [shape: bf16[16,16], index: 5, kind: input, shape index: {}]   ;;  %s1557_s7 = inlined_call_operand.vmem [shape: bf16[128,16], index: 7, kind: output, shape index: {}]  }
   0x1   :  { %v892_v0 = vld [vmem:[%s1550_s1 + $0x8] sm:$0xf]  ;;  %v923_v1 = vld [vmem:[%s1550_s1 + $0x8] sm:$0x30]  ;;  %v129_v3 = vsel %vm127_vm0, 4294967295, %v934_v2  ;;  %v922_v7 = vld [vmem:[%s1550_s1] sm:$0xff] }
   0x2   :  { %v893_v4 = vor.u32 %v923_v1, %v892_v0  ;;  %v130_v5 = vsel %vm128_vm1, %v129_v3, 0  ;;  %v914_v8 = vld [vmem:[%s1552_s0] sm:$0xff]  ;;  %v915_v10 = vld [vmem:[%s1552_s0 + $0x8] sm:$0xff]  ;;  %v916_v12 = vld [vmem:[%s1552_s0 + $0x10] sm:$0xff]  ;;  %vm199_vm3 = vcmask 130048   ;;  %vm201_vm4 = vcmask 123904  }
   0x3   :  { %v918_v9 = vld [vmem:[%s1552_s0 + $0x20] sm:$0xff]  ;;  %v919_v11 = vld [vmem:[%s1552_s0 + $0x28] sm:$0xff]  ;;  %v920_v13 = vld [vmem:[%s1552_s0 + $0x30] sm:$0xff]  ;;  %v935_v16 = vmov 0.0   ;;  %vm211_vm5 = vcmask 122880   ;;  %vm833_vm6 = vcmask 125952  }
   0x4   :  { %v132_v6 = vand.u32 %v893_v4, %v130_v5  ;;  %v917_v14 = vld [vmem:[%s1552_s0 + $0x18] sm:$0xff]  ;;  %200 = vst.msk [vmem:[#allocation2] sm:$0xff] %vm199_vm3, %v935_v16  ;;  %v1074_v17 = vld [vmem:[%s1553_s3] sm:$0xff] }
   0x5   :  { %v921_v15 = vld [vmem:[%s1552_s0 + $0x38] sm:$0xff]  ;;  %202 = vst.msk [vmem:[#allocation2 + $0x8] sm:$0x3] %vm201_vm4, %v935_v16  ;;  %v1081_v18 = vld [vmem:[%s1551_s2] ss:$0 sm:$0xff]  ;;  %v1088_v19 = vperm.slane %v1074_v17, 0 }
   0x6   :  { %140 = vmatpush.bf16.msra.mxu0 %v132_v6  ;;  %925 = vmatpush.bf16.msra.mxu2 %v132_v6  ;;  %203 = vst.msk [vmem:[#allocation2 + $0xa0] sm:$0xff] %vm199_vm3, %v935_v16  ;;  %v1091_v20 = vperm.slane %v1074_v17, 1  ;;  %v1105_v28 = vperm.slane %v1074_v17, 2  ;;  %v924_v31 = vld [vmem:[%s1556_s5] sm:$0xff]  ;;  %v1125_v40 = vperm.slane %v1074_v17, 3  ;;  %v1133_v45 = vperm.slane %v1074_v17, 4 }
   0x7   :  { %204 = vst.msk [vmem:[#allocation2 + $0xa8] sm:$0x3] %vm201_vm4, %v935_v16  ;;  %775 = vmatpush.bf16.msra.mxu1 %v924_v31  ;;  %927 = vmatpush.bf16.msra.mxu3 %v924_v31  ;;  %v1140_v54 = vperm.slane %v1074_v17, 5  ;;  %v1146_v62 = vperm.slane %v1074_v17, 6  ;;  %v1152_v4 = vperm.slane %v1074_v17, 7 }
   0x8   :  { %212 = vst.msk [vmem:[#allocation2 + $0x10] sm:$0x1] %vm211_vm5, %v935_v16 }
   0x9   :  { %213 = vst.msk [vmem:[#allocation2 + $0x20] sm:$0x1] %vm211_vm5, %v935_v16 }
   0xa   :  { %141 = vmatpush.bf16.msra.mxu0 %v922_v7  ;;  %926 = vmatpush.bf16.msra.mxu2 %v922_v7  ;;  %214 = vst.msk [vmem:[#allocation2 + $0x30] sm:$0x1] %vm211_vm5, %v935_v16 }
   0xb   :  { %228 = vst.msk [vmem:[#allocation2 + $0x19] sm:$0x1] %vm211_vm5, %v935_v16  ;;  %v266_v22 = vld [vmem:[#allocation2] sm:$0xff] }
   0xc   :  { %229 = vst.msk [vmem:[#allocation2 + $0x29] sm:$0x1] %vm211_vm5, %v935_v16  ;;  %v299_v23 = vld [vmem:[#allocation2 + $0x1] sm:$0xff]  ;;  %v283_v26 = vmul.f32 %v1088_v19, %v266_v22 }
   0xd   :  { %894 = vmatmul.msk.bf16.vlgmr.msra.gmra.mxu0 %vm102_vm2, %v914_v8  ;;  %898 = vmatmul.msk.bf16.vlgmr.msra.gmra.mxu2 %vm102_vm2, %v918_v9  ;;  %230 = vst.msk [vmem:[#allocation2 + $0x39] sm:$0x1] %vm211_vm5, %v935_v16  ;;  %v316_v27 = vmul.f32 %v1091_v20, %v299_v23  ;;  %v348_v29 = vld [vmem:[#allocation2 + $0x2] sm:$0xff] }
   0xe   :  { %206 = vst.msk [vmem:[#allocation2 + $0x90] sm:$0xff] %vm199_vm3, %v935_v16  ;;  %v365_v34 = vmul.f32 %v1105_v28, %v348_v29  ;;  %v274_v35 = vld [vmem:[#allocation2 + $0xa0] sm:$0xff] }
   0xf   :  { %207 = vst.msk [vmem:[#allocation2 + $0x98] sm:$0x3] %vm201_vm4, %v935_v16  ;;  %v332_v33 = vadd.f32 %v316_v27, %v283_v26  ;;  %v307_v36 = vld [vmem:[#allocation2 + $0xa1] sm:$0xff]  ;;  %v291_v41 = vmul.f32 %v1088_v19, %v274_v35 }
  0x10   :  { %208 = vst.msk [vmem:[#allocation2 + $0x130] sm:$0xff] %vm199_vm3, %v935_v16  ;;  %v324_v42 = vmul.f32 %v1091_v20, %v307_v36  ;;  %v356_v46 = vld [vmem:[#allocation2 + $0xa2] sm:$0xff] }
  0x11   :  { %209 = vst.msk [vmem:[#allocation2 + $0x138] sm:$0x3] %vm201_vm4, %v935_v16  ;;  %v381_v44 = vadd.f32 %v365_v34, %v332_v33  ;;  %v373_v56 = vmul.f32 %v1105_v28, %v356_v46 }
  0x12   :  { %215 = vst.msk [vmem:[#allocation2 + $0x40] sm:$0x1] %vm211_vm5, %v935_v16  ;;  %v340_v55 = vadd.f32 %v324_v42, %v291_v41 }
  0x13   :  { %216 = vst.msk [vmem:[#allocation2 + $0x50] sm:$0x1] %vm211_vm5, %v935_v16 }
  0x14   :  { %217 = vst.msk [vmem:[#allocation2 + $0x60] sm:$0x1] %vm211_vm5, %v935_v16 }
  0x15   :  { %218 = vst.msk [vmem:[#allocation2 + $0x70] sm:$0x1] %vm211_vm5, %v935_v16 }
  0x16   :  { %219 = vst.msk [vmem:[#allocation2 + $0x80] sm:$0x1] %vm211_vm5, %v935_v16 }
  0x17   :  { %220 = vst.msk [vmem:[#allocation2 + $0xb0] sm:$0x1] %vm211_vm5, %v935_v16 }
  0x18   :  { %221 = vst.msk [vmem:[#allocation2 + $0xc0] sm:$0x1] %vm211_vm5, %v935_v16 }
  0x19   :  { %222 = vst.msk [vmem:[#allocation2 + $0xd0] sm:$0x1] %vm211_vm5, %v935_v16 }
  0x1a   :  { %223 = vst.msk [vmem:[#allocation2 + $0xe0] sm:$0x1] %vm211_vm5, %v935_v16 }
  0x1b   :  { %224 = vst.msk [vmem:[#allocation2 + $0xf0] sm:$0x1] %vm211_vm5, %v935_v16 }
  0x1c   :  { %225 = vst.msk [vmem:[#allocation2 + $0x100] sm:$0x1] %vm211_vm5, %v935_v16 }
  0x1d   :  { %895 = vmatmul.msk.bf16.gmra.mxu0 %vm102_vm2, %v915_v10  ;;  %899 = vmatmul.msk.bf16.gmra.mxu2 %vm102_vm2, %v919_v11  ;;  %226 = vst.msk [vmem:[#allocation2 + $0x110] sm:$0x1] %vm211_vm5, %v935_v16  ;;  %v1160_v10 = vld [vmem:[%s1553_s3 + $0x8] ss:$0 sm:$0xff]  ;;  %v389_v11 = vadd.f32 %v373_v56, %v340_v55 }
  0x1e   :  { %227 = vst.msk [vmem:[#allocation2 + $0x120] sm:$0x1] %vm211_vm5, %v935_v16 }
  0x1f   :  { %231 = vst.msk [vmem:[#allocation2 + $0x49] sm:$0x1] %vm211_vm5, %v935_v16 }
  0x20   :  { %232 = vst.msk [vmem:[#allocation2 + $0x59] sm:$0x1] %vm211_vm5, %v935_v16 }
  0x21   :  { %233 = vst.msk [vmem:[#allocation2 + $0x69] sm:$0x1] %vm211_vm5, %v935_v16 }
  0x22   :  { %234 = vst.msk [vmem:[#allocation2 + $0x79] sm:$0x1] %vm211_vm5, %v935_v16 }
  0x23   :  { %235 = vst.msk [vmem:[#allocation2 + $0x89] sm:$0x1] %vm211_vm5, %v935_v16 }
  0x24   :  { %236 = vst.msk [vmem:[#allocation2 + $0xb9] sm:$0x1] %vm211_vm5, %v935_v16 }
  0x25   :  { %237 = vst.msk [vmem:[#allocation2 + $0xc9] sm:$0x1] %vm211_vm5, %v935_v16 }
  0x26   :  { %238 = vst.msk [vmem:[#allocation2 + $0xd9] sm:$0x1] %vm211_vm5, %v935_v16 }
  0x27   :  { %239 = vst.msk [vmem:[#allocation2 + $0xe9] sm:$0x1] %vm211_vm5, %v935_v16 }
  0x28   :  { %240 = vst.msk [vmem:[#allocation2 + $0xf9] sm:$0x1] %vm211_vm5, %v935_v16 }
  0x29   :  { %241 = vst.msk [vmem:[#allocation2 + $0x109] sm:$0x1] %vm211_vm5, %v935_v16 }
  0x2a   :  { %242 = vst.msk [vmem:[#allocation2 + $0x119] sm:$0x1] %vm211_vm5, %v935_v16 }
  0x2b   :  { %243 = vst.msk [vmem:[#allocation2 + $0x129] sm:$0x1] %vm211_vm5, %v935_v16 }
  0x2d   :  { %896 = vmatmul.msk.bf16.gmra.mxu0 %vm102_vm2, %v916_v12  ;;  %900 = vmatmul.msk.bf16.gmra.mxu2 %vm102_vm2, %v920_v13 }
  0x3d   :  { %897 = vmatmul.msk.bf16.gmra.mxu0 %vm102_vm2, %v917_v14  ;;  %901 = vmatmul.msk.bf16.gmra.mxu2 %vm102_vm2, %v921_v15 }
  0x8a   :  { %v143_v21 = vpop.f32.mrf.mxu0 }
  0x8b   :  { %v144_v24 = vadd.f32 %v1081_v18, %v143_v21 }
  0x8d   :  { %v183_v25 = vmax.f32 %v144_v24, 0.0 }
  0x8f   :  { %244 = vst.msk [vmem:[#allocation2 + $0x11] sm:$0xff] %vm199_vm3, %v183_v25 }
  0x90   :  { %v163_v30 = vpop.f32.mrf.mxu2 }
  0x91   :  { %v164_v32 = vadd.f32 %v1081_v18, %v163_v30 }
  0x92   :  { %v145_v37 = vpop.f32.mrf.mxu0 }
  0x93   :  { %v191_v38 = vmax.f32 %v164_v32, 0.0  ;;  %v146_v39 = vadd.f32 %v1081_v18, %v145_v37 }
  0x95   :  { %252 = vst.msk [vmem:[#allocation2 + $0xb1] sm:$0xff] %vm199_vm3, %v191_v38  ;;  %v184_v43 = vmax.f32 %v146_v39, 0.0 }
  0x96   :  { %v267_v47 = vld [vmem:[#allocation2 + $0x10] sm:$0xff] }
  0x97   :  { %v300_v48 = vld [vmem:[#allocation2 + $0x11] sm:$0xff]  ;;  %245 = vst.msk [vmem:[#allocation2 + $0x21] sm:$0xff] %vm199_vm3, %v184_v43  ;;  %v284_v49 = vmul.f32 %v1088_v19, %v267_v47  ;;  %v414_v51 = vmul.f32 %v1125_v40, %v267_v47  ;;  %v1182_v47 = vld [vmem:[%s1554_s4] ss:$0 sm:$0xff] }
  0x98   :  { %v317_v50 = vmul.f32 %v1091_v20, %v300_v48  ;;  %v165_v52 = vpop.f32.mrf.mxu2  ;;  %v349_v53 = vld [vmem:[#allocation2 + $0x12] sm:$0xff]  ;;  %v463_v60 = vmul.f32 %v1133_v45, %v300_v48 }
  0x99   :  { %v166_v57 = vadd.f32 %v1081_v18, %v165_v52  ;;  %v430_v59 = vadd.f32 %v414_v51, %v381_v44  ;;  %v366_v1 = vmul.f32 %v1105_v28, %v349_v53  ;;  %v512_v3 = vmul.f32 %v1140_v54, %v349_v53 }
  0x9a   :  { %v333_v58 = vadd.f32 %v317_v50, %v284_v49  ;;  %v148_v61 = vpop.f32.mrf.mxu0 }
  0x9b   :  { %v192_v63 = vmax.f32 %v166_v57, 0.0  ;;  %v149_v0 = vadd.f32 %v1081_v18, %v148_v61  ;;  %v479_v2 = vadd.f32 %v463_v60, %v430_v59 }
  0x9c   :  { %v275_v5 = vld [vmem:[#allocation2 + $0xb0] sm:$0xff]  ;;  %v382_v9 = vadd.f32 %v366_v1, %v333_v58 }
  0x9d   :  { %v308_v6 = vld [vmem:[#allocation2 + $0xb1] sm:$0xff]  ;;  %253 = vst.msk [vmem:[#allocation2 + $0xc1] sm:$0xff] %vm199_vm3, %v192_v63  ;;  %v185_v8 = vmax.f32 %v149_v0, 0.0  ;;  %v528_v15 = vadd.f32 %v512_v3, %v479_v2  ;;  %v292_v16 = vmul.f32 %v1088_v19, %v275_v5  ;;  %v422_v21 = vmul.f32 %v1125_v40, %v275_v5 }
  0x9e   :  { %v1154_v7 = vld [vmem:[#allocation2 + $0xb2] sm:$0xff]  ;;  %v398_v12 = vld [vmem:[#allocation2 + $0x20] sm:$0xff]  ;;  %v325_v17 = vmul.f32 %v1091_v20, %v308_v6  ;;  %v471_v25 = vmul.f32 %v1133_v45, %v308_v6 }
  0x9f   :  { %v447_v13 = vld [vmem:[#allocation2 + $0x21] sm:$0xff]  ;;  %246 = vst.msk [vmem:[#allocation2 + $0x31] sm:$0xff] %vm199_vm3, %v185_v8  ;;  %v415_v22 = vmul.f32 %v1125_v40, %v398_v12  ;;  %v562_v23 = vmul.f32 %v1146_v62, %v398_v12  ;;  %v374_v24 = vmul.f32 %v1105_v28, %v1154_v7  ;;  %v285_v30 = vmul.f32 %v398_v12, %v1088_v19 }
  0xa0   :  { %v496_v14 = vld [vmem:[#allocation2 + $0x22] sm:$0xff]  ;;  %v168_v26 = vpop.f32.mrf.mxu2  ;;  %v464_v27 = vmul.f32 %v1133_v45, %v447_v13  ;;  %v611_v29 = vmul.f32 %v1152_v4, %v447_v13  ;;  %v318_v31 = vmul.f32 %v447_v13, %v1091_v20  ;;  %v341_v39 = vadd.f32 %v325_v17, %v292_v16 }
  0xa1   :  { %v169_v32 = vadd.f32 %v1081_v18, %v168_v26  ;;  %v431_v33 = vadd.f32 %v415_v22, %v382_v9  ;;  %v578_v34 = vadd.f32 %v562_v23, %v528_v15  ;;  %v660_v35 = vmul.f32 %v1160_v10, %v496_v14 }
  0xa2   :  { %v150_v36 = vpop.f32.mrf.mxu0  ;;  %v334_v37 = vadd.f32 %v318_v31, %v285_v30  ;;  %v367_v38 = vmul.f32 %v496_v14, %v1105_v28  ;;  %v438_v41 = vadd.f32 %v422_v21, %v389_v11  ;;  %v513_v48 = vmul.f32 %v1140_v54, %v496_v14 }
  0xa3   :  { %v193_v42 = vmax.f32 %v169_v32, 0.0  ;;  %v151_v43 = vadd.f32 %v1081_v18, %v150_v36  ;;  %v480_v44 = vadd.f32 %v464_v27, %v431_v33  ;;  %v627_v46 = vadd.f32 %v611_v29, %v578_v34 }
  0xa4   :  { %v1185_v49 = vld [vmem:[#allocation2 + $0xc0] sm:$0xff]  ;;  %v383_v55 = vadd.f32 %v367_v38, %v334_v37  ;;  %v1192_v56 = vadd.f32 %v374_v24, %v341_v39  ;;  %v1198_v0 = vadd.f32 %v471_v25, %v438_v41 }
  0xa5   :  { %v1187_v50 = vld [vmem:[#allocation2 + $0xc1] sm:$0xff]  ;;  %254 = vst.msk [vmem:[#allocation2 + $0xd1] sm:$0xff] %vm199_vm3, %v193_v42  ;;  %v186_v52 = vmax.f32 %v151_v43, 0.0  ;;  %v676_v53 = vadd.f32 %v660_v35, %v627_v46  ;;  %v529_v57 = vadd.f32 %v513_v48, %v480_v44  ;;  %v293_v61 = vmul.f32 %v1088_v19, %v1185_v49 }
  0xa6   :  { %v1189_v51 = vld [vmem:[#allocation2 + $0xc2] sm:$0xff]  ;;  %v546_v58 = vld [vmem:[#allocation2 + $0x30] sm:$0xff]  ;;  %v326_v63 = vmul.f32 %v1091_v20, %v1187_v50  ;;  %v1207_v5 = vmul.f32 %v1125_v40, %v1185_v49 }
  0xa7   :  { %v595_v59 = vld [vmem:[#allocation2 + $0x31] sm:$0xff]  ;;  %247 = vst.msk [vmem:[#allocation2 + $0x41] sm:$0xff] %vm199_vm3, %v186_v52  ;;  %v563_v1 = vmul.f32 %v1146_v62, %v546_v58  ;;  %v695_v2 = vadd.f32 %v1182_v47, %v676_v53  ;;  %v375_v3 = vmul.f32 %v1105_v28, %v1189_v51  ;;  %v286_v9 = vmul.f32 %v546_v58, %v1088_v19 }
  0xa8   :  { %v644_v60 = vld [vmem:[#allocation2 + $0x32] sm:$0xff]  ;;  %v170_v6 = vpop.f32.mrf.mxu2  ;;  %v612_v8 = vmul.f32 %v1152_v4, %v595_v59  ;;  %v319_v11 = vmul.f32 %v595_v59, %v1091_v20  ;;  %v416_v12 = vmul.f32 %v546_v58, %v1125_v40  ;;  %v465_v23 = vmul.f32 %v595_v59, %v1133_v45 }
  0xa9   :  { %v171_v13 = vadd.f32 %v1081_v18, %v170_v6  ;;  %v579_v14 = vadd.f32 %v563_v1, %v529_v57  ;;  %v661_v15 = vmul.f32 %v1160_v10, %v644_v60  ;;  %v368_v16 = vmul.f32 %v644_v60, %v1105_v28 }
  0xaa   :  { %v153_v17 = vpop.f32.mrf.mxu0  ;;  %v335_v21 = vadd.f32 %v319_v11, %v286_v9  ;;  %v432_v22 = vadd.f32 %v416_v12, %v383_v55  ;;  %v342_v24 = vadd.f32 %v326_v63, %v293_v61  ;;  %v711_v29 = vmax.f32 %v695_v2, 0.0 }
  0xab   :  { %v194_v25 = vmax.f32 %v171_v13, 0.0  ;;  %v154_v26 = vadd.f32 %v1081_v18, %v153_v17  ;;  %v628_v27 = vadd.f32 %v612_v8, %v579_v14  ;;  %v514_v32 = vmul.f32 %v644_v60, %v1140_v54 }
  0xac   :  { %v384_v30 = vadd.f32 %v368_v16, %v335_v21  ;;  %v481_v31 = vadd.f32 %v465_v23, %v432_v22  ;;  %v1219_v33 = vld [vmem:[#allocation2 + $0xd0] sm:$0xff]  ;;  %v391_v36 = vadd.f32 %v375_v3, %v342_v24 }
  0xad   :  { %v1221_v34 = vld [vmem:[#allocation2 + $0xd1] sm:$0xff]  ;;  %255 = vst.msk [vmem:[#allocation2 + $0xe1] sm:$0xff] %vm199_vm3, %v194_v25  ;;  %v187_v37 = vmax.f32 %v154_v26, 0.0  ;;  %v677_v38 = vadd.f32 %v661_v15, %v628_v27  ;;  %v294_v39 = vmul.f32 %v1088_v19, %v1219_v33  ;;  %v424_v52 = vmul.f32 %v1125_v40, %v1219_v33 }
  0xae   :  { %v1223_v35 = vld [vmem:[#allocation2 + $0xd2] sm:$0xff]  ;;  %v327_v41 = vmul.f32 %v1091_v20, %v1221_v34  ;;  %v400_v42 = vld [vmem:[#allocation2 + $0x40] sm:$0xff]  ;;  %v530_v46 = vadd.f32 %v514_v32, %v481_v31  ;;  %v473_v53 = vmul.f32 %v1133_v45, %v1221_v34 }
  0xaf   :  { %v449_v43 = vld [vmem:[#allocation2 + $0x41] sm:$0xff]  ;;  %v376_v48 = vmul.f32 %v1105_v28, %v1223_v35  ;;  %248 = vst.msk [vmem:[#allocation2 + $0x51] sm:$0xff] %vm199_vm3, %v187_v37  ;;  %v696_v55 = vadd.f32 %v1182_v47, %v677_v38  ;;  %v417_v57 = vmul.f32 %v1125_v40, %v400_v42  ;;  %v564_v61 = vmul.f32 %v1146_v62, %v400_v42 }
  0xb0   :  { %v498_v44 = vld [vmem:[#allocation2 + $0x42] sm:$0xff]  ;;  %v466_v58 = vmul.f32 %v1133_v45, %v449_v43  ;;  %v173_v60 = vpop.f32.mrf.mxu2  ;;  %v613_v63 = vmul.f32 %v1152_v4, %v449_v43  ;;  %v343_v2 = vadd.f32 %v327_v41, %v294_v39  ;;  %v440_v9 = vadd.f32 %v424_v52, %v391_v36 }
  0xb1   :  { %v515_v59 = vmul.f32 %v1140_v54, %v498_v44  ;;  %v662_v1 = vmul.f32 %v1160_v10, %v498_v44  ;;  %v174_v3 = vadd.f32 %v1081_v18, %v173_v60  ;;  %v712_v6 = vmax.f32 %v696_v55, 0.0 }
  0xb2   :  { %v433_v8 = vadd.f32 %v417_v57, %v384_v30  ;;  %v155_v11 = vpop.f32.mrf.mxu0  ;;  %v580_v12 = vadd.f32 %v564_v61, %v530_v46  ;;  %v392_v13 = vadd.f32 %v376_v48, %v343_v2  ;;  %v522_v14 = vmul.f32 %v1140_v54, %v1223_v35 }
  0xb3   :  { %v287_v15 = vmul.f32 %v400_v42, %v1088_v19  ;;  %v195_v16 = vmax.f32 %v174_v3, 0.0  ;;  %v156_v17 = vadd.f32 %v1081_v18, %v155_v11  ;;  %v727_v21 = vpack.c.bf16 %v712_v6, %v711_v29 }
  0xb4   :  { %v482_v22 = vadd.f32 %v466_v58, %v433_v8  ;;  %v629_v23 = vadd.f32 %v613_v63, %v580_v12  ;;  %v1249_v24 = vld [vmem:[#allocation2 + $0xe0] sm:$0xff]  ;;  %v489_v26 = vadd.f32 %v473_v53, %v440_v9  ;;  %v320_v30 = vmul.f32 %v449_v43, %v1091_v20 }
  0xb5   :  { %v1251_v25 = vld [vmem:[#allocation2 + $0xe1] sm:$0xff]  ;;  %v369_v31 = vmul.f32 %v498_v44, %v1105_v28  ;;  %256 = vst.msk [vmem:[#allocation2 + $0xf1] sm:$0xff] %vm199_vm3, %v195_v16  ;;  %v188_v32 = vmax.f32 %v156_v17, 0.0  ;;  %906 = vmatmul.msk.bf16.vlgmr.msra.gmra.mxu1 %vm199_vm3, %v727_v21  ;;  %v425_v29 = vmul.f32 %v1125_v40, %v1249_v24  ;;  %v572_v46 = vmul.f32 %v1146_v62, %v1249_v24 }
  0xb6   :  { %v1253_v27 = vld [vmem:[#allocation2 + $0xe2] sm:$0xff]  ;;  %v531_v36 = vadd.f32 %v515_v59, %v482_v22  ;;  %v474_v37 = vmul.f32 %v1133_v45, %v1251_v25  ;;  %v548_v38 = vld [vmem:[#allocation2 + $0x50] sm:$0xff]  ;;  %v678_v42 = vadd.f32 %v662_v1, %v629_v23  ;;  %v538_v44 = vadd.f32 %v522_v14, %v489_v26 }
  0xb7   :  { %v597_v39 = vld [vmem:[#allocation2 + $0x51] sm:$0xff]  ;;  %v523_v43 = vmul.f32 %v1140_v54, %v1253_v27  ;;  %249 = vst.msk [vmem:[#allocation2 + $0x61] sm:$0xff] %vm199_vm3, %v188_v32  ;;  %v565_v48 = vmul.f32 %v1146_v62, %v548_v38  ;;  %v441_v55 = vadd.f32 %v425_v29, %v392_v13  ;;  %v621_v60 = vmul.f32 %v1152_v4, %v1251_v25 }
  0xb8   :  { %v646_v41 = vld [vmem:[#allocation2 + $0x52] sm:$0xff]  ;;  %v614_v52 = vmul.f32 %v1152_v4, %v597_v39  ;;  %v175_v57 = vpop.f32.mrf.mxu2  ;;  %v697_v58 = vadd.f32 %v1182_v47, %v678_v42  ;;  %v588_v59 = vadd.f32 %v572_v46, %v538_v44  ;;  %v670_v61 = vmul.f32 %v1160_v10, %v1253_v27 }
  0xb9   :  { %v663_v53 = vmul.f32 %v1160_v10, %v646_v41  ;;  %v176_v63 = vadd.f32 %v1081_v18, %v175_v57  ;;  %v581_v1 = vadd.f32 %v565_v48, %v531_v36  ;;  %v490_v2 = vadd.f32 %v474_v37, %v441_v55 }
  0xba   :  { %v288_v3 = vmul.f32 %v548_v38, %v1088_v19  ;;  %v158_v6 = vpop.f32.mrf.mxu0  ;;  %v713_v8 = vmax.f32 %v697_v58, 0.0  ;;  %v637_v9 = vadd.f32 %v621_v60, %v588_v59  ;;  %v321_v11 = vmul.f32 %v597_v39, %v1091_v20 }
  0xbb   :  { %v336_v12 = vadd.f32 %v320_v30, %v287_v15  ;;  %v196_v13 = vmax.f32 %v176_v63, 0.0  ;;  %v159_v14 = vadd.f32 %v1081_v18, %v158_v6  ;;  %v630_v16 = vadd.f32 %v614_v52, %v581_v1 }
  0xbc   :  { %v539_v17 = vadd.f32 %v523_v43, %v490_v2  ;;  %v1280_v21 = vld [vmem:[#allocation2 + $0xf0] sm:$0xff]  ;;  %v686_v26 = vadd.f32 %v670_v61, %v637_v9  ;;  %v337_v32 = vadd.f32 %v321_v11, %v288_v3  ;;  %v370_v36 = vmul.f32 %v646_v41, %v1105_v28 }
  0xbd   :  { %v1282_v22 = vld [vmem:[#allocation2 + $0xf1] sm:$0xff]  ;;  %v385_v29 = vadd.f32 %v369_v31, %v336_v12  ;;  %257 = vst.msk [vmem:[#allocation2 + $0x101] sm:$0xff] %vm199_vm3, %v196_v13  ;;  %v189_v37 = vmax.f32 %v159_v14, 0.0  ;;  %v679_v15 = vadd.f32 %v663_v53, %v630_v16  ;;  %v573_v30 = vmul.f32 %v1146_v62, %v1280_v21 }
  0xbe   :  { %v1284_v23 = vld [vmem:[#allocation2 + $0xf2] sm:$0xff]  ;;  %v622_v42 = vmul.f32 %v1152_v4, %v1282_v22  ;;  %v705_v44 = vadd.f32 %v1182_v47, %v686_v26  ;;  %v386_v46 = vadd.f32 %v370_v36, %v337_v32  ;;  %v1295_v48 = vld [vmem:[#allocation2 + $0x60] sm:$0xff]  ;;  %v418_v31 = vmul.f32 %v548_v38, %v1125_v40 }
  0xbf   :  { %v671_v43 = vmul.f32 %v1160_v10, %v1284_v23  ;;  %v1298_v52 = vld [vmem:[#allocation2 + $0x61] sm:$0xff]  ;;  %250 = vst.msk [vmem:[#allocation2 + $0x71] sm:$0xff] %vm199_vm3, %v189_v37  ;;  %v698_v53 = vadd.f32 %v1182_v47, %v679_v15  ;;  %v589_v55 = vadd.f32 %v573_v30, %v539_v17  ;;  %v419_v57 = vmul.f32 %v1125_v40, %v1295_v48 }
  0xc0   :  { %v467_v58 = vmul.f32 %v597_v39, %v1133_v45  ;;  %v1305_v59 = vld [vmem:[#allocation2 + $0x62] sm:$0xff]  ;;  %v178_v60 = vpop.f32.mrf.mxu2  ;;  %v721_v61 = vmax.f32 %v705_v44, 0.0  ;;  %v434_v63 = vadd.f32 %v418_v31, %v385_v29  ;;  %v468_v38 = vmul.f32 %v1133_v45, %v1298_v52 }
  0xc1   :  { %v516_v1 = vmul.f32 %v646_v41, %v1140_v54  ;;  %v179_v2 = vadd.f32 %v1081_v18, %v178_v60  ;;  %v714_v3 = vmax.f32 %v698_v53, 0.0  ;;  %v638_v6 = vadd.f32 %v622_v42, %v589_v55 }
  0xc2   :  { %v435_v9 = vadd.f32 %v419_v57, %v386_v46  ;;  %v160_v11 = vpop.f32.mrf.mxu0  ;;  %v483_v12 = vadd.f32 %v467_v58, %v434_v63  ;;  %v517_v39 = vmul.f32 %v1140_v54, %v1305_v59  ;;  %v566_v13 = vmul.f32 %v1146_v62, %v1295_v48 }
  0xc3   :  { %v615_v14 = vmul.f32 %v1152_v4, %v1298_v52  ;;  %v197_v16 = vmax.f32 %v179_v2, 0.0  ;;  %v161_v17 = vadd.f32 %v1081_v18, %v160_v11  ;;  %v728_v41 = vpack.c.bf16 %v714_v3, %v713_v8 }
  0xc4   :  { %v687_v26 = vadd.f32 %v671_v43, %v638_v6  ;;  %v484_v32 = vadd.f32 %v468_v38, %v435_v9  ;;  %v532_v36 = vadd.f32 %v516_v1, %v483_v12  ;;  %v664_v29 = vmul.f32 %v1160_v10, %v1305_v59  ;;  %v1346_v63 = vld [vmem:[#allocation2 + $0x100] sm:$0xff] }
  0xc5   :  { %v295_v37 = vmul.f32 %v1249_v24, %v1088_v19  ;;  %258 = vst.msk [vmem:[#allocation2 + $0x111] sm:$0xff] %vm199_vm3, %v197_v16  ;;  %v190_v15 = vmax.f32 %v161_v17, 0.0  ;;  %907 = vmatmul.msk.bf16.gmra.mxu1 %vm199_vm3, %v728_v41  ;;  %v296_v42 = vmul.f32 %v1280_v21, %v1088_v19  ;;  %v328_v8 = vmul.f32 %v1251_v25, %v1091_v20  ;;  %v1350_v6 = vld [vmem:[#allocation2 + $0x101] sm:$0xff] }
  0xc6   :  { %v706_v30 = vadd.f32 %v1182_v47, %v687_v26  ;;  %v533_v43 = vadd.f32 %v517_v39, %v484_v32  ;;  %v1329_v44 = vld [vmem:[#allocation2 + $0x70] sm:$0xff]  ;;  %v582_v46 = vadd.f32 %v566_v13, %v532_v36  ;;  %v329_v53 = vmul.f32 %v1282_v22, %v1091_v20  ;;  %v1357_v41 = vld [vmem:[#allocation2 + $0x102] sm:$0xff] }
  0xc7   :  { %v1331_v31 = vld [vmem:[#allocation2 + $0x71] sm:$0xff]  ;;  %v377_v55 = vmul.f32 %v1253_v27, %v1105_v28  ;;  %251 = vst.msk [vmem:[#allocation2 + $0x81] sm:$0xff] %vm199_vm3, %v190_v15  ;;  %v567_v25 = vmul.f32 %v1146_v62, %v1329_v44  ;;  %v344_v2 = vadd.f32 %v328_v8, %v295_v37  ;;  %v378_v27 = vmul.f32 %v1284_v23, %v1105_v28 }
  0xc8   :  { %v1333_v24 = vld [vmem:[#allocation2 + $0x72] sm:$0xff]  ;;  %v722_v57 = vmax.f32 %v706_v30, 0.0  ;;  %v616_v58 = vmul.f32 %v1152_v4, %v1331_v31  ;;  %v180_v38 = vpop.f32.mrf.mxu2  ;;  %v631_v1 = vadd.f32 %v615_v14, %v582_v46  ;;  %v345_v3 = vadd.f32 %v329_v53, %v296_v42 }
  0xc9   :  { %v665_v60 = vmul.f32 %v1160_v10, %v1333_v24  ;;  %v181_v9 = vadd.f32 %v1081_v18, %v180_v38  ;;  %v583_v12 = vadd.f32 %v567_v25, %v533_v43  ;;  %v426_v39 = vmul.f32 %v1280_v21, %v1125_v40 }
  0xca   :  { %v732_v11 = vpack.c.bf16 %v722_v57, %v721_v61  ;;  %v680_v13 = vadd.f32 %v664_v29, %v631_v1  ;;  %v393_v16 = vadd.f32 %v377_v55, %v344_v2  ;;  %v394_v17 = vadd.f32 %v378_v27, %v345_v3 }
  0xcb   :  { %v427_v14 = vmul.f32 %v1125_v40, %v1346_v63  ;;  %v198_v26 = vmax.f32 %v181_v9, 0.0  ;;  %v632_v32 = vadd.f32 %v616_v58, %v583_v12  ;;  %v475_v18 = vmul.f32 %v1282_v22, %v1133_v45 }
  0xcc   :  { %911 = vmatmul.msk.bf16.vlgmr.msra.gmra.mxu3 %vm199_vm3, %v732_v11  ;;  %v476_v61 = vmul.f32 %v1133_v45, %v1350_v6  ;;  %v699_v21 = vadd.f32 %v1182_v47, %v680_v13  ;;  %v442_v36 = vadd.f32 %v426_v39, %v393_v16  ;;  %v524_v37 = vmul.f32 %v1284_v23, %v1140_v54  ;;  %v1367_v15 = vld [vmem:[#allocation2 + $0x110] sm:$0xff] }
  0xcd   :  { %v443_v29 = vadd.f32 %v427_v14, %v394_v17  ;;  %v1369_v30 = vld [vmem:[#allocation2 + $0x111] sm:$0xff]  ;;  %259 = vst.msk [vmem:[#allocation2 + $0x121] sm:$0xff] %vm199_vm3, %v198_v26  ;;  %v681_v8 = vadd.f32 %v665_v60, %v632_v32  ;;  %v525_v22 = vmul.f32 %v1140_v54, %v1357_v41  ;;  %v574_v43 = vmul.f32 %v1146_v62, %v1346_v63 }
  0xce   :  { %v1371_v42 = vld [vmem:[#allocation2 + $0x112] sm:$0xff]  ;;  %v1380_v46 = vmul.f32 %v1133_v45, %v1187_v50  ;;  %v715_v23 = vmax.f32 %v699_v21, 0.0  ;;  %v491_v53 = vadd.f32 %v475_v18, %v442_v36  ;;  %v575_v57 = vmul.f32 %v1146_v62, %v1367_v15  ;;  %v404_v9 = vld [vmem:[#allocation2 + $0x80] sm:$0xff] }
  0xcf   :  { %v492_v55 = vadd.f32 %v476_v61, %v443_v29  ;;  %v700_v25 = vadd.f32 %v1182_v47, %v681_v8  ;;  %v623_v58 = vmul.f32 %v1152_v4, %v1350_v6  ;;  %v624_v60 = vmul.f32 %v1152_v4, %v1369_v30  ;;  %v453_v26 = vld [vmem:[#allocation2 + $0x81] sm:$0xff] }
  0xd0   :  { %v673_v38 = vmul.f32 %v1160_v10, %v1371_v42  ;;  %v540_v1 = vadd.f32 %v524_v37, %v491_v53  ;;  %v289_v3 = vmul.f32 %v1295_v48, %v1088_v19  ;;  %v290_v27 = vmul.f32 %v1329_v44, %v1088_v19  ;;  %v502_v21 = vld [vmem:[#allocation2 + $0x82] sm:$0xff]  ;;  %v552_v37 = vld [vmem:[#allocation2 + $0x90] sm:$0xff] }
  0xd1   :  { %v541_v2 = vadd.f32 %v525_v22, %v492_v55  ;;  %v716_v11 = vmax.f32 %v700_v25, 0.0  ;;  %v322_v12 = vmul.f32 %v1298_v52, %v1091_v20  ;;  %v323_v39 = vmul.f32 %v1331_v31, %v1091_v20  ;;  %v601_v53 = vld [vmem:[#allocation2 + $0x91] sm:$0xff] }
  0xd2   :  { %v371_v13 = vmul.f32 %v1305_v59, %v1105_v28  ;;  %v590_v16 = vadd.f32 %v574_v43, %v540_v1  ;;  %v372_v14 = vmul.f32 %v1333_v24, %v1105_v28  ;;  %v420_v48 = vmul.f32 %v1329_v44, %v1125_v40 }
  0xd3   :  { %v591_v17 = vadd.f32 %v575_v57, %v541_v2  ;;  %v729_v32 = vpack.c.bf16 %v716_v11, %v715_v23  ;;  %v338_v18 = vadd.f32 %v322_v12, %v289_v3  ;;  %v339_v61 = vadd.f32 %v323_v39, %v290_v27 }
  0xd4   :  { %v421_v52 = vmul.f32 %v1125_v40, %v404_v9  ;;  %v639_v36 = vadd.f32 %v623_v58, %v590_v16  ;;  %v672_v59 = vmul.f32 %v1160_v10, %v1357_v41  ;;  %v1410_v8 = vadd.f32 %v1207_v5, %v1192_v56 }
  0xd5   :  { %v640_v29 = vadd.f32 %v624_v60, %v591_v17  ;;  %908 = vmatmul.msk.bf16.gmra.mxu1 %vm199_vm3, %v729_v32  ;;  %v387_v44 = vadd.f32 %v371_v13, %v338_v18  ;;  %v388_v22 = vadd.f32 %v372_v14, %v339_v61  ;;  %v469_v43 = vmul.f32 %v1331_v31, %v1133_v45  ;;  %v650_v13 = vld [vmem:[#allocation2 + $0x92] sm:$0xff]  ;;  %v412_v14 = vld [vmem:[#allocation2 + $0x120] sm:$0xff] }
  0xd6   :  { %v470_v23 = vmul.f32 %v1133_v45, %v453_v26  ;;  %v688_v55 = vadd.f32 %v672_v59, %v639_v36  ;;  %v518_v25 = vmul.f32 %v1333_v24, %v1140_v54  ;;  %v519_v58 = vmul.f32 %v1140_v54, %v502_v21  ;;  %v461_v36 = vld [vmem:[#allocation2 + $0x121] sm:$0xff] }
  0xd7   :  { %v689_v57 = vadd.f32 %v673_v38, %v640_v29  ;;  %v436_v60 = vadd.f32 %v420_v48, %v387_v44  ;;  %v437_v56 = vadd.f32 %v421_v52, %v388_v22  ;;  %v568_v5 = vmul.f32 %v1146_v62, %v404_v9 }
  0xd8   :  { %v569_v1 = vmul.f32 %v1146_v62, %v552_v37  ;;  %v707_v2 = vadd.f32 %v1182_v47, %v688_v55  ;;  %v617_v3 = vmul.f32 %v1152_v4, %v453_v26  ;;  %v618_v27 = vmul.f32 %v1152_v4, %v601_v53  ;;  %v510_v37 = vld [vmem:[#allocation2 + $0x122] sm:$0xff] }
  0xd9   :  { %v708_v31 = vadd.f32 %v1182_v47, %v689_v57  ;;  %v485_v38 = vadd.f32 %v469_v43, %v436_v60  ;;  %v486_v11 = vadd.f32 %v470_v23, %v437_v56  ;;  %v297_v24 = vmul.f32 %v1346_v63, %v1088_v19  ;;  %v560_v43 = vld [vmem:[#allocation2 + $0x130] sm:$0xff] }
  0xda   :  { %v298_v12 = vmul.f32 %v1367_v15, %v1088_v19  ;;  %v723_v39 = vmax.f32 %v707_v2, 0.0  ;;  %v330_v16 = vmul.f32 %v1350_v6, %v1091_v20  ;;  %v331_v17 = vmul.f32 %v1369_v30, %v1091_v20  ;;  %v609_v57 = vld [vmem:[#allocation2 + $0x131] sm:$0xff] }
  0xdb   :  { %v724_v9 = vmax.f32 %v708_v31, 0.0  ;;  %v534_v48 = vadd.f32 %v518_v25, %v485_v38  ;;  %v535_v26 = vadd.f32 %v519_v58, %v486_v11  ;;  %v379_v32 = vmul.f32 %v1357_v41, %v1105_v28 }
  0xdc   :  { %v380_v63 = vmul.f32 %v1371_v42, %v1105_v28  ;;  %v346_v19 = vadd.f32 %v330_v16, %v297_v24  ;;  %v347_v61 = vadd.f32 %v331_v17, %v298_v12  ;;  %v428_v52 = vmul.f32 %v1367_v15, %v1125_v40 }
  0xdd   :  { %v733_v18 = vpack.c.bf16 %v724_v9, %v723_v39  ;;  %v584_v6 = vadd.f32 %v568_v5, %v534_v48  ;;  %v585_v29 = vadd.f32 %v569_v1, %v535_v26  ;;  %v667_v20 = vmul.f32 %v1160_v10, %v650_v13 }
  0xde   :  { %v429_v59 = vmul.f32 %v1125_v40, %v412_v14  ;;  %v666_v41 = vmul.f32 %v1160_v10, %v502_v21  ;;  %v395_v44 = vadd.f32 %v379_v32, %v346_v19  ;;  %v396_v28 = vadd.f32 %v380_v63, %v347_v61 }
  0xdf   :  { %912 = vmatmul.msk.bf16.gmra.mxu3 %vm199_vm3, %v733_v18  ;;  %v477_v22 = vmul.f32 %v1369_v30, %v1133_v45  ;;  %v633_v23 = vadd.f32 %v617_v3, %v584_v6  ;;  %v634_v15 = vadd.f32 %v618_v27, %v585_v29  ;;  %v478_v53 = vmul.f32 %v1133_v45, %v461_v36  ;;  %v658_v27 = vld [vmem:[#allocation2 + $0x132] sm:$0xff] }
  0xe0   :  { %v526_v55 = vmul.f32 %v1371_v42, %v1140_v54  ;;  %v444_v40 = vadd.f32 %v428_v52, %v395_v44  ;;  %v445_v25 = vadd.f32 %v429_v59, %v396_v28  ;;  %v527_v58 = vmul.f32 %v1140_v54, %v510_v37 }
  0xe1   :  { %v576_v21 = vmul.f32 %v1146_v62, %v412_v14  ;;  %v682_v60 = vadd.f32 %v666_v41, %v633_v23  ;;  %v683_v56 = vadd.f32 %v667_v20, %v634_v15  ;;  %v577_v5 = vmul.f32 %v1146_v62, %v560_v43 }
  0xe2   :  { %v625_v30 = vmul.f32 %v1152_v4, %v461_v36  ;;  %v493_v1 = vadd.f32 %v477_v22, %v444_v40  ;;  %v494_v2 = vadd.f32 %v478_v53, %v445_v25  ;;  %v626_v45 = vmul.f32 %v1152_v4, %v609_v57 }
  0xe3   :  { %v488_v42 = vadd.f32 %v1380_v46, %v1410_v8  ;;  %v701_v31 = vadd.f32 %v1182_v47, %v682_v60  ;;  %v702_v3 = vadd.f32 %v1182_v47, %v683_v56  ;;  %v520_v38 = vmul.f32 %v1140_v54, %v1154_v7 }
  0xe4   :  { %v521_v11 = vmul.f32 %v1140_v54, %v1189_v51  ;;  %v542_v24 = vadd.f32 %v526_v55, %v493_v1  ;;  %v543_v12 = vadd.f32 %v527_v58, %v494_v2  ;;  %v570_v39 = vmul.f32 %v1146_v62, %v1185_v49 }
  0xe5   :  { %v571_v9 = vmul.f32 %v1146_v62, %v1219_v33  ;;  %v717_v46 = vmax.f32 %v701_v31, 0.0  ;;  %v718_v8 = vmax.f32 %v702_v3, 0.0  ;;  %v536_v13 = vadd.f32 %v520_v38, %v1198_v0 }
  0xe6   :  { %v537_v16 = vadd.f32 %v521_v11, %v488_v42  ;;  %v592_v17 = vadd.f32 %v576_v21, %v542_v24  ;;  %v593_v14 = vadd.f32 %v577_v5, %v543_v12  ;;  %v675_v7 = vmul.f32 %v1160_v10, %v658_v27 }
  0xe7   :  { %v620_v54 = vmul.f32 %v1152_v4, %v1221_v34  ;;  %v730_v48 = vpack.c.bf16 %v718_v8, %v717_v46  ;;  %v586_v26 = vadd.f32 %v570_v39, %v536_v13  ;;  %v619_v49 = vmul.f32 %v1152_v4, %v1187_v50 }
  0xe8   :  { %v587_v32 = vadd.f32 %v571_v9, %v537_v16  ;;  %v641_v63 = vadd.f32 %v625_v30, %v592_v17  ;;  %v642_v62 = vadd.f32 %v626_v45, %v593_v14  ;;  %v674_v33 = vmul.f32 %v1160_v10, %v510_v37 }
  0xe9   :  { %v669_v0 = vmul.f32 %v1160_v10, %v1223_v35  ;;  %909 = vmatmul.msk.bf16.gmra.mxu1 %vm199_vm3, %v730_v48  ;;  %v635_v18 = vadd.f32 %v619_v49, %v586_v26  ;;  %v668_v34 = vmul.f32 %v1160_v10, %v1189_v51  ;;  %v933_v10 = vld [vmem:[%s1555_s6] ss:$0 sm:$0xff] }
  0xea   :  { %v636_v19 = vadd.f32 %v620_v54, %v587_v32  ;;  %v690_v61 = vadd.f32 %v674_v33, %v641_v63  ;;  %v691_v52 = vadd.f32 %v675_v7, %v642_v62 }
  0xeb   :  { %v684_v50 = vadd.f32 %v668_v34, %v635_v18 }
  0xec   :  { %v685_v36 = vadd.f32 %v669_v0, %v636_v19  ;;  %v709_v6 = vadd.f32 %v1182_v47, %v690_v61  ;;  %v710_v4 = vadd.f32 %v1182_v47, %v691_v52 }
  0xed   :  { %v703_v37 = vadd.f32 %v1182_v47, %v684_v50 }
  0xee   :  { %v725_v29 = vmax.f32 %v709_v6, 0.0  ;;  %v726_v20 = vmax.f32 %v710_v4, 0.0  ;;  %v704_v59 = vadd.f32 %v1182_v47, %v685_v36 }
  0xef   :  { %v719_v44 = vmax.f32 %v703_v37, 0.0 }
  0xf0   :  { %v734_v35 = vpack.c.bf16 %v726_v20, %v725_v29  ;;  %v720_v41 = vmax.f32 %v704_v59, 0.0 }
  0xf2   :  { %913 = vmatmul.msk.bf16.gmra.mxu3 %vm199_vm3, %v734_v35  ;;  %v731_v28 = vpack.c.bf16 %v720_v41, %v719_v44 }
  0xf9   :  { %910 = vmatmul.msk.bf16.gmra.mxu1 %vm199_vm3, %v731_v28 }
 0x132   :  { %v777_v51 = vpop.f32.mrf.mxu1 }
 0x133   :  { %v778_v22 = vadd.f32 %v933_v10, %v777_v51 }
 0x135   :  { %v817_v43 = vpack.c.bf16 %v778_v22, %v778_v22 }
 0x137   :  { %834 = vst.msk [vmem:[%s1557_s7] sm:$0xf] %vm833_vm6, %v817_v43 }
 0x13a   :  { %v779_v47 = vpop.f32.mrf.mxu1 }
 0x13b   :  { %v780_v23 = vadd.f32 %v933_v10, %v779_v47 }
 0x13d   :  { %v818_v15 = vpack.c.bf16 %v780_v23, %v780_v23 }
 0x13f   :  { %835 = vst.msk [vmem:[%s1557_s7 + $0x4] sm:$0xf] %vm833_vm6, %v818_v15 }
 0x142   :  { %v782_v53 = vpop.f32.mrf.mxu1 }
 0x143   :  { %v783_v55 = vadd.f32 %v933_v10, %v782_v53 }
 0x145   :  { %v819_v57 = vpack.c.bf16 %v783_v55, %v783_v55 }
 0x147   :  { %836 = vst.msk [vmem:[%s1557_s7 + $0x8] sm:$0xf] %vm833_vm6, %v819_v57 }
 0x14a   :  { %v784_v40 = vpop.f32.mrf.mxu1 }
 0x14b   :  { %v785_v25 = vadd.f32 %v933_v10, %v784_v40 }
 0x14d   :  { %v820_v58 = vpack.c.bf16 %v785_v25, %v785_v25 }
 0x14f   :  { %v802_v21 = vpop.f32.mrf.mxu3  ;;  %837 = vst.msk [vmem:[%s1557_s7 + $0xc] sm:$0xf] %vm833_vm6, %v820_v58 }
 0x150   :  { %v803_v60 = vadd.f32 %v933_v10, %v802_v21 }
 0x152   :  { %v827_v56 = vpack.c.bf16 %v803_v60, %v803_v60  ;;  %v787_v5 = vpop.f32.mrf.mxu1 }
 0x153   :  { %v788_v30 = vadd.f32 %v933_v10, %v787_v5 }
 0x154   :  { %844 = vst.msk [vmem:[%s1557_s7 + $0x28] sm:$0xf] %vm833_vm6, %v827_v56 }
 0x155   :  { %v821_v1 = vpack.c.bf16 %v788_v30, %v788_v30 }
 0x157   :  { %v804_v2 = vpop.f32.mrf.mxu3  ;;  %838 = vst.msk [vmem:[%s1557_s7 + $0x10] sm:$0xf] %vm833_vm6, %v821_v1 }
 0x158   :  { %v805_v45 = vadd.f32 %v933_v10, %v804_v2 }
 0x15a   :  { %v828_v42 = vpack.c.bf16 %v805_v45, %v805_v45  ;;  %v789_v31 = vpop.f32.mrf.mxu1 }
 0x15b   :  { %v790_v3 = vadd.f32 %v933_v10, %v789_v31 }
 0x15c   :  { %845 = vst.msk [vmem:[%s1557_s7 + $0x2c] sm:$0xf] %vm833_vm6, %v828_v42 }
 0x15d   :  { %v822_v27 = vpack.c.bf16 %v790_v3, %v790_v3 }
 0x15f   :  { %839 = vst.msk [vmem:[%s1557_s7 + $0x14] sm:$0xf] %vm833_vm6, %v822_v27 }
 0x162   :  { %v807_v38 = vpop.f32.mrf.mxu3 }
 0x163   :  { %v808_v11 = vadd.f32 %v933_v10, %v807_v38 }
 0x165   :  { %v829_v24 = vpack.c.bf16 %v808_v11, %v808_v11 }
 0x166   :  { %v792_v12 = vpop.f32.mrf.mxu1 }
 0x167   :  { %846 = vst.msk [vmem:[%s1557_s7 + $0x30] sm:$0xf] %vm833_vm6, %v829_v24  ;;  %v793_v39 = vadd.f32 %v933_v10, %v792_v12 }
 0x169   :  { %v823_v9 = vpack.c.bf16 %v793_v39, %v793_v39 }
 0x16a   :  { %v809_v46 = vpop.f32.mrf.mxu3 }
 0x16b   :  { %v810_v8 = vadd.f32 %v933_v10, %v809_v46  ;;  %840 = vst.msk [vmem:[%s1557_s7 + $0x18] sm:$0xf] %vm833_vm6, %v823_v9 }
 0x16d   :  { %v830_v13 = vpack.c.bf16 %v810_v8, %v810_v8 }
 0x16e   :  { %v794_v16 = vpop.f32.mrf.mxu1 }
 0x16f   :  { %847 = vst.msk [vmem:[%s1557_s7 + $0x34] sm:$0xf] %vm833_vm6, %v830_v13  ;;  %v795_v17 = vadd.f32 %v933_v10, %v794_v16 }
 0x171   :  { %v824_v14 = vpack.c.bf16 %v795_v17, %v795_v17 }
 0x173   :  { %841 = vst.msk [vmem:[%s1557_s7 + $0x1c] sm:$0xf] %vm833_vm6, %v824_v14 }
 0x175   :  { %v812_v7 = vpop.f32.mrf.mxu3 }
 0x176   :  { %v813_v54 = vadd.f32 %v933_v10, %v812_v7  ;;  %v797_v48 = vpop.f32.mrf.mxu1 }
 0x177   :  { %v798_v26 = vadd.f32 %v933_v10, %v797_v48 }
 0x178   :  { %v831_v32 = vpack.c.bf16 %v813_v54, %v813_v54 }
 0x179   :  { %v825_v49 = vpack.c.bf16 %v798_v26, %v798_v26 }
 0x17a   :  { %848 = vst.msk [vmem:[%s1557_s7 + $0x38] sm:$0xf] %vm833_vm6, %v831_v32 }
 0x17b   :  { %842 = vst.msk [vmem:[%s1557_s7 + $0x20] sm:$0xf] %vm833_vm6, %v825_v49 }
 0x17d   :  { %v814_v63 = vpop.f32.mrf.mxu3 }
 0x17e   :  { %v815_v62 = vadd.f32 %v933_v10, %v814_v63  ;;  %v799_v33 = vpop.f32.mrf.mxu1 }
 0x17f   :  { %v800_v0 = vadd.f32 %v933_v10, %v799_v33 }
 0x180   :  { %v832_v18 = vpack.c.bf16 %v815_v62, %v815_v62 }
 0x181   :  { %v826_v19 = vpack.c.bf16 %v800_v0, %v800_v0 }
 0x182   :  { %849 = vst.msk [vmem:[%s1557_s7 + $0x3c] sm:$0xf] %vm833_vm6, %v832_v18 }
 0x183   :  { %843 = vst.msk [vmem:[%s1557_s7 + $0x24] sm:$0xf] %vm833_vm6, %v826_v19 }

// kernel: token_pyramid_forward.5
= control target key start
LH: loop header
LB: loop body
LE: loop exit
PB: predicated region body
PF: predicated region fallthrough
CT: control target
= control target key end

     0   :  { %v1787_v2 = vmov 0   ;;  %vm113_vm0 = vcmask 261120   ;;  %s2530_s0 = inlined_call_operand.vmem [shape: bf16[72,32], index: 0, kind: input, shape index: {}]   ;;  %s2531_s1 = inlined_call_operand.vmem [shape: f32[12,3,1], index: 1, kind: input, shape index: {}]   ;;  %s2532_s2 = inlined_call_operand.vmem [shape: bf16[32,128], index: 2, kind: input, shape index: {}]   ;;  %s2533_s3 = inlined_call_operand.vmem [shape: f32[1,128], index: 3, kind: input, shape index: {}]   ;;  %s2534_s4 = inlined_call_operand.vmem [shape: f32[9,128], index: 4, kind: input, shape index: {}]   ;;  %s2535_s5 = inlined_call_operand.vmem [shape: f32[1,128], index: 5, kind: input, shape index: {}]   ;;  %s2536_s6 = inlined_call_operand.vmem [shape: bf16[128,48], index: 6, kind: input, shape index: {}]   ;;  %s2537_s7 = inlined_call_operand.vmem [shape: f32[1,48], index: 7, kind: input, shape index: {}]   ;;  %s2538_s8 = inlined_call_operand.vmem [shape: bf16[48,192], index: 8, kind: input, shape index: {}]   ;;  %s2539_s9 = inlined_call_operand.vmem [shape: f32[1,192], index: 9, kind: input, shape index: {}]   ;;  %s2540_s10 = inlined_call_operand.vmem [shape: f32[9,192], index: 10, kind: input, shape index: {}]   ;;  %s2541_s11 = inlined_call_operand.vmem [shape: f32[1,192], index: 11, kind: input, shape index: {}]   ;;  %s2542_s12 = inlined_call_operand.vmem [shape: bf16[192,48], index: 12, kind: input, shape index: {}]   ;;  %s2543_s13 = inlined_call_operand.vmem [shape: f32[1,48], index: 13, kind: input, shape index: {}]   ;;  %s2544_s14 = inlined_call_operand.hbm [shape: f32[8,48], index: 14, kind: output, shape index: {}]  }
   0x1   :  { %v58_v0 = vld [vmem:[%s2531_s1] sm:$0x7]  ;;  %v1719_v1 = vld [vmem:[%s2532_s2 + $0x8] sm:$0xff]  ;;  %1751 = vset.pattern.permute.xlu0 %v1787_v2  ;;  %1752 = vset.pattern.permute.xlu1 %v1787_v2  ;;  %v59_v9 = vld [vmem:[%s2531_s1 + $0x4] sm:$0x7] }
   0x2   :  { %v57_v3 = vld [vmem:[%s2530_s0 + $0x20] sm:$0xf]  ;;  %308 = vperm.xlu0 %1751, %v58_v0   ;;  %135 = vmatpush.bf16.msra.mxu0 %v1719_v1  ;;  %v60_v6 = vld [vmem:[%s2531_s1 + $0x8] sm:$0x7] }
   0x3   :  { %v1718_v4 = vld [vmem:[%s2532_s2] sm:$0xff]  ;;  %v95_v5 = vunpack.c.l.b16 %v57_v3  ;;  %1746 = vmatpush.bf16.msra.mxu3 %v1719_v1  ;;  %316 = vperm.xlu1 %1752, %v60_v6  }
   0x4   :  { %v1714_v7 = vld [vmem:[%s2530_s0] sm:$0xff]  ;;  %1753 = vset.pattern.permute.xlu2 %v1787_v2 }
   0x5   :  { %v100_v8 = vpack.c.b16 %v95_v5, %v95_v5 }
   0x6   :  { %136 = vmatpush.bf16.msra.mxu0 %v1718_v4 }
   0x7   :  { %1747 = vmatpush.bf16.msra.mxu3 %v1718_v4 }
   0x8   :  { %19 = vsyncpa [#allocation5], 0  ;;  %v61_v10 = vld [vmem:[%s2531_s1 + $0xc] sm:$0x7]  ;;  %v62_v11 = vld [vmem:[%s2531_s1 + $0x10] sm:$0x7] }
   0x9   :  { %1578 = vmatmul.msk.bf16.vlgmr.msra.gmra.mxu0 %vm113_vm0, %v1714_v7  ;;  %324 = vperm.xlu2 %1753, %v62_v11   ;;  %v64_v12 = vld [vmem:[%s2531_s1 + $0x18] sm:$0x7]  ;;  %v65_v13 = vld [vmem:[%s2531_s1 + $0x1c] sm:$0x7]  ;;  %v63_v14 = vld [vmem:[%s2531_s1 + $0x14] sm:$0x7] }
   0xa   :  { %312 = vperm.xlu0 %1751, %v59_v9   ;;  %1582 = vmatmul.msk.bf16.vlgmr.msra.gmra.mxu3 %vm113_vm0, %v100_v8  ;;  %v1715_v15 = vld [vmem:[%s2530_s0 + $0x8] sm:$0xff]  ;;  %v67_v16 = vld [vmem:[%s2531_s1 + $0x24] sm:$0x7]  ;;  %v66_v18 = vld [vmem:[%s2531_s1 + $0x20] sm:$0x7]  ;;  %vm986_vm1 = vcmask 392192  }
   0xb   :  { %320 = vperm.xlu1 %1752, %v61_v10   ;;  %v68_v17 = vld [vmem:[%s2531_s1 + $0x28] sm:$0x7]  ;;  %v69_v19 = vld [vmem:[%s2531_s1 + $0x2c] sm:$0x7]  ;;  %v1716_v20 = vld [vmem:[%s2530_s0 + $0x10] sm:$0xff]  ;;  %vm1018_vm2 = vcmask 1043456  }
   0xc   :  { %v1717_v21 = vld [vmem:[%s2530_s0 + $0x18] sm:$0xff]  ;;  %v1938_v26 = vld [vmem:[%s2533_s3] ss:$0 sm:$0xff]  ;;  %vm1019_vm3 = vcmask 523268   ;;  %vm1049_vm6 = vcmask 1041408   ;;  %vm1051_vm7 = vcmask 1043458  }
   0xd   :  { %vm1020_vm4 = vmor %vm1019_vm3, %vm1018_vm2  ;;  %vm1054_vm8 = vcmask 1045508   ;;  %vm1057_vm9 = vcmask 1045504   ;;  %vm1079_vm10 = vcmask 1042433   ;;  %vm1080_vm11 = vcmask 522245   ;;  %s1789_s24 = smov [#allocation4]   ;;  %s1538_s27 = sshll.u32 %s2544_s14, 4  ;;  %s1539_s27 = int_to_ptr.hbm [resolvable:$true] %s1538_s27 }
   0xe   :  { %vm2385_vm12 = vmor %vm1080_vm11, %vm1079_vm10  ;;  %vm1500_vm13 = vcmask 523264   ;;  %s1536_s25 = sshll.u32 %s1789_s24, 4  ;;  %s1537_s25 = int_to_ptr.vmem [resolvable:$true] %s1536_s25 }
  0x11   :  { %328 = vperm.xlu2 %1753, %v63_v14  }
  0x12   :  { %332 = vperm.xlu0 %1751, %v64_v12  }
  0x13   :  { %336 = vperm.xlu1 %1752, %v65_v13  }
  0x19   :  { %1579 = vmatmul.msk.bf16.gmra.mxu0 %vm113_vm0, %v1715_v15  ;;  %340 = vperm.xlu2 %1753, %v66_v18  }
  0x1a   :  { %344 = vperm.xlu0 %1751, %v67_v16  }
  0x1b   :  { %348 = vperm.xlu1 %1752, %v68_v17  }
  0x21   :  { %352 = vperm.xlu2 %1753, %v69_v19  }
  0x29   :  { %1580 = vmatmul.msk.bf16.gmra.mxu0 %vm113_vm0, %v1716_v20 }
  0x39   :  { %1581 = vmatmul.msk.bf16.gmra.mxu0 %vm113_vm0, %v1717_v21 }
  0x63   :  { %v1944_v31 = vpop.permute.xlu2 %324 }
  0x6b   :  { %v1964_v49 = vpop.permute.xlu2 %328 }
  0x73   :  { %v2004_v9 = vpop.permute.xlu2 %340 }
  0x74   :  { %v1927_v22 = vpop.permute.xlu0 %308 }
  0x75   :  { %v1929_v23 = vpop.permute.xlu1 %316  ;;  %v354_v30 = vperm.slane %v1927_v22, 0  ;;  %v355_v32 = vperm.slane %v1927_v22, 1  ;;  %v356_v33 = vperm.slane %v1927_v22, 2 }
  0x76   :  { %v360_v11 = vperm.slane %v1929_v23, 0  ;;  %v361_v13 = vperm.slane %v1929_v23, 1  ;;  %v362_v15 = vperm.slane %v1929_v23, 2 }
  0x7b   :  { %v2016_v21 = vpop.permute.xlu2 %352 }
  0x7c   :  { %v1931_v24 = vpop.permute.xlu0 %312 }
  0x7d   :  { %v1933_v25 = vpop.permute.xlu1 %320  ;;  %v357_v46 = vperm.slane %v1931_v24, 0  ;;  %v358_v47 = vperm.slane %v1931_v24, 1  ;;  %v359_v55 = vperm.slane %v1931_v24, 2 }
  0x84   :  { %v1940_v27 = vpop.permute.xlu0 %332 }
  0x85   :  { %v1948_v35 = vpop.permute.xlu1 %336 }
  0x86   :  { %v138_v28 = vpop.f32.mrf.mxu0 }
  0x87   :  { %v139_v29 = vadd.f32 %v1938_v26, %v138_v28  ;;  %v363_v28 = vperm.slane %v1933_v25, 0 }
  0x89   :  { %v162_v34 = vmax.f32 %v139_v29, 0.0 }
  0x8b   :  { %v180_v36 = vrot.slane %v162_v34, 1  ;;  %v181_v37 = vrot.slane %v162_v34, 2  ;;  %v426_v38 = vmul.f32 %v354_v30, %v162_v34  ;;  %v182_v48 = vrot.slane %v162_v34, 3 }
  0x8c   :  { %v1956_v42 = vpop.permute.xlu0 %344  ;;  %v183_v50 = vrot.slane %v162_v34, 4  ;;  %v184_v56 = vrot.slane %v162_v34, 5  ;;  %v185_v12 = vrot.slane %v162_v34, 6  ;;  %v186_v14 = vrot.slane %v162_v34, 7 }
  0x8d   :  { %v427_v39 = vmul.f32 %v355_v32, %v180_v36  ;;  %v428_v40 = vmul.f32 %v356_v33, %v181_v37  ;;  %v158_v41 = vpop.f32.mrf.mxu3  ;;  %570 = vst [vmem:[#allocation1] ss:$9 sm:$0xff] %v426_v38  ;;  %v382_v44 = vperm.slane %v1956_v42, 1  ;;  %v383_v51 = vperm.slane %v1956_v42, 2  ;;  %v1973_v54 = vpop.permute.xlu1 %348 }
  0x8e   :  { %v159_v43 = vadd.f32 %v1938_v26, %v158_v41  ;;  %v429_v59 = vmul.f32 %v357_v46, %v182_v48  ;;  %v384_v60 = vperm.slane %v1973_v54, 0  ;;  %v385_v61 = vperm.slane %v1973_v54, 1  ;;  %v140_v2 = vpop.f32.mrf.mxu0 }
  0x8f   :  { %572 = vst [vmem:[#allocation1 + $0x1] ss:$9 sm:$0xff] %v427_v39  ;;  %v386_v62 = vperm.slane %v1973_v54, 2  ;;  %v430_v63 = vmul.f32 %v358_v47, %v183_v50  ;;  %v431_v1 = vmul.f32 %v359_v55, %v184_v56  ;;  %v141_v10 = vadd.f32 %v1938_v26, %v140_v2 }
  0x90   :  { %574 = vst [vmem:[#allocation1 + $0x2] ss:$9 sm:$0xff] %v428_v40  ;;  %v1960_v45 = vmax.f32 %v159_v43, 0.0  ;;  %v432_v17 = vmul.f32 %v360_v11, %v185_v12  ;;  %v433_v18 = vmul.f32 %v361_v13, %v186_v14  ;;  %v387_v38 = vperm.slane %v2016_v21, 0 }
  0x91   :  { %v163_v16 = vmax.f32 %v141_v10, 0.0  ;;  %v364_v39 = vperm.slane %v1933_v25, 1  ;;  %v388_v41 = vperm.slane %v2016_v21, 1  ;;  %v389_v43 = vperm.slane %v2016_v21, 2 }
  0x92   :  { %v236_v52 = vrot.slane %v1960_v45, 1  ;;  %v1971_v53 = vmul.f32 %v382_v44, %v1960_v45  ;;  %v237_v3 = vrot.slane %v1960_v45, 2  ;;  %v238_v4 = vrot.slane %v1960_v45, 3 }
  0x93   :  { %v239_v5 = vrot.slane %v1960_v45, 4  ;;  %v434_v20 = vmul.f32 %v362_v15, %v163_v16  ;;  %v240_v29 = vrot.slane %v1960_v45, 5  ;;  %v187_v34 = vrot.slane %v163_v16, 1 }
  0x94   :  { %v1978_v57 = vmul.f32 %v383_v51, %v236_v52  ;;  %v1994_v6 = vmul.f32 %v384_v60, %v237_v3  ;;  %v1998_v7 = vmul.f32 %v385_v61, %v238_v4  ;;  %v241_v36 = vrot.slane %v1960_v45, 6 }
  0x95   :  { %v160_v58 = vpop.f32.mrf.mxu3  ;;  %v2002_v8 = vmul.f32 %v386_v62, %v239_v5  ;;  %v242_v37 = vrot.slane %v1960_v45, 7  ;;  %v188_v40 = vrot.slane %v163_v16, 2  ;;  %v365_v48 = vperm.slane %v1933_v25, 2  ;;  %v1727_v25 = vld [vmem:[%s2536_s6 + $0x38] sm:$0xff] }
  0x96   :  { %v189_v50 = vrot.slane %v163_v16, 3  ;;  %v2029_v52 = vmul.f32 %v387_v38, %v240_v29  ;;  %v2033_v56 = vmul.f32 %v388_v41, %v241_v36  ;;  %v435_v58 = vmul.f32 %v363_v28, %v187_v34  ;;  %v143_v14 = vpop.f32.mrf.mxu0  ;;  %930 = vmatpush.bf16.msra.mxu1 %v1727_v25 }
  0x97   :  { %v575_v0 = vld [vmem:[#allocation1] sm:$0xff]  ;;  %v2037_v45 = vmul.f32 %v389_v43, %v242_v37  ;;  %v191_v2 = vrot.slane %v163_v16, 5  ;;  %v368_v3 = vperm.slane %v1944_v31, 2  ;;  %v192_v4 = vrot.slane %v163_v16, 6 }
  0x98   :  { %576 = vst [vmem:[#allocation1] ss:$9 sm:$0xff] %v429_v59  ;;  %v436_v59 = vmul.f32 %v364_v39, %v188_v40  ;;  %v366_v5 = vperm.slane %v1944_v31, 0  ;;  %v190_v10 = vrot.slane %v163_v16, 4  ;;  %v193_v29 = vrot.slane %v163_v16, 7 }
  0x99   :  { %577 = vst [vmem:[#allocation1 + $0x1] ss:$9 sm:$0xff] %v430_v63  ;;  %v369_v34 = vperm.slane %v1964_v49, 0  ;;  %v370_v37 = vperm.slane %v1964_v49, 1  ;;  %v371_v40 = vperm.slane %v1964_v49, 2  ;;  %v1723_v49 = vld [vmem:[%s2536_s6 + $0x18] sm:$0xff] }
  0x9a   :  { %578 = vst [vmem:[#allocation1 + $0x2] ss:$9 sm:$0xff] %v431_v1  ;;  %v367_v1 = vperm.slane %v1944_v31, 1  ;;  %v1725_v31 = vld [vmem:[%s2536_s6 + $0x28] sm:$0xff] }
  0x9b   :  { %692 = vst [vmem:[#allocation2] sm:$0x7] %v575_v0  ;;  %v437_v0 = vmul.f32 %v365_v48, %v189_v50 }
  0x9c   :  { %v439_v12 = vmul.f32 %v367_v1, %v191_v2 }
  0xa1   :  { %v579_v19 = vld [vmem:[#allocation1] sm:$0xff] }
  0xa2   :  { %580 = vst [vmem:[#allocation1] ss:$9 sm:$0xff] %v432_v17  ;;  %v440_v17 = vmul.f32 %v368_v3, %v192_v4  ;;  %v372_v4 = vperm.slane %v1940_v27, 0 }
  0xa3   :  { %581 = vst [vmem:[#allocation1 + $0x1] ss:$9 sm:$0xff] %v433_v18 }
  0xa4   :  { %693 = vst [vmem:[#allocation2 + $0x4] sm:$0x7] %v579_v19  ;;  %v438_v19 = vmul.f32 %v366_v5, %v190_v10 }
  0xa5   :  { %582 = vst [vmem:[#allocation1 + $0x2] ss:$9 sm:$0xff] %v434_v20  ;;  %v144_v20 = vadd.f32 %v1938_v26, %v143_v14  ;;  %v2545_v14 = vperm.slane %v1940_v27, 2 }
  0xa7   :  { %v164_v36 = vmax.f32 %v144_v20, 0.0 }
  0xa9   :  { %v194_v50 = vrot.slane %v164_v36, 1  ;;  %v196_v2 = vrot.slane %v164_v36, 3  ;;  %v197_v10 = vrot.slane %v164_v36, 4 }
  0xab   :  { %v443_v16 = vmul.f32 %v371_v40, %v194_v50  ;;  %v446_v20 = vmul.f32 %v2545_v14, %v197_v10  ;;  %v198_v50 = vrot.slane %v164_v36, 5 }
  0xac   :  { %v583_v63 = vld [vmem:[#allocation1] sm:$0xff] }
  0xad   :  { %584 = vst [vmem:[#allocation1] ss:$9 sm:$0xff] %v435_v58  ;;  %v441_v58 = vmul.f32 %v369_v34, %v193_v29  ;;  %v2547_v29 = vperm.slane %v1948_v35, 0 }
  0xae   :  { %585 = vst [vmem:[#allocation1 + $0x1] ss:$9 sm:$0xff] %v436_v59 }
  0xaf   :  { %586 = vst [vmem:[#allocation1 + $0x2] ss:$9 sm:$0xff] %v437_v0  ;;  %v195_v0 = vrot.slane %v164_v36, 2 }
  0xb0   :  { %694 = vst [vmem:[#allocation2 + $0x8] sm:$0x7] %v583_v63  ;;  %v442_v63 = vmul.f32 %v370_v37, %v164_v36 }
  0xb6   :  { %v587_v18 = vld [vmem:[#allocation1] sm:$0xff] }
  0xb7   :  { %589 = vst [vmem:[#allocation1 + $0x1] ss:$9 sm:$0xff] %v439_v12  ;;  %v2546_v12 = vperm.slane %v1940_v27, 1 }
  0xb8   :  { %590 = vst [vmem:[#allocation1 + $0x2] ss:$9 sm:$0xff] %v440_v17  ;;  %v444_v17 = vmul.f32 %v372_v4, %v195_v0  ;;  %v145_v0 = vpop.f32.mrf.mxu0 }
  0xb9   :  { %588 = vst [vmem:[#allocation1] ss:$9 sm:$0xff] %v438_v19 }
  0xba   :  { %695 = vst [vmem:[#allocation2 + $0xc] sm:$0x7] %v587_v18  ;;  %v445_v18 = vmul.f32 %v2546_v12, %v196_v2  ;;  %v447_v2 = vmul.f32 %v2547_v29, %v198_v50  ;;  %v2549_v12 = vperm.slane %v2004_v9, 1  ;;  %v2550_v29 = vperm.slane %v2004_v9, 2 }
  0xc0   :  { %v591_v59 = vld [vmem:[#allocation1] sm:$0xff] }
  0xc1   :  { %592 = vst [vmem:[#allocation1] ss:$9 sm:$0xff] %v441_v58  ;;  %v2548_v58 = vperm.slane %v1948_v35, 1 }
  0xc2   :  { %696 = vst [vmem:[#allocation2 + $0x10] sm:$0x7] %v591_v59  ;;  %v199_v59 = vrot.slane %v164_v36, 6 }
  0xc3   :  { %593 = vst [vmem:[#allocation1 + $0x1] ss:$9 sm:$0xff] %v442_v63  ;;  %v377_v63 = vperm.slane %v1948_v35, 2 }
  0xc4   :  { %594 = vst [vmem:[#allocation1 + $0x2] ss:$9 sm:$0xff] %v443_v16  ;;  %v200_v16 = vrot.slane %v164_v36, 7  ;;  %v448_v10 = vmul.f32 %v2548_v58, %v199_v59  ;;  %v378_v36 = vperm.slane %v2004_v9, 0 }
  0xcb   :  { %v595_v19 = vld [vmem:[#allocation1] sm:$0xff] }
  0xcc   :  { %596 = vst [vmem:[#allocation1] ss:$9 sm:$0xff] %v444_v17 }
  0xcd   :  { %597 = vst [vmem:[#allocation1 + $0x1] ss:$9 sm:$0xff] %v445_v18  ;;  %v449_v18 = vmul.f32 %v377_v63, %v200_v16 }
  0xce   :  { %598 = vst [vmem:[#allocation1 + $0x2] ss:$9 sm:$0xff] %v446_v20 }
  0xcf   :  { %697 = vst [vmem:[#allocation2 + $0x14] sm:$0x7] %v595_v19  ;;  %v146_v19 = vadd.f32 %v1938_v26, %v145_v0 }
  0xd1   :  { %v165_v20 = vmax.f32 %v146_v19, 0.0 }
  0xd3   :  { %v201_v14 = vrot.slane %v165_v20, 1  ;;  %v202_v50 = vrot.slane %v165_v20, 2  ;;  %v450_v58 = vmul.f32 %v378_v36, %v165_v20 }
  0xd5   :  { %v599_v17 = vld [vmem:[#allocation1] sm:$0xff]  ;;  %v451_v16 = vmul.f32 %v2549_v12, %v201_v14  ;;  %v452_v0 = vmul.f32 %v2550_v29, %v202_v50  ;;  %v148_v12 = vpop.f32.mrf.mxu0  ;;  %v206_v50 = vrot.slane %v165_v20, 6 }
  0xd6   :  { %600 = vst [vmem:[#allocation1] ss:$9 sm:$0xff] %v447_v2  ;;  %v203_v2 = vrot.slane %v165_v20, 3 }
  0xd7   :  { %601 = vst [vmem:[#allocation1 + $0x1] ss:$9 sm:$0xff] %v448_v10  ;;  %v204_v10 = vrot.slane %v165_v20, 4  ;;  %v456_v29 = vmul.f32 %v384_v60, %v206_v50 }
  0xd8   :  { %602 = vst [vmem:[#allocation1 + $0x2] ss:$9 sm:$0xff] %v449_v18  ;;  %v205_v18 = vrot.slane %v165_v20, 5 }
  0xd9   :  { %698 = vst [vmem:[#allocation2 + $0x18] sm:$0x7] %v599_v17  ;;  %v2551_v17 = vperm.slane %v1956_v42, 0 }
  0xda   :  { %v455_v14 = vmul.f32 %v383_v51, %v205_v18 }
  0xdb   :  { %v453_v19 = vmul.f32 %v2551_v17, %v203_v2 }
  0xdf   :  { %v603_v59 = vld [vmem:[#allocation1] sm:$0xff] }
  0xe0   :  { %699 = vst [vmem:[#allocation2 + $0x1c] sm:$0x7] %v603_v59  ;;  %v454_v59 = vmul.f32 %v382_v44, %v204_v10 }
  0xe1   :  { %604 = vst [vmem:[#allocation1] ss:$9 sm:$0xff] %v450_v58  ;;  %v149_v58 = vadd.f32 %v1938_v26, %v148_v12 }
  0xe2   :  { %605 = vst [vmem:[#allocation1 + $0x1] ss:$9 sm:$0xff] %v451_v16  ;;  %v207_v16 = vrot.slane %v165_v20, 7 }
  0xe3   :  { %606 = vst [vmem:[#allocation1 + $0x2] ss:$9 sm:$0xff] %v452_v0  ;;  %v166_v0 = vmax.f32 %v149_v58, 0.0 }
  0xe4   :  { %608 = vst [vmem:[#allocation1] ss:$9 sm:$0xff] %v453_v19  ;;  %v457_v2 = vmul.f32 %v385_v61, %v207_v16 }
  0xe5   :  { %609 = vst [vmem:[#allocation1 + $0x1] ss:$9 sm:$0xff] %v454_v59  ;;  %v458_v44 = vmul.f32 %v386_v62, %v166_v0  ;;  %v208_v51 = vrot.slane %v166_v0, 1  ;;  %v209_v10 = vrot.slane %v166_v0, 2  ;;  %v210_v12 = vrot.slane %v166_v0, 3 }
  0xe6   :  { %610 = vst [vmem:[#allocation1 + $0x2] ss:$9 sm:$0xff] %v455_v14  ;;  %v211_v54 = vrot.slane %v166_v0, 4  ;;  %v212_v62 = vrot.slane %v166_v0, 5 }
  0xe7   :  { %v459_v20 = vmul.f32 %v387_v38, %v208_v51  ;;  %v460_v60 = vmul.f32 %v388_v41, %v209_v10  ;;  %v461_v61 = vmul.f32 %v389_v43, %v210_v12  ;;  %v214_v43 = vrot.slane %v166_v0, 7 }
  0xe8   :  { %v462_v19 = vmul.f32 %v354_v30, %v211_v54  ;;  %v463_v38 = vmul.f32 %v355_v32, %v212_v62 }
  0xe9   :  { %v465_v58 = vmul.f32 %v357_v46, %v214_v43 }
  0xed   :  { %v611_v17 = vld [vmem:[#allocation1] sm:$0xff] }
  0xee   :  { %612 = vst [vmem:[#allocation1] ss:$9 sm:$0xff] %v456_v29  ;;  %v213_v29 = vrot.slane %v166_v0, 6 }
  0xef   :  { %613 = vst [vmem:[#allocation1 + $0x1] ss:$9 sm:$0xff] %v457_v2 }
  0xf0   :  { %701 = vst [vmem:[#allocation2 + $0x24] sm:$0x7] %v611_v17  ;;  %v150_v17 = vpop.f32.mrf.mxu0  ;;  %v464_v41 = vmul.f32 %v356_v33, %v213_v29 }
  0xf1   :  { %614 = vst [vmem:[#allocation1 + $0x2] ss:$9 sm:$0xff] %v458_v44  ;;  %v151_v59 = vadd.f32 %v1938_v26, %v150_v17 }
  0xf3   :  { %v167_v21 = vmax.f32 %v151_v59, 0.0 }
  0xf5   :  { %v215_v14 = vrot.slane %v167_v21, 1  ;;  %v466_v30 = vmul.f32 %v358_v47, %v167_v21  ;;  %v216_v22 = vrot.slane %v167_v21, 2  ;;  %v217_v33 = vrot.slane %v167_v21, 3 }
  0xf6   :  { %v218_v16 = vrot.slane %v167_v21, 4  ;;  %v219_v24 = vrot.slane %v167_v21, 5  ;;  %v220_v47 = vrot.slane %v167_v21, 6  ;;  %v221_v51 = vrot.slane %v167_v21, 7 }
  0xf7   :  { %v467_v32 = vmul.f32 %v359_v55, %v215_v14  ;;  %v468_v0 = vmul.f32 %v360_v11, %v216_v22  ;;  %v469_v46 = vmul.f32 %v361_v13, %v217_v33  ;;  %v2552_v21 = vperm.slane %v1940_v27, 1  ;;  %v1720_v33 = vld [vmem:[%s2536_s6] sm:$0xff] }
  0xf8   :  { %v615_v18 = vld [vmem:[#allocation1] sm:$0xff]  ;;  %v470_v44 = vmul.f32 %v362_v15, %v218_v16  ;;  %v153_v55 = vpop.f32.mrf.mxu0  ;;  %v471_v10 = vmul.f32 %v363_v28, %v219_v24  ;;  %v472_v13 = vmul.f32 %v364_v39, %v220_v47  ;;  %v473_v23 = vmul.f32 %v365_v48, %v221_v51 }
  0xf9   :  { %702 = vst [vmem:[#allocation2 + $0x28] sm:$0x7] %v615_v18  ;;  %v154_v11 = vadd.f32 %v1938_v26, %v153_v55  ;;  %v2199_v51 = vld [vmem:[%s2534_s4] sm:$0xff] }
  0xfa   :  { %616 = vst [vmem:[#allocation1] ss:$9 sm:$0xff] %v459_v20 }
  0xfb   :  { %617 = vst [vmem:[#allocation1 + $0x1] ss:$9 sm:$0xff] %v460_v60  ;;  %v168_v15 = vmax.f32 %v154_v11, 0.0 }
  0xfc   :  { %618 = vst [vmem:[#allocation1 + $0x2] ss:$9 sm:$0xff] %v461_v61 }
  0xfd   :  { %620 = vst [vmem:[#allocation1] ss:$9 sm:$0xff] %v462_v19  ;;  %v222_v18 = vrot.slane %v168_v15, 1  ;;  %v223_v20 = vrot.slane %v168_v15, 2  ;;  %v474_v28 = vmul.f32 %v366_v5, %v168_v15  ;;  %v224_v48 = vrot.slane %v168_v15, 3  ;;  %v1726_v5 = vld [vmem:[%s2536_s6 + $0x30] sm:$0xff] }
  0xfe   :  { %621 = vst [vmem:[#allocation1 + $0x1] ss:$9 sm:$0xff] %v463_v38  ;;  %v225_v54 = vrot.slane %v168_v15, 4  ;;  %v226_v62 = vrot.slane %v168_v15, 5  ;;  %931 = vmatpush.bf16.msra.mxu1 %v1726_v5  ;;  %v227_v59 = vrot.slane %v168_v15, 6 }
  0xff   :  { %622 = vst [vmem:[#allocation1 + $0x2] ss:$9 sm:$0xff] %v464_v41  ;;  %v475_v61 = vmul.f32 %v367_v1, %v222_v18  ;;  %v476_v39 = vmul.f32 %v368_v3, %v223_v20  ;;  %v477_v1 = vmul.f32 %v369_v34, %v224_v48  ;;  %v1724_v34 = vld [vmem:[%s2536_s6 + $0x20] sm:$0xff]  ;;  %v228_v41 = vrot.slane %v168_v15, 7  ;;  %v759_v5 = vld [vmem:[#allocation2 + $0x1] sm:$0x3] }
 0x100   :  { %v478_v3 = vmul.f32 %v370_v37, %v225_v54  ;;  %v479_v17 = vmul.f32 %v371_v40, %v226_v62  ;;  %v155_v19 = vpop.f32.mrf.mxu0  ;;  %v480_v40 = vmul.f32 %v372_v4, %v227_v59  ;;  %v1721_v4 = vld [vmem:[%s2536_s6 + $0x8] sm:$0xff]  ;;  %v2557_v15 = vperm.slane %v2004_v9, 2 }
 0x101   :  { %v156_v38 = vadd.f32 %v1938_v26, %v155_v19  ;;  %v481_v43 = vmul.f32 %v2552_v21, %v228_v41  ;;  %v1722_v26 = vld [vmem:[%s2536_s6 + $0x10] sm:$0xff]  ;;  %v2211_v20 = vperm.slane %v2199_v51, 0  ;;  %v2222_v54 = vperm.slane %v2199_v51, 3  ;;  %v760_v62 = vld [vmem:[#allocation2 + $0x5] sm:$0x3] }
 0x102   :  { %932 = vmatpush.bf16.msra.mxu1 %v1725_v31  ;;  %v774_v31 = vld [vmem:[#allocation2 + $0x1c] sm:$0x3]  ;;  %v2558_v59 = vperm.slane %v1956_v42, 0 }
 0x103   :  { %v2166_v37 = vmax.f32 %v156_v38, 0.0  ;;  %v788_v38 = vld [vmem:[#allocation2 + $0x28] sm:$0x3] }
 0x105   :  { %v231_v22 = vrot.slane %v2166_v37, 3  ;;  %v232_v24 = vrot.slane %v2166_v37, 4  ;;  %v233_v47 = vrot.slane %v2166_v37, 5  ;;  %v234_v55 = vrot.slane %v2166_v37, 6 }
 0x106   :  { %v623_v50 = vld [vmem:[#allocation1] sm:$0xff]  ;;  %933 = vmatpush.bf16.msra.mxu1 %v1724_v34  ;;  %v235_v25 = vrot.slane %v2166_v37, 7  ;;  %v787_v34 = vld [vmem:[#allocation2 + $0x24] sm:$0x3] }
 0x107   :  { %624 = vst [vmem:[#allocation1] ss:$9 sm:$0xff] %v465_v58  ;;  %v2553_v58 = vperm.slane %v1940_v27, 2  ;;  %v2554_v27 = vperm.slane %v1948_v35, 0  ;;  %v488_v18 = vmul.f32 %v2557_v15, %v234_v55 }
 0x108   :  { %704 = vst [vmem:[#allocation2 + $0x30] sm:$0x7] %v623_v50  ;;  %v489_v41 = vmul.f32 %v2558_v59, %v235_v25 }
 0x109   :  { %625 = vst [vmem:[#allocation1 + $0x1] ss:$9 sm:$0xff] %v466_v30  ;;  %v482_v50 = vmul.f32 %v2553_v58, %v2166_v37  ;;  %v229_v30 = vrot.slane %v2166_v37, 1 }
 0x10a   :  { %626 = vst [vmem:[#allocation1 + $0x2] ss:$9 sm:$0xff] %v467_v32  ;;  %934 = vmatpush.bf16.msra.mxu1 %v1723_v49  ;;  %v230_v32 = vrot.slane %v2166_v37, 2 }
 0x10b   :  { %v483_v16 = vmul.f32 %v2554_v27, %v229_v30  ;;  %v801_v30 = vld [vmem:[#allocation2 + $0x1d] sm:$0x3] }
 0x10e   :  { %935 = vmatpush.bf16.msra.mxu1 %v1722_v26 }
 0x10f   :  { %v761_v15 = vld [vmem:[#allocation2 + $0x31] sm:$0x3] }
 0x111   :  { %v627_v2 = vld [vmem:[#allocation1] sm:$0xff] }
 0x112   :  { %628 = vst [vmem:[#allocation1] ss:$9 sm:$0xff] %v468_v0  ;;  %936 = vmatpush.bf16.msra.mxu1 %v1721_v4  ;;  %v2555_v0 = vperm.slane %v1948_v35, 1  ;;  %v486_v35 = vmul.f32 %v378_v36, %v232_v24  ;;  %v800_v4 = vld [vmem:[#allocation2 + $0x19] sm:$0x3] }
 0x113   :  { %629 = vst [vmem:[#allocation1 + $0x1] ss:$9 sm:$0xff] %v469_v46  ;;  %v738_v24 = vld [vmem:[#allocation2 + $0x30] sm:$0x3] }
 0x114   :  { %630 = vst [vmem:[#allocation1 + $0x2] ss:$9 sm:$0xff] %v470_v44  ;;  %v484_v46 = vmul.f32 %v2555_v0, %v230_v32  ;;  %v485_v44 = vmul.f32 %v377_v63, %v231_v22  ;;  %v2204_v63 = vperm.slane %v2199_v51, 1  ;;  %v814_v0 = vld [vmem:[#allocation2 + $0x4] sm:$0x3] }
 0x115   :  { %705 = vst [vmem:[#allocation2 + $0x34] sm:$0x7] %v627_v2 }
 0x116   :  { %937 = vmatpush.bf16.msra.mxu1 %v1720_v33 }
 0x11b   :  { %v631_v12 = vld [vmem:[#allocation1] sm:$0xff] }
 0x11c   :  { %632 = vst [vmem:[#allocation1] ss:$9 sm:$0xff] %v471_v10  ;;  %v2556_v10 = vperm.slane %v2004_v9, 1 }
 0x11d   :  { %633 = vst [vmem:[#allocation1 + $0x1] ss:$9 sm:$0xff] %v472_v13 }
 0x11e   :  { %634 = vst [vmem:[#allocation1 + $0x2] ss:$9 sm:$0xff] %v473_v23  ;;  %v487_v11 = vmul.f32 %v2556_v10, %v233_v47  ;;  %v747_v23 = vld [vmem:[#allocation2 + $0x10] sm:$0x3] }
 0x11f   :  { %706 = vst [vmem:[#allocation2 + $0x38] sm:$0x7] %v631_v12  ;;  %v746_v12 = vld [vmem:[#allocation2 + $0xc] sm:$0x3] }
 0x120   :  { %v751_v36 = vmul.f32 %v2204_v63, %v746_v12 }
 0x125   :  { %v635_v60 = vld [vmem:[#allocation1] sm:$0xff] }
 0x126   :  { %707 = vst [vmem:[#allocation2 + $0x3c] sm:$0x7] %v635_v60  ;;  %v736_v60 = vld [vmem:[#allocation2] sm:$0x3] }
 0x127   :  { %636 = vst [vmem:[#allocation1] ss:$9 sm:$0xff] %v474_v28  ;;  %v737_v28 = vld [vmem:[#allocation2 + $0x4] sm:$0x3]  ;;  %v741_v9 = vmul.f32 %v2211_v20, %v736_v60 }
 0x128   :  { %637 = vst [vmem:[#allocation1 + $0x1] ss:$9 sm:$0xff] %v475_v61  ;;  %v752_v61 = vmul.f32 %v2204_v63, %v747_v23  ;;  %v742_v48 = vmul.f32 %v2211_v20, %v737_v28 }
 0x129   :  { %638 = vst [vmem:[#allocation1 + $0x2] ss:$9 sm:$0xff] %v476_v39  ;;  %v2216_v39 = vperm.slane %v2199_v51, 2 }
 0x12b   :  { %v764_v19 = vmul.f32 %v2216_v39, %v759_v5  ;;  %v765_v49 = vmul.f32 %v2216_v39, %v760_v62 }
 0x130   :  { %v639_v29 = vld [vmem:[#allocation1] sm:$0xff] }
 0x131   :  { %640 = vst [vmem:[#allocation1] ss:$9 sm:$0xff] %v477_v1  ;;  %v773_v1 = vld [vmem:[#allocation2 + $0x18] sm:$0x3] }
 0x132   :  { %641 = vst [vmem:[#allocation1 + $0x1] ss:$9 sm:$0xff] %v478_v3  ;;  %v755_v3 = vadd.f32 %v751_v36, %v741_v9  ;;  %v778_v37 = vmul.f32 %v2222_v54, %v773_v1  ;;  %v841_v36 = vld [vmem:[#allocation2 + $0x5] sm:$0x3]  ;;  %v766_v9 = vmul.f32 %v2216_v39, %v761_v15 }
 0x133   :  { %642 = vst [vmem:[#allocation1 + $0x2] ss:$9 sm:$0xff] %v479_v17  ;;  %v2225_v17 = vperm.slane %v2199_v51, 4 }
 0x134   :  { %708 = vst [vmem:[#allocation2 + $0x40] sm:$0x7] %v639_v29  ;;  %v756_v29 = vadd.f32 %v752_v61, %v742_v48  ;;  %v768_v21 = vadd.f32 %v764_v19, %v755_v3  ;;  %v842_v61 = vld [vmem:[#allocation2 + $0x9] sm:$0x3]  ;;  %v739_v3 = vld [vmem:[#allocation2 + $0x34] sm:$0x3] }
 0x135   :  { %v793_v26 = vmul.f32 %v2225_v17, %v788_v38  ;;  %v2269_v19 = vld [vmem:[%s2535_s5] ss:$0 sm:$0xff] }
 0x136   :  { %v782_v58 = vadd.f32 %v778_v37, %v768_v21  ;;  %v816_v21 = vld [vmem:[#allocation2 + $0x34] sm:$0x3] }
 0x13a   :  { %v643_v14 = vld [vmem:[#allocation1] sm:$0xff] }
 0x13b   :  { %644 = vst [vmem:[#allocation1] ss:$9 sm:$0xff] %v480_v40  ;;  %v779_v40 = vmul.f32 %v2222_v54, %v774_v31  ;;  %v749_v5 = vld [vmem:[#allocation2 + $0x40] sm:$0x3] }
 0x13c   :  { %645 = vst [vmem:[#allocation1 + $0x1] ss:$9 sm:$0xff] %v481_v43  ;;  %v769_v43 = vadd.f32 %v765_v49, %v756_v29  ;;  %v754_v49 = vmul.f32 %v2204_v63, %v749_v5 }
 0x13d   :  { %709 = vst [vmem:[#allocation2 + $0x44] sm:$0x7] %v643_v14  ;;  %v792_v14 = vmul.f32 %v2225_v17, %v787_v34 }
 0x13e   :  { %646 = vst [vmem:[#allocation1 + $0x2] ss:$9 sm:$0xff] %v482_v50  ;;  %v783_v42 = vadd.f32 %v779_v40, %v769_v43  ;;  %v2238_v50 = vperm.slane %v2199_v51, 5  ;;  %v744_v43 = vmul.f32 %v2211_v20, %v739_v3 }
 0x13f   :  { %v796_v32 = vadd.f32 %v792_v14, %v782_v58  ;;  %v762_v14 = vld [vmem:[#allocation2 + $0x35] sm:$0x3] }
 0x140   :  { %v797_v22 = vadd.f32 %v793_v26, %v783_v42  ;;  %v805_v33 = vmul.f32 %v2238_v50, %v800_v4  ;;  %v806_v27 = vmul.f32 %v2238_v50, %v801_v30  ;;  %v830_v42 = vld [vmem:[#allocation2 + $0x40] sm:$0x3]  ;;  %v843_v4 = vld [vmem:[#allocation2 + $0x35] sm:$0x3]  ;;  %v758_v30 = vadd.f32 %v754_v49, %v744_v43 }
 0x145   :  { %v647_v2 = vld [vmem:[#allocation1] sm:$0xff] }
 0x146   :  { %648 = vst [vmem:[#allocation1] ss:$9 sm:$0xff] %v483_v16  ;;  %v2243_v16 = vperm.slane %v2199_v51, 6 }
 0x147   :  { %649 = vst [vmem:[#allocation1 + $0x1] ss:$9 sm:$0xff] %v484_v46  ;;  %v748_v46 = vld [vmem:[#allocation2 + $0x3c] sm:$0x3] }
 0x148   :  { %650 = vst [vmem:[#allocation1 + $0x2] ss:$9 sm:$0xff] %v485_v44  ;;  %v819_v47 = vmul.f32 %v2243_v16, %v814_v0  ;;  %v753_v10 = vmul.f32 %v2204_v63, %v748_v46  ;;  %v1730_v46 = vld [vmem:[%s2538_s8 + $0x14] sm:$0xf] }
 0x149   :  { %710 = vst [vmem:[#allocation2 + $0x48] sm:$0x7] %v647_v2  ;;  %v810_v2 = vadd.f32 %v806_v27, %v797_v22  ;;  %v821_v22 = vmul.f32 %v2243_v16, %v816_v21  ;;  %v767_v27 = vmul.f32 %v2216_v39, %v762_v14  ;;  %v1625_v39 = vld [vmem:[%s2538_s8 + $0x10] sm:$0xf] }
 0x14f   :  { %v651_v13 = vld [vmem:[#allocation1] sm:$0xff] }
 0x150   :  { %652 = vst [vmem:[#allocation1] ss:$9 sm:$0xff] %v486_v35  ;;  %v2249_v35 = vperm.slane %v2199_v51, 7  ;;  %v802_v38 = vld [vmem:[#allocation2 + $0x49] sm:$0x3] }
 0x151   :  { %653 = vst [vmem:[#allocation1 + $0x1] ss:$9 sm:$0xff] %v487_v11  ;;  %v828_v11 = vld [vmem:[#allocation2 + $0x10] sm:$0x3] }
 0x152   :  { %654 = vst [vmem:[#allocation1 + $0x2] ss:$9 sm:$0xff] %v488_v18  ;;  %v775_v18 = vld [vmem:[#allocation2 + $0x48] sm:$0x3]  ;;  %v833_v60 = vmul.f32 %v2249_v35, %v828_v11 }
 0x153   :  { %711 = vst [vmem:[#allocation2 + $0x4c] sm:$0x7] %v651_v13  ;;  %v829_v13 = vld [vmem:[#allocation2 + $0x14] sm:$0x3]  ;;  %v780_v48 = vmul.f32 %v2222_v54, %v775_v18 }
 0x154   :  { %656 = vst [vmem:[#allocation1] ss:$9 sm:$0xff] %v489_v41  ;;  %v834_v51 = vmul.f32 %v2249_v35, %v829_v13 }
 0x155   :  { %657 = vst [vmem:[#allocation1 + $0x1] ss:$9 sm:$0xff] %v1971_v53  ;;  %v815_v53 = vld [vmem:[#allocation2 + $0x8] sm:$0x3] }
 0x156   :  { %658 = vst [vmem:[#allocation1 + $0x2] ss:$9 sm:$0xff] %v1978_v57  ;;  %v809_v57 = vadd.f32 %v805_v33, %v796_v32  ;;  %v820_v55 = vmul.f32 %v2243_v16, %v815_v53  ;;  %v1633_v33 = vld [vmem:[%s2538_s8 + $0x20] sm:$0xf]  ;;  %v1733_v53 = vld [vmem:[%s2538_s8 + $0x24] sm:$0xf0] }
 0x158   :  { %v823_v12 = vadd.f32 %v819_v47, %v809_v57  ;;  %v824_v23 = vadd.f32 %v820_v55, %v810_v2  ;;  %v1627_v57 = vld [vmem:[%s2538_s8 + $0x18] sm:$0xf0]  ;;  %v1634_v47 = vor.u32 %v1733_v53, %v1633_v33  ;;  %v1731_v55 = vld [vmem:[%s2538_s8 + $0x14] sm:$0xf0] }
 0x159   :  { %v1630_v13 = vor.u32 %v1730_v46, %v1627_v57 }
 0x15a   :  { %v838_v25 = vadd.f32 %v834_v51, %v824_v23  ;;  %v776_v58 = vld [vmem:[#allocation2 + $0x4c] sm:$0x3]  ;;  %995 = vmatpush.bf16.msra.mxu2 %v1634_v47 }
 0x15b   :  { %v781_v2 = vmul.f32 %v2222_v54, %v776_v58  ;;  %v803_v18 = vld [vmem:[#allocation2 + $0x4d] sm:$0x3]  ;;  %v1788_v58 = vmov 0.0  }
 0x15c   :  { %1021 = vst.msk [vmem:[#allocation3] sm:$0xff] %vm1020_vm4, %v1788_v58 }
 0x15d   :  { %v659_v44 = vld [vmem:[#allocation1] sm:$0xff]  ;;  %1022 = vst.msk [vmem:[#allocation3 + $0x20] sm:$0xff] %vm1020_vm4, %v1788_v58 }
 0x15e   :  { %660 = vst [vmem:[#allocation1] ss:$9 sm:$0xff] %v1994_v6  ;;  %v743_v6 = vmul.f32 %v2211_v20, %v738_v24  ;;  %v1635_v20 = vld [vmem:[%s2538_s8 + $0x28] sm:$0xf0]  ;;  %v835_v24 = vmul.f32 %v2249_v35, %v830_v42 }
 0x15f   :  { %661 = vst [vmem:[#allocation1 + $0x1] ss:$9 sm:$0xff] %v1998_v7  ;;  %v2260_v7 = vld [vmem:[%s2534_s4 + $0x8] ss:$0 sm:$0xff] }
 0x160   :  { %662 = vst [vmem:[#allocation1 + $0x2] ss:$9 sm:$0xff] %v2002_v8  ;;  %v757_v28 = vadd.f32 %v753_v10, %v743_v6  ;;  %v837_v8 = vadd.f32 %v833_v60, %v823_v12  ;;  %v846_v62 = vmul.f32 %v2260_v7, %v841_v36  ;;  %v847_v1 = vmul.f32 %v2260_v7, %v842_v61  ;;  %v817_v36 = vld [vmem:[#allocation2 + $0x38] sm:$0x3]  ;;  %v2337_v42 = vld [vmem:[%s2540_s10 + $0x8] sm:$0xff] }
 0x161   :  { %713 = vst [vmem:[#allocation2 + $0x54] sm:$0x7] %v659_v44  ;;  %v771_v12 = vadd.f32 %v767_v27, %v758_v30  ;;  %v848_v54 = vmul.f32 %v2260_v7, %v843_v4  ;;  %v1626_v6 = vor.u32 %v1731_v55, %v1625_v39  ;;  %v822_v5 = vmul.f32 %v2243_v16, %v817_v36  ;;  %v1728_v16 = vld [vmem:[%s2538_s8 + $0x4] sm:$0xf]  ;;  %v949_v4 = vld [vmem:[%s2539_s9] sm:$0x3] }
 0x162   :  { %v770_v29 = vadd.f32 %v766_v9, %v757_v28  ;;  %v850_v59 = vadd.f32 %v846_v62, %v837_v8  ;;  %v851_v41 = vadd.f32 %v847_v1, %v838_v25  ;;  %v808_v8 = vmul.f32 %v2238_v50, %v803_v18  ;;  %v831_v9 = vld [vmem:[#allocation2 + $0x44] sm:$0x3]  ;;  %v844_v1 = vld [vmem:[#allocation2 + $0x39] sm:$0x3]  ;;  %1024 = vst.msk [vmem:[#allocation3 + $0x18] sm:$0xff] %vm1020_vm4, %v1788_v58 }
 0x163   :  { %v785_v60 = vadd.f32 %v781_v2, %v771_v12  ;;  %996 = vmatpush.bf16.msra.mxu2 %v1626_v6  ;;  %1025 = vst.msk [vmem:[#allocation3 + $0x38] sm:$0xff] %vm1020_vm4, %v1788_v58  ;;  %v1172_v30 = vperm.slane %v2337_v42, 2  ;;  %v1121_v47 = vperm.slane %v2337_v42, 0 }
 0x164   :  { %v784_v37 = vadd.f32 %v780_v48, %v770_v29  ;;  %v858_v63 = vadd.f32 %v2269_v19, %v851_v41  ;;  %v849_v29 = vmul.f32 %v2260_v7, %v844_v1  ;;  %v1617_v7 = vld [vmem:[%s2538_s8] sm:$0xf]  ;;  %v1133_v12 = vld [vmem:[#allocation3 + $0x20] sm:$0x66] }
 0x165   :  { %v1175_v27 = vrot.slane %v1172_v30, 4  ;;  %v1740_v30 = vld [vmem:[%s2542_s12 + $0x30] sm:$0xff] }
 0x166   :  { %v862_v11 = vmax.f32 %v858_v63, 0.0  ;;  %v2346_v63 = vld [vmem:[%s2540_s10] sm:$0xff] }
 0x167   :  { %v663_v31 = vld [vmem:[#allocation1] sm:$0xff]  ;;  %v1171_v33 = vperm.slane %v2346_v63, 2 }
 0x168   :  { %664 = vst [vmem:[#allocation1] ss:$9 sm:$0xff] %v2029_v52  ;;  %v789_v34 = vld [vmem:[#allocation2 + $0x54] sm:$0x3]  ;;  %v807_v52 = vmul.f32 %v2238_v50, %v802_v38 }
 0x169   :  { %665 = vst [vmem:[#allocation1 + $0x1] ss:$9 sm:$0xff] %v2033_v56  ;;  %v794_v40 = vmul.f32 %v2225_v17, %v789_v34  ;;  %v857_v56 = vadd.f32 %v2269_v19, %v850_v59 }
 0x16a   :  { %666 = vst [vmem:[#allocation1 + $0x2] ss:$9 sm:$0xff] %v2037_v45  ;;  %v1732_v45 = vld [vmem:[%s2538_s8 + $0x24] sm:$0xf] }
 0x16b   :  { %714 = vst [vmem:[#allocation2 + $0x58] sm:$0x7] %v663_v31  ;;  %v798_v26 = vadd.f32 %v794_v40, %v784_v37  ;;  %v1638_v0 = vor.u32 %v1732_v45, %v1635_v20  ;;  %v861_v10 = vmax.f32 %v857_v56, 0.0  ;;  %v1757_v40 = vld [vmem:[%s2537_s7] ss:$0 sm:$0xff]  ;;  %v1136_v56 = vperm.slane %v2337_v42, 1 }
 0x16c   :  { %871 = vst [vmem:[#allocation1 + $0x1] ss:$4 sm:$0xff] %v862_v11  ;;  %v1135_v45 = vperm.slane %v2346_v63, 1 }
 0x16d   :  { %v811_v32 = vadd.f32 %v807_v52, %v798_v26  ;;  %1008 = vmatpush.bf16.msrb.mxu3 %v1638_v0  ;;  %869 = vst [vmem:[#allocation1] ss:$4 sm:$0xff] %v861_v10  ;;  %v1027_v52 = vlaneseq  ;;  %v1139_v20 = vrot.slane %v1136_v56, 4  ;;  %v1120_v10 = vperm.slane %v2346_v63, 0 }
 0x16e   :  { %v1300_v56 = vperm.slane %v2337_v42, 6 }
 0x16f   :  { %v825_v44 = vadd.f32 %v821_v22, %v811_v32  ;;  %vm1029_vm5 = vcmp.lt.s32.totalorder %v1027_v52, 192  ;;  %v952_v32 = vperm.slane %v949_v4, 0  ;;  %v953_v22 = vperm.slane %v949_v4, 1  ;;  %v2392_v52 = vld [vmem:[%s2541_s11] sm:$0x3] }
 0x170   :  { %1031 = vst.msk [vmem:[#allocation3 + $0x8] ss:$4 sm:$0x3] %vm1029_vm5, %v1788_v58  ;;  %v1140_v2 = vsel %vm1018_vm2, %v1135_v45, %v1139_v20  ;;  %v1262_v4 = vperm.slane %v2346_v63, 5  ;;  %v1299_v45 = vperm.slane %v2346_v63, 6 }
 0x171   :  { %v839_v23 = vadd.f32 %v835_v24, %v825_v44  ;;  %1009 = vmatpush.bf16.msrb.mxu3 %v1630_v13  ;;  %1033 = vst.msk [vmem:[#allocation3 + $0x10] ss:$4 sm:$0x3] %vm1029_vm5, %v1788_v58  ;;  %v1176_v24 = vsel %vm1018_vm2, %v1171_v33, %v1175_v27  ;;  %v2355_v11 = vrot.slane %v1140_v2, 7  ;;  %v1131_v13 = vld [vmem:[#allocation3] sm:$0x66] }
 0x172   :  { %v790_v15 = vld [vmem:[#allocation2 + $0x58] sm:$0x3]  ;;  %1035 = vst.msk [vmem:[#allocation3 + $0x28] ss:$4 sm:$0x3] %vm1029_vm5, %v1788_v58 }
 0x173   :  { %v795_v51 = vmul.f32 %v2225_v17, %v790_v15  ;;  %v852_v28 = vadd.f32 %v848_v54, %v839_v23  ;;  %v836_v17 = vmul.f32 %v2249_v35, %v831_v9  ;;  %v1619_v35 = vld [vmem:[%s2538_s8 + $0x8] sm:$0xf0]  ;;  %1037 = vst.msk [vmem:[#allocation3 + $0x30] ss:$4 sm:$0x3] %vm1029_vm5, %v1788_v58  ;;  %v2357_v23 = vrot.slane %v1176_v24, 6 }
 0x174   :  { %v1622_v49 = vor.u32 %v1728_v16, %v1619_v35  ;;  %1039 = vst.msk [vmem:[#allocation3 + $0xb] ss:$4 sm:$0x3] %vm1029_vm5, %v1788_v58  ;;  %v1319_v54 = vperm.slane %v2337_v42, 7  ;;  %v1758_v20 = vld [vmem:[%s2540_s10 + $0x10] ss:$0 sm:$0xff] }
 0x175   :  { %v799_v61 = vadd.f32 %v795_v51, %v785_v60  ;;  %v859_v25 = vadd.f32 %v2269_v19, %v852_v28  ;;  %1041 = vst.msk [vmem:[#allocation3 + $0x13] ss:$4 sm:$0x3] %vm1029_vm5, %v1788_v58  ;;  %v1167_v51 = vld [vmem:[#allocation3] sm:$0xcc] }
 0x176   :  { %1010 = vmatpush.bf16.msrb.mxu3 %v1622_v49  ;;  %1043 = vst.msk [vmem:[#allocation3 + $0x2b] ss:$4 sm:$0x3] %vm1029_vm5, %v1788_v58  ;;  %v2365_v1 = vmul.f32 %v2357_v23, %v1167_v51 }
 0x177   :  { %v812_v48 = vadd.f32 %v808_v8, %v799_v61  ;;  %v863_v62 = vmax.f32 %v859_v25, 0.0  ;;  %1045 = vst.msk [vmem:[#allocation3 + $0x33] ss:$4 sm:$0x3] %vm1029_vm5, %v1788_v58  ;;  %v1124_v8 = vrot.slane %v1121_v47, 4 }
 0x179   :  { %v826_v31 = vadd.f32 %v822_v5, %v812_v48  ;;  %873 = vst [vmem:[#allocation1 + $0x2] ss:$4 sm:$0xff] %v863_v62  ;;  %v1143_v48 = vmul.f32 %v2355_v11, %v1131_v13  ;;  %v1145_v5 = vmul.f32 %v2355_v11, %v1133_v12  ;;  %v1208_v62 = vperm.slane %v2337_v42, 3 }
 0x17b   :  { %v840_v3 = vadd.f32 %v836_v17, %v826_v31  ;;  %v1227_v31 = vperm.slane %v2337_v42, 4  ;;  %v1318_v17 = vperm.slane %v2346_v63, 7  ;;  %v1641_v16 = vrot.slane %v1143_v48, 9  ;;  %v1351_v48 = vld [vmem:[#allocation3 + $0x18] sm:$0xcc] }
 0x17c   :  { %v1643_v35 = vrot.slane %v1145_v5, 9  ;;  %v1211_v49 = vrot.slane %v1208_v62, 4  ;;  %v1353_v5 = vld [vmem:[#allocation3 + $0x38] sm:$0xcc] }
 0x17d   :  { %v853_v34 = vadd.f32 %v849_v29, %v840_v3  ;;  %v1322_v3 = vrot.slane %v1319_v54, 4  ;;  %v1116_v29 = vld [vmem:[#allocation3] sm:$0x33]  ;;  %v1388_v54 = vperm.slane %v2392_v52, 1  ;;  %v1738_v62 = vld [vmem:[%s2542_s12 + $0x20] sm:$0xff] }
 0x17f   :  { %v860_v38 = vadd.f32 %v2269_v19, %v853_v34  ;;  %v1729_v19 = vld [vmem:[%s2538_s8 + $0x4] sm:$0xf0]  ;;  %v2370_v34 = vsel %vm1018_vm2, %v1120_v10, %v1124_v8 }
 0x180   :  { %v1618_v37 = vor.u32 %v1729_v19, %v1617_v7  ;;  %v1207_v7 = vperm.slane %v2346_v63, 3  ;;  %v1169_v19 = vld [vmem:[#allocation3 + $0x20] sm:$0xcc]  ;;  %v1127_v58 = vmul.f32 %v2370_v34, %v1116_v29  ;;  %v1745_v29 = vld [vmem:[%s2542_s12 + $0x58] sm:$0xff] }
 0x181   :  { %v864_v50 = vmax.f32 %v860_v38, 0.0  ;;  %v1263_v38 = vperm.slane %v2337_v42, 5  ;;  %1521 = vmatpush.bf16.msra.mxu3 %v1745_v29 }
 0x182   :  { %997 = vmatpush.bf16.msra.mxu2 %v1618_v37  ;;  %v1645_v37 = vrot.slane %v2365_v1, 10  ;;  %v1163_v47 = vadd.f32 %v1641_v16, %v1127_v58  ;;  %v2429_v8 = vsel %vm1018_vm2, %v1207_v7, %v1211_v49 }
 0x183   :  { %875 = vst [vmem:[#allocation1 + $0x3] ss:$4 sm:$0xff] %v864_v50  ;;  %v1759_v50 = vld [vmem:[%s2540_s10 + $0x18] ss:$0 sm:$0xff] }
 0x184   :  { %v1358_v33 = vrot.slane %v1759_v50, 4 }
 0x186   :  { %v1359_v51 = vsel %vm1018_vm2, %v1758_v20, %v1358_v33 }
 0x18a   :  { %v876_v59 = vld.sshfl [vmem:[#allocation1] sm:$0xff pattern:$0x73625140] }
 0x18b   :  { %v878_v41 = vpack.c.bf16 %v876_v59, %v876_v59  ;;  %v1741_v59 = vld [vmem:[%s2542_s12 + $0x38] sm:$0xff] }
 0x18c   :  { %1504 = vmatpush.bf16.msrb.mxu2 %v1741_v59 }
 0x18d   :  { %938 = vmatmul.bf16.vlgmr.msra.gmra.mxu1 %v878_v41  ;;  %v1118_v41 = vld [vmem:[#allocation3 + $0x20] sm:$0x33] }
 0x190   :  { %1505 = vmatpush.bf16.msrb.mxu2 %v1740_v30 }
 0x20a   :  { %v939_v21 = vpop.f32.mrf.mxu1 }
 0x20b   :  { %v940_v43 = vadd.f32 %v1757_v40, %v939_v21  ;;  %v1226_v40 = vperm.slane %v2346_v63, 4  ;;  %v1230_v21 = vrot.slane %v1227_v31, 4  ;;  %v2440_v31 = vrot.slane %v1359_v51, 6 }
 0x20d   :  { %v950_v14 = vpack.c.bf16 %v940_v43, %v940_v43  ;;  %v1323_v43 = vsel %vm1018_vm2, %v1318_v17, %v1322_v3  ;;  %v1231_v63 = vsel %vm1018_vm2, %v1226_v40, %v1230_v21  ;;  %v1387_v17 = vperm.slane %v2392_v52, 0 }
 0x20e   :  { %v2406_v42 = vrot.slane %v1323_v43, 7  ;;  %v2443_v3 = vrot.slane %v1388_v54, 4 }
 0x20f   :  { %1639 = vmatmul.msk.bf16.vlgmr.msra.gmra.mxu2 %vm986_vm1, %v950_v14  ;;  %1640 = vmatmul.msk.bf16.vlgmr.msrb.gmra.mxu3 %vm986_vm1, %v950_v14 }
 0x212   :  { %v941_v26 = vpop.f32.mrf.mxu1 }
 0x213   :  { %v2466_v26 = vmul.f32 %v2440_v31, %v1351_v48 }
 0x292   :  { %v999_v0 = vpop.f32.mrf.mxu2  ;;  %v1012_v53 = vpop.f32.mrf.mxu3 }
 0x293   :  { %v1000_v46 = vadd.f32 %v999_v0, %v952_v32  ;;  %v1013_v57 = vadd.f32 %v1012_v53, %v953_v22  ;;  %v1266_v22 = vrot.slane %v1263_v38, 4  ;;  %v1129_v0 = vmul.f32 %v2370_v34, %v1118_v41  ;;  %v1737_v38 = vld [vmem:[%s2542_s12 + $0x18] sm:$0xff] }
 0x294   :  { %v1181_v53 = vmul.f32 %v2357_v23, %v1169_v19  ;;  %v1744_v19 = vld [vmem:[%s2542_s12 + $0x50] sm:$0xff] }
 0x295   :  { %v1017_v44 = vmax.f32 %v1013_v57, 0.0  ;;  %v1016_v39 = vmax.f32 %v1000_v46, 0.0  ;;  %v1315_v46 = vld [vmem:[#allocation3 + $0x18] sm:$0x66]  ;;  %v1267_v13 = vsel %vm1018_vm2, %v1262_v4, %v1266_v22  ;;  %1522 = vmatpush.bf16.msra.mxu3 %v1744_v19  ;;  %v1736_v19 = vld [vmem:[%s2542_s12 + $0x10] sm:$0xff] }
 0x296   :  { %v2418_v12 = vmul.f32 %v2406_v42, %v1315_v46 }
 0x297   :  { %v1048_v55 = vrot.slane %v1017_v44, 6 }
 0x298   :  { %v1658_v1 = vrot.slane %v2418_v12, 9 }
 0x299   :  { %v1050_v6 = vsel %vm1049_vm6, %v1016_v39, %v1048_v55  ;;  %v1052_v15 = vsel %vm1051_vm7, %v1016_v39, %v1048_v55  ;;  %v1055_v18 = vsel %vm1054_vm8, %v1016_v39, %v1048_v55  ;;  %v1058_v60 = vsel %vm1057_vm9, %v1048_v55, %v1016_v39  ;;  %v1739_v55 = vld [vmem:[%s2542_s12 + $0x28] sm:$0xff] }
 0x29a   :  { %v1053_v28 = vrot.slane %v1052_v15, 2  ;;  %v1056_v36 = vrot.slane %v1055_v18, 4  ;;  %v1059_v61 = vrot.slane %v1058_v60, 6  ;;  %1060 = vst [vmem:[#allocation1] ss:$2 sm:$0xff] %v1050_v6  ;;  %v1001_v25 = vpop.f32.mrf.mxu2  ;;  %v1014_v9 = vpop.f32.mrf.mxu3  ;;  %v1303_v39 = vrot.slane %v1300_v56, 4  ;;  %1506 = vmatpush.bf16.msrb.mxu2 %v1739_v55 }
 0x29b   :  { %v1165_v6 = vadd.f32 %v1643_v35, %v1129_v0  ;;  %v1647_v15 = vrot.slane %v1181_v53, 10  ;;  %v2423_v18 = vrot.slane %v1231_v63, 7  ;;  %v1296_v60 = vld [vmem:[#allocation3 + $0x18] sm:$0x33]  ;;  %v2431_v25 = vrot.slane %v1267_v13, 6 }
 0x29c   :  { %1063 = vst [vmem:[#allocation1 + $0x10] ss:$2 sm:$0xff] %v1053_v28  ;;  %v1298_v28 = vld [vmem:[#allocation3 + $0x38] sm:$0x33]  ;;  %v2434_v9 = vsel %vm1018_vm2, %v1299_v45, %v1303_v39  ;;  %v2472_v45 = vmul.f32 %v2440_v31, %v1353_v5 }
 0x29d   :  { %1066 = vst [vmem:[#allocation1 + $0x20] ss:$2 sm:$0xff] %v1056_v36  ;;  %v1317_v36 = vld [vmem:[#allocation3 + $0x38] sm:$0x66]  ;;  %v1201_v16 = vadd.f32 %v1647_v15, %v1165_v6  ;;  %v2452_v35 = vmul.f32 %v2434_v9, %v1296_v60  ;;  %v2455_v7 = vmul.f32 %v2434_v9, %v1298_v28 }
 0x29e   :  { %1069 = vst [vmem:[#allocation1 + $0x30] ss:$2 sm:$0xff] %v1059_v61  ;;  %v1199_v61 = vadd.f32 %v1645_v37, %v1163_v47  ;;  %v2458_v49 = vmul.f32 %v2406_v42, %v1317_v36  ;;  %1507 = vmatpush.bf16.msrb.mxu2 %v1738_v62 }
 0x2a1   :  { %v1061_v14 = vld.sshfl [vmem:[#allocation1] sm:$0xff pattern:$0x75643120] }
 0x2a2   :  { %v1071_v32 = vrot.slane %v1061_v14, 7  ;;  %1508 = vmatpush.bf16.msrb.mxu2 %v1737_v38 }
 0x2a3   :  { %v1064_v27 = vld.sshfl [vmem:[#allocation1 + $0x10] sm:$0xff pattern:$0x75643120] }
 0x2a4   :  { %v1067_v57 = vld.sshfl [vmem:[#allocation1 + $0x20] sm:$0xff pattern:$0x75643120]  ;;  %v1072_v2 = vrot.slane %v1064_v27, 7  ;;  %1082 = vst.msk [vmem:[#allocation3 + $0x8] sm:$0x66] %vm2385_vm12, %v1071_v32 }
 0x2a5   :  { %v1070_v44 = vld.sshfl [vmem:[#allocation1 + $0x30] sm:$0xff pattern:$0x75643120]  ;;  %v1073_v24 = vrot.slane %v1067_v57, 7 }
 0x2a6   :  { %v1074_v10 = vrot.slane %v1070_v44, 7  ;;  %1083 = vst.msk [vmem:[#allocation3 + $0x10] sm:$0x66] %vm2385_vm12, %v1072_v2  ;;  %1509 = vmatpush.bf16.msrb.mxu2 %v1736_v19 }
 0x2a7   :  { %1084 = vst.msk [vmem:[#allocation3 + $0x28] sm:$0x66] %vm2385_vm12, %v1073_v24 }
 0x2a8   :  { %1085 = vst.msk [vmem:[#allocation3 + $0x30] sm:$0x66] %vm2385_vm12, %v1074_v10 }
 0x2ab   :  { %v1117_v50 = vld [vmem:[#allocation3 + $0x8] sm:$0x33]  ;;  %v1168_v41 = vld [vmem:[#allocation3 + $0x8] sm:$0xcc] }
 0x2ac   :  { %v1132_v59 = vld [vmem:[#allocation3 + $0x8] sm:$0x66]  ;;  %v1180_v40 = vmul.f32 %v2357_v23, %v1168_v41  ;;  %v1128_v58 = vmul.f32 %v2370_v34, %v1117_v50 }
 0x2ad   :  { %v1144_v37 = vmul.f32 %v2355_v11, %v1132_v59  ;;  %v1203_v21 = vld [vmem:[#allocation3 + $0x8] sm:$0x33]  ;;  %v1258_v14 = vld [vmem:[#allocation3 + $0x8] sm:$0xcc]  ;;  %v1204_v4 = vld [vmem:[#allocation3 + $0x10] sm:$0x33] }
 0x2ae   :  { %v1222_v43 = vld [vmem:[#allocation3 + $0x8] sm:$0x66]  ;;  %v1214_v56 = vmul.f32 %v2429_v8, %v1203_v21  ;;  %v1223_v30 = vld [vmem:[#allocation3 + $0x10] sm:$0x66]  ;;  %v1646_v0 = vrot.slane %v1180_v40, 10  ;;  %v1215_v53 = vmul.f32 %v2429_v8, %v1204_v4  ;;  %v1270_v46 = vmul.f32 %v2431_v25, %v1258_v14 }
 0x2af   :  { %v1234_v32 = vmul.f32 %v2423_v18, %v1222_v43  ;;  %v1259_v22 = vld [vmem:[#allocation3 + $0x10] sm:$0xcc]  ;;  %v1119_v20 = vld [vmem:[#allocation3 + $0x28] sm:$0x33]  ;;  %v1642_v27 = vrot.slane %v1144_v37, 9  ;;  %v1235_v39 = vmul.f32 %v2423_v18, %v1223_v30 }
 0x2b0   :  { %v1134_v33 = vld [vmem:[#allocation3 + $0x28] sm:$0x66]  ;;  %v1130_v57 = vmul.f32 %v2370_v34, %v1119_v20  ;;  %v1206_v24 = vld [vmem:[#allocation3 + $0x30] sm:$0x33]  ;;  %v1218_v47 = vadd.f32 %v1214_v56, %v1199_v61  ;;  %v1271_v15 = vmul.f32 %v2431_v25, %v1259_v22  ;;  %v1261_v5 = vld [vmem:[#allocation3 + $0x30] sm:$0xcc] }
 0x2b1   :  { %v1146_v2 = vmul.f32 %v2355_v11, %v1134_v33  ;;  %v1170_v63 = vld [vmem:[#allocation3 + $0x28] sm:$0xcc]  ;;  %v1205_v44 = vld [vmem:[#allocation3 + $0x28] sm:$0x33]  ;;  %v1164_v55 = vadd.f32 %v1642_v27, %v1128_v58  ;;  %v1225_v6 = vld [vmem:[#allocation3 + $0x30] sm:$0x66]  ;;  %v1217_v48 = vmul.f32 %v2429_v8, %v1206_v24  ;;  %v1273_v4 = vmul.f32 %v2431_v25, %v1261_v5 }
 0x2b2   :  { %v1182_v10 = vmul.f32 %v2357_v23, %v1170_v63  ;;  %v1216_v13 = vmul.f32 %v2429_v8, %v1205_v44  ;;  %v1224_v54 = vld [vmem:[#allocation3 + $0x28] sm:$0x66]  ;;  %v1237_v11 = vmul.f32 %v2423_v18, %v1225_v6  ;;  %v1649_v51 = vrot.slane %v1234_v32, 9  ;;  %v1295_v62 = vld [vmem:[#allocation3 + $0x10] sm:$0x33]  ;;  %v1743_v8 = vld [vmem:[%s2542_s12 + $0x48] sm:$0xff] }
 0x2b3   :  { %v1644_v60 = vrot.slane %v1146_v2, 9  ;;  %v1236_v34 = vmul.f32 %v2423_v18, %v1224_v54  ;;  %v1260_v28 = vld [vmem:[#allocation3 + $0x28] sm:$0xcc]  ;;  %v1200_v61 = vadd.f32 %v1646_v0, %v1164_v55  ;;  %v1650_v50 = vrot.slane %v1235_v39, 9  ;;  %v1297_v38 = vld [vmem:[#allocation3 + $0x30] sm:$0x33]  ;;  %1523 = vmatpush.bf16.msra.mxu3 %v1743_v8 }
 0x2b4   :  { %v1648_v36 = vrot.slane %v1182_v10, 10  ;;  %v1220_v23 = vadd.f32 %v1216_v13, %v1201_v16  ;;  %v1254_v41 = vadd.f32 %v1649_v51, %v1218_v47  ;;  %v1314_v37 = vld [vmem:[#allocation3 + $0x10] sm:$0x66]  ;;  %v1652_v21 = vrot.slane %v1237_v11, 9  ;;  %v1735_v0 = vld [vmem:[%s2542_s12 + $0x8] sm:$0xff] }
 0x2b5   :  { %v1166_v29 = vadd.f32 %v1644_v60, %v1130_v57  ;;  %v1651_v59 = vrot.slane %v1236_v34, 9  ;;  %v1219_v40 = vadd.f32 %v1215_v53, %v1200_v61  ;;  %v1272_v18 = vmul.f32 %v2431_v25, %v1260_v28  ;;  %v1316_v14 = vld [vmem:[#allocation3 + $0x30] sm:$0x66]  ;;  %v1742_v53 = vld [vmem:[%s2542_s12 + $0x40] sm:$0xff]  ;;  %1510 = vmatpush.bf16.msrb.mxu2 %v1735_v0 }
 0x2b6   :  { %v1653_v43 = vrot.slane %v1270_v46, 10  ;;  %v1654_v56 = vrot.slane %v1271_v15, 10  ;;  %v1350_v30 = vld [vmem:[#allocation3 + $0x10] sm:$0xcc]  ;;  %v1306_v33 = vmul.f32 %v2434_v9, %v1295_v62  ;;  %v1308_v25 = vmul.f32 %v2434_v9, %v1297_v38 }
 0x2b7   :  { %v1202_v16 = vadd.f32 %v1648_v36, %v1166_v29  ;;  %v1256_v58 = vadd.f32 %v1651_v59, %v1220_v23  ;;  %v1255_v32 = vadd.f32 %v1650_v50, %v1219_v40  ;;  %v1655_v22 = vrot.slane %v1272_v18, 10  ;;  %v1352_v27 = vld [vmem:[#allocation3 + $0x30] sm:$0xcc]  ;;  %1524 = vmatpush.bf16.msra.mxu3 %v1742_v53 }
 0x2b8   :  { %v1290_v20 = vadd.f32 %v1653_v43, %v1254_v41  ;;  %v1326_v57 = vmul.f32 %v2406_v42, %v1314_v37  ;;  %v1328_v2 = vmul.f32 %v2406_v42, %v1316_v14  ;;  %v1362_v47 = vmul.f32 %v2440_v31, %v1350_v30  ;;  %v1734_v42 = vld [vmem:[%s2542_s12] sm:$0xff] }
 0x2b9   :  { %v1221_v46 = vadd.f32 %v1217_v48, %v1202_v16  ;;  %v1291_v63 = vadd.f32 %v1654_v56, %v1255_v32  ;;  %v1292_v44 = vadd.f32 %v1655_v22, %v1256_v58  ;;  %v1656_v55 = vrot.slane %v1273_v4, 10  ;;  %1511 = vmatpush.bf16.msrb.mxu2 %v1734_v42  ;;  %v1760_v16 = vld [vmem:[%s2543_s13] ss:$0 sm:$0xff] }
 0x2ba   :  { %v1310_v24 = vadd.f32 %v1306_v33, %v1290_v20  ;;  %v1657_v10 = vrot.slane %v1326_v57, 9  ;;  %v1364_v13 = vmul.f32 %v2440_v31, %v1352_v27  ;;  %v1659_v15 = vrot.slane %v1328_v2, 9 }
 0x2bb   :  { %v1257_v39 = vadd.f32 %v1652_v21, %v1221_v46  ;;  %v1311_v54 = vadd.f32 %v2452_v35, %v1291_v63  ;;  %v1312_v6 = vadd.f32 %v1308_v25, %v1292_v44  ;;  %v1662_v9 = vrot.slane %v2466_v26, 10 }
 0x2bc   :  { %v1660_v34 = vrot.slane %v2458_v49, 9  ;;  %v1346_v11 = vadd.f32 %v1657_v10, %v1310_v24  ;;  %v1661_v51 = vrot.slane %v1362_v47, 10  ;;  %v1663_v35 = vrot.slane %v1364_v13, 10 }
 0x2bd   :  { %v1293_v60 = vadd.f32 %v1656_v55, %v1257_v39  ;;  %v1347_v31 = vadd.f32 %v1658_v1, %v1311_v54  ;;  %v1348_v28 = vadd.f32 %v1659_v15, %v1312_v6  ;;  %v1390_v26 = vsel %vm1018_vm2, %v1387_v17, %v2443_v3 }
 0x2be   :  { %v1664_v61 = vrot.slane %v2472_v45, 10  ;;  %v1382_v48 = vadd.f32 %v1661_v51, %v1346_v11 }
 0x2bf   :  { %v1313_v36 = vadd.f32 %v2455_v7, %v1293_v60  ;;  %v1383_v23 = vadd.f32 %v1662_v9, %v1347_v31  ;;  %v1384_v5 = vadd.f32 %v1663_v35, %v1348_v28 }
 0x2c0   :  { %v1392_v62 = vadd.f32 %v1390_v26, %v1382_v48 }
 0x2c1   :  { %v1349_v49 = vadd.f32 %v1660_v34, %v1313_v36  ;;  %v1393_v29 = vadd.f32 %v1390_v26, %v1383_v23  ;;  %v1394_v12 = vadd.f32 %v1390_v26, %v1384_v5 }
 0x2c2   :  { %v1396_v50 = vmax.f32 %v1392_v62, 0.0 }
 0x2c3   :  { %v1385_v1 = vadd.f32 %v1664_v61, %v1349_v49  ;;  %v1397_v59 = vmax.f32 %v1393_v29, 0.0  ;;  %v1398_v41 = vmax.f32 %v1394_v12, 0.0 }
 0x2c4   :  { %v1404_v52 = vrot.slane %v1396_v50, 2 }
 0x2c5   :  { %v1395_v38 = vadd.f32 %v1390_v26, %v1385_v1  ;;  %v1405_v37 = vrot.slane %v1397_v59, 2  ;;  %v1406_v17 = vrot.slane %v1398_v41, 2 }
 0x2c6   :  { %v1408_v7 = vsel %vm1049_vm6, %v1396_v50, %v1404_v52 }
 0x2c7   :  { %v1399_v3 = vmax.f32 %v1395_v38, 0.0  ;;  %v1409_v45 = vsel %vm1049_vm6, %v1397_v59, %v1405_v37  ;;  %v1410_v40 = vsel %vm1049_vm6, %v1398_v41, %v1406_v17  ;;  %1412 = vst [vmem:[#allocation1] ss:$4 sm:$0xff] %v1408_v7 }
 0x2c8   :  { %1414 = vst [vmem:[#allocation1 + $0x1] ss:$4 sm:$0xff] %v1409_v45 }
 0x2c9   :  { %v1407_v21 = vrot.slane %v1399_v3, 2  ;;  %1416 = vst [vmem:[#allocation1 + $0x2] ss:$4 sm:$0xff] %v1410_v40 }
 0x2cb   :  { %v1411_v18 = vsel %vm1049_vm6, %v1399_v3, %v1407_v21 }
 0x2cc   :  { %1418 = vst [vmem:[#allocation1 + $0x3] ss:$4 sm:$0xff] %v1411_v18 }
 0x2d3   :  { %v1419_v43 = vld.sshfl [vmem:[#allocation1] sm:$0xff pattern:$0x73625140]  ;;  %v1420_v14 = vld.sshfl [vmem:[#allocation1 + $0x8] sm:$0xff pattern:$0x73625140] }
 0x2d4   :  { %v1423_v19 = vpack.c.bf16 %v1419_v43, %v1419_v43  ;;  %v1424_v8 = vpack.c.bf16 %v1420_v14, %v1420_v14 }
 0x2d6   :  { %1512 = vmatmul.bf16.vlgmr.msrb.gmra.mxu2 %v1423_v19  ;;  %1713 = vmatmul.msk.bf16.vlgmr.msra.gmra.mxu3 %vm1500_vm13, %v1424_v8 }
 0x359   :  { %v1513_v58 = vpop.f32.mrf.mxu2  ;;  %v1526_v4 = vpop.f32.mrf.mxu3 }
 0x35a   :  { %v1514_v56 = vadd.f32 %v1760_v16, %v1513_v58 }
 0x35c   :  { %v1527_v30 = vadd.f32 %v1526_v4, %v1514_v56 }
 0x35e   :  { %1530 = vst.msk [vmem:[#allocation4] sm:$0xff] %vm986_vm1, %v1527_v30 }
 0x35f   :  { %1541 = dma.vmem_to_hbm [thread:$0]  %s1537_s25, 128, %s1539_s27, [#allocation5]  }
 0x361   :  { %v1515_v32 = vpop.f32.mrf.mxu2  ;;  %v1528_v22 = vpop.f32.mrf.mxu3 }
 0x362   :  { %1785 = dma.done.wait [#allocation5], 128  }
 0x363   :  { %1786 = vsyncadd [#allocation5], 4294967168 }
 0x364   :  { %1546 = vsyncpa [#allocation5], 1 }

// kernel: token_pyramid_forward.4
= control target key start
LH: loop header
LB: loop body
LE: loop exit
PB: predicated region body
PF: predicated region fallthrough
CT: control target
= control target key end

     0   :  { %v3512_v0 = vmov 0   ;;  %vm210_vm0 = vcmask 130048   ;;  %v3513_v45 = vmov 269488144   ;;  %v3514_v47 = vmov 842150450   ;;  %s5092_s1 = inlined_call_operand.vmem [shape: f32[24,6,1], index: 1, kind: input, shape index: {}]   ;;  %s5093_s2 = inlined_call_operand.vmem [shape: bf16[16,64], index: 2, kind: input, shape index: {}]   ;;  %s5094_s0 = inlined_call_operand.vmem [shape: bf16[288,16], index: 0, kind: input, shape index: {}]   ;;  %s5095_s3 = inlined_call_operand.vmem [shape: f32[1,64], index: 3, kind: input, shape index: {}]   ;;  %s5096_s4 = inlined_call_operand.vmem [shape: f32[25,64], index: 4, kind: input, shape index: {}]   ;;  %s5097_s5 = inlined_call_operand.vmem [shape: f32[1,64], index: 5, kind: input, shape index: {}]   ;;  %s5098_s6 = inlined_call_operand.vmem [shape: bf16[64,32], index: 6, kind: input, shape index: {}]   ;;  %s5099_s7 = inlined_call_operand.vmem [shape: f32[1,32], index: 7, kind: input, shape index: {}]   ;;  %s5100_s8 = inlined_call_operand.vmem [shape: bf16[32,128], index: 8, kind: input, shape index: {}]   ;;  %s5101_s9 = inlined_call_operand.vmem [shape: f32[1,128], index: 9, kind: input, shape index: {}]   ;;  %s5102_s10 = inlined_call_operand.vmem [shape: f32[25,128], index: 10, kind: input, shape index: {}]   ;;  %s5103_s11 = inlined_call_operand.vmem [shape: f32[1,128], index: 11, kind: input, shape index: {}]   ;;  %s5104_s13 = inlined_call_operand.vmem [shape: f32[1,32], index: 13, kind: input, shape index: {}]   ;;  %s5105_s12 = inlined_call_operand.vmem [shape: bf16[128,32], index: 12, kind: input, shape index: {}]   ;;  %s5106_s14 = inlined_call_operand.vmem [shape: f32[32,32], index: 14, kind: output, shape index: {}]  }
   0x1   :  { %3500 = vset.pattern.permute.xlu0 %v3512_v0  ;;  %v84_v1 = vld [vmem:[%s5092_s1] sm:$0x3f]  ;;  %3501 = vset.pattern.permute.xlu1 %v3512_v0  ;;  %v86_v3 = vld [vmem:[%s5092_s1 + $0x10] sm:$0x3f]  ;;  %v3466_v5 = vld [vmem:[%s5094_s0 + $0x38] sm:$0xff]  ;;  %v749_v46 = vunpack.c.l.s4 %v3513_v45  ;;  %v753_v48 = vunpack.c.l.s4 %v3514_v47  ;;  %vm1641_vm1 = vcmask 521216  }
   0x2   :  { %v3477_v2 = vld [vmem:[%s5093_s2] sm:$0xff]  ;;  %654 = vperm.xlu0 %3500, %v84_v1   ;;  %662 = vperm.xlu1 %3501, %v86_v3   ;;  %v3470_v6 = vld [vmem:[%s5094_s0 + $0x58] sm:$0xff]  ;;  %v85_v8 = vld [vmem:[%s5092_s1 + $0x8] sm:$0x3f]  ;;  %v3515_v49 = vmov 1414812756  }
   0x3   :  { %v3459_v4 = vld [vmem:[%s5094_s0] sm:$0xff]  ;;  %272 = vmatpush.bf16.msra.mxu0 %v3477_v2  ;;  %3492 = vmatpush.bf16.msra.mxu1 %v3477_v2  ;;  %v87_v9 = vld [vmem:[%s5092_s1 + $0x18] sm:$0x3f]  ;;  %v89_v11 = vld [vmem:[%s5092_s1 + $0x28] sm:$0x3f]  ;;  %v757_v50 = vunpack.c.l.s4 %v3515_v49  ;;  %v3739_v51 = vunpack.c.0.s8 %v749_v46  ;;  %v3746_v53 = vunpack.c.0.s8 %v753_v48  ;;  %vm2409_vm2 = vcmask 523264  }
   0x4   :  { %3493 = vmatpush.bf16.msra.mxu2 %v3477_v2  ;;  %3494 = vmatpush.bf16.msra.mxu3 %v3477_v2  ;;  %v3475_v7 = vld [vmem:[%s5094_s0 + $0x80] sm:$0xff]  ;;  %v90_v12 = vld [vmem:[%s5092_s1 + $0x30] sm:$0x3f]  ;;  %v91_v13 = vld [vmem:[%s5092_s1 + $0x38] sm:$0x3f]  ;;  %vm2457_vm3 = vcmask 261120  }
   0x5   :  { %3502 = vset.pattern.permute.xlu2 %v3512_v0  ;;  %v88_v10 = vld [vmem:[%s5092_s1 + $0x20] sm:$0x3f]  ;;  %v3460_v14 = vld [vmem:[%s5094_s0 + $0x8] sm:$0xff]  ;;  %v94_v20 = vld [vmem:[%s5092_s1 + $0x50] sm:$0x3f]  ;;  %v3748_v54 = vunpack.c.0.s8 %v757_v50 }
   0x6   :  { %3381 = vmatmul.msk.bf16.vlgmr.msra.gmra.mxu0 %vm210_vm0, %v3459_v4  ;;  %3388 = vmatmul.msk.bf16.vlgmr.msra.gmra.mxu1 %vm210_vm0, %v3466_v5  ;;  %v3467_v15 = vld [vmem:[%s5094_s0 + $0x40] sm:$0xff]  ;;  %v3476_v17 = vld [vmem:[%s5094_s0 + $0x88] sm:$0xff]  ;;  %v95_v21 = vld [vmem:[%s5092_s1 + $0x58] sm:$0x3f] }
   0x7   :  { %3392 = vmatmul.msk.bf16.vlgmr.msra.gmra.mxu2 %vm210_vm0, %v3470_v6  ;;  %3397 = vmatmul.msk.bf16.vlgmr.msra.gmra.mxu3 %vm210_vm0, %v3475_v7  ;;  %v3471_v16 = vld [vmem:[%s5094_s0 + $0x60] sm:$0xff]  ;;  %v93_v19 = vld [vmem:[%s5092_s1 + $0x48] sm:$0x3f]  ;;  %v3461_v24 = vld [vmem:[%s5094_s0 + $0x10] sm:$0xff] }
   0x8   :  { %670 = vperm.xlu2 %3502, %v88_v10   ;;  %v92_v18 = vld [vmem:[%s5092_s1 + $0x40] sm:$0x3f]  ;;  %v97_v23 = vld [vmem:[%s5092_s1 + $0x68] sm:$0x3f]  ;;  %v98_v27 = vld [vmem:[%s5092_s1 + $0x70] sm:$0x3f] }
   0x9   :  { %v96_v22 = vld [vmem:[%s5092_s1 + $0x60] sm:$0x3f]  ;;  %v3468_v25 = vld [vmem:[%s5094_s0 + $0x48] sm:$0xff]  ;;  %v99_v28 = vld [vmem:[%s5092_s1 + $0x78] sm:$0x3f] }
   0xa   :  { %658 = vperm.xlu0 %3500, %v85_v8   ;;  %666 = vperm.xlu1 %3501, %v87_v9   ;;  %v3472_v26 = vld [vmem:[%s5094_s0 + $0x68] sm:$0xff]  ;;  %v100_v29 = vld [vmem:[%s5092_s1 + $0x80] sm:$0x3f]  ;;  %v102_v31 = vld [vmem:[%s5092_s1 + $0x90] sm:$0x3f] }
   0xb   :  { %v101_v30 = vld [vmem:[%s5092_s1 + $0x88] sm:$0x3f]  ;;  %v103_v32 = vld [vmem:[%s5092_s1 + $0x98] sm:$0x3f]  ;;  %v3469_v34 = vld [vmem:[%s5094_s0 + $0x50] sm:$0xff] }
   0xc   :  { %v3462_v33 = vld [vmem:[%s5094_s0 + $0x18] sm:$0xff]  ;;  %v3473_v35 = vld [vmem:[%s5094_s0 + $0x70] sm:$0xff]  ;;  %v104_v36 = vld [vmem:[%s5092_s1 + $0xa0] sm:$0x3f] }
   0xd   :  { %v105_v37 = vld [vmem:[%s5092_s1 + $0xa8] sm:$0x3f]  ;;  %v106_v38 = vld [vmem:[%s5092_s1 + $0xb0] sm:$0x3f]  ;;  %v107_v39 = vld [vmem:[%s5092_s1 + $0xb8] sm:$0x3f] }
   0xe   :  { %v3463_v40 = vld [vmem:[%s5094_s0 + $0x20] sm:$0xff]  ;;  %v3474_v41 = vld [vmem:[%s5094_s0 + $0x78] sm:$0xff]  ;;  %v3464_v42 = vld [vmem:[%s5094_s0 + $0x28] sm:$0xff] }
   0xf   :  { %v3465_v43 = vld [vmem:[%s5094_s0 + $0x30] sm:$0xff]  ;;  %v3744_v52 = vld [vmem:[%s5095_s3] ss:$0 sm:$0xff] }
  0x10   :  { %674 = vperm.xlu2 %3502, %v89_v11  }
  0x12   :  { %678 = vperm.xlu0 %3500, %v90_v12   ;;  %682 = vperm.xlu1 %3501, %v91_v13  }
  0x16   :  { %3382 = vmatmul.msk.bf16.gmra.mxu0 %vm210_vm0, %v3460_v14  ;;  %3389 = vmatmul.msk.bf16.gmra.mxu1 %vm210_vm0, %v3467_v15 }
  0x17   :  { %3393 = vmatmul.msk.bf16.gmra.mxu2 %vm210_vm0, %v3471_v16  ;;  %3398 = vmatmul.msk.bf16.gmra.mxu3 %vm210_vm0, %v3476_v17 }
  0x18   :  { %686 = vperm.xlu2 %3502, %v92_v18  }
  0x1a   :  { %690 = vperm.xlu0 %3500, %v93_v19   ;;  %694 = vperm.xlu1 %3501, %v94_v20  }
  0x20   :  { %698 = vperm.xlu2 %3502, %v95_v21  }
  0x22   :  { %702 = vperm.xlu0 %3500, %v96_v22   ;;  %706 = vperm.xlu1 %3501, %v97_v23  }
  0x26   :  { %3383 = vmatmul.msk.bf16.gmra.mxu0 %vm210_vm0, %v3461_v24  ;;  %3390 = vmatmul.msk.bf16.gmra.mxu1 %vm210_vm0, %v3468_v25 }
  0x27   :  { %3394 = vmatmul.msk.bf16.gmra.mxu2 %vm210_vm0, %v3472_v26 }
  0x28   :  { %710 = vperm.xlu2 %3502, %v98_v27  }
  0x2a   :  { %714 = vperm.xlu0 %3500, %v99_v28   ;;  %718 = vperm.xlu1 %3501, %v100_v29  }
  0x30   :  { %722 = vperm.xlu2 %3502, %v101_v30  }
  0x32   :  { %726 = vperm.xlu0 %3500, %v102_v31   ;;  %730 = vperm.xlu1 %3501, %v103_v32  }
  0x36   :  { %3384 = vmatmul.msk.bf16.gmra.mxu0 %vm210_vm0, %v3462_v33  ;;  %3391 = vmatmul.msk.bf16.gmra.mxu1 %vm210_vm0, %v3469_v34 }
  0x37   :  { %3395 = vmatmul.msk.bf16.gmra.mxu2 %vm210_vm0, %v3473_v35 }
  0x38   :  { %734 = vperm.xlu2 %3502, %v104_v36  }
  0x3a   :  { %738 = vperm.xlu0 %3500, %v105_v37   ;;  %742 = vperm.xlu1 %3501, %v106_v38  }
  0x40   :  { %746 = vperm.xlu2 %3502, %v107_v39  }
  0x46   :  { %3385 = vmatmul.msk.bf16.gmra.mxu0 %vm210_vm0, %v3463_v40 }
  0x47   :  { %3396 = vmatmul.msk.bf16.gmra.mxu2 %vm210_vm0, %v3474_v41 }
  0x56   :  { %3386 = vmatmul.msk.bf16.gmra.mxu0 %vm210_vm0, %v3464_v42 }
  0x62   :  { %v671_v21 = vpop.permute.xlu2 %670 }
  0x63   :  { %v3806_v40 = vperm.slane %v671_v21, %v3739_v51 }
  0x66   :  { %3387 = vmatmul.msk.bf16.gmra.mxu0 %vm210_vm0, %v3465_v43  ;;  %v3810_v43 = vperm.slane %v671_v21, %v3746_v53 }
  0x6a   :  { %v675_v42 = vpop.permute.xlu2 %674 }
  0x6b   :  { %v3816_v45 = vperm.slane %v675_v42, %v3739_v51 }
  0x74   :  { %v655_v44 = vpop.permute.xlu0 %654  ;;  %v663_v6 = vpop.permute.xlu1 %662 }
  0x75   :  { %v3751_v56 = vperm.slane %v655_v44, %v3739_v51  ;;  %v3755_v59 = vperm.slane %v655_v44, %v3746_v53  ;;  %v3758_v60 = vperm.slane %v655_v44, %v3748_v54  ;;  %v3772_v10 = vperm.slane %v663_v6, %v3739_v51 }
  0x76   :  { %v3775_v11 = vperm.slane %v663_v6, %v3746_v53  ;;  %v3785_v23 = vperm.slane %v663_v6, %v3748_v54  ;;  %v3813_v44 = vperm.slane %v671_v21, %v3748_v54 }
  0x7c   :  { %v659_v58 = vpop.permute.xlu0 %658  ;;  %v667_v26 = vpop.permute.xlu1 %666 }
  0x7d   :  { %v3761_v61 = vperm.slane %v659_v58, %v3739_v51  ;;  %v3768_v8 = vperm.slane %v659_v58, %v3746_v53  ;;  %v3778_v12 = vperm.slane %v659_v58, %v3748_v54  ;;  %v3791_v27 = vperm.slane %v667_v26, %v3739_v51 }
  0x7e   :  { %v3794_v28 = vperm.slane %v667_v26, %v3746_v53  ;;  %v3797_v29 = vperm.slane %v667_v26, %v3748_v54 }
  0x83   :  { %v274_v55 = vpop.f32.mrf.mxu0 }
  0x84   :  { %v275_v57 = vadd.f32 %v3744_v52, %v274_v55 }
  0x86   :  { %v364_v62 = vmax.f32 %v275_v57, 0.0 }
  0x88   :  { %v436_v63 = vrot.slane %v364_v62, 2  ;;  %v437_v0 = vrot.slane %v364_v62, 4  ;;  %v438_v1 = vrot.slane %v364_v62, 6  ;;  %v1108_v2 = vmul.f32 %v3751_v56, %v364_v62 }
  0x8a   :  { %v1109_v3 = vmul.f32 %v3755_v59, %v436_v63  ;;  %v1110_v4 = vmul.f32 %v3758_v60, %v437_v0  ;;  %v1111_v5 = vmul.f32 %v3761_v61, %v438_v1  ;;  %1396 = vst [vmem:[#allocation1] ss:$4 sm:$0xff] %v1108_v2  ;;  %v679_v1 = vpop.permute.xlu0 %678 }
  0x8b   :  { %v276_v7 = vpop.f32.mrf.mxu0 }
  0x8c   :  { %1398 = vst [vmem:[#allocation1 + $0x1] ss:$4 sm:$0xff] %v1109_v3  ;;  %v277_v9 = vadd.f32 %v3744_v52, %v276_v7  ;;  %v3828_v3 = vperm.slane %v679_v1, %v3739_v51  ;;  %v3837_v7 = vperm.slane %v679_v1, %v3746_v53 }
  0x8d   :  { %1400 = vst [vmem:[#allocation1 + $0x2] ss:$4 sm:$0xff] %v1110_v4  ;;  %v3831_v4 = vperm.slane %v675_v42, %v3746_v53 }
  0x8e   :  { %1403 = vst [vmem:[#allocation1 + $0x20] ss:$4 sm:$0xff] %v1111_v5  ;;  %v365_v13 = vmax.f32 %v277_v9, 0.0  ;;  %v3834_v5 = vperm.slane %v675_v42, %v3748_v54 }
  0x90   :  { %v439_v14 = vrot.slane %v365_v13, 2  ;;  %v440_v15 = vrot.slane %v365_v13, 4  ;;  %v441_v16 = vrot.slane %v365_v13, 6  ;;  %v1112_v17 = vmul.f32 %v3768_v8, %v365_v13 }
  0x92   :  { %v1113_v18 = vmul.f32 %v3778_v12, %v439_v14  ;;  %v1114_v19 = vmul.f32 %v3772_v10, %v440_v15  ;;  %v1115_v20 = vmul.f32 %v3775_v11, %v441_v16  ;;  %1405 = vst [vmem:[#allocation1 + $0x21] ss:$4 sm:$0xff] %v1112_v17 }
  0x93   :  { %v279_v22 = vpop.f32.mrf.mxu0 }
  0x94   :  { %v3787_v24 = vld.sshfl [vmem:[#allocation1] sm:$0xff pattern:$0x73625140]  ;;  %1407 = vst [vmem:[#allocation1 + $0x22] ss:$4 sm:$0xff] %v1113_v18  ;;  %v280_v25 = vadd.f32 %v3744_v52, %v279_v22  ;;  %v3847_v22 = vperm.slane %v679_v1, %v3748_v54 }
  0x95   :  { %1409 = vst [vmem:[#allocation1] ss:$4 sm:$0xff] %v1114_v19 }
  0x96   :  { %1410 = vst [vmem:[#allocation1 + $0x1] ss:$4 sm:$0xff] %v1115_v20  ;;  %v366_v30 = vmax.f32 %v280_v25, 0.0  ;;  %v683_v25 = vpop.permute.xlu1 %682 }
  0x97   :  { %v3850_v26 = vperm.slane %v683_v25, %v3739_v51  ;;  %1642 = vst.msk [vmem:[#allocation2] sm:$0x3f] %vm1641_vm1, %v3787_v24 }
  0x98   :  { %v442_v31 = vrot.slane %v366_v30, 2  ;;  %v443_v32 = vrot.slane %v366_v30, 4  ;;  %v444_v33 = vrot.slane %v366_v30, 6  ;;  %v1116_v34 = vmul.f32 %v3785_v23, %v366_v30 }
  0x99   :  { %v3853_v30 = vperm.slane %v683_v25, %v3746_v53 }
  0x9a   :  { %v1117_v35 = vmul.f32 %v3791_v27, %v442_v31  ;;  %v1118_v36 = vmul.f32 %v3794_v28, %v443_v32  ;;  %v1119_v37 = vmul.f32 %v3797_v29, %v444_v33  ;;  %1411 = vst [vmem:[#allocation1 + $0x2] ss:$4 sm:$0xff] %v1116_v34  ;;  %v3856_v31 = vperm.slane %v683_v25, %v3748_v54 }
  0x9b   :  { %v3803_v38 = vld.sshfl [vmem:[#allocation1 + $0x20] sm:$0xff pattern:$0x73625140]  ;;  %v281_v39 = vpop.f32.mrf.mxu0 }
  0x9c   :  { %1413 = vst [vmem:[#allocation1 + $0x20] ss:$4 sm:$0xff] %v1117_v35  ;;  %v282_v41 = vadd.f32 %v3744_v52, %v281_v39 }
  0x9d   :  { %1414 = vst [vmem:[#allocation1 + $0x21] ss:$4 sm:$0xff] %v1118_v36 }
  0x9e   :  { %1415 = vst [vmem:[#allocation1 + $0x22] ss:$4 sm:$0xff] %v1119_v37  ;;  %v367_v46 = vmax.f32 %v282_v41, 0.0 }
  0x9f   :  { %1643 = vst.msk [vmem:[#allocation2 + $0x8] sm:$0x3f] %vm1641_vm1, %v3803_v38 }
  0xa0   :  { %v445_v47 = vrot.slane %v367_v46, 2  ;;  %v446_v48 = vrot.slane %v367_v46, 4  ;;  %v447_v49 = vrot.slane %v367_v46, 6  ;;  %v1120_v50 = vmul.f32 %v3806_v40, %v367_v46 }
  0xa1   :  { %v3819_v55 = vld.sshfl [vmem:[#allocation1] sm:$0xff pattern:$0x73625140] }
  0xa2   :  { %v1121_v57 = vmul.f32 %v3810_v43, %v445_v47  ;;  %v1122_v58 = vmul.f32 %v3813_v44, %v446_v48  ;;  %v1123_v62 = vmul.f32 %v3816_v45, %v447_v49  ;;  %1417 = vst [vmem:[#allocation1] ss:$4 sm:$0xff] %v1120_v50  ;;  %v687_v48 = vpop.permute.xlu2 %686 }
  0xa3   :  { %v284_v63 = vpop.f32.mrf.mxu0  ;;  %v3866_v50 = vperm.slane %v687_v48, %v3739_v51  ;;  %1644 = vst.msk [vmem:[#allocation2 + $0x10] sm:$0x3f] %vm1641_vm1, %v3819_v55 }
  0xa4   :  { %1418 = vst [vmem:[#allocation1 + $0x1] ss:$4 sm:$0xff] %v1121_v57  ;;  %v285_v0 = vadd.f32 %v3744_v52, %v284_v63  ;;  %v3872_v63 = vperm.slane %v687_v48, %v3748_v54 }
  0xa5   :  { %v3825_v2 = vld.sshfl [vmem:[#allocation1 + $0x20] sm:$0xff pattern:$0x73625140]  ;;  %1419 = vst [vmem:[#allocation1 + $0x2] ss:$4 sm:$0xff] %v1122_v58  ;;  %v691_v58 = vpop.permute.xlu0 %690 }
  0xa6   :  { %1421 = vst [vmem:[#allocation1 + $0x20] ss:$4 sm:$0xff] %v1123_v62  ;;  %v368_v6 = vmax.f32 %v285_v0, 0.0  ;;  %v3869_v62 = vperm.slane %v687_v48, %v3746_v53  ;;  %v3875_v0 = vperm.slane %v691_v58, %v3739_v51 }
  0xa7   :  { %1645 = vst.msk [vmem:[#allocation2 + $0x18] sm:$0x3f] %vm1641_vm1, %v3825_v2 }
  0xa8   :  { %v448_v9 = vrot.slane %v368_v6, 2  ;;  %v449_v13 = vrot.slane %v368_v6, 4  ;;  %v450_v14 = vrot.slane %v368_v6, 6  ;;  %v1124_v15 = vmul.f32 %v3831_v4, %v368_v6 }
  0xaa   :  { %v1125_v16 = vmul.f32 %v3834_v5, %v448_v9  ;;  %v1126_v17 = vmul.f32 %v3828_v3, %v449_v13  ;;  %v1127_v18 = vmul.f32 %v3837_v7, %v450_v14  ;;  %1422 = vst [vmem:[#allocation1 + $0x21] ss:$4 sm:$0xff] %v1124_v15  ;;  %v699_v38 = vpop.permute.xlu2 %698 }
  0xab   :  { %v286_v19 = vpop.f32.mrf.mxu0 }
  0xac   :  { %v3843_v20 = vld.sshfl [vmem:[#allocation1] sm:$0xff pattern:$0x73625140]  ;;  %1423 = vst [vmem:[#allocation1 + $0x22] ss:$4 sm:$0xff] %v1125_v16  ;;  %v287_v21 = vadd.f32 %v3744_v52, %v286_v19 }
  0xad   :  { %1425 = vst [vmem:[#allocation1] ss:$4 sm:$0xff] %v1126_v17 }
  0xae   :  { %1426 = vst [vmem:[#allocation1 + $0x1] ss:$4 sm:$0xff] %v1127_v18  ;;  %v369_v32 = vmax.f32 %v287_v21, 0.0 }
  0xaf   :  { %1646 = vst.msk [vmem:[#allocation2 + $0x20] sm:$0x3f] %vm1641_vm1, %v3843_v20 }
  0xb0   :  { %v451_v34 = vrot.slane %v369_v32, 2  ;;  %v452_v35 = vrot.slane %v369_v32, 4  ;;  %v453_v36 = vrot.slane %v369_v32, 6  ;;  %v1128_v37 = vmul.f32 %v3847_v22, %v369_v32 }
  0xb1   :  { %v3885_v32 = vperm.slane %v691_v58, %v3746_v53 }
  0xb2   :  { %v1129_v41 = vmul.f32 %v3850_v26, %v451_v34  ;;  %v1130_v42 = vmul.f32 %v3853_v30, %v452_v35  ;;  %v1131_v46 = vmul.f32 %v3856_v31, %v453_v36  ;;  %1427 = vst [vmem:[#allocation1 + $0x2] ss:$4 sm:$0xff] %v1128_v37  ;;  %v3888_v35 = vperm.slane %v691_v58, %v3748_v54 }
  0xb3   :  { %v289_v33 = vpop.f32.mrf.mxu0  ;;  %v3859_v39 = vld.sshfl [vmem:[#allocation1 + $0x20] sm:$0xff pattern:$0x73625140] }
  0xb4   :  { %1429 = vst [vmem:[#allocation1 + $0x20] ss:$4 sm:$0xff] %v1129_v41  ;;  %v290_v49 = vadd.f32 %v3744_v52, %v289_v33  ;;  %v695_v33 = vpop.permute.xlu1 %694 }
  0xb5   :  { %1430 = vst [vmem:[#allocation1 + $0x21] ss:$4 sm:$0xff] %v1130_v42  ;;  %v3891_v36 = vperm.slane %v695_v33, %v3739_v51  ;;  %v3894_v37 = vperm.slane %v695_v33, %v3746_v53 }
  0xb6   :  { %1431 = vst [vmem:[#allocation1 + $0x22] ss:$4 sm:$0xff] %v1131_v46  ;;  %v370_v57 = vmax.f32 %v290_v49, 0.0 }
  0xb7   :  { %1647 = vst.msk [vmem:[#allocation2 + $0x28] sm:$0x3f] %vm1641_vm1, %v3859_v39 }
  0xb8   :  { %v454_v6 = vrot.slane %v370_v57, 2  ;;  %v455_v9 = vrot.slane %v370_v57, 4  ;;  %v456_v13 = vrot.slane %v370_v57, 6  ;;  %v1132_v14 = vmul.f32 %v3866_v50, %v370_v57 }
  0xb9   :  { %v1428_v1 = vld.sshfl [vmem:[#allocation1] sm:$0xff pattern:$0x73625140] }
  0xba   :  { %v1133_v16 = vmul.f32 %v3869_v62, %v454_v6  ;;  %v1134_v17 = vmul.f32 %v3872_v63, %v455_v9  ;;  %v1135_v18 = vmul.f32 %v3875_v0, %v456_v13  ;;  %1433 = vst [vmem:[#allocation1] ss:$4 sm:$0xff] %v1132_v14  ;;  %v3910_v9 = vperm.slane %v695_v33, %v3748_v54  ;;  %v3928_v33 = vpop.f32.mrf.mxu1 }
  0xbb   :  { %v291_v47 = vpop.f32.mrf.mxu0  ;;  %v3914_v13 = vperm.slane %v699_v38, %v3739_v51  ;;  %1648 = vst.msk [vmem:[#allocation2 + $0x30] sm:$0x3f] %vm1641_vm1, %v1428_v1 }
  0xbc   :  { %1434 = vst [vmem:[#allocation1 + $0x1] ss:$4 sm:$0xff] %v1133_v16  ;;  %v292_v21 = vadd.f32 %v3744_v52, %v291_v47 }
  0xbd   :  { %v3881_v19 = vld.sshfl [vmem:[#allocation1 + $0x20] sm:$0xff pattern:$0x73625140]  ;;  %1435 = vst [vmem:[#allocation1 + $0x2] ss:$4 sm:$0xff] %v1134_v17 }
  0xbe   :  { %1437 = vst [vmem:[#allocation1 + $0x20] ss:$4 sm:$0xff] %v1135_v18  ;;  %v371_v25 = vmax.f32 %v292_v21, 0.0  ;;  %v3917_v18 = vperm.slane %v699_v38, %v3746_v53  ;;  %v3923_v21 = vperm.slane %v699_v38, %v3748_v54 }
  0xbf   :  { %1649 = vst.msk [vmem:[#allocation2 + $0x38] sm:$0x3f] %vm1641_vm1, %v3881_v19 }
  0xc0   :  { %v457_v42 = vrot.slane %v371_v25, 2  ;;  %v458_v46 = vrot.slane %v371_v25, 4  ;;  %v459_v47 = vrot.slane %v371_v25, 6  ;;  %v1136_v48 = vmul.f32 %v3885_v32, %v371_v25 }
  0xc2   :  { %v1137_v57 = vmul.f32 %v3888_v35, %v457_v42  ;;  %v1138_v58 = vmul.f32 %v3891_v36, %v458_v46  ;;  %v1139_v6 = vmul.f32 %v3894_v37, %v459_v47  ;;  %1438 = vst [vmem:[#allocation1 + $0x21] ss:$4 sm:$0xff] %v1136_v48  ;;  %v703_v42 = vpop.permute.xlu0 %702  ;;  %v3960_v19 = vpop.f32.mrf.mxu1 }
  0xc3   :  { %v294_v15 = vpop.f32.mrf.mxu0  ;;  %v3935_v20 = vperm.slane %v703_v42, %v3739_v51  ;;  %v3938_v39 = vperm.slane %v703_v42, %v3746_v53 }
  0xc4   :  { %v295_v41 = vadd.f32 %v3744_v52, %v294_v15  ;;  %v1436_v49 = vld.sshfl [vmem:[#allocation1] sm:$0xff pattern:$0x73625140]  ;;  %1439 = vst [vmem:[#allocation1 + $0x22] ss:$4 sm:$0xff] %v1137_v57 }
  0xc5   :  { %1441 = vst [vmem:[#allocation1] ss:$4 sm:$0xff] %v1138_v58 }
  0xc6   :  { %v372_v24 = vmax.f32 %v295_v41, 0.0  ;;  %1442 = vst [vmem:[#allocation1 + $0x1] ss:$4 sm:$0xff] %v1139_v6 }
  0xc7   :  { %5139 = vst [vmem:[#allocation4_spill] sm:$0xff] %v3935_v20 }
  0xc8   :  { %v460_v14 = vrot.slane %v372_v24, 2  ;;  %v461_v15 = vrot.slane %v372_v24, 4  ;;  %v462_v16 = vrot.slane %v372_v24, 6  ;;  %v1140_v2 = vmul.f32 %v3910_v9, %v372_v24  ;;  %5140 = vst [vmem:[#allocation5_spill] sm:$0xff] %v3938_v39 }
  0xc9   :  { %v3941_v24 = vperm.slane %v703_v42, %v3748_v54  ;;  %1650 = vst.msk [vmem:[#allocation2 + $0x40] sm:$0x3f] %vm1641_vm1, %v1436_v49 }
  0xca   :  { %v1141_v25 = vmul.f32 %v3914_v13, %v460_v14  ;;  %1443 = vst [vmem:[#allocation1 + $0x2] ss:$4 sm:$0xff] %v1140_v2  ;;  %v1143_v46 = vmul.f32 %v3923_v21, %v462_v16 }
  0xcb   :  { %v296_v34 = vpop.f32.mrf.mxu0  ;;  %v1440_v48 = vld.sshfl [vmem:[#allocation1 + $0x20] sm:$0xff pattern:$0x73625140]  ;;  %5141 = vst [vmem:[#allocation6_spill] sm:$0xff] %v3941_v24 }
  0xcc   :  { %v297_v55 = vadd.f32 %v3744_v52, %v296_v34  ;;  %v1142_v34 = vmul.f32 %v3917_v18, %v461_v15  ;;  %1445 = vst [vmem:[#allocation1 + $0x20] ss:$4 sm:$0xff] %v1141_v25  ;;  %v707_v15 = vpop.permute.xlu1 %706 }
  0xcd   :  { %1447 = vst [vmem:[#allocation1 + $0x22] ss:$4 sm:$0xff] %v1143_v46  ;;  %v3957_v42 = vperm.slane %v707_v15, %v3748_v54 }
  0xce   :  { %v373_v41 = vmax.f32 %v297_v55, 0.0  ;;  %1446 = vst [vmem:[#allocation1 + $0x21] ss:$4 sm:$0xff] %v1142_v34  ;;  %v3953_v34 = vperm.slane %v707_v15, %v3746_v53 }
  0xcf   :  { %5144 = vst [vmem:[#allocation9_spill] sm:$0xff] %v3957_v42 }
  0xd0   :  { %v463_v57 = vrot.slane %v373_v41, 2  ;;  %v464_v58 = vrot.slane %v373_v41, 4  ;;  %v1144_v38 = vmul.f32 %v3935_v20, %v373_v41  ;;  %v465_v55 = vrot.slane %v373_v41, 6  ;;  %5143 = vst [vmem:[#allocation8_spill] sm:$0xff] %v3953_v34 }
  0xd1   :  { %v1444_v2 = vld.sshfl [vmem:[#allocation1] sm:$0xff pattern:$0x73625140]  ;;  %1651 = vst.msk [vmem:[#allocation2 + $0x48] sm:$0x3f] %vm1641_vm1, %v1440_v48 }
  0xd2   :  { %v1145_v1 = vmul.f32 %v3938_v39, %v463_v57  ;;  %v1146_v16 = vmul.f32 %v3941_v24, %v464_v58  ;;  %1449 = vst [vmem:[#allocation1] ss:$4 sm:$0xff] %v1144_v38  ;;  %v711_v58 = vpop.permute.xlu2 %710 }
  0xd3   :  { %v299_v17 = vpop.f32.mrf.mxu0  ;;  %v3966_v38 = vperm.slane %v711_v58, %v3739_v51  ;;  %1652 = vst.msk [vmem:[#allocation2 + $0x50] sm:$0x3f] %vm1641_vm1, %v1444_v2 }
  0xd4   :  { %v300_v47 = vadd.f32 %v3744_v52, %v299_v17  ;;  %v3949_v17 = vperm.slane %v707_v15, %v3739_v51  ;;  %1450 = vst [vmem:[#allocation1 + $0x1] ss:$4 sm:$0xff] %v1145_v1  ;;  %v3972_v15 = vperm.slane %v711_v58, %v3748_v54 }
  0xd5   :  { %1451 = vst [vmem:[#allocation1 + $0x2] ss:$4 sm:$0xff] %v1146_v16 }
  0xd6   :  { %v374_v6 = vmax.f32 %v300_v47, 0.0  ;;  %5142 = vst [vmem:[#allocation7_spill] sm:$0xff] %v3949_v17  ;;  %v1147_v46 = vmul.f32 %v3949_v17, %v465_v55  ;;  %v3969_v55 = vperm.slane %v711_v58, %v3746_v53 }
  0xd7   :  { %5146 = vst [vmem:[#allocation11_spill] sm:$0xff] %v3972_v15 }
  0xd8   :  { %v466_v25 = vrot.slane %v374_v6, 2  ;;  %v467_v47 = vrot.slane %v374_v6, 4  ;;  %v1148_v57 = vmul.f32 %v3953_v34, %v374_v6  ;;  %v468_v49 = vrot.slane %v374_v6, 6  ;;  %5145 = vst [vmem:[#allocation10_spill] sm:$0xff] %v3969_v55 }
  0xda   :  { %v1149_v24 = vmul.f32 %v3957_v42, %v466_v25  ;;  %v1150_v16 = vmul.f32 %v3966_v38, %v467_v47  ;;  %v1151_v25 = vmul.f32 %v3969_v55, %v468_v49  ;;  %v719_v49 = vpop.permute.xlu1 %718 }
  0xdb   :  { %v301_v14 = vpop.f32.mrf.mxu0 }
  0xdc   :  { %v302_v41 = vadd.f32 %v3744_v52, %v301_v14  ;;  %v1448_v14 = vld.sshfl [vmem:[#allocation1 + $0x20] sm:$0xff pattern:$0x73625140] }
  0xdd   :  { %1453 = vst [vmem:[#allocation1 + $0x20] ss:$4 sm:$0xff] %v1147_v46  ;;  %v1452_v58 = vld.sshfl [vmem:[#allocation1] sm:$0xff pattern:$0x73625140] }
  0xde   :  { %v375_v39 = vmax.f32 %v302_v41, 0.0  ;;  %1454 = vst [vmem:[#allocation1 + $0x21] ss:$4 sm:$0xff] %v1148_v57  ;;  %v715_v41 = vpop.permute.xlu0 %714 }
  0xdf   :  { %1455 = vst [vmem:[#allocation1 + $0x22] ss:$4 sm:$0xff] %v1149_v24  ;;  %v3980_v46 = vperm.slane %v715_v41, %v3739_v51  ;;  %v3984_v47 = vperm.slane %v715_v41, %v3746_v53  ;;  %v3987_v24 = vperm.slane %v715_v41, %v3748_v54 }
  0xe0   :  { %v469_v48 = vrot.slane %v375_v39, 2  ;;  %v470_v42 = vrot.slane %v375_v39, 4  ;;  %v471_v34 = vrot.slane %v375_v39, 6  ;;  %v1152_v17 = vmul.f32 %v3972_v15, %v375_v39  ;;  %1653 = vst.msk [vmem:[#allocation2 + $0x58] sm:$0x3f] %vm1641_vm1, %v1448_v14  ;;  %v3990_v39 = vpop.f32.mrf.mxu1 }
  0xe1   :  { %5147 = vst [vmem:[#allocation12_spill] sm:$0xff] %v3980_v46 }
  0xe2   :  { %5148 = vst [vmem:[#allocation13_spill] sm:$0xff] %v3984_v47  ;;  %v1153_v57 = vmul.f32 %v3980_v46, %v469_v48  ;;  %v1154_v2 = vmul.f32 %v3984_v47, %v470_v42  ;;  %v4000_v48 = vperm.slane %v719_v49, %v3746_v53  ;;  %v723_v47 = vpop.permute.xlu2 %722 }
  0xe3   :  { %v304_v1 = vpop.f32.mrf.mxu0  ;;  %1457 = vst [vmem:[#allocation1] ss:$4 sm:$0xff] %v1150_v16  ;;  %v3996_v16 = vperm.slane %v719_v49, %v3739_v51 }
  0xe4   :  { %v305_v6 = vadd.f32 %v3744_v52, %v304_v1  ;;  %5149 = vst [vmem:[#allocation14_spill] sm:$0xff] %v3987_v24  ;;  %v1155_v1 = vmul.f32 %v3987_v24, %v471_v34 }
  0xe5   :  { %1458 = vst [vmem:[#allocation1 + $0x1] ss:$4 sm:$0xff] %v1151_v25 }
  0xe6   :  { %v376_v20 = vmax.f32 %v305_v6, 0.0  ;;  %1459 = vst [vmem:[#allocation1 + $0x2] ss:$4 sm:$0xff] %v1152_v17  ;;  %v1456_v41 = vld.sshfl [vmem:[#allocation1 + $0x20] sm:$0xff pattern:$0x73625140]  ;;  %v4003_v17 = vperm.slane %v719_v49, %v3748_v54  ;;  %v4015_v49 = vperm.slane %v723_v47, %v3746_v53 }
  0xe7   :  { %1654 = vst.msk [vmem:[#allocation2 + $0x60] sm:$0x3f] %vm1641_vm1, %v1452_v58 }
  0xe8   :  { %v472_v6 = vrot.slane %v376_v20, 2  ;;  %5150 = vst [vmem:[#allocation15_spill] sm:$0xff] %v3996_v16  ;;  %v473_v15 = vrot.slane %v376_v20, 4  ;;  %v1156_v34 = vmul.f32 %v3996_v16, %v376_v20  ;;  %v474_v58 = vrot.slane %v376_v20, 6 }
  0xe9   :  { %5151 = vst [vmem:[#allocation16_spill] sm:$0xff] %v4000_v48  ;;  %v4018_v20 = vperm.slane %v723_v47, %v3748_v54 }
  0xea   :  { %1461 = vst [vmem:[#allocation1 + $0x20] ss:$4 sm:$0xff] %v1153_v57  ;;  %v1157_v24 = vmul.f32 %v4000_v48, %v472_v6  ;;  %v1158_v46 = vmul.f32 %v4003_v17, %v473_v15  ;;  %v316_v6 = vpop.f32.mrf.mxu1 }
  0xeb   :  { %v306_v14 = vpop.f32.mrf.mxu0  ;;  %5152 = vst [vmem:[#allocation17_spill] sm:$0xff] %v4003_v17 }
  0xec   :  { %v307_v25 = vadd.f32 %v3744_v52, %v306_v14  ;;  %1462 = vst [vmem:[#allocation1 + $0x21] ss:$4 sm:$0xff] %v1154_v2  ;;  %v4010_v14 = vperm.slane %v723_v47, %v3739_v51  ;;  %v310_v2 = vadd.f32 %v3744_v52, %v3928_v33 }
  0xed   :  { %1463 = vst [vmem:[#allocation1 + $0x22] ss:$4 sm:$0xff] %v1155_v1  ;;  %v1460_v57 = vld.sshfl [vmem:[#allocation1] sm:$0xff pattern:$0x73625140] }
  0xee   :  { %v377_v42 = vmax.f32 %v307_v25, 0.0  ;;  %1655 = vst.msk [vmem:[#allocation2 + $0x68] sm:$0x3f] %vm1641_vm1, %v1456_v41  ;;  %v1159_v1 = vmul.f32 %v4010_v14, %v474_v58  ;;  %v727_v41 = vpop.permute.xlu0 %726  ;;  %v378_v33 = vmax.f32 %v310_v2, 0.0  ;;  %v731_v58 = vpop.permute.xlu1 %730 }
  0xef   :  { %5153 = vst [vmem:[#allocation18_spill] sm:$0xff] %v4015_v49  ;;  %v4025_v48 = vperm.slane %v727_v41, %v3748_v54  ;;  %v4028_v16 = vperm.slane %v727_v41, %v3739_v51 }
  0xf0   :  { %v475_v55 = vrot.slane %v377_v42, 2  ;;  %1465 = vst [vmem:[#allocation1] ss:$4 sm:$0xff] %v1156_v34  ;;  %v1160_v15 = vmul.f32 %v4015_v49, %v377_v42  ;;  %v476_v25 = vrot.slane %v377_v42, 4  ;;  %v477_v47 = vrot.slane %v377_v42, 6 }
  0xf1   :  { %5154 = vst [vmem:[#allocation19_spill] sm:$0xff] %v4018_v20  ;;  %v312_v42 = vadd.f32 %v3744_v52, %v3960_v19  ;;  %v478_v2 = vrot.slane %v378_v33, 2  ;;  %v315_v19 = vadd.f32 %v3744_v52, %v3990_v39 }
  0xf2   :  { %1466 = vst [vmem:[#allocation1 + $0x1] ss:$4 sm:$0xff] %v1157_v24  ;;  %v1161_v17 = vmul.f32 %v4018_v20, %v475_v55  ;;  %v1162_v24 = vmul.f32 %v4028_v16, %v476_v25  ;;  %v1164_v55 = vmul.f32 %v4025_v48, %v378_v33  ;;  %v479_v20 = vrot.slane %v378_v33, 4 }
  0xf3   :  { %1467 = vst [vmem:[#allocation1 + $0x2] ss:$4 sm:$0xff] %v1158_v46  ;;  %v4031_v46 = vperm.slane %v727_v41, %v3746_v53  ;;  %v4046_v25 = vperm.slane %v731_v58, %v3748_v54 }
  0xf4   :  { %1656 = vst.msk [vmem:[#allocation2 + $0x70] sm:$0x3f] %vm1641_vm1, %v1460_v57  ;;  %v1464_v34 = vld.sshfl [vmem:[#allocation1 + $0x20] sm:$0xff pattern:$0x73625140] }
  0xf5   :  { %5155 = vst [vmem:[#allocation20_spill] sm:$0xff] %v4025_v48  ;;  %v1163_v57 = vmul.f32 %v4031_v46, %v477_v47  ;;  %v319_v47 = vpop.f32.mrf.mxu1 }
  0xf6   :  { %5156 = vst [vmem:[#allocation21_spill] sm:$0xff] %v4028_v16 }
  0xf7   :  { %1469 = vst [vmem:[#allocation1 + $0x20] ss:$4 sm:$0xff] %v1159_v1  ;;  %v4040_v1 = vperm.slane %v731_v58, %v3739_v51 }
  0xf8   :  { %5157 = vst [vmem:[#allocation22_spill] sm:$0xff] %v4031_v46  ;;  %v735_v46 = vpop.permute.xlu2 %734 }
  0xf9   :  { %1470 = vst [vmem:[#allocation1 + $0x21] ss:$4 sm:$0xff] %v1160_v15  ;;  %v4043_v15 = vperm.slane %v731_v58, %v3746_v53  ;;  %v1165_v48 = vmul.f32 %v4040_v1, %v478_v2  ;;  %v380_v2 = vmax.f32 %v315_v19, 0.0 }
  0xfa   :  { %1471 = vst [vmem:[#allocation1 + $0x22] ss:$4 sm:$0xff] %v1161_v17  ;;  %v1468_v41 = vld.sshfl [vmem:[#allocation1] sm:$0xff pattern:$0x73625140]  ;;  %v480_v17 = vrot.slane %v378_v33, 6 }
  0xfb   :  { %1657 = vst.msk [vmem:[#allocation2 + $0x78] sm:$0x3f] %vm1641_vm1, %v1464_v34  ;;  %v379_v34 = vmax.f32 %v312_v42, 0.0  ;;  %v1166_v16 = vmul.f32 %v4043_v15, %v479_v20  ;;  %v4061_v42 = vperm.slane %v735_v46, %v3748_v54  ;;  %v485_v49 = vrot.slane %v380_v2, 4 }
  0xfc   :  { %5158 = vst [vmem:[#allocation23_spill] sm:$0xff] %v4040_v1  ;;  %v1167_v33 = vmul.f32 %v4046_v25, %v480_v17  ;;  %v4068_v1 = vpop.f32.mrf.mxu2 }
  0xfd   :  { %5159 = vst [vmem:[#allocation24_spill] sm:$0xff] %v4043_v15  ;;  %v481_v58 = vrot.slane %v379_v34, 2  ;;  %v482_v39 = vrot.slane %v379_v34, 4 }
  0xfe   :  { %1475 = vst [vmem:[#allocation1 + $0x2] ss:$4 sm:$0xff] %v1164_v55  ;;  %v4054_v55 = vperm.slane %v735_v46, %v3739_v51 }
  0xff   :  { %5160 = vst [vmem:[#allocation25_spill] sm:$0xff] %v4046_v25 }
 0x100   :  { %1473 = vst [vmem:[#allocation1] ss:$4 sm:$0xff] %v1162_v24  ;;  %v4058_v24 = vperm.slane %v735_v46, %v3746_v53  ;;  %v1168_v20 = vmul.f32 %v4054_v55, %v379_v34  ;;  %v1170_v46 = vmul.f32 %v4061_v42, %v482_v39 }
 0x101   :  { %1474 = vst [vmem:[#allocation1 + $0x1] ss:$4 sm:$0xff] %v1163_v57  ;;  %v739_v57 = vpop.permute.xlu0 %738 }
 0x102   :  { %1658 = vst.msk [vmem:[#allocation2 + $0x80] sm:$0x3f] %vm1641_vm1, %v1468_v41  ;;  %v483_v41 = vrot.slane %v379_v34, 6  ;;  %v4065_v15 = vperm.slane %v739_v57, %v3739_v51  ;;  %v1169_v17 = vmul.f32 %v4058_v24, %v481_v58  ;;  %v4075_v19 = vperm.slane %v739_v57, %v3748_v54 }
 0x103   :  { %5161 = vst [vmem:[#allocation26_spill] sm:$0xff] %v4054_v55  ;;  %v317_v34 = vadd.f32 %v3744_v52, %v316_v6 }
 0x104   :  { %5162 = vst [vmem:[#allocation27_spill] sm:$0xff] %v4058_v24  ;;  %v1171_v58 = vmul.f32 %v4065_v15, %v483_v41  ;;  %v321_v24 = vpop.f32.mrf.mxu1 }
 0x105   :  { %1477 = vst [vmem:[#allocation1 + $0x20] ss:$4 sm:$0xff] %v1165_v48  ;;  %v4071_v48 = vperm.slane %v739_v57, %v3746_v53  ;;  %v381_v6 = vmax.f32 %v317_v34, 0.0  ;;  %v4098_v34 = vpop.f32.mrf.mxu2 }
 0x106   :  { %5163 = vst [vmem:[#allocation28_spill] sm:$0xff] %v4061_v42  ;;  %v486_v42 = vrot.slane %v380_v2, 6 }
 0x107   :  { %1478 = vst [vmem:[#allocation1 + $0x21] ss:$4 sm:$0xff] %v1166_v16  ;;  %v484_v16 = vrot.slane %v380_v2, 2  ;;  %v1172_v55 = vmul.f32 %v4071_v48, %v380_v2  ;;  %v487_v2 = vrot.slane %v381_v6, 2 }
 0x108   :  { %1479 = vst [vmem:[#allocation1 + $0x22] ss:$4 sm:$0xff] %v1167_v33  ;;  %v1476_v25 = vld.sshfl [vmem:[#allocation1] sm:$0xff pattern:$0x73625140]  ;;  %v743_v33 = vpop.permute.xlu1 %742 }
 0x109   :  { %5164 = vst [vmem:[#allocation29_spill] sm:$0xff] %v4065_v15  ;;  %v4082_v39 = vperm.slane %v743_v33, %v3739_v51  ;;  %v1173_v57 = vmul.f32 %v4075_v19, %v484_v16  ;;  %v4089_v41 = vperm.slane %v743_v33, %v3748_v54  ;;  %v488_v15 = vrot.slane %v381_v6, 4 }
 0x10a   :  { %5165 = vst [vmem:[#allocation30_spill] sm:$0xff] %v4071_v48 }
 0x10b   :  { %1481 = vst [vmem:[#allocation1] ss:$4 sm:$0xff] %v1168_v20  ;;  %v1174_v48 = vmul.f32 %v4082_v39, %v485_v49  ;;  %v489_v49 = vrot.slane %v381_v6, 6 }
 0x10c   :  { %5166 = vst [vmem:[#allocation31_spill] sm:$0xff] %v4075_v19 }
 0x10d   :  { %1482 = vst [vmem:[#allocation1 + $0x1] ss:$4 sm:$0xff] %v1169_v17  ;;  %v4086_v17 = vperm.slane %v743_v33, %v3746_v53  ;;  %v1176_v33 = vmul.f32 %v4089_v41, %v381_v6 }
 0x10e   :  { %1483 = vst [vmem:[#allocation1 + $0x2] ss:$4 sm:$0xff] %v1170_v46  ;;  %v747_v46 = vpop.permute.xlu2 %746 }
 0x10f   :  { %1660 = vst.msk [vmem:[#allocation2 + $0x90] sm:$0x3f] %vm1641_vm1, %v1476_v25  ;;  %v1480_v20 = vld.sshfl [vmem:[#allocation1 + $0x20] sm:$0xff pattern:$0x73625140]  ;;  %v320_v25 = vadd.f32 %v3744_v52, %v319_v47  ;;  %v1175_v16 = vmul.f32 %v4086_v17, %v486_v42  ;;  %v4096_v19 = vperm.slane %v747_v46, %v3739_v51  ;;  %v322_v51 = vadd.f32 %v3744_v52, %v321_v24  ;;  %v324_v42 = vpop.f32.mrf.mxu1 }
 0x110   :  { %5167 = vst [vmem:[#allocation32_spill] sm:$0xff] %v4086_v17 }
 0x111   :  { %1485 = vst [vmem:[#allocation1 + $0x20] ss:$4 sm:$0xff] %v1171_v58  ;;  %v382_v47 = vmax.f32 %v320_v25, 0.0 }
 0x112   :  { %5168 = vst [vmem:[#allocation33_spill] sm:$0xff] %v4089_v41 }
 0x113   :  { %1486 = vst [vmem:[#allocation1 + $0x21] ss:$4 sm:$0xff] %v1172_v55  ;;  %v4102_v55 = vperm.slane %v747_v46, %v3746_v53  ;;  %v490_v53 = vrot.slane %v382_v47, 2  ;;  %v491_v6 = vrot.slane %v382_v47, 4  ;;  %v492_v24 = vrot.slane %v382_v47, 6 }
 0x114   :  { %1487 = vst [vmem:[#allocation1 + $0x22] ss:$4 sm:$0xff] %v1173_v57  ;;  %v1177_v57 = vmul.f32 %v4096_v19, %v487_v2  ;;  %v4115_v2 = vpop.f32.mrf.mxu2 }
 0x115   :  { %1661 = vst.msk [vmem:[#allocation2 + $0x98] sm:$0x3f] %vm1641_vm1, %v1480_v20  ;;  %v1484_v58 = vld.sshfl [vmem:[#allocation1] sm:$0xff pattern:$0x73625140]  ;;  %v4105_v20 = vperm.slane %v747_v46, %v3748_v54  ;;  %v1178_v41 = vmul.f32 %v4102_v55, %v488_v15  ;;  %v383_v54 = vmax.f32 %v322_v51, 0.0  ;;  %v1180_v46 = vmul.f32 %v3751_v56, %v382_v47 }
 0x116   :  { %5169 = vst [vmem:[#allocation34_spill] sm:$0xff] %v4102_v55  ;;  %v1181_v25 = vmul.f32 %v3755_v59, %v490_v53  ;;  %v1182_v15 = vmul.f32 %v3758_v60, %v491_v6  ;;  %v330_v59 = vadd.f32 %v3744_v52, %v4068_v1 }
 0x117   :  { %1489 = vst [vmem:[#allocation1] ss:$4 sm:$0xff] %v1174_v48  ;;  %v1179_v48 = vmul.f32 %v4105_v20, %v489_v49  ;;  %v326_v49 = vpop.f32.mrf.mxu1  ;;  %v494_v56 = vrot.slane %v383_v54, 4  ;;  %v495_v47 = vrot.slane %v383_v54, 6 }
 0x118   :  { %5170 = vst [vmem:[#allocation35_spill] sm:$0xff] %v4105_v20  ;;  %v4138_v53 = vmax.f32 %v330_v59, 0.0 }
 0x119   :  { %1490 = vst [vmem:[#allocation1 + $0x1] ss:$4 sm:$0xff] %v1175_v16  ;;  %v1186_v1 = vmul.f32 %v3772_v10, %v494_v56 }
 0x11a   :  { %1491 = vst [vmem:[#allocation1 + $0x2] ss:$4 sm:$0xff] %v1176_v33  ;;  %v325_v33 = vadd.f32 %v3744_v52, %v324_v42  ;;  %v3481_v42 = vld [vmem:[%s5098_s6 + $0x18] sm:$0xff] }
 0x11b   :  { %1662 = vst.msk [vmem:[#allocation2 + $0xa0] sm:$0x3f] %vm1641_vm1, %v1484_v58  ;;  %v1488_v17 = vld.sshfl [vmem:[#allocation1 + $0x20] sm:$0xff pattern:$0x73625140]  ;;  %v493_v58 = vrot.slane %v383_v54, 2  ;;  %2420 = vmatpush.bf16.msrb.mxu1 %v3481_v42 }
 0x11c   :  { %1493 = vst [vmem:[#allocation1 + $0x20] ss:$4 sm:$0xff] %v1177_v57  ;;  %v384_v51 = vmax.f32 %v325_v33, 0.0  ;;  %v1724_v57 = vld [vmem:[#allocation2 + $0x40] sm:$0xf] }
 0x11d   :  { %1494 = vst [vmem:[#allocation1 + $0x21] ss:$4 sm:$0xff] %v1178_v41  ;;  %v1183_v41 = vmul.f32 %v3761_v61, %v492_v24  ;;  %v1185_v60 = vmul.f32 %v3778_v12, %v493_v58  ;;  %v327_v61 = vadd.f32 %v3744_v52, %v326_v49  ;;  %v4136_v12 = vld [vmem:[%s5096_s4] sm:$0xff]  ;;  %v4144_v24 = vpop.f32.mrf.mxu2  ;;  %v332_v49 = vadd.f32 %v3744_v52, %v4098_v34 }
 0x11e   :  { %1495 = vst [vmem:[#allocation1 + $0x22] ss:$4 sm:$0xff] %v1179_v48  ;;  %v1187_v48 = vmul.f32 %v3775_v11, %v495_v47  ;;  %v496_v6 = vrot.slane %v384_v51, 2  ;;  %v1188_v10 = vmul.f32 %v3785_v23, %v384_v51  ;;  %v498_v58 = vrot.slane %v384_v51, 6  ;;  %v3479_v11 = vld [vmem:[%s5098_s6 + $0x8] sm:$0xff]  ;;  %v3478_v34 = vld [vmem:[%s5098_s6] sm:$0xff] }
 0x11f   :  { %1663 = vst.msk [vmem:[#allocation2 + $0xa8] sm:$0x3f] %vm1641_vm1, %v1488_v17  ;;  %v1184_v17 = vmul.f32 %v3768_v8, %v383_v54  ;;  %v3480_v8 = vld [vmem:[%s5098_s6 + $0x10] sm:$0xff]  ;;  %v4153_v33 = vperm.slane %v4136_v12, 0  ;;  %v1707_v47 = vld [vmem:[#allocation2 + $0x18] sm:$0xf] }
 0x120   :  { %1501 = vst [vmem:[#allocation1 + $0x20] ss:$4 sm:$0xff] %v1183_v41  ;;  %2421 = vmatpush.bf16.msrb.mxu1 %v3480_v8  ;;  %v1725_v23 = vld [vmem:[#allocation2 + $0x48] sm:$0xf]  ;;  %v1189_v59 = vmul.f32 %v3791_v27, %v496_v6  ;;  %v1749_v8 = vld [vmem:[#allocation2 + $0x11] sm:$0xf]  ;;  %v1191_v52 = vmul.f32 %v3797_v29, %v498_v58 }
 0x121   :  { %v1492_v16 = vld.sshfl [vmem:[#allocation1] sm:$0xff pattern:$0x73625140]  ;;  %1502 = vst [vmem:[#allocation1 + $0x21] ss:$4 sm:$0xff] %v1184_v17  ;;  %v4174_v6 = vmax.f32 %v332_v49, 0.0 }
 0x122   :  { %1497 = vst [vmem:[#allocation1] ss:$4 sm:$0xff] %v1180_v46  ;;  %v4142_v46 = vperm.slane %v4136_v12, 1  ;;  %v1722_v27 = vld [vmem:[#allocation2 + $0x30] sm:$0xf] }
 0x123   :  { %1498 = vst [vmem:[#allocation1 + $0x1] ss:$4 sm:$0xff] %v1181_v25  ;;  %v497_v25 = vrot.slane %v384_v51, 4  ;;  %v1750_v49 = vld [vmem:[#allocation2 + $0x19] sm:$0xf] }
 0x124   :  { %1499 = vst [vmem:[#allocation1 + $0x2] ss:$4 sm:$0xff] %v1182_v15  ;;  %v1706_v15 = vld [vmem:[#allocation2 + $0x10] sm:$0xf]  ;;  %v1733_v41 = vmul.f32 %v4142_v46, %v1724_v57  ;;  %2422 = vmatpush.bf16.msrb.mxu1 %v3479_v11 }
 0x125   :  { %1664 = vst.msk [vmem:[#allocation2 + $0xb0] sm:$0x3f] %vm1641_vm1, %v1492_v16  ;;  %v4147_v16 = vmax.f32 %v327_v61, 0.0  ;;  %v1190_v51 = vmul.f32 %v3794_v28, %v497_v25  ;;  %v504_v28 = vrot.slane %v4138_v53, 6  ;;  %v1704_v25 = vld [vmem:[#allocation2] sm:$0xf]  ;;  %v4189_v56 = vpop.f32.mrf.mxu2 }
 0x126   :  { %1503 = vst [vmem:[#allocation1 + $0x22] ss:$4 sm:$0xff] %v1185_v60  ;;  %v1715_v60 = vmul.f32 %v4153_v33, %v1706_v15  ;;  %v1723_v15 = vld [vmem:[#allocation2 + $0x38] sm:$0xf] }
 0x127   :  { %v499_v42 = vrot.slane %v4147_v16, 2  ;;  %v501_v29 = vrot.slane %v4147_v16, 6  ;;  %v1192_v11 = vmul.f32 %v3806_v40, %v4147_v16 }
 0x128   :  { %v1741_v57 = vadd.f32 %v1733_v41, %v1715_v60  ;;  %v1731_v41 = vmul.f32 %v4142_v46, %v1722_v27  ;;  %2423 = vmatpush.bf16.msrb.mxu1 %v3478_v34 }
 0x12b   :  { %v1500_v54 = vld.sshfl [vmem:[#allocation1] sm:$0xff pattern:$0x73625140] }
 0x12c   :  { %1505 = vst [vmem:[#allocation1] ss:$4 sm:$0xff] %v1186_v1  ;;  %v1734_v1 = vmul.f32 %v4142_v46, %v1725_v23  ;;  %v1774_v23 = vld [vmem:[#allocation2 + $0x41] sm:$0xf] }
 0x12d   :  { %1506 = vst [vmem:[#allocation1 + $0x1] ss:$4 sm:$0xff] %v1187_v48  ;;  %v1504_v61 = vld.sshfl [vmem:[#allocation1 + $0x20] sm:$0xff pattern:$0x73625140]  ;;  %v4171_v48 = vperm.slane %v4136_v12, 2 }
 0x12e   :  { %1507 = vst [vmem:[#allocation1 + $0x2] ss:$4 sm:$0xff] %v1188_v10  ;;  %v1716_v10 = vmul.f32 %v4153_v33, %v1707_v47  ;;  %v4186_v47 = vperm.slane %v4136_v12, 3 }
 0x12f   :  { %1666 = vst.msk [vmem:[#allocation2 + $0xc0] sm:$0x3f] %vm1641_vm1, %v1500_v54  ;;  %v500_v54 = vrot.slane %v4147_v16, 4  ;;  %v1758_v58 = vmul.f32 %v4171_v48, %v1749_v8  ;;  %v1713_v16 = vmul.f32 %v4153_v33, %v1704_v25  ;;  %v1759_v34 = vmul.f32 %v4171_v48, %v1750_v49 }
 0x130   :  { %1509 = vst [vmem:[#allocation1 + $0x20] ss:$4 sm:$0xff] %v1189_v59  ;;  %v1193_v59 = vmul.f32 %v3810_v43, %v499_v42  ;;  %v1196_v43 = vmul.f32 %v3831_v4, %v4138_v53  ;;  %v1747_v42 = vld [vmem:[#allocation2 + $0x1] sm:$0xf]  ;;  %v1783_v27 = vmul.f32 %v4186_v47, %v1774_v23  ;;  %v4209_v23 = vperm.slane %v4136_v12, 4 }
 0x131   :  { %1510 = vst [vmem:[#allocation1 + $0x21] ss:$4 sm:$0xff] %v1190_v51  ;;  %v1705_v51 = vld [vmem:[#allocation2 + $0x8] sm:$0xf]  ;;  %v1766_v17 = vadd.f32 %v1758_v58, %v1741_v57  ;;  %v1194_v40 = vmul.f32 %v3813_v44, %v500_v54  ;;  %v4201_v57 = vld [vmem:[%s5095_s3] ss:$0 sm:$0xff]  ;;  %v1195_v54 = vmul.f32 %v3816_v45, %v501_v29  ;;  %v1739_v25 = vadd.f32 %v1731_v41, %v1713_v16 }
 0x132   :  { %1511 = vst [vmem:[#allocation1 + $0x22] ss:$4 sm:$0xff] %v1191_v52  ;;  %v1742_v52 = vadd.f32 %v1734_v1, %v1716_v10  ;;  %v1799_v1 = vld [vmem:[#allocation2 + $0x12] sm:$0xf]  ;;  %v335_v44 = vadd.f32 %v4201_v57, %v4115_v2  ;;  %v1714_v4 = vmul.f32 %v4153_v33, %v1705_v51  ;;  %v1775_v10 = vld [vmem:[#allocation2 + $0x49] sm:$0xf] }
 0x133   :  { %1667 = vst.msk [vmem:[#allocation2 + $0xc8] sm:$0x3f] %vm1641_vm1, %v1504_v61  ;;  %v1732_v61 = vmul.f32 %v4142_v46, %v1723_v15  ;;  %v1825_v15 = vld [vmem:[#allocation2 + $0x70] sm:$0xf]  ;;  %v1748_v58 = vld [vmem:[#allocation2 + $0x9] sm:$0xf]  ;;  %v1791_v49 = vadd.f32 %v1783_v27, %v1766_v17  ;;  %v1784_v17 = vmul.f32 %v4186_v47, %v1775_v10 }
 0x134   :  { %v5171_v2 = vrot.slane %v4138_v53, 2  ;;  %v506_v29 = vrot.slane %v4174_v6, 4  ;;  %v4223_v27 = vperm.slane %v4136_v12, 6  ;;  %v1826_v10 = vld [vmem:[#allocation2 + $0x78] sm:$0xf]  ;;  %v4230_v8 = vmax.f32 %v335_v44, 0.0 }
 0x135   :  { %v1508_v60 = vld.sshfl [vmem:[#allocation1] sm:$0xff pattern:$0x73625140]  ;;  %v1740_v51 = vadd.f32 %v1732_v61, %v1714_v4  ;;  %v1199_v61 = vmul.f32 %v3837_v7, %v504_v28 }
 0x136   :  { %1513 = vst [vmem:[#allocation1] ss:$4 sm:$0xff] %v1192_v11  ;;  %v1767_v11 = vadd.f32 %v1759_v34, %v1742_v52  ;;  %v1197_v45 = vmul.f32 %v3834_v5, %v5171_v2  ;;  %v1808_v52 = vmul.f32 %v4209_v23, %v1799_v1  ;;  %v1851_v34 = vld [vmem:[#allocation2 + $0xa0] sm:$0xf]  ;;  %v5172_v5 = vrot.slane %v4138_v53, 4 }
 0x137   :  { %1514 = vst [vmem:[#allocation1 + $0x1] ss:$4 sm:$0xff] %v1193_v59  ;;  %v4212_v59 = vperm.slane %v4136_v12, 5  ;;  %v1800_v4 = vld [vmem:[#allocation2 + $0x1a] sm:$0xf]  ;;  %v1860_v55 = vmul.f32 %v4223_v27, %v1851_v34  ;;  %v507_v53 = vrot.slane %v4174_v6, 6 }
 0x138   :  { %1515 = vst [vmem:[#allocation1 + $0x2] ss:$4 sm:$0xff] %v1194_v40  ;;  %v1756_v40 = vmul.f32 %v4171_v48, %v1747_v42  ;;  %v1198_v2 = vmul.f32 %v3828_v3, %v5172_v5  ;;  %v1757_v42 = vmul.f32 %v4171_v48, %v1748_v58  ;;  %v1773_v1 = vld [vmem:[#allocation2 + $0x39] sm:$0xf]  ;;  %v1816_v20 = vadd.f32 %v1808_v52, %v1791_v49  ;;  %v1798_v58 = vld [vmem:[#allocation2 + $0xa] sm:$0xf]  ;;  %v4242_v52 = vpop.f32.mrf.mxu2 }
 0x139   :  { %1668 = vst.msk [vmem:[#allocation2 + $0xd0] sm:$0x3f] %vm1641_vm1, %v1508_v60  ;;  %v1512_v41 = vld.sshfl [vmem:[#allocation1 + $0x20] sm:$0xff pattern:$0x73625140]  ;;  %v1834_v16 = vmul.f32 %v4212_v59, %v1825_v15  ;;  %v1792_v15 = vadd.f32 %v1784_v17, %v1767_v11  ;;  %v1200_v3 = vmul.f32 %v3847_v22, %v4174_v6  ;;  %v508_v44 = vrot.slane %v4230_v8, 2 }
 0x13a   :  { %v1772_v60 = vld [vmem:[#allocation2 + $0x31] sm:$0xf]  ;;  %1517 = vst [vmem:[#allocation1 + $0x20] ss:$4 sm:$0xff] %v1195_v54  ;;  %v1764_v54 = vadd.f32 %v1756_v40, %v1739_v25  ;;  %v1765_v7 = vadd.f32 %v1757_v42, %v1740_v51  ;;  %v1809_v11 = vmul.f32 %v4209_v23, %v1800_v4  ;;  %v1823_v49 = vld [vmem:[#allocation2 + $0x60] sm:$0xf]  ;;  %v1782_v22 = vmul.f32 %v4186_v47, %v1773_v1 }
 0x13b   :  { %1518 = vst [vmem:[#allocation1 + $0x21] ss:$4 sm:$0xff] %v1196_v43  ;;  %v1781_v28 = vmul.f32 %v4186_v47, %v1772_v60  ;;  %v1797_v43 = vld [vmem:[#allocation2 + $0x2] sm:$0xf]  ;;  %v1842_v40 = vadd.f32 %v1834_v16, %v1816_v20  ;;  %v509_v17 = vrot.slane %v4230_v8, 4  ;;  %v5173_v34 = vrot.slane %v4174_v6, 2 }
 0x13c   :  { %1519 = vst [vmem:[#allocation1 + $0x22] ss:$4 sm:$0xff] %v1197_v45  ;;  %v1835_v45 = vmul.f32 %v4212_v59, %v1826_v10  ;;  %v1876_v60 = vld [vmem:[#allocation2 + $0x71] sm:$0xf]  ;;  %v1202_v42 = vmul.f32 %v3853_v30, %v506_v29  ;;  %v1817_v20 = vadd.f32 %v1809_v11, %v1792_v15  ;;  %v1824_v16 = vld [vmem:[#allocation2 + $0x68] sm:$0xf]  ;;  %v1806_v1 = vmul.f32 %v4209_v23, %v1797_v43 }
 0x13d   :  { %1669 = vst.msk [vmem:[#allocation2 + $0xd8] sm:$0x3f] %vm1641_vm1, %v1512_v41  ;;  %v1789_v51 = vadd.f32 %v1781_v28, %v1764_v54  ;;  %v4246_v41 = vperm.slane %v4136_v12, 7  ;;  %v1201_v5 = vmul.f32 %v3850_v26, %v5173_v34  ;;  %v1849_v4 = vld [vmem:[#allocation2 + $0x90] sm:$0xf]  ;;  %v1868_v10 = vadd.f32 %v1860_v55, %v1842_v40  ;;  %v4265_v15 = vld [vmem:[%s5096_s4 + $0x8] sm:$0xff] }
 0x13e   :  { %v1790_v54 = vadd.f32 %v1782_v22, %v1765_v7  ;;  %v1832_v12 = vmul.f32 %v4212_v59, %v1823_v49  ;;  %v1852_v28 = vld [vmem:[#allocation2 + $0xa8] sm:$0xf]  ;;  %v1877_v6 = vld [vmem:[#allocation2 + $0x79] sm:$0xf]  ;;  %v1203_v26 = vmul.f32 %v3856_v31, %v507_v53  ;;  %v1843_v34 = vadd.f32 %v1835_v45, %v1817_v20  ;;  %v1901_v55 = vld [vmem:[#allocation2 + $0xa1] sm:$0xf] }
 0x13f   :  { %v1516_v25 = vld.sshfl [vmem:[#allocation1] sm:$0xff pattern:$0x73625140]  ;;  %v1861_v29 = vmul.f32 %v4223_v27, %v1852_v28  ;;  %v1814_v7 = vadd.f32 %v1806_v1, %v1789_v51  ;;  %v1833_v31 = vmul.f32 %v4212_v59, %v1824_v16  ;;  %v1858_v53 = vmul.f32 %v4223_v27, %v1849_v4  ;;  %v1902_v43 = vld [vmem:[#allocation2 + $0xa9] sm:$0xf] }
 0x140   :  { %1521 = vst [vmem:[#allocation1] ss:$4 sm:$0xff] %v1198_v2  ;;  %v337_v2 = vadd.f32 %v4201_v57, %v4144_v24  ;;  %v1850_v30 = vld [vmem:[#allocation2 + $0x98] sm:$0xf]  ;;  %v1886_v49 = vmul.f32 %v4246_v41, %v1877_v6  ;;  %v4272_v45 = vperm.slane %v4265_v15, 0  ;;  %v510_v4 = vrot.slane %v4230_v8, 6 }
 0x141   :  { %1522 = vst [vmem:[#allocation1 + $0x1] ss:$4 sm:$0xff] %v1199_v61  ;;  %v1885_v61 = vmul.f32 %v4246_v41, %v1876_v60  ;;  %v1869_v11 = vadd.f32 %v1861_v29, %v1843_v34  ;;  %v1840_v60 = vadd.f32 %v1832_v12, %v1814_v7  ;;  %v1874_v51 = vld [vmem:[#allocation2 + $0x61] sm:$0xf]  ;;  %v1926_v28 = vld [vmem:[#allocation2 + $0x72] sm:$0xf]  ;;  %v1206_v29 = vmul.f32 %v3872_v63, %v509_v17 }
 0x142   :  { %1523 = vst [vmem:[#allocation1 + $0x2] ss:$4 sm:$0xff] %v1200_v3  ;;  %v1807_v3 = vmul.f32 %v4209_v23, %v1798_v58  ;;  %v4274_v40 = vmax.f32 %v337_v2, 0.0  ;;  %v1859_v58 = vmul.f32 %v4223_v27, %v1850_v30  ;;  %v1910_v16 = vmul.f32 %v4272_v45, %v1901_v55  ;;  %v1927_v6 = vld [vmem:[#allocation2 + $0x7a] sm:$0xf] }
 0x143   :  { %1670 = vst.msk [vmem:[#allocation2 + $0xe0] sm:$0x3f] %vm1641_vm1, %v1516_v25  ;;  %v4260_v24 = vld.sshfl [vmem:[#allocation1 + $0x20] sm:$0xff pattern:$0x73625140]  ;;  %v1893_v25 = vadd.f32 %v1885_v61, %v1868_v10  ;;  %v1894_v20 = vadd.f32 %v1886_v49, %v1869_v11  ;;  %v1204_v10 = vmul.f32 %v3866_v50, %v4230_v8  ;;  %v1866_v2 = vadd.f32 %v1858_v53, %v1840_v60  ;;  %v4290_v50 = vpop.f32.mrf.mxu2  ;;  %v354_v8 = vpop.f32.mrf.mxu3 }
 0x144   :  { %1526 = vst [vmem:[#allocation1 + $0x21] ss:$4 sm:$0xff] %v1202_v42  ;;  %v1815_v22 = vadd.f32 %v1807_v3, %v1790_v54  ;;  %v1911_v42 = vmul.f32 %v4272_v45, %v1902_v43  ;;  %v1205_v54 = vmul.f32 %v3869_v62, %v508_v44  ;;  %v1875_v12 = vld [vmem:[#allocation2 + $0x69] sm:$0xf]  ;;  %v4286_v30 = vperm.slane %v4265_v15, 1 }
 0x145   :  { %1527 = vst [vmem:[#allocation1 + $0x22] ss:$4 sm:$0xff] %v1203_v26  ;;  %v1918_v26 = vadd.f32 %v1910_v16, %v1893_v25  ;;  %v511_v61 = vrot.slane %v4274_v40, 2  ;;  %v1883_v3 = vmul.f32 %v4246_v41, %v1874_v51  ;;  %v512_v62 = vrot.slane %v4274_v40, 4  ;;  %v1899_v7 = vld [vmem:[#allocation2 + $0x91] sm:$0xf] }
 0x146   :  { %1525 = vst [vmem:[#allocation1 + $0x20] ss:$4 sm:$0xff] %v1201_v5  ;;  %v1841_v1 = vadd.f32 %v1833_v31, %v1815_v22  ;;  %v1919_v34 = vadd.f32 %v1911_v42, %v1894_v20  ;;  %v340_v44 = vadd.f32 %v4201_v57, %v4189_v56  ;;  %v1935_v31 = vmul.f32 %v4286_v30, %v1926_v28  ;;  %v1952_v11 = vld [vmem:[#allocation2 + $0x18] sm:$0xf]  ;;  %v1953_v49 = vld [vmem:[#allocation2 + $0x20] sm:$0xf] }
 0x147   :  { %v1936_v63 = vmul.f32 %v4286_v30, %v1927_v6  ;;  %v1207_v17 = vmul.f32 %v3875_v0, %v510_v4  ;;  %v1884_v53 = vmul.f32 %v4246_v41, %v1875_v12  ;;  %v1891_v43 = vadd.f32 %v1883_v3, %v1866_v2  ;;  %v1900_v22 = vld [vmem:[#allocation2 + $0x99] sm:$0xf]  ;;  %1671 = vst.msk [vmem:[#allocation2 + $0xe8] sm:$0x3f] %vm1641_vm1, %v4260_v24  ;;  %v1979_v24 = vld [vmem:[#allocation2 + $0x50] sm:$0xf] }
 0x148   :  { %v1867_v55 = vadd.f32 %v1859_v58, %v1841_v1  ;;  %v513_v25 = vrot.slane %v4274_v40, 6  ;;  %v1943_v56 = vadd.f32 %v1935_v31, %v1918_v26  ;;  %v4303_v58 = vperm.slane %v4265_v15, 2  ;;  %v1924_v1 = vld [vmem:[#allocation2 + $0x62] sm:$0xf]  ;;  %v1925_v12 = vld [vmem:[#allocation2 + $0x6a] sm:$0xf] }
 0x149   :  { %v1524_v5 = vld.sshfl [vmem:[#allocation1] sm:$0xff pattern:$0x73625140]  ;;  %v1944_v60 = vadd.f32 %v1936_v63, %v1919_v34  ;;  %v1208_v51 = vmul.f32 %v3885_v32, %v4274_v40  ;;  %v1209_v0 = vmul.f32 %v3888_v35, %v511_v61  ;;  %v1908_v42 = vmul.f32 %v4272_v45, %v1899_v7 }
 0x14a   :  { %1529 = vst [vmem:[#allocation1] ss:$4 sm:$0xff] %v1204_v10  ;;  %v1892_v16 = vadd.f32 %v1884_v53, %v1867_v55  ;;  %v390_v4 = vmax.f32 %v340_v44, 0.0  ;;  %v342_v10 = vadd.f32 %v4201_v57, %v4242_v52  ;;  %v1961_v2 = vmul.f32 %v4303_v58, %v1952_v11  ;;  %v1950_v44 = vld [vmem:[#allocation2 + $0x8] sm:$0xf] }
 0x14b   :  { %1530 = vst [vmem:[#allocation1 + $0x1] ss:$4 sm:$0xff] %v1205_v54  ;;  %v1962_v28 = vmul.f32 %v4303_v58, %v1953_v49  ;;  %v355_v32 = vadd.f32 %v4201_v57, %v354_v8  ;;  %v1210_v35 = vmul.f32 %v3891_v36, %v512_v62  ;;  %v1909_v40 = vmul.f32 %v4272_v45, %v1900_v22  ;;  %v1978_v54 = vld [vmem:[#allocation2 + $0x48] sm:$0xf]  ;;  %v2003_v11 = vld [vmem:[#allocation2 + $0x19] sm:$0xf] }
 0x14c   :  { %1531 = vst [vmem:[#allocation1 + $0x2] ss:$4 sm:$0xff] %v1206_v29  ;;  %v1916_v6 = vadd.f32 %v1908_v42, %v1891_v43  ;;  %v1969_v52 = vadd.f32 %v1961_v2, %v1943_v56  ;;  %v4319_v34 = vperm.slane %v4265_v15, 3  ;;  %v515_v29 = vrot.slane %v390_v4, 4  ;;  %v2004_v49 = vld [vmem:[#allocation2 + $0x21] sm:$0xf] }
 0x14d   :  { %1672 = vst.msk [vmem:[#allocation2 + $0xf0] sm:$0x3f] %vm1641_vm1, %v1524_v5  ;;  %v1528_v20 = vld.sshfl [vmem:[#allocation1 + $0x20] sm:$0xff pattern:$0x73625140]  ;;  %v514_v5 = vrot.slane %v390_v4, 2  ;;  %v1970_v26 = vadd.f32 %v1962_v28, %v1944_v60  ;;  %v1917_v55 = vadd.f32 %v1909_v40, %v1892_v16  ;;  %v1933_v36 = vmul.f32 %v4286_v30, %v1924_v1 }
 0x14e   :  { %1533 = vst [vmem:[#allocation1 + $0x20] ss:$4 sm:$0xff] %v1207_v17  ;;  %v516_v61 = vrot.slane %v390_v4, 6  ;;  %v1211_v3 = vmul.f32 %v3894_v37, %v513_v25  ;;  %v4324_v8 = vmax.f32 %v342_v10, 0.0  ;;  %v1987_v7 = vmul.f32 %v4319_v34, %v1978_v54  ;;  %v346_v17 = vpop.f32.mrf.mxu2  ;;  %v356_v37 = vpop.f32.mrf.mxu3  ;;  %v1951_v25 = vld [vmem:[#allocation2 + $0x10] sm:$0xf] }
 0x14f   :  { %1534 = vst [vmem:[#allocation1 + $0x21] ss:$4 sm:$0xff] %v1208_v51  ;;  %v1988_v31 = vmul.f32 %v4319_v34, %v1979_v24  ;;  %v1212_v63 = vmul.f32 %v3910_v9, %v390_v4  ;;  %v1934_v53 = vmul.f32 %v4286_v30, %v1925_v12  ;;  %v1941_v43 = vadd.f32 %v1933_v36, %v1916_v6  ;;  %v1976_v10 = vld [vmem:[#allocation2 + $0x38] sm:$0xf]  ;;  %v2028_v28 = vld [vmem:[#allocation2 + $0x49] sm:$0xf] }
 0x150   :  { %1535 = vst [vmem:[#allocation1 + $0x22] ss:$4 sm:$0xff] %v1209_v0  ;;  %v4330_v22 = vmax.f32 %v355_v32, 0.0  ;;  %v1995_v56 = vadd.f32 %v1987_v7, %v1969_v52  ;;  %v4333_v51 = vperm.slane %v4265_v15, 4  ;;  %v357_v0 = vadd.f32 %v4201_v57, %v356_v37  ;;  %v2029_v54 = vld [vmem:[#allocation2 + $0x51] sm:$0xf] }
 0x151   :  { %1673 = vst.msk [vmem:[#allocation2 + $0xf8] sm:$0x3f] %vm1641_vm1, %v1528_v20  ;;  %v1996_v60 = vadd.f32 %v1988_v31, %v1970_v26  ;;  %v345_v9 = vadd.f32 %v4201_v57, %v4290_v50  ;;  %v1942_v20 = vadd.f32 %v1934_v53, %v1917_v55  ;;  %v1959_v16 = vmul.f32 %v4303_v58, %v1950_v44  ;;  %v2001_v36 = vld [vmem:[#allocation2 + $0x9] sm:$0xf]  ;;  %v5174_v44 = vld [vmem:[#allocation4_spill] sm:$0xff]  ;;  %v5176_v37 = vld [vmem:[#allocation6_spill] sm:$0xff] }
 0x152   :  { %v1213_v42 = vmul.f32 %v3914_v13, %v514_v5  ;;  %v1214_v4 = vmul.f32 %v3917_v18, %v515_v29  ;;  %v2012_v1 = vmul.f32 %v4333_v51, %v2003_v11  ;;  %v2013_v2 = vmul.f32 %v4333_v51, %v2004_v49  ;;  %v1977_v18 = vld [vmem:[#allocation2 + $0x40] sm:$0xf]  ;;  %v5175_v31 = vld [vmem:[#allocation5_spill] sm:$0xff]  ;;  %v2053_v11 = vld [vmem:[#allocation2 + $0x1a] sm:$0xf] }
 0x153   :  { %v1532_v62 = vld.sshfl [vmem:[#allocation1] sm:$0xff pattern:$0x73625140]  ;;  %v1215_v32 = vmul.f32 %v3923_v21, %v516_v61  ;;  %v517_v50 = vrot.slane %v4324_v8, 2  ;;  %v1960_v40 = vmul.f32 %v4303_v58, %v1951_v25  ;;  %v1967_v6 = vadd.f32 %v1959_v16, %v1941_v43  ;;  %v2054_v49 = vld [vmem:[#allocation2 + $0x22] sm:$0xf] }
 0x154   :  { %1537 = vst [vmem:[#allocation1] ss:$4 sm:$0xff] %v1210_v35  ;;  %v518_v13 = vrot.slane %v4324_v8, 4  ;;  %v2020_v24 = vadd.f32 %v2012_v1, %v1995_v56  ;;  %v2021_v5 = vadd.f32 %v2013_v2, %v1996_v60  ;;  %v4349_v12 = vperm.slane %v4265_v15, 5  ;;  %v2002_v60 = vld [vmem:[#allocation2 + $0x11] sm:$0xf] }
 0x155   :  { %1538 = vst [vmem:[#allocation1 + $0x1] ss:$4 sm:$0xff] %v1211_v3  ;;  %v4351_v52 = vmax.f32 %v357_v0, 0.0  ;;  %v4353_v26 = vmax.f32 %v345_v9, 0.0  ;;  %v1968_v21 = vadd.f32 %v1960_v40, %v1942_v20  ;;  %v1985_v29 = vmul.f32 %v4319_v34, %v1976_v10  ;;  %v2026_v1 = vld [vmem:[#allocation2 + $0x39] sm:$0xf] }
 0x156   :  { %1539 = vst [vmem:[#allocation1 + $0x2] ss:$4 sm:$0xff] %v1212_v63  ;;  %v532_v61 = vrot.slane %v4330_v22, 2  ;;  %v519_v55 = vrot.slane %v4324_v8, 6  ;;  %v2037_v3 = vmul.f32 %v4349_v12, %v2028_v28  ;;  %v1216_v7 = vmul.f32 %v5174_v44, %v4324_v8  ;;  %v359_v44 = vpop.f32.mrf.mxu3 }
 0x157   :  { %1674 = vst.msk [vmem:[#allocation2 + $0x100] sm:$0x3f] %vm1641_vm1, %v1532_v62  ;;  %v1536_v35 = vld.sshfl [vmem:[#allocation1 + $0x20] sm:$0xff pattern:$0x73625140]  ;;  %v2038_v62 = vmul.f32 %v4349_v12, %v2029_v54  ;;  %v1217_v63 = vmul.f32 %v5175_v31, %v517_v50  ;;  %v1986_v53 = vmul.f32 %v4319_v34, %v1977_v18  ;;  %v1993_v43 = vadd.f32 %v1985_v29, %v1967_v6  ;;  %v5179_v31 = vld [vmem:[#allocation9_spill] sm:$0xff] }
 0x158   :  { %1541 = vst [vmem:[#allocation1 + $0x20] ss:$4 sm:$0xff] %v1213_v42  ;;  %v1218_v25 = vmul.f32 %v5176_v37, %v518_v13  ;;  %v2045_v0 = vadd.f32 %v2037_v3, %v2020_v24  ;;  %v4367_v20 = vperm.slane %v4265_v15, 6  ;;  %v520_v8 = vrot.slane %v4353_v26, 2  ;;  %v349_v42 = vpop.f32.mrf.mxu2  ;;  %v2079_v6 = vld [vmem:[#allocation2 + $0x78] sm:$0xf] }
 0x159   :  { %1542 = vst [vmem:[#allocation1 + $0x21] ss:$4 sm:$0xff] %v1214_v4  ;;  %v2046_v9 = vadd.f32 %v2038_v62, %v2021_v5  ;;  %v347_v16 = vadd.f32 %v4201_v57, %v346_v17  ;;  %v1994_v4 = vadd.f32 %v1986_v53, %v1968_v21  ;;  %v2010_v10 = vmul.f32 %v4333_v51, %v2001_v36  ;;  %v2080_v54 = vld [vmem:[#allocation2 + $0x80] sm:$0xf]  ;;  %v2051_v53 = vld [vmem:[#allocation2 + $0xa] sm:$0xf] }
 0x15a   :  { %1543 = vst [vmem:[#allocation1 + $0x22] ss:$4 sm:$0xff] %v1215_v32  ;;  %v2062_v2 = vmul.f32 %v4367_v20, %v2053_v11  ;;  %v2063_v28 = vmul.f32 %v4367_v20, %v2054_v49  ;;  %v5177_v32 = vld [vmem:[#allocation7_spill] sm:$0xff]  ;;  %v521_v17 = vrot.slane %v4353_v26, 4  ;;  %v2027_v13 = vld [vmem:[#allocation2 + $0x41] sm:$0xf]  ;;  %v2035_v62 = vmul.f32 %v4349_v12, %v2026_v1 }
 0x15b   :  { %1675 = vst.msk [vmem:[#allocation2 + $0x108] sm:$0x3f] %vm1641_vm1, %v1536_v35  ;;  %v1219_v50 = vmul.f32 %v5177_v32, %v519_v55  ;;  %v2011_v35 = vmul.f32 %v4333_v51, %v2002_v60  ;;  %v2018_v40 = vadd.f32 %v2010_v10, %v1993_v43  ;;  %v4378_v5 = vperm.slane %v4265_v15, 7  ;;  %v5178_v21 = vld [vmem:[#allocation8_spill] sm:$0xff]  ;;  %v4391_v15 = vld [vmem:[%s5096_s4 + $0x10] sm:$0xff] }
 0x15c   :  { %v2070_v18 = vadd.f32 %v2062_v2, %v2045_v0  ;;  %v2071_v24 = vadd.f32 %v2063_v28, %v2046_v9  ;;  %v1220_v29 = vmul.f32 %v5178_v21, %v4353_v26  ;;  %v4383_v55 = vmax.f32 %v347_v16, 0.0  ;;  %v2106_v60 = vld [vmem:[#allocation2 + $0xb0] sm:$0xf]  ;;  %v2130_v21 = vld [vmem:[#allocation2 + $0x79] sm:$0xf] }
 0x15d   :  { %v1540_v56 = vld.sshfl [vmem:[#allocation1] sm:$0xff pattern:$0x73625140]  ;;  %v2019_v3 = vadd.f32 %v2011_v35, %v1994_v4  ;;  %v2088_v43 = vmul.f32 %v4378_v5, %v2079_v6  ;;  %v2089_v11 = vmul.f32 %v4378_v5, %v2080_v54  ;;  %v360_v49 = vadd.f32 %v4201_v57, %v359_v44  ;;  %v2052_v9 = vld [vmem:[#allocation2 + $0x12] sm:$0xf] }
 0x15e   :  { %1545 = vst [vmem:[#allocation1] ss:$4 sm:$0xff] %v1216_v7  ;;  %v522_v7 = vrot.slane %v4353_v26, 6  ;;  %v350_v37 = vadd.f32 %v4201_v57, %v349_v42  ;;  %v2036_v26 = vmul.f32 %v4349_v12, %v2027_v13  ;;  %v1222_v0 = vmul.f32 %v3966_v38, %v521_v17  ;;  %v5180_v28 = vld [vmem:[#allocation10_spill] sm:$0xff]  ;;  %v2077_v35 = vld [vmem:[#allocation2 + $0x68] sm:$0xf] }
 0x15f   :  { %1546 = vst [vmem:[#allocation1 + $0x1] ss:$4 sm:$0xff] %v1217_v63  ;;  %v1221_v63 = vmul.f32 %v5179_v31, %v520_v8  ;;  %v2096_v8 = vadd.f32 %v2088_v43, %v2070_v18  ;;  %v2097_v16 = vadd.f32 %v2089_v11, %v2071_v24  ;;  %v4400_v4 = vperm.slane %v4391_v15, 0  ;;  %v5181_v54 = vld [vmem:[#allocation11_spill] sm:$0xff]  ;;  %v5182_v43 = vld [vmem:[#allocation12_spill] sm:$0xff] }
 0x160   :  { %1547 = vst [vmem:[#allocation1 + $0x2] ss:$4 sm:$0xff] %v1218_v25  ;;  %v2043_v25 = vadd.f32 %v2035_v62, %v2018_v40  ;;  %v523_v10 = vrot.slane %v4383_v55, 2  ;;  %v524_v1 = vrot.slane %v4383_v55, 4  ;;  %v2044_v42 = vadd.f32 %v2036_v26, %v2019_v3  ;;  %v351_v13 = vpop.f32.mrf.mxu2  ;;  %v2078_v3 = vld [vmem:[#allocation2 + $0x70] sm:$0xf] }
 0x161   :  { %1676 = vst.msk [vmem:[#allocation2 + $0x110] sm:$0x3f] %vm1641_vm1, %v1540_v56  ;;  %v1544_v36 = vld.sshfl [vmem:[#allocation1 + $0x20] sm:$0xff pattern:$0x73625140]  ;;  %v2060_v2 = vmul.f32 %v4367_v20, %v2051_v53  ;;  %v1223_v32 = vmul.f32 %v5180_v28, %v522_v7  ;;  %v525_v38 = vrot.slane %v4383_v55, 6  ;;  %v2115_v6 = vmul.f32 %v4400_v4, %v2106_v60 }
 0x162   :  { %1549 = vst [vmem:[#allocation1 + $0x20] ss:$4 sm:$0xff] %v1219_v50  ;;  %v2105_v56 = vld [vmem:[#allocation2 + $0xa8] sm:$0xf]  ;;  %v1224_v17 = vmul.f32 %v5181_v54, %v4383_v55  ;;  %v2061_v18 = vmul.f32 %v4367_v20, %v2052_v9  ;;  %v4416_v7 = vperm.slane %v4391_v15, 1  ;;  %v4418_v31 = vmax.f32 %v360_v49, 0.0 }
 0x163   :  { %1550 = vst [vmem:[#allocation1 + $0x21] ss:$4 sm:$0xff] %v1220_v29  ;;  %v2114_v40 = vmul.f32 %v4400_v4, %v2105_v56  ;;  %v2068_v24 = vadd.f32 %v2060_v2, %v2043_v25  ;;  %v2131_v29 = vld [vmem:[#allocation2 + $0x81] sm:$0xf]  ;;  %v2123_v44 = vadd.f32 %v2115_v6, %v2097_v16  ;;  %v533_v55 = vrot.slane %v4330_v22, 4  ;;  %v5183_v49 = vld [vmem:[#allocation13_spill] sm:$0xff] }
 0x164   :  { %1551 = vst [vmem:[#allocation1 + $0x22] ss:$4 sm:$0xff] %v1221_v63  ;;  %v2069_v63 = vadd.f32 %v2061_v18, %v2044_v42  ;;  %v2086_v53 = vmul.f32 %v4378_v5, %v2077_v35  ;;  %v1225_v11 = vmul.f32 %v5182_v43, %v523_v10  ;;  %v2103_v26 = vld [vmem:[#allocation2 + $0x98] sm:$0xf]  ;;  %v2139_v25 = vmul.f32 %v4416_v7, %v2130_v21  ;;  %v2155_v60 = vld [vmem:[#allocation2 + $0xa9] sm:$0xf]  ;;  %v361_v43 = vpop.f32.mrf.mxu3 }
 0x165   :  { %1677 = vst.msk [vmem:[#allocation2 + $0x118] sm:$0x3f] %vm1641_vm1, %v1544_v36  ;;  %v4413_v36 = vmax.f32 %v350_v37, 0.0  ;;  %v2122_v62 = vadd.f32 %v2114_v40, %v2096_v8  ;;  %v352_v37 = vadd.f32 %v4201_v57, %v351_v13  ;;  %v2140_v56 = vmul.f32 %v4416_v7, %v2131_v29  ;;  %v5184_v9 = vld [vmem:[#allocation14_spill] sm:$0xff]  ;;  %v2128_v18 = vld [vmem:[#allocation2 + $0x69] sm:$0xf] }
 0x166   :  { %v1227_v8 = vmul.f32 %v5184_v9, %v525_v38  ;;  %v2087_v42 = vmul.f32 %v4378_v5, %v2078_v3  ;;  %v2094_v2 = vadd.f32 %v2086_v53, %v2068_v24  ;;  %v2156_v28 = vld [vmem:[#allocation2 + $0xb1] sm:$0xf]  ;;  %v4432_v40 = vperm.slane %v4391_v15, 2  ;;  %v5185_v29 = vld [vmem:[#allocation15_spill] sm:$0xff]  ;;  %v2181_v53 = vld [vmem:[#allocation2 + $0x82] sm:$0xf] }
 0x167   :  { %v1548_v50 = vld.sshfl [vmem:[#allocation1] sm:$0xff pattern:$0x73625140]  ;;  %v526_v10 = vrot.slane %v4413_v36, 2  ;;  %v2148_v35 = vadd.f32 %v2140_v56, %v2123_v44  ;;  %v534_v6 = vrot.slane %v4330_v22, 6  ;;  %v2112_v54 = vmul.f32 %v4400_v4, %v2103_v26 }
 0x168   :  { %1553 = vst [vmem:[#allocation1] ss:$4 sm:$0xff] %v1222_v0  ;;  %v1226_v0 = vmul.f32 %v5183_v49, %v524_v1  ;;  %v527_v1 = vrot.slane %v4413_v36, 4  ;;  %v2095_v38 = vadd.f32 %v2087_v42, %v2069_v63  ;;  %v4438_v13 = vmax.f32 %v352_v37, 0.0  ;;  %v2180_v63 = vld [vmem:[#allocation2 + $0x7a] sm:$0xf] }
 0x169   :  { %1554 = vst [vmem:[#allocation1 + $0x1] ss:$4 sm:$0xff] %v1223_v32  ;;  %v2104_v32 = vld [vmem:[#allocation2 + $0xa0] sm:$0xf]  ;;  %v2164_v24 = vmul.f32 %v4432_v40, %v2155_v60  ;;  %v2165_v21 = vmul.f32 %v4432_v40, %v2156_v28  ;;  %v1228_v3 = vmul.f32 %v5185_v29, %v4413_v36  ;;  %v2120_v44 = vadd.f32 %v2112_v54, %v2094_v2  ;;  %v2153_v28 = vld [vmem:[#allocation2 + $0x99] sm:$0xf] }
 0x16a   :  { %1555 = vst [vmem:[#allocation1 + $0x2] ss:$4 sm:$0xff] %v1224_v17  ;;  %v528_v17 = vrot.slane %v4413_v36, 6  ;;  %v4448_v60 = vperm.slane %v4391_v15, 3  ;;  %v5187_v36 = vld [vmem:[#allocation17_spill] sm:$0xff]  ;;  %v529_v2 = vrot.slane %v4438_v13, 2 }
 0x16b   :  { %1678 = vst.msk [vmem:[#allocation2 + $0x120] sm:$0x3f] %vm1641_vm1, %v1548_v50  ;;  %v1552_v16 = vld.sshfl [vmem:[#allocation1 + $0x20] sm:$0xff pattern:$0x73625140]  ;;  %v2147_v50 = vadd.f32 %v2139_v25, %v2122_v62  ;;  %v2113_v62 = vmul.f32 %v4400_v4, %v2104_v32  ;;  %v2173_v49 = vadd.f32 %v2165_v21, %v2148_v35  ;;  %v1230_v9 = vmul.f32 %v5187_v36, %v527_v1 }
 0x16c   :  { %1557 = vst [vmem:[#allocation1 + $0x20] ss:$4 sm:$0xff] %v1225_v11  ;;  %v5186_v11 = vld [vmem:[#allocation16_spill] sm:$0xff]  ;;  %v2129_v25 = vld [vmem:[#allocation2 + $0x71] sm:$0xf]  ;;  %v2190_v32 = vmul.f32 %v4448_v60, %v2181_v53 }
 0x16d   :  { %1558 = vst [vmem:[#allocation1 + $0x21] ss:$4 sm:$0xff] %v1226_v0  ;;  %v1229_v37 = vmul.f32 %v5186_v11, %v526_v10  ;;  %v2172_v56 = vadd.f32 %v2164_v24, %v2147_v50  ;;  %v537_v0 = vrot.slane %v4351_v52, 6  ;;  %v2189_v10 = vmul.f32 %v4448_v60, %v2180_v63  ;;  %v2206_v54 = vld [vmem:[#allocation2 + $0x20] sm:$0xf] }
 0x16e   :  { %1559 = vst [vmem:[#allocation1 + $0x22] ss:$4 sm:$0xff] %v1227_v8  ;;  %v2121_v8 = vadd.f32 %v2113_v62, %v2095_v38  ;;  %v362_v50 = vadd.f32 %v4201_v57, %v361_v43  ;;  %v2138_v35 = vmul.f32 %v4416_v7, %v2129_v25  ;;  %v2207_v38 = vld [vmem:[#allocation2 + $0x28] sm:$0xf]  ;;  %v2154_v24 = vld [vmem:[#allocation2 + $0xa1] sm:$0xf]  ;;  %v2198_v29 = vadd.f32 %v2190_v32, %v2173_v49 }
 0x16f   :  { %1679 = vst.msk [vmem:[#allocation2 + $0x128] sm:$0x3f] %vm1641_vm1, %v1552_v16  ;;  %v2137_v16 = vmul.f32 %v4416_v7, %v2128_v18  ;;  %v1231_v18 = vmul.f32 %v4010_v14, %v528_v17  ;;  %v2197_v21 = vadd.f32 %v2189_v10, %v2172_v56  ;;  %v530_v62 = vrot.slane %v4438_v13, 4  ;;  %v5188_v57 = vld [vmem:[#allocation18_spill] sm:$0xff]  ;;  %v5189_v14 = vld [vmem:[#allocation19_spill] sm:$0xff]  ;;  %v5190_v32 = vld [vmem:[#allocation21_spill] sm:$0xff] }
 0x170   :  { %v1232_v63 = vmul.f32 %v5188_v57, %v4438_v13  ;;  %v2146_v43 = vadd.f32 %v2138_v35, %v2121_v8  ;;  %v531_v11 = vrot.slane %v4438_v13, 6  ;;  %v1233_v17 = vmul.f32 %v5189_v14, %v529_v2  ;;  %v2232_v36 = vld [vmem:[#allocation2 + $0x50] sm:$0xf]  ;;  %v5192_v14 = vld [vmem:[#allocation20_spill] sm:$0xff] }
 0x171   :  { %v1556_v26 = vld.sshfl [vmem:[#allocation1] sm:$0xff pattern:$0x73625140]  ;;  %v2145_v1 = vadd.f32 %v2137_v16, %v2120_v44  ;;  %v2162_v44 = vmul.f32 %v4432_v40, %v2153_v28  ;;  %v4473_v16 = vmax.f32 %v362_v50, 0.0  ;;  %v2179_v8 = vld [vmem:[#allocation2 + $0x72] sm:$0xf]  ;;  %v1234_v35 = vmul.f32 %v5190_v32, %v530_v62 }
 0x172   :  { %1561 = vst [vmem:[#allocation1] ss:$4 sm:$0xff] %v1228_v3  ;;  %v4461_v3 = vperm.slane %v4391_v15, 4  ;;  %v4476_v2 = vperm.slane %v4391_v15, 5  ;;  %v535_v10 = vrot.slane %v4351_v52, 2 }
 0x173   :  { %1562 = vst [vmem:[#allocation1 + $0x1] ss:$4 sm:$0xff] %v1229_v37  ;;  %v2178_v37 = vld [vmem:[#allocation2 + $0x6a] sm:$0xf]  ;;  %v2170_v49 = vadd.f32 %v2162_v44, %v2145_v1  ;;  %v536_v1 = vrot.slane %v4351_v52, 4 }
 0x174   :  { %1563 = vst [vmem:[#allocation1 + $0x2] ss:$4 sm:$0xff] %v1230_v9  ;;  %v2215_v25 = vmul.f32 %v4461_v3, %v2206_v54  ;;  %v2216_v56 = vmul.f32 %v4461_v3, %v2207_v38  ;;  %v2233_v9 = vld [vmem:[#allocation2 + $0x58] sm:$0xf]  ;;  %v2187_v38 = vmul.f32 %v4448_v60, %v2178_v37  ;;  %v2257_v44 = vld [vmem:[#allocation2 + $0x21] sm:$0xf] }
 0x175   :  { %1680 = vst.msk [vmem:[#allocation2 + $0x130] sm:$0x3f] %vm1641_vm1, %v1556_v26  ;;  %v1560_v53 = vld.sshfl [vmem:[#allocation1 + $0x20] sm:$0xff pattern:$0x73625140]  ;;  %v2163_v26 = vmul.f32 %v4432_v40, %v2154_v24  ;;  %v5191_v24 = vld [vmem:[#allocation22_spill] sm:$0xff] }
 0x176   :  { %1565 = vst [vmem:[#allocation1 + $0x20] ss:$4 sm:$0xff] %v1231_v18  ;;  %v2223_v28 = vadd.f32 %v2215_v25, %v2197_v21  ;;  %v2224_v13 = vadd.f32 %v2216_v56, %v2198_v29  ;;  %v2204_v18 = vld [vmem:[#allocation2 + $0x10] sm:$0xf]  ;;  %v1235_v50 = vmul.f32 %v5191_v24, %v531_v11  ;;  %v2241_v21 = vmul.f32 %v4476_v2, %v2232_v36  ;;  %v2258_v25 = vld [vmem:[#allocation2 + $0x29] sm:$0xf] }
 0x177   :  { %1566 = vst [vmem:[#allocation1 + $0x21] ss:$4 sm:$0xff] %v1232_v63  ;;  %v2171_v54 = vadd.f32 %v2163_v26, %v2146_v43  ;;  %v2205_v63 = vld [vmem:[#allocation2 + $0x18] sm:$0xf]  ;;  %v2242_v29 = vmul.f32 %v4476_v2, %v2233_v9  ;;  %v1726_v62 = vld [vmem:[#allocation2 + $0xf0] sm:$0xf]  ;;  %v2188_v43 = vmul.f32 %v4448_v60, %v2179_v8  ;;  %v2195_v37 = vadd.f32 %v2187_v38, %v2170_v49 }
 0x178   :  { %1567 = vst [vmem:[#allocation1 + $0x22] ss:$4 sm:$0xff] %v1233_v17  ;;  %v1236_v17 = vmul.f32 %v5192_v14, %v4330_v22  ;;  %v1727_v11 = vld [vmem:[#allocation2 + $0xf8] sm:$0xf]  ;;  %v2230_v26 = vld [vmem:[#allocation2 + $0x40] sm:$0xf]  ;;  %v2249_v32 = vadd.f32 %v2241_v21, %v2223_v28 }
 0x179   :  { %v2250_v24 = vadd.f32 %v2242_v29, %v2224_v13  ;;  %v4490_v36 = vperm.slane %v4391_v15, 6  ;;  %v5193_v9 = vld [vmem:[#allocation23_spill] sm:$0xff]  ;;  %v1708_v49 = vld [vmem:[#allocation2 + $0xc0] sm:$0xf]  ;;  %v2196_v38 = vadd.f32 %v2188_v43, %v2171_v54  ;;  %v2282_v56 = vld [vmem:[#allocation2 + $0x51] sm:$0xf]  ;;  %v1735_v29 = vmul.f32 %v4142_v46, %v1726_v62 }
 0x17a   :  { %v1237_v14 = vmul.f32 %v5193_v9, %v532_v61  ;;  %v5195_v28 = vld [vmem:[#allocation25_spill] sm:$0xff]  ;;  %v2283_v9 = vld [vmem:[#allocation2 + $0x59] sm:$0xf]  ;;  %1681 = vst.msk [vmem:[#allocation2 + $0x138] sm:$0x3f] %vm1641_vm1, %v1560_v53  ;;  %v1736_v54 = vmul.f32 %v4142_v46, %v1727_v11  ;;  %v1717_v22 = vmul.f32 %v4153_v33, %v1708_v49  ;;  %v4512_v43 = vperm.slane %v4391_v15, 7 }
 0x17b   :  { %v1564_v57 = vld.sshfl [vmem:[#allocation1] sm:$0xff pattern:$0x73625140]  ;;  %v1239_v13 = vmul.f32 %v5195_v28, %v534_v6  ;;  %v1709_v21 = vld [vmem:[#allocation2 + $0xc8] sm:$0xf]  ;;  %v2266_v42 = vmul.f32 %v4490_v36, %v2257_v44  ;;  %v2267_v61 = vmul.f32 %v4490_v36, %v2258_v25  ;;  %v2239_v11 = vmul.f32 %v4476_v2, %v2230_v26 }
 0x17c   :  { %1569 = vst [vmem:[#allocation1] ss:$4 sm:$0xff] %v1234_v35  ;;  %v5194_v35 = vld [vmem:[#allocation24_spill] sm:$0xff]  ;;  %v2231_v6 = vld [vmem:[#allocation2 + $0x48] sm:$0xf]  ;;  %v1718_v53 = vmul.f32 %v4153_v33, %v1709_v21  ;;  %v2291_v49 = vmul.f32 %v4512_v43, %v2282_v56  ;;  %v5197_v26 = vld [vmem:[#allocation27_spill] sm:$0xff] }
 0x17d   :  { %1570 = vst [vmem:[#allocation1 + $0x1] ss:$4 sm:$0xff] %v1235_v50  ;;  %v1238_v8 = vmul.f32 %v5194_v35, %v533_v55  ;;  %v2213_v50 = vmul.f32 %v4461_v3, %v2204_v18  ;;  %v540_v55 = vrot.slane %v4418_v31, 6  ;;  %v2214_v18 = vmul.f32 %v4461_v3, %v2205_v63  ;;  %v1751_v25 = vld [vmem:[#allocation2 + $0xc1] sm:$0xf] }
 0x17e   :  { %1571 = vst [vmem:[#allocation1 + $0x2] ss:$4 sm:$0xff] %v1236_v17  ;;  %v2274_v62 = vadd.f32 %v2266_v42, %v2249_v32  ;;  %v2275_v44 = vadd.f32 %v2267_v61, %v2250_v24  ;;  %v2255_v63 = vld [vmem:[#allocation2 + $0x11] sm:$0xf]  ;;  %v2292_v42 = vmul.f32 %v4512_v43, %v2283_v9  ;;  %v1744_v24 = vadd.f32 %v1736_v54, %v1718_v53  ;;  %v2307_v28 = vld [vmem:[#allocation2 + $0x22] sm:$0xf] }
 0x17f   :  { %v2221_v17 = vadd.f32 %v2213_v50, %v2195_v37  ;;  %1682 = vst.msk [vmem:[#allocation2 + $0x140] sm:$0x3f] %vm1641_vm1, %v1564_v57  ;;  %v2222_v35 = vadd.f32 %v2214_v18, %v2196_v38  ;;  %v1743_v37 = vadd.f32 %v1735_v29, %v1717_v22  ;;  %v1752_v57 = vld [vmem:[#allocation2 + $0xc9] sm:$0xf]  ;;  %v5196_v32 = vld [vmem:[#allocation26_spill] sm:$0xff]  ;;  %v1760_v29 = vmul.f32 %v4171_v48, %v1751_v25  ;;  %v5198_v54 = vld [vmem:[#allocation28_spill] sm:$0xff] }
 0x180   :  { %1573 = vst [vmem:[#allocation1 + $0x20] ss:$4 sm:$0xff] %v1237_v14  ;;  %v2256_v14 = vld [vmem:[#allocation2 + $0x19] sm:$0xf]  ;;  %v1240_v15 = vmul.f32 %v5196_v32, %v4351_v52  ;;  %v2308_v38 = vld [vmem:[#allocation2 + $0x2a] sm:$0xf]  ;;  %v2299_v61 = vadd.f32 %v2291_v49, %v2274_v62  ;;  %v2300_v56 = vadd.f32 %v2292_v42, %v2275_v44  ;;  %v1242_v18 = vmul.f32 %v5198_v54, %v536_v1 }
 0x181   :  { %1574 = vst [vmem:[#allocation1 + $0x21] ss:$4 sm:$0xff] %v1238_v8  ;;  %v2240_v8 = vmul.f32 %v4476_v2, %v2231_v6  ;;  %v2247_v50 = vadd.f32 %v2239_v11, %v2221_v17  ;;  %v4528_v9 = vld [vmem:[%s5096_s4 + $0x18] ss:$0 sm:$0xff]  ;;  %v1761_v17 = vmul.f32 %v4171_v48, %v1752_v57  ;;  %v1776_v22 = vld [vmem:[#allocation2 + $0xf1] sm:$0xf]  ;;  %v1768_v53 = vadd.f32 %v1760_v29, %v1743_v37 }
 0x182   :  { %1575 = vst [vmem:[#allocation1 + $0x22] ss:$4 sm:$0xff] %v1239_v13  ;;  %v1241_v13 = vmul.f32 %v5197_v26, %v535_v10  ;;  %v2264_v10 = vmul.f32 %v4490_v36, %v2255_v63  ;;  %v1777_v62 = vld [vmem:[#allocation2 + $0xf9] sm:$0xf]  ;;  %v2280_v44 = vld [vmem:[#allocation2 + $0x41] sm:$0xf]  ;;  %v2316_v25 = vmul.f32 %v4528_v9, %v2307_v28  ;;  %v2317_v11 = vmul.f32 %v4528_v9, %v2308_v38 }
 0x183   :  { %v2248_v6 = vadd.f32 %v2240_v8, %v2222_v35  ;;  %v5199_v49 = vld [vmem:[#allocation29_spill] sm:$0xff]  ;;  %v1769_v1 = vadd.f32 %v1761_v17, %v1744_v24  ;;  %v1801_v32 = vld [vmem:[#allocation2 + $0xc2] sm:$0xf]  ;;  %v2265_v57 = vmul.f32 %v4490_v36, %v2256_v14  ;;  %v5200_v63 = vld [vmem:[#allocation30_spill] sm:$0xff]  ;;  %v1785_v8 = vmul.f32 %v4186_v47, %v1776_v22 }
 0x184   :  { %v1243_v42 = vmul.f32 %v5199_v49, %v537_v0  ;;  %v2272_v35 = vadd.f32 %v2264_v10, %v2247_v50  ;;  %v1244_v37 = vmul.f32 %v5200_v63, %v4418_v31  ;;  %v1802_v28 = vld [vmem:[#allocation2 + $0xca] sm:$0xf]  ;;  %v2305_v38 = vld [vmem:[#allocation2 + $0x12] sm:$0xf]  ;;  %v2324_v26 = vadd.f32 %v2316_v25, %v2299_v61  ;;  %v1827_v14 = vld [vmem:[#allocation2 + $0x120] sm:$0xf] }
 0x185   :  { %v1572_v21 = vld.sshfl [vmem:[#allocation1] sm:$0xff pattern:$0x73625140]  ;;  %v2325_v52 = vadd.f32 %v2317_v11, %v2300_v56  ;;  %v541_v0 = vrot.slane %v4473_v16, 2  ;;  %v1786_v29 = vmul.f32 %v4186_v47, %v1777_v62  ;;  %v2273_v50 = vadd.f32 %v2265_v57, %v2248_v6  ;;  %v5204_v61 = vld [vmem:[#allocation32_spill] sm:$0xff] }
 0x186   :  { %1577 = vst [vmem:[#allocation1] ss:$4 sm:$0xff] %v1240_v15  ;;  %v2281_v15 = vld [vmem:[#allocation2 + $0x49] sm:$0xf]  ;;  %v2289_v54 = vmul.f32 %v4512_v43, %v2280_v44  ;;  %v5202_v17 = vld [vmem:[#allocation31_spill] sm:$0xff]  ;;  %v5203_v22 = vrot.slane %v4418_v31, 4  ;;  %v1247_v56 = vmul.f32 %v5204_v61, %v540_v55  ;;  %v1793_v25 = vadd.f32 %v1785_v8, %v1768_v53 }
 0x187   :  { %1578 = vst [vmem:[#allocation1 + $0x1] ss:$4 sm:$0xff] %v1241_v13  ;;  %v1728_v13 = vld [vmem:[#allocation2 + $0x100] sm:$0xf]  ;;  %v4561_v6 = vld [vmem:[%s5097_s5] ss:$0 sm:$0xff]  ;;  %v1794_v44 = vadd.f32 %v1786_v29, %v1769_v1  ;;  %v2290_v49 = vmul.f32 %v4512_v43, %v2281_v15  ;;  %v1836_v55 = vmul.f32 %v4212_v59, %v1827_v14  ;;  %v2314_v29 = vmul.f32 %v4528_v9, %v2305_v38 }
 0x188   :  { %1579 = vst [vmem:[#allocation1 + $0x2] ss:$4 sm:$0xff] %v1242_v18  ;;  %v5201_v18 = vrot.slane %v4418_v31, 2  ;;  %v1246_v10 = vmul.f32 %v4082_v39, %v5203_v22  ;;  %v1710_v62 = vld [vmem:[#allocation2 + $0xd0] sm:$0xf]  ;;  %v2297_v57 = vadd.f32 %v2289_v54, %v2272_v35  ;;  %v1737_v39 = vmul.f32 %v4142_v46, %v1728_v13  ;;  %v5205_v35 = vld [vmem:[#allocation33_spill] sm:$0xff] }
 0x189   :  { %1684 = vst.msk [vmem:[#allocation2 + $0x150] sm:$0x3f] %vm1641_vm1, %v1572_v21  ;;  %v1576_v24 = vld.sshfl [vmem:[#allocation1 + $0x20] sm:$0xff pattern:$0x73625140]  ;;  %v1810_v31 = vmul.f32 %v4209_v23, %v1801_v32  ;;  %v2335_v53 = vadd.f32 %v4561_v6, %v2324_v26  ;;  %v2336_v8 = vadd.f32 %v4561_v6, %v2325_v52  ;;  %v2298_v1 = vadd.f32 %v2290_v49, %v2273_v50 }
 0x18a   :  { %v1245_v21 = vmul.f32 %v5202_v17, %v5201_v18  ;;  %1685 = vst.msk [vmem:[#allocation2 + $0x158] sm:$0x3f] %vm1641_vm1, %v1576_v24  ;;  %v1828_v11 = vld [vmem:[#allocation2 + $0x128] sm:$0xf]  ;;  %v2306_v63 = vld [vmem:[#allocation2 + $0x1a] sm:$0xf]  ;;  %v1811_v24 = vmul.f32 %v4209_v23, %v1802_v28  ;;  %v1248_v15 = vmul.f32 %v5205_v35, %v4473_v16  ;;  %v2322_v38 = vadd.f32 %v2314_v29, %v2297_v57 }
 0x18b   :  { %1581 = vst [vmem:[#allocation1 + $0x20] ss:$4 sm:$0xff] %v1243_v42  ;;  %v1719_v42 = vmul.f32 %v4153_v33, %v1710_v62  ;;  %v542_v32 = vrot.slane %v4473_v16, 4  ;;  %v1818_v14 = vadd.f32 %v1810_v31, %v1793_v25  ;;  %v1837_v26 = vmul.f32 %v4212_v59, %v1828_v11  ;;  %v1753_v54 = vld [vmem:[#allocation2 + $0xd1] sm:$0xf] }
 0x18c   :  { %1582 = vst [vmem:[#allocation1 + $0x21] ss:$4 sm:$0xff] %v1244_v37  ;;  %v1819_v37 = vadd.f32 %v1811_v24, %v1794_v44  ;;  %v1878_v28 = vld [vmem:[#allocation2 + $0x121] sm:$0xf]  ;;  %v2315_v50 = vmul.f32 %v4528_v9, %v2306_v63  ;;  %v1879_v22 = vld [vmem:[#allocation2 + $0x129] sm:$0xf] }
 0x18d   :  { %1583 = vst [vmem:[#allocation1 + $0x22] ss:$4 sm:$0xff] %v1245_v21  ;;  %v1745_v18 = vadd.f32 %v1737_v39, %v1719_v42  ;;  %v1844_v17 = vadd.f32 %v1836_v55, %v1818_v14  ;;  %v2343_v61 = vmax.f32 %v2335_v53, 0.0  ;;  %v2344_v62 = vmax.f32 %v2336_v8, 0.0  ;;  %v1778_v39 = vld [vmem:[#allocation2 + $0x101] sm:$0xf] }
 0x18e   :  { %v2323_v11 = vadd.f32 %v2315_v50, %v2298_v1  ;;  %v1845_v44 = vadd.f32 %v1837_v26, %v1819_v37  ;;  %v1887_v57 = vmul.f32 %v4246_v41, %v1878_v28  ;;  %v1928_v63 = vld [vmem:[#allocation2 + $0x122] sm:$0xf]  ;;  %v2333_v53 = vadd.f32 %v4561_v6, %v2322_v38  ;;  %v1711_v14 = vld [vmem:[#allocation2 + $0xd8] sm:$0xf] }
 0x18f   :  { %v1580_v13 = vld.sshfl [vmem:[#allocation1] sm:$0xff pattern:$0x73625140]  ;;  %v1888_v1 = vmul.f32 %v4246_v41, %v1879_v22  ;;  %v543_v26 = vrot.slane %v4473_v16, 6  ;;  %v1787_v28 = vmul.f32 %v4186_v47, %v1778_v39  ;;  %v1829_v22 = vld [vmem:[#allocation2 + $0x130] sm:$0xf] }
 0x190   :  { %1585 = vst [vmem:[#allocation1] ss:$4 sm:$0xff] %v1246_v10  ;;  %v1853_v52 = vld [vmem:[#allocation2 + $0x150] sm:$0xf]  ;;  %v1762_v10 = vmul.f32 %v4171_v48, %v1753_v54  ;;  %v1929_v54 = vld [vmem:[#allocation2 + $0x12a] sm:$0xf]  ;;  %v2334_v37 = vadd.f32 %v4561_v6, %v2323_v11 }
 0x191   :  { %1586 = vst [vmem:[#allocation1 + $0x1] ss:$4 sm:$0xff] %v1247_v56  ;;  %v1862_v21 = vmul.f32 %v4223_v27, %v1853_v52  ;;  %v1854_v25 = vld [vmem:[#allocation2 + $0x158] sm:$0xf]  ;;  %v1903_v49 = vld [vmem:[#allocation2 + $0x151] sm:$0xf] }
 0x192   :  { %1587 = vst [vmem:[#allocation1 + $0x2] ss:$4 sm:$0xff] %v1248_v15  ;;  %v1863_v31 = vmul.f32 %v4223_v27, %v1854_v25  ;;  %v1729_v56 = vld [vmem:[#allocation2 + $0x108] sm:$0xf]  ;;  %v1904_v55 = vld [vmem:[#allocation2 + $0x159] sm:$0xf]  ;;  %v1770_v8 = vadd.f32 %v1762_v10, %v1745_v18  ;;  %v1912_v35 = vmul.f32 %v4272_v45, %v1903_v49 }
 0x193   :  { %v1870_v24 = vadd.f32 %v1862_v21, %v1844_v17  ;;  %2361 = vst [vmem:[#allocation1 + $0x10] ss:$2 sm:$0xff] %v2343_v61  ;;  %v1954_v15 = vld [vmem:[#allocation2 + $0xc8] sm:$0xf]  ;;  %v1738_v52 = vmul.f32 %v4142_v46, %v1729_v56  ;;  %v1913_v38 = vmul.f32 %v4272_v45, %v1904_v55  ;;  %v1937_v17 = vmul.f32 %v4286_v30, %v1928_v63  ;;  %v1803_v21 = vld [vmem:[#allocation2 + $0xd2] sm:$0xf] }
 0x194   :  { %2363 = vst [vmem:[#allocation1 + $0x11] ss:$2 sm:$0xff] %v2344_v62  ;;  %v1871_v29 = vadd.f32 %v1863_v31, %v1845_v44  ;;  %v1955_v61 = vld [vmem:[#allocation2 + $0xd0] sm:$0xf]  ;;  %v1963_v62 = vmul.f32 %v4303_v58, %v1954_v15  ;;  %v1980_v25 = vld [vmem:[#allocation2 + $0xf8] sm:$0xf]  ;;  %v1720_v46 = vmul.f32 %v4153_v33, %v1711_v14  ;;  %v1795_v11 = vadd.f32 %v1787_v28, %v1770_v8 }
 0x195   :  { %v1895_v42 = vadd.f32 %v1887_v57, %v1870_v24  ;;  %1686 = vst.msk [vmem:[#allocation2 + $0x160] sm:$0x3f] %vm1641_vm1, %v1580_v13  ;;  %v1249_v13 = vmul.f32 %v4096_v19, %v541_v0  ;;  %v2005_v49 = vld [vmem:[#allocation2 + $0xc9] sm:$0xf]  ;;  %v1938_v31 = vmul.f32 %v4286_v30, %v1929_v54  ;;  %v2341_v57 = vmax.f32 %v2333_v53, 0.0  ;;  %v5206_v14 = vld [vmem:[#allocation34_spill] sm:$0xff] }
 0x196   :  { %v1896_v50 = vadd.f32 %v1888_v1, %v1871_v29  ;;  %v1754_v56 = vld [vmem:[#allocation2 + $0xd9] sm:$0xf]  ;;  %v1981_v39 = vld [vmem:[#allocation2 + $0x100] sm:$0xf]  ;;  %v2006_v55 = vld [vmem:[#allocation2 + $0xd1] sm:$0xf]  ;;  %v1746_v0 = vadd.f32 %v1738_v52, %v1720_v46  ;;  %v1812_v63 = vmul.f32 %v4209_v23, %v1803_v21  ;;  %v1838_v29 = vmul.f32 %v4212_v59, %v1829_v22 }
 0x197   :  { %v1920_v18 = vadd.f32 %v1912_v35, %v1895_v42  ;;  %v2342_v19 = vmax.f32 %v2334_v37, 0.0  ;;  %v1964_v33 = vmul.f32 %v4303_v58, %v1955_v61  ;;  %v1989_v42 = vmul.f32 %v4319_v34, %v1980_v25  ;;  %v2030_v35 = vld [vmem:[#allocation2 + $0xf9] sm:$0xf]  ;;  %v2055_v15 = vld [vmem:[#allocation2 + $0xca] sm:$0xf] }
 0x198   :  { %v1921_v44 = vadd.f32 %v1913_v38, %v1896_v50  ;;  %v1779_v53 = vld [vmem:[#allocation2 + $0x109] sm:$0xf]  ;;  %v1250_v54 = vmul.f32 %v5206_v14, %v542_v32  ;;  %v5207_v37 = vld [vmem:[#allocation35_spill] sm:$0xff]  ;;  %v1763_v50 = vmul.f32 %v4171_v48, %v1754_v56  ;;  %v1820_v38 = vadd.f32 %v1812_v63, %v1795_v11  ;;  %v2031_v25 = vld [vmem:[#allocation2 + $0x101] sm:$0xf] }
 0x199   :  { %v1588_v10 = vld.sshfl [vmem:[#allocation1] sm:$0xff pattern:$0x73625140]  ;;  %v1945_v24 = vadd.f32 %v1937_v17, %v1920_v18  ;;  %v1251_v52 = vmul.f32 %v5207_v37, %v543_v26  ;;  %v1990_v17 = vmul.f32 %v4319_v34, %v1981_v39  ;;  %v2014_v22 = vmul.f32 %v4333_v51, %v2005_v49  ;;  %v2056_v16 = vld [vmem:[#allocation2 + $0xd2] sm:$0xf] }
 0x19a   :  { %1688 = vst.msk [vmem:[#allocation2 + $0x170] sm:$0x3f] %vm1641_vm1, %v1588_v10  ;;  %v1946_v1 = vadd.f32 %v1938_v31, %v1921_v44  ;;  %v1584_v28 = vld.sshfl [vmem:[#allocation1 + $0x20] sm:$0xff pattern:$0x73625140]  ;;  %v1771_v32 = vadd.f32 %v1763_v50, %v1746_v0  ;;  %v1846_v46 = vadd.f32 %v1838_v29, %v1820_v38  ;;  %v2015_v48 = vmul.f32 %v4333_v51, %v2006_v55 }
 0x19b   :  { %v1971_v8 = vadd.f32 %v1963_v62, %v1945_v24  ;;  %2357 = vst [vmem:[#allocation1] ss:$2 sm:$0xff] %v2341_v57  ;;  %v1880_v62 = vld [vmem:[#allocation2 + $0x131] sm:$0xf]  ;;  %v2039_v44 = vmul.f32 %v4349_v12, %v2030_v35  ;;  %v1804_v31 = vld [vmem:[#allocation2 + $0xda] sm:$0xf]  ;;  %v1788_v57 = vmul.f32 %v4186_v47, %v1779_v53  ;;  %v2040_v0 = vmul.f32 %v4349_v12, %v2031_v25 }
 0x19c   :  { %2359 = vst [vmem:[#allocation1 + $0x1] ss:$2 sm:$0xff] %v2342_v19  ;;  %v1972_v18 = vadd.f32 %v1964_v33, %v1946_v1  ;;  %v1855_v61 = vld [vmem:[#allocation2 + $0x160] sm:$0xf]  ;;  %v2081_v49 = vld [vmem:[#allocation2 + $0x128] sm:$0xf]  ;;  %v1889_v39 = vmul.f32 %v4246_v41, %v1880_v62  ;;  %v2065_v63 = vmul.f32 %v4367_v20, %v2056_v16  ;;  %v1813_v35 = vmul.f32 %v4209_v23, %v1804_v31 }
 0x19d   :  { %v1997_v21 = vadd.f32 %v1989_v42, %v1971_v8  ;;  %1589 = vst [vmem:[#allocation1 + $0x20] ss:$4 sm:$0xff] %v1249_v13  ;;  %v1864_v26 = vmul.f32 %v4223_v27, %v1855_v61  ;;  %v1905_v24 = vld [vmem:[#allocation2 + $0x161] sm:$0xf]  ;;  %v2064_v13 = vmul.f32 %v4367_v20, %v2055_v15  ;;  %v2107_v29 = vld [vmem:[#allocation2 + $0x158] sm:$0xf]  ;;  %v1796_v42 = vadd.f32 %v1788_v57, %v1771_v32 }
 0x19e   :  { %1590 = vst [vmem:[#allocation1 + $0x21] ss:$4 sm:$0xff] %v1250_v54  ;;  %v1998_v10 = vadd.f32 %v1990_v17, %v1972_v18  ;;  %v1830_v1 = vld [vmem:[#allocation2 + $0x138] sm:$0xf]  ;;  %v1930_v33 = vld [vmem:[#allocation2 + $0x132] sm:$0xf]  ;;  %v1914_v14 = vmul.f32 %v4272_v45, %v1905_v24  ;;  %v2090_v37 = vmul.f32 %v4378_v5, %v2081_v49  ;;  %v2116_v62 = vmul.f32 %v4400_v4, %v2107_v29 }
 0x19f   :  { %v2022_v11 = vadd.f32 %v2014_v22, %v1997_v21  ;;  %1591 = vst [vmem:[#allocation1 + $0x22] ss:$4 sm:$0xff] %v1251_v52  ;;  %v1872_v56 = vadd.f32 %v1864_v26, %v1846_v46  ;;  %v2373_v8 = vld.sshfl [vmem:[#allocation1 + $0x10] sm:$0xff pattern:$0x75316420]  ;;  %v1839_v18 = vmul.f32 %v4212_v59, %v1830_v1  ;;  %v1939_v21 = vmul.f32 %v4286_v30, %v1930_v33 }
 0x1a0   :  { %1687 = vst.msk [vmem:[#allocation2 + $0x168] sm:$0x3f] %vm1641_vm1, %v1584_v28  ;;  %v2023_v19 = vadd.f32 %v2015_v48, %v1998_v10  ;;  %v2082_v47 = vld [vmem:[#allocation2 + $0x130] sm:$0xf]  ;;  %v1956_v28 = vld [vmem:[#allocation2 + $0xd8] sm:$0xf]  ;;  %v1821_v26 = vadd.f32 %v1813_v35, %v1796_v42 }
 0x1a1   :  { %v2047_v55 = vadd.f32 %v2039_v44, %v2022_v11  ;;  %v1897_v15 = vadd.f32 %v1889_v39, %v1872_v56  ;;  %v2132_v50 = vld [vmem:[#allocation2 + $0x129] sm:$0xf]  ;;  %v2108_v22 = vld [vmem:[#allocation2 + $0x160] sm:$0xf]  ;;  %v2157_v25 = vld [vmem:[#allocation2 + $0x159] sm:$0xf]  ;;  %v2091_v46 = vmul.f32 %v4378_v5, %v2082_v47  ;;  %v1965_v48 = vmul.f32 %v4303_v58, %v1956_v28 }
 0x1a2   :  { %v2048_v53 = vadd.f32 %v2040_v0, %v2023_v19  ;;  %v1982_v16 = vld [vmem:[#allocation2 + $0x108] sm:$0xf]  ;;  %v2007_v32 = vld [vmem:[#allocation2 + $0xd9] sm:$0xf]  ;;  %v2133_v59 = vld [vmem:[#allocation2 + $0x131] sm:$0xf]  ;;  %v2141_v44 = vmul.f32 %v4416_v7, %v2132_v50  ;;  %v2117_v49 = vmul.f32 %v4400_v4, %v2108_v22  ;;  %v1847_v56 = vadd.f32 %v1839_v18, %v1821_v26 }
 0x1a3   :  { %v2072_v54 = vadd.f32 %v2064_v13, %v2047_v55  ;;  %v2372_v52 = vld.sshfl [vmem:[#allocation1] sm:$0xff pattern:$0x75316420]  ;;  %v1922_v17 = vadd.f32 %v1914_v14, %v1897_v15  ;;  %v2182_v57 = vld [vmem:[#allocation2 + $0x12a] sm:$0xf]  ;;  %v1991_v0 = vmul.f32 %v4319_v34, %v1982_v16  ;;  %v2166_v29 = vmul.f32 %v4432_v40, %v2157_v25 }
 0x1a4   :  { %v2380_v38 = vpack.c.bf16 %v2373_v8, %v2372_v52  ;;  %v2073_v23 = vadd.f32 %v2065_v63, %v2048_v53  ;;  %v1881_v24 = vld [vmem:[#allocation2 + $0x139] sm:$0xf]  ;;  %v2158_v55 = vld [vmem:[#allocation2 + $0x161] sm:$0xf]  ;;  %v2032_v33 = vld [vmem:[#allocation2 + $0x109] sm:$0xf]  ;;  %v2142_v42 = vmul.f32 %v4416_v7, %v2133_v59  ;;  %v2016_v53 = vmul.f32 %v4333_v51, %v2007_v32 }
 0x1a5   :  { %v2098_v61 = vadd.f32 %v2090_v37, %v2072_v54  ;;  %v1947_v10 = vadd.f32 %v1939_v21, %v1922_v17  ;;  %v2208_v35 = vld [vmem:[#allocation2 + $0xd0] sm:$0xf]  ;;  %v1890_v14 = vmul.f32 %v4246_v41, %v1881_v24  ;;  %v2191_v37 = vmul.f32 %v4448_v60, %v2182_v57  ;;  %v1931_v52 = vld [vmem:[#allocation2 + $0x13a] sm:$0xf]  ;;  %v2234_v18 = vld [vmem:[#allocation2 + $0x100] sm:$0xf] }
 0x1a6   :  { %3415 = vmatmul.msk.bf16.vlgmr.msrb.gmra.mxu1 %vm2409_vm2, %v2380_v38  ;;  %v2099_v13 = vadd.f32 %v2091_v46, %v2073_v23  ;;  %v2057_v28 = vld [vmem:[#allocation2 + $0xda] sm:$0xf]  ;;  %v2167_v38 = vmul.f32 %v4432_v40, %v2158_v55  ;;  %v2041_v23 = vmul.f32 %v4349_v12, %v2032_v33  ;;  %v1957_v25 = vld [vmem:[#allocation2 + $0xe0] sm:$0xf]  ;;  %v2259_v26 = vld [vmem:[#allocation2 + $0xd1] sm:$0xf] }
 0x1a7   :  { %v2124_v11 = vadd.f32 %v2116_v62, %v2098_v61  ;;  %v1856_v31 = vld [vmem:[#allocation2 + $0x168] sm:$0xf]  ;;  %v1973_v19 = vadd.f32 %v1965_v48, %v1947_v10  ;;  %v2209_v41 = vld [vmem:[#allocation2 + $0xd8] sm:$0xf]  ;;  %v2217_v62 = vmul.f32 %v4461_v3, %v2208_v35  ;;  %v1940_v48 = vmul.f32 %v4286_v30, %v1931_v52  ;;  %v1983_v24 = vld [vmem:[#allocation2 + $0x110] sm:$0xf] }
 0x1a8   :  { %v1865_v39 = vmul.f32 %v4223_v27, %v1856_v31  ;;  %v1906_v1 = vld [vmem:[#allocation2 + $0x169] sm:$0xf]  ;;  %v2125_v8 = vadd.f32 %v2117_v49, %v2099_v13  ;;  %v2183_v27 = vld [vmem:[#allocation2 + $0x132] sm:$0xf]  ;;  %v2083_v16 = vld [vmem:[#allocation2 + $0x138] sm:$0xf]  ;;  %v2243_v31 = vmul.f32 %v4476_v2, %v2234_v18  ;;  %v2218_v57 = vmul.f32 %v4461_v3, %v2209_v41 }
 0x1a9   :  { %v2149_v63 = vadd.f32 %v2141_v44, %v2124_v11  ;;  %v1999_v47 = vadd.f32 %v1991_v0, %v1973_v19  ;;  %v1915_v21 = vmul.f32 %v4272_v45, %v1906_v1  ;;  %v2192_v46 = vmul.f32 %v4448_v60, %v2183_v27  ;;  %v2235_v45 = vld [vmem:[#allocation2 + $0x108] sm:$0xf]  ;;  %v2260_v30 = vld [vmem:[#allocation2 + $0xd9] sm:$0xf]  ;;  %v2008_v1 = vld [vmem:[#allocation2 + $0xe1] sm:$0xf] }
 0x1aa   :  { %v1873_v15 = vadd.f32 %v1865_v39, %v1847_v56  ;;  %v2150_v50 = vadd.f32 %v2142_v42, %v2125_v8  ;;  %v2066_v11 = vmul.f32 %v4367_v20, %v2057_v28  ;;  %v2109_v13 = vld [vmem:[#allocation2 + $0x168] sm:$0xf]  ;;  %v2284_v56 = vld [vmem:[#allocation2 + $0x101] sm:$0xf]  ;;  %v1966_v19 = vmul.f32 %v4303_v58, %v1957_v25  ;;  %v2134_v33 = vld [vmem:[#allocation2 + $0x139] sm:$0xf] }
 0x1ab   :  { %v2174_v54 = vadd.f32 %v2166_v29, %v2149_v63  ;;  %v2024_v22 = vadd.f32 %v2016_v53, %v1999_v47  ;;  %v2092_v55 = vmul.f32 %v4378_v5, %v2083_v16  ;;  %v2268_v29 = vmul.f32 %v4490_v36, %v2259_v26  ;;  %v2309_v35 = vld [vmem:[#allocation2 + $0xd2] sm:$0xf]  ;;  %v2285_v58 = vld [vmem:[#allocation2 + $0x109] sm:$0xf]  ;;  %v2058_v41 = vld [vmem:[#allocation2 + $0xe2] sm:$0xf] }
 0x1ac   :  { %v1898_v17 = vadd.f32 %v1890_v14, %v1873_v15  ;;  %v2175_v32 = vadd.f32 %v2167_v38, %v2150_v50  ;;  %v2244_v42 = vmul.f32 %v4476_v2, %v2235_v45  ;;  %v1992_v14 = vmul.f32 %v4319_v34, %v1983_v24  ;;  %v2159_v52 = vld [vmem:[#allocation2 + $0x169] sm:$0xf] }
 0x1ad   :  { %v2199_v61 = vadd.f32 %v2191_v37, %v2174_v54  ;;  %v2049_v59 = vadd.f32 %v2041_v23, %v2024_v22  ;;  %v2118_v53 = vmul.f32 %v4400_v4, %v2109_v13  ;;  %v2293_v54 = vmul.f32 %v4512_v43, %v2284_v56  ;;  %v2033_v37 = vld [vmem:[#allocation2 + $0x111] sm:$0xf]  ;;  %v2310_v22 = vld [vmem:[#allocation2 + $0xda] sm:$0xf] }
 0x1ae   :  { %v1923_v10 = vadd.f32 %v1915_v21, %v1898_v17  ;;  %v2200_v49 = vadd.f32 %v2192_v46, %v2175_v32  ;;  %v2269_v50 = vmul.f32 %v4490_v36, %v2260_v30  ;;  %v2017_v18 = vmul.f32 %v4333_v51, %v2008_v1  ;;  %v2084_v51 = vld [vmem:[#allocation2 + $0x140] sm:$0xf] }
 0x1af   :  { %v2225_v44 = vadd.f32 %v2217_v62, %v2199_v61  ;;  %v2074_v0 = vadd.f32 %v2066_v11, %v2049_v59  ;;  %v2143_v21 = vmul.f32 %v4416_v7, %v2134_v33  ;;  %v2318_v23 = vmul.f32 %v4528_v9, %v2309_v35  ;;  %v2184_v61 = vld [vmem:[#allocation2 + $0x13a] sm:$0xf]  ;;  %v2135_v30 = vld [vmem:[#allocation2 + $0x141] sm:$0xf]  ;;  %v2160_v35 = vld [vmem:[#allocation2 + $0x171] sm:$0xf] }
 0x1b0   :  { %v1948_v39 = vadd.f32 %v1940_v48, %v1923_v10  ;;  %v2226_v8 = vadd.f32 %v2218_v57, %v2200_v49  ;;  %v2294_v25 = vmul.f32 %v4512_v43, %v2285_v58  ;;  %v2042_v32 = vmul.f32 %v4349_v12, %v2033_v37  ;;  %v2210_v48 = vld [vmem:[#allocation2 + $0xe0] sm:$0xf]  ;;  %v2110_v49 = vld [vmem:[#allocation2 + $0x170] sm:$0xf] }
 0x1b1   :  { %v2251_v63 = vadd.f32 %v2243_v31, %v2225_v44  ;;  %v2100_v47 = vadd.f32 %v2092_v55, %v2074_v0  ;;  %v2168_v26 = vmul.f32 %v4432_v40, %v2159_v52  ;;  %v2319_v11 = vmul.f32 %v4528_v9, %v2310_v22  ;;  %v2236_v57 = vld [vmem:[#allocation2 + $0x110] sm:$0xf]  ;;  %v3483_v58 = vld [vmem:[%s5100_s8 + $0x8] sm:$0xff] }
 0x1b2   :  { %v1974_v15 = vadd.f32 %v1966_v19, %v1948_v39  ;;  %v2252_v28 = vadd.f32 %v2244_v42, %v2226_v8  ;;  %v2067_v44 = vmul.f32 %v4367_v20, %v2058_v41  ;;  %v2193_v24 = vmul.f32 %v4448_v60, %v2184_v61  ;;  %v2286_v42 = vld [vmem:[#allocation2 + $0x111] sm:$0xf]  ;;  %2470 = vmatpush.bf16.msrb.mxu2 %v3483_v58  ;;  %v2262_v41 = vld [vmem:[#allocation2 + $0xe9] sm:$0xf] }
 0x1b3   :  { %v2276_v27 = vadd.f32 %v2268_v29, %v2251_v63  ;;  %v2126_v17 = vadd.f32 %v2118_v53, %v2100_v47  ;;  %v2093_v39 = vmul.f32 %v4378_v5, %v2084_v51  ;;  %v2219_v0 = vmul.f32 %v4461_v3, %v2210_v48  ;;  %v2261_v63 = vld [vmem:[#allocation2 + $0xe1] sm:$0xf] }
 0x1b4   :  { %v2000_v38 = vadd.f32 %v1992_v14, %v1974_v15  ;;  %v2277_v62 = vadd.f32 %v2269_v50, %v2252_v28  ;;  %v2119_v1 = vmul.f32 %v4400_v4, %v2110_v49  ;;  %v2245_v8 = vmul.f32 %v4476_v2, %v2236_v57  ;;  %v2211_v50 = vld [vmem:[#allocation2 + $0xe8] sm:$0xf] }
 0x1b5   :  { %v2301_v34 = vadd.f32 %v2293_v54, %v2276_v27  ;;  %v2151_v46 = vadd.f32 %v2143_v21, %v2126_v17  ;;  %v2144_v5 = vmul.f32 %v4416_v7, %v2135_v30  ;;  %v2270_v53 = vmul.f32 %v4490_v36, %v2261_v63  ;;  %v2185_v27 = vld [vmem:[#allocation2 + $0x142] sm:$0xf]  ;;  %v2237_v21 = vld [vmem:[#allocation2 + $0x118] sm:$0xf] }
 0x1b6   :  { %v2025_v16 = vadd.f32 %v2017_v18, %v2000_v38  ;;  %v2302_v59 = vadd.f32 %v2294_v25, %v2277_v62  ;;  %v2311_v54 = vld [vmem:[#allocation2 + $0xe2] sm:$0xf]  ;;  %v2169_v37 = vmul.f32 %v4432_v40, %v2160_v35  ;;  %v2295_v28 = vmul.f32 %v4512_v43, %v2286_v42  ;;  %v2287_v25 = vld [vmem:[#allocation2 + $0x119] sm:$0xf] }
 0x1b7   :  { %v2326_v10 = vadd.f32 %v2318_v23, %v2301_v34  ;;  %v2176_v31 = vadd.f32 %v2168_v26, %v2151_v46  ;;  %v2194_v7 = vmul.f32 %v4448_v60, %v2185_v27  ;;  %v2320_v17 = vmul.f32 %v4528_v9, %v2311_v54  ;;  %v2312_v60 = vld [vmem:[#allocation2 + $0xea] sm:$0xf] }
 0x1b8   :  { %v2050_v45 = vadd.f32 %v2042_v32, %v2025_v16  ;;  %v2327_v12 = vadd.f32 %v2319_v11, %v2302_v59  ;;  %v2220_v34 = vmul.f32 %v4461_v3, %v2211_v50  ;;  %v2246_v40 = vmul.f32 %v4476_v2, %v2237_v21 }
 0x1b9   :  { %v2337_v13 = vadd.f32 %v4561_v6, %v2326_v10  ;;  %v2201_v19 = vadd.f32 %v2193_v24, %v2176_v31  ;;  %v2271_v32 = vmul.f32 %v4490_v36, %v2262_v41  ;;  %v2296_v10 = vmul.f32 %v4512_v43, %v2287_v25  ;;  %v3482_v36 = vld [vmem:[%s5100_s8] sm:$0xff] }
 0x1ba   :  { %v2075_v56 = vadd.f32 %v2067_v44, %v2050_v45  ;;  %v2338_v29 = vadd.f32 %v4561_v6, %v2327_v12  ;;  %v2321_v3 = vmul.f32 %v4528_v9, %v2312_v60  ;;  %2471 = vmatpush.bf16.msrb.mxu2 %v3482_v36  ;;  %v3506_v9 = vld [vmem:[%s5099_s7] ss:$0 sm:$0xff]  ;;  %v4731_v60 = vld [vmem:[%s5102_s10 + $0x8] sm:$0xff] }
 0x1bb   :  { %v2345_v55 = vmax.f32 %v2337_v13, 0.0  ;;  %v2227_v33 = vadd.f32 %v2219_v0, %v2201_v19  ;;  %v3516_v19 = vmov 0.0   ;;  %v2533_v0 = vld [vmem:[%s5102_s10] sm:$0xff] }
 0x1bc   :  { %v2101_v20 = vadd.f32 %v2093_v39, %v2075_v56  ;;  %v2346_v15 = vmax.f32 %v2338_v29, 0.0  ;;  %2487 = vst [vmem:[#allocation3] sm:$0xff] %v3516_v19  ;;  %v4696_v30 = vperm.slane %v2533_v0, 0  ;;  %v4698_v29 = vperm.slane %v2533_v0, 1 }
 0x1bd   :  { %2365 = vst [vmem:[#allocation1 + $0x20] ss:$2 sm:$0xff] %v2345_v55  ;;  %v2253_v47 = vadd.f32 %v2245_v8, %v2227_v33  ;;  %v4702_v8 = vperm.slane %v2533_v0, 2 }
 0x1be   :  { %v2127_v14 = vadd.f32 %v2119_v1, %v2101_v20  ;;  %2367 = vst [vmem:[#allocation1 + $0x21] ss:$2 sm:$0xff] %v2346_v15 }
 0x1bf   :  { %v2278_v52 = vadd.f32 %v2270_v53, %v2253_v47  ;;  %2488 = vst [vmem:[#allocation3 + $0x8] sm:$0xff] %v3516_v19  ;;  %v4708_v53 = vperm.slane %v2533_v0, 4 }
 0x1c0   :  { %v2152_v4 = vadd.f32 %v2144_v5, %v2127_v14  ;;  %2497 = vst [vmem:[#allocation3 + $0x10] sm:$0x3] %v3516_v19  ;;  %v4705_v14 = vperm.slane %v2533_v0, 3 }
 0x1c1   :  { %v2303_v18 = vadd.f32 %v2295_v28, %v2278_v52  ;;  %2498 = vst [vmem:[#allocation3 + $0x18] sm:$0x3] %v3516_v19  ;;  %v4711_v52 = vperm.slane %v2533_v0, 5 }
 0x1c2   :  { %v2177_v38 = vadd.f32 %v2169_v37, %v2152_v4  ;;  %2505 = vst [vmem:[#allocation3 + $0x16] sm:$0x3] %v3516_v19 }
 0x1c3   :  { %v2328_v23 = vadd.f32 %v2320_v17, %v2303_v18  ;;  %2506 = vst [vmem:[#allocation3 + $0x1e] sm:$0x3] %v3516_v19  ;;  %v2555_v55 = vld [vmem:[#allocation3] sm:$0xf]  ;;  %v2647_v58 = vld [vmem:[#allocation3 + $0x4] sm:$0xf] }
 0x1c4   :  { %v2202_v22 = vadd.f32 %v2194_v7, %v2177_v38  ;;  %2489 = vst [vmem:[#allocation3 + $0x40] sm:$0xff] %v3516_v19  ;;  %v2572_v63 = vld [vmem:[#allocation3 + $0x1] sm:$0xf]  ;;  %v2564_v20 = vmul.f32 %v4696_v30, %v2555_v55  ;;  %v2656_v37 = vmul.f32 %v4708_v53, %v2647_v58  ;;  %v4718_v7 = vld [vmem:[%s5101_s9] ss:$0 sm:$0xff] }
 0x1c5   :  { %v2339_v62 = vadd.f32 %v4561_v6, %v2328_v23  ;;  %v2374_v2 = vld.sshfl [vmem:[#allocation1 + $0x20] sm:$0xff pattern:$0x75316420]  ;;  %2490 = vst [vmem:[#allocation3 + $0x48] sm:$0xff] %v3516_v19  ;;  %v2581_v1 = vmul.f32 %v4698_v29, %v2572_v63  ;;  %v2597_v33 = vld [vmem:[#allocation3 + $0x2] sm:$0xf] }
 0x1c6   :  { %v2228_v61 = vadd.f32 %v2220_v34, %v2202_v22  ;;  %2492 = vst [vmem:[#allocation3 + $0x30] sm:$0xff] %v3516_v19  ;;  %v2606_v35 = vmul.f32 %v4702_v8, %v2597_v33  ;;  %v2622_v15 = vld [vmem:[#allocation3 + $0x3] sm:$0xf]  ;;  %v2556_v27 = vld [vmem:[#allocation3 + $0x8] sm:$0xf]  ;;  %v4721_v22 = vperm.slane %v2533_v0, 6 }
 0x1c7   :  { %v2347_v46 = vmax.f32 %v2339_v62, 0.0  ;;  %2493 = vst [vmem:[#allocation3 + $0x38] sm:$0xff] %v3516_v19  ;;  %v2589_v42 = vadd.f32 %v2581_v1, %v2564_v20  ;;  %v2631_v47 = vmul.f32 %v4705_v14, %v2622_v15  ;;  %v2573_v54 = vld [vmem:[#allocation3 + $0x9] sm:$0xf]  ;;  %v2565_v50 = vmul.f32 %v4696_v30, %v2556_v27 }
 0x1c8   :  { %v2254_v16 = vadd.f32 %v2246_v40, %v2228_v61  ;;  %2494 = vst [vmem:[#allocation3 + $0x70] sm:$0xff] %v3516_v19  ;;  %v2673_v28 = vld [vmem:[#allocation3 + $0x8] sm:$0xf]  ;;  %v2582_v38 = vmul.f32 %v4698_v29, %v2573_v54  ;;  %v4752_v63 = vperm.slane %v4731_v60, 4  ;;  %v4755_v20 = vperm.slane %v4731_v60, 5 }
 0x1c9   :  { %2369 = vst [vmem:[#allocation1 + $0x30] ss:$2 sm:$0xff] %v2347_v46  ;;  %v2614_v5 = vadd.f32 %v2606_v35, %v2589_v42  ;;  %v2598_v18 = vld [vmem:[#allocation3 + $0xa] sm:$0xf]  ;;  %v2682_v21 = vmul.f32 %v4711_v52, %v2673_v28 }
 0x1ca   :  { %v2279_v26 = vadd.f32 %v2271_v32, %v2254_v16  ;;  %2495 = vst [vmem:[#allocation3 + $0x78] sm:$0xff] %v3516_v19  ;;  %v2698_v34 = vld [vmem:[#allocation3 + $0x9] sm:$0xf]  ;;  %v2590_v41 = vadd.f32 %v2582_v38, %v2565_v50  ;;  %v2607_v61 = vmul.f32 %v4702_v8, %v2598_v18  ;;  %v4726_v32 = vperm.slane %v2533_v0, 7 }
 0x1cb   :  { %2499 = vst [vmem:[#allocation3 + $0x20] sm:$0x3] %v3516_v19  ;;  %v2639_v4 = vadd.f32 %v2631_v47, %v2614_v5  ;;  %v2623_v62 = vld [vmem:[#allocation3 + $0xb] sm:$0xf]  ;;  %v2707_v16 = vmul.f32 %v4721_v22, %v2698_v34 }
 0x1cc   :  { %v2304_v51 = vadd.f32 %v2296_v10, %v2279_v26  ;;  %2500 = vst [vmem:[#allocation3 + $0x28] sm:$0x3] %v3516_v19  ;;  %v2723_v26 = vld [vmem:[#allocation3 + $0xa] sm:$0xf]  ;;  %v2615_v10 = vadd.f32 %v2607_v61, %v2590_v41 }
 0x1cd   :  { %2501 = vst [vmem:[#allocation3 + $0x50] sm:$0x3] %v3516_v19  ;;  %v2664_v17 = vadd.f32 %v2656_v37, %v2639_v4 }
 0x1ce   :  { %v2329_v48 = vadd.f32 %v2321_v3, %v2304_v51  ;;  %2502 = vst [vmem:[#allocation3 + $0x58] sm:$0x3] %v3516_v19  ;;  %v2632_v51 = vmul.f32 %v4705_v14, %v2623_v62 }
 0x1cf   :  { %2503 = vst [vmem:[#allocation3 + $0x60] sm:$0x3] %v3516_v19  ;;  %v2690_v25 = vadd.f32 %v2682_v21, %v2664_v17  ;;  %v4768_v17 = vld [vmem:[%s5102_s10 + $0x10] sm:$0xff] }
 0x1d0   :  { %v2340_v59 = vadd.f32 %v4561_v6, %v2329_v48  ;;  %2504 = vst [vmem:[#allocation3 + $0x68] sm:$0x3] %v3516_v19  ;;  %v2648_v48 = vld [vmem:[#allocation3 + $0xc] sm:$0xf] }
 0x1d1   :  { %2507 = vst [vmem:[#allocation3 + $0x26] sm:$0x3] %v3516_v19  ;;  %v2657_v36 = vmul.f32 %v4708_v53, %v2648_v48 }
 0x1d2   :  { %v2348_v11 = vmax.f32 %v2340_v59, 0.0  ;;  %2508 = vst [vmem:[#allocation3 + $0x2e] sm:$0x3] %v3516_v19  ;;  %v2715_v59 = vadd.f32 %v2707_v16, %v2690_v25 }
 0x1d3   :  { %2509 = vst [vmem:[#allocation3 + $0x56] sm:$0x3] %v3516_v19 }
 0x1d4   :  { %2371 = vst [vmem:[#allocation1 + $0x31] ss:$2 sm:$0xff] %v2348_v11  ;;  %v2732_v11 = vmul.f32 %v4726_v32, %v2723_v26 }
 0x1d5   :  { %2510 = vst [vmem:[#allocation3 + $0x5e] sm:$0x3] %v3516_v19 }
 0x1d6   :  { %2511 = vst [vmem:[#allocation3 + $0x66] sm:$0x3] %v3516_v19 }
 0x1d7   :  { %2512 = vst [vmem:[#allocation3 + $0x6e] sm:$0x3] %v3516_v19 }
 0x1db   :  { %v2375_v45 = vld.sshfl [vmem:[#allocation1 + $0x30] sm:$0xff pattern:$0x75316420] }
 0x1dc   :  { %v2381_v44 = vpack.c.bf16 %v2375_v45, %v2374_v2  ;;  %v4736_v2 = vperm.slane %v4731_v60, 0  ;;  %v2748_v45 = vld [vmem:[#allocation3 + $0xb] sm:$0xf] }
 0x1de   :  { %3416 = vmatmul.msk.bf16.gmra.mxu1 %vm2409_vm2, %v2381_v44  ;;  %v2640_v44 = vadd.f32 %v2632_v51, %v2615_v10 }
 0x223   :  { %v2425_v43 = vpop.f32.mrf.mxu1 }
 0x224   :  { %v2426_v24 = vadd.f32 %v3506_v9, %v2425_v43  ;;  %v2740_v43 = vadd.f32 %v2732_v11, %v2715_v59 }
 0x22b   :  { %v2427_v31 = vpop.f32.mrf.mxu1 }
 0x22c   :  { %v2428_v6 = vadd.f32 %v3506_v9, %v2427_v31  ;;  %v4741_v31 = vperm.slane %v4731_v60, 1 }
 0x22e   :  { %v2440_v13 = vpack.c.bf16 %v2428_v6, %v2426_v24  ;;  %v2773_v24 = vld [vmem:[#allocation3 + $0xc] sm:$0xf]  ;;  %v4744_v6 = vperm.slane %v4731_v60, 2 }
 0x22f   :  { %v2782_v5 = vmul.f32 %v4741_v31, %v2773_v24  ;;  %v4785_v24 = vperm.slane %v4768_v17, 0 }
 0x230   :  { %3425 = vmatmul.msk.bf16.vlgmr.msrb.gmra.mxu2 %vm2457_vm3, %v2440_v13  ;;  %v4747_v13 = vperm.slane %v4731_v60, 3 }
 0x25b   :  { %v2430_v49 = vpop.f32.mrf.mxu1 }
 0x25c   :  { %v2431_v12 = vadd.f32 %v3506_v9, %v2430_v49 }
 0x263   :  { %v2432_v57 = vpop.f32.mrf.mxu1 }
 0x264   :  { %v2433_v56 = vadd.f32 %v3506_v9, %v2432_v57  ;;  %v2757_v9 = vmul.f32 %v4736_v2, %v2748_v45 }
 0x266   :  { %v2441_v39 = vpack.c.bf16 %v2433_v56, %v2431_v12  ;;  %v2765_v15 = vadd.f32 %v2757_v9, %v2740_v43  ;;  %v4782_v9 = vperm.slane %v4731_v60, 7 }
 0x268   :  { %3426 = vmatmul.msk.bf16.gmra.mxu2 %vm2457_vm3, %v2441_v39  ;;  %v2665_v39 = vadd.f32 %v2657_v36, %v2640_v44  ;;  %v2790_v25 = vadd.f32 %v2782_v5, %v2765_v15 }
 0x2b3   :  { %v2473_v23 = vpop.f32.mrf.mxu2 }
 0x2b4   :  { %v2474_v40 = vadd.f32 %v4718_v7, %v2473_v23 }
 0x2b6   :  { %v2483_v46 = vmax.f32 %v2474_v40, 0.0 }
 0x2b8   :  { %v2517_v3 = vrot.slane %v2483_v46, 4  ;;  %2525 = vst [vmem:[#allocation3 + $0x12] sm:$0xf] %v2483_v46  ;;  %v4774_v46 = vperm.slane %v4731_v60, 6 }
 0x2ba   :  { %2526 = vst [vmem:[#allocation3 + $0x1a] sm:$0xf] %v2517_v3 }
 0x2bb   :  { %v2475_v49 = vpop.f32.mrf.mxu2 }
 0x2bc   :  { %v4760_v47 = vadd.f32 %v4718_v7, %v2475_v49 }
 0x2be   :  { %v2484_v26 = vmax.f32 %v4760_v47, 0.0 }
 0x2bf   :  { %v2557_v57 = vld [vmem:[#allocation3 + $0x10] sm:$0xf]  ;;  %v2649_v37 = vld [vmem:[#allocation3 + $0x14] sm:$0xf] }
 0x2c0   :  { %v2574_v12 = vld [vmem:[#allocation3 + $0x11] sm:$0xf]  ;;  %v2566_v19 = vmul.f32 %v4696_v30, %v2557_v57  ;;  %v2658_v40 = vmul.f32 %v4708_v53, %v2649_v37  ;;  %2527 = vst [vmem:[#allocation3 + $0x22] sm:$0xf] %v2484_v26 }
 0x2c1   :  { %v2599_v56 = vld [vmem:[#allocation3 + $0x12] sm:$0xf]  ;;  %v2583_v0 = vmul.f32 %v4698_v29, %v2574_v12  ;;  %v2558_v1 = vld [vmem:[#allocation3 + $0x18] sm:$0xf]  ;;  %v2650_v60 = vld [vmem:[#allocation3 + $0x1c] sm:$0xf] }
 0x2c2   :  { %v2674_v55 = vld [vmem:[#allocation3 + $0x10] sm:$0xf]  ;;  %v2575_v33 = vld [vmem:[#allocation3 + $0x19] sm:$0xf]  ;;  %v2567_v58 = vmul.f32 %v4696_v30, %v2558_v1  ;;  %v2608_v4 = vmul.f32 %v4702_v8, %v2599_v56  ;;  %v2774_v36 = vld [vmem:[#allocation3 + $0x14] sm:$0xf] }
 0x2c3   :  { %v2624_v42 = vld [vmem:[#allocation3 + $0x13] sm:$0xf]  ;;  %v2683_v35 = vmul.f32 %v4711_v52, %v2674_v55  ;;  %v2584_v27 = vmul.f32 %v4698_v29, %v2575_v33  ;;  %v2591_v54 = vadd.f32 %v2583_v0, %v2566_v19  ;;  %v2600_v28 = vld [vmem:[#allocation3 + $0x1a] sm:$0xf]  ;;  %v2783_v47 = vmul.f32 %v4741_v31, %v2774_v36 }
 0x2c4   :  { %v2699_v38 = vld [vmem:[#allocation3 + $0x11] sm:$0xf]  ;;  %v2633_v23 = vmul.f32 %v4705_v14, %v2624_v42  ;;  %v2675_v41 = vld [vmem:[#allocation3 + $0x18] sm:$0xf]  ;;  %v2609_v10 = vmul.f32 %v4702_v8, %v2600_v28  ;;  %v4791_v42 = vperm.slane %v4768_v17, 1 }
 0x2c5   :  { %v2691_v50 = vadd.f32 %v2683_v35, %v2665_v39  ;;  %v2724_v18 = vld [vmem:[#allocation3 + $0x12] sm:$0xf]  ;;  %v2592_v21 = vadd.f32 %v2584_v27, %v2567_v58  ;;  %v2616_v34 = vadd.f32 %v2608_v4, %v2591_v54  ;;  %v2708_v61 = vmul.f32 %v4721_v22, %v2699_v38  ;;  %v2625_v51 = vld [vmem:[#allocation3 + $0x1b] sm:$0xf] }
 0x2c6   :  { %v2749_v62 = vld [vmem:[#allocation3 + $0x13] sm:$0xf]  ;;  %v2733_v59 = vmul.f32 %v4726_v32, %v2724_v18  ;;  %v2684_v45 = vmul.f32 %v4711_v52, %v2675_v41  ;;  %v2700_v44 = vld [vmem:[#allocation3 + $0x19] sm:$0xf]  ;;  %v2634_v0 = vmul.f32 %v4705_v14, %v2625_v51 }
 0x2c7   :  { %v2798_v16 = vld [vmem:[#allocation3 + $0x10] sm:$0xf]  ;;  %v2641_v3 = vadd.f32 %v2633_v23, %v2616_v34  ;;  %v2716_v48 = vadd.f32 %v2708_v61, %v2691_v50  ;;  %v2617_v49 = vadd.f32 %v2609_v10, %v2592_v21  ;;  %v2725_v12 = vld [vmem:[#allocation3 + $0x1a] sm:$0xf]  ;;  %v2758_v39 = vmul.f32 %v4736_v2, %v2749_v62  ;;  %v2898_v41 = vld [vmem:[#allocation3 + $0x14] sm:$0xf] }
 0x2c8   :  { %v2823_v11 = vld [vmem:[#allocation3 + $0x11] sm:$0xf]  ;;  %v2807_v43 = vmul.f32 %v4744_v6, %v2798_v16  ;;  %v2799_v55 = vld [vmem:[#allocation3 + $0x18] sm:$0xf]  ;;  %v2709_v15 = vmul.f32 %v4721_v22, %v2700_v44  ;;  %v2734_v27 = vmul.f32 %v4726_v32, %v2725_v12  ;;  %v4798_v50 = vperm.slane %v4768_v17, 2 }
 0x2c9   :  { %v2666_v57 = vadd.f32 %v2658_v40, %v2641_v3  ;;  %v2741_v56 = vadd.f32 %v2733_v59, %v2716_v48  ;;  %v2848_v19 = vld [vmem:[#allocation3 + $0x12] sm:$0xf]  ;;  %v2832_v33 = vmul.f32 %v4747_v13, %v2823_v11  ;;  %v2750_v54 = vld [vmem:[#allocation3 + $0x1b] sm:$0xf]  ;;  %v2642_v38 = vadd.f32 %v2634_v0, %v2617_v49 }
 0x2ca   :  { %v2815_v1 = vadd.f32 %v2807_v43, %v2790_v25  ;;  %v2873_v58 = vld [vmem:[#allocation3 + $0x13] sm:$0xf]  ;;  %v2824_v4 = vld [vmem:[#allocation3 + $0x19] sm:$0xf]  ;;  %v2857_v28 = vmul.f32 %v4752_v63, %v2848_v19  ;;  %v2808_v23 = vmul.f32 %v4744_v6, %v2799_v55  ;;  %v2659_v61 = vmul.f32 %v4708_v53, %v2650_v60 }
 0x2cb   :  { %v2692_v35 = vadd.f32 %v2684_v45, %v2666_v57  ;;  %v2766_v5 = vadd.f32 %v2758_v39, %v2741_v56  ;;  %v2775_v21 = vld [vmem:[#allocation3 + $0x1c] sm:$0xf]  ;;  %v2882_v25 = vmul.f32 %v4755_v20, %v2873_v58  ;;  %v2518_v16 = vrot.slane %v2484_v26, 4  ;;  %v2924_v11 = vld [vmem:[#allocation3 + $0x18] sm:$0xf] }
 0x2cc   :  { %v2840_v37 = vadd.f32 %v2832_v33, %v2815_v1  ;;  %v2849_v40 = vld [vmem:[#allocation3 + $0x1a] sm:$0xf]  ;;  %v2759_v51 = vmul.f32 %v4736_v2, %v2750_v54  ;;  %v2833_v48 = vmul.f32 %v4747_v13, %v2824_v4  ;;  %v2784_v45 = vmul.f32 %v4741_v31, %v2775_v21  ;;  %v2726_v54 = vld [vmem:[#allocation3 + $0x22] sm:$0xf] }
 0x2cd   :  { %v2717_v18 = vadd.f32 %v2709_v15, %v2692_v35  ;;  %v2791_v34 = vadd.f32 %v2783_v47, %v2766_v5  ;;  %v2874_v59 = vld [vmem:[#allocation3 + $0x1b] sm:$0xf]  ;;  %v2907_v43 = vmul.f32 %v4774_v46, %v2898_v41  ;;  %v4808_v49 = vperm.slane %v4768_v17, 3  ;;  %2528 = vst [vmem:[#allocation3 + $0x2a] sm:$0xf] %v2518_v16 }
 0x2ce   :  { %v2865_v62 = vadd.f32 %v2857_v28, %v2840_v37  ;;  %v2899_v36 = vld [vmem:[#allocation3 + $0x1c] sm:$0xf]  ;;  %v2667_v57 = vadd.f32 %v2659_v61, %v2642_v38  ;;  %v2858_v56 = vmul.f32 %v4752_v63, %v2849_v40  ;;  %v2883_v55 = vmul.f32 %v4755_v20, %v2874_v59  ;;  %v2676_v35 = vld [vmem:[#allocation3 + $0x20] sm:$0xf]  ;;  %v2927_v37 = vld [vmem:[#allocation3 + $0x30] sm:$0xf] }
 0x2cf   :  { %v2742_v10 = vadd.f32 %v2734_v27, %v2717_v18  ;;  %v2816_v3 = vadd.f32 %v2808_v23, %v2791_v34  ;;  %v2949_v39 = vld [vmem:[#allocation3 + $0x19] sm:$0xf]  ;;  %v2933_v33 = vmul.f32 %v4782_v9, %v2924_v11  ;;  %v2701_v15 = vld [vmem:[#allocation3 + $0x21] sm:$0xf]  ;;  %v2908_v58 = vmul.f32 %v4774_v46, %v2899_v36 }
 0x2d0   :  { %v2890_v44 = vadd.f32 %v2882_v25, %v2865_v62  ;;  %v2974_v19 = vld [vmem:[#allocation3 + $0x1a] sm:$0xf]  ;;  %v2685_v27 = vmul.f32 %v4711_v52, %v2676_v35  ;;  %v2800_v4 = vld [vmem:[#allocation3 + $0x20] sm:$0xf]  ;;  %v2958_v38 = vmul.f32 %v4785_v24, %v2949_v39  ;;  %v2710_v61 = vmul.f32 %v4721_v22, %v2701_v15  ;;  %v2952_v25 = vld [vmem:[#allocation3 + $0x31] sm:$0xf] }
 0x2d1   :  { %v2767_v26 = vadd.f32 %v2759_v51, %v2742_v10  ;;  %v2841_v12 = vadd.f32 %v2833_v48, %v2816_v3  ;;  %v2999_v0 = vld [vmem:[#allocation3 + $0x1b] sm:$0xf]  ;;  %v2983_v18 = vmul.f32 %v4791_v42, %v2974_v19  ;;  %v2825_v34 = vld [vmem:[#allocation3 + $0x21] sm:$0xf]  ;;  %v2809_v40 = vmul.f32 %v4744_v6, %v2800_v4 }
 0x2d2   :  { %v2915_v1 = vadd.f32 %v2907_v43, %v2890_v44  ;;  %v3024_v60 = vld [vmem:[#allocation3 + $0x1c] sm:$0xf]  ;;  %v3008_v21 = vmul.f32 %v4798_v50, %v2999_v0  ;;  %v2693_v41 = vadd.f32 %v2685_v27, %v2667_v57  ;;  %v2925_v62 = vld [vmem:[#allocation3 + $0x20] sm:$0xf]  ;;  %v2735_v51 = vmul.f32 %v4726_v32, %v2726_v54  ;;  %v2776_v44 = vld [vmem:[#allocation3 + $0x24] sm:$0xf] }
 0x2d3   :  { %v2792_v5 = vadd.f32 %v2784_v45, %v2767_v26  ;;  %v2866_v47 = vadd.f32 %v2858_v56, %v2841_v12  ;;  %v3033_v10 = vmul.f32 %v4808_v49, %v3024_v60  ;;  %v2751_v3 = vld [vmem:[#allocation3 + $0x23] sm:$0xf]  ;;  %v4823_v59 = vmul.f32 %v4782_v9, %v2927_v37 }
 0x2d4   :  { %v2941_v28 = vadd.f32 %v2933_v33, %v2915_v1  ;;  %v2850_v48 = vld [vmem:[#allocation3 + $0x22] sm:$0xf]  ;;  %v2718_v45 = vadd.f32 %v2710_v61, %v2693_v41  ;;  %v2834_v43 = vmul.f32 %v4747_v13, %v2825_v34  ;;  %v2934_v39 = vmul.f32 %v4782_v9, %v2925_v62  ;;  %v2801_v33 = vld [vmem:[#allocation3 + $0x28] sm:$0xf] }
 0x2d5   :  { %v2891_v23 = vadd.f32 %v2883_v55, %v2866_v47  ;;  %v2817_v36 = vadd.f32 %v2809_v40, %v2792_v5  ;;  %v2950_v57 = vld [vmem:[#allocation3 + $0x21] sm:$0xf]  ;;  %v4828_v19 = vmul.f32 %v4785_v24, %v2952_v25  ;;  %v4831_v0 = vperm.slane %v4768_v17, 4  ;;  %v2851_v27 = vld [vmem:[#allocation3 + $0x2a] sm:$0xf] }
 0x2d6   :  { %v2966_v16 = vadd.f32 %v2958_v38, %v2941_v28  ;;  %v2875_v12 = vld [vmem:[#allocation3 + $0x23] sm:$0xf]  ;;  %v2743_v55 = vadd.f32 %v2735_v51, %v2718_v45  ;;  %v2760_v1 = vmul.f32 %v4736_v2, %v2751_v3  ;;  %v2859_v35 = vmul.f32 %v4752_v63, %v2850_v48  ;;  %v2876_v38 = vld [vmem:[#allocation3 + $0x2b] sm:$0xf] }
 0x2d7   :  { %v2916_v11 = vadd.f32 %v2908_v58, %v2891_v23  ;;  %v2900_v56 = vld [vmem:[#allocation3 + $0x24] sm:$0xf]  ;;  %v2842_v60 = vadd.f32 %v2834_v43, %v2817_v36  ;;  %v2785_v47 = vmul.f32 %v4741_v31, %v2776_v44  ;;  %v2826_v58 = vld [vmem:[#allocation3 + $0x29] sm:$0xf]  ;;  %v2959_v4 = vmul.f32 %v4785_v24, %v2950_v57  ;;  %v3050_v41 = vld [vmem:[#allocation3 + $0x20] sm:$0xf] }
 0x2d8   :  { %v2991_v26 = vadd.f32 %v2983_v18, %v2966_v16  ;;  %v2975_v15 = vld [vmem:[#allocation3 + $0x22] sm:$0xf]  ;;  %v2768_v37 = vadd.f32 %v2760_v1, %v2743_v55  ;;  %v2884_v18 = vmul.f32 %v4755_v20, %v2875_v12  ;;  %v2909_v34 = vmul.f32 %v4774_v46, %v2900_v56  ;;  %v2901_v44 = vld [vmem:[#allocation3 + $0x2c] sm:$0xf]  ;;  %v3051_v1 = vld [vmem:[#allocation3 + $0x28] sm:$0xf] }
 0x2d9   :  { %v2942_v54 = vadd.f32 %v2934_v39, %v2916_v11  ;;  %v2867_v28 = vadd.f32 %v2859_v35, %v2842_v60  ;;  %v3000_v23 = vld [vmem:[#allocation3 + $0x23] sm:$0xf]  ;;  %v2810_v40 = vmul.f32 %v4744_v6, %v2801_v33  ;;  %v2984_v25 = vmul.f32 %v4791_v42, %v2975_v15  ;;  %v2951_v36 = vld [vmem:[#allocation3 + $0x29] sm:$0xf]  ;;  %v3491_v60 = vld [vmem:[%s5105_s12 + $0x38] sm:$0xff] }
 0x2da   :  { %v3016_v5 = vadd.f32 %v3008_v21, %v2991_v26  ;;  %v2926_v21 = vld [vmem:[#allocation3 + $0x28] sm:$0xf]  ;;  %v3025_v16 = vld [vmem:[#allocation3 + $0x24] sm:$0xf]  ;;  %v2793_v51 = vadd.f32 %v2785_v47, %v2768_v37  ;;  %v2835_v3 = vmul.f32 %v4747_v13, %v2826_v58  ;;  %v2860_v48 = vmul.f32 %v4752_v63, %v2851_v27  ;;  %3278 = vmatpush.bf16.msrb.mxu3 %v3491_v60 }
 0x2db   :  { %v2967_v62 = vadd.f32 %v2959_v4, %v2942_v54  ;;  %v2892_v11 = vadd.f32 %v2884_v18, %v2867_v28  ;;  %v2885_v45 = vmul.f32 %v4755_v20, %v2876_v38  ;;  %v2976_v43 = vld [vmem:[#allocation3 + $0x2a] sm:$0xf]  ;;  %v3059_v26 = vmul.f32 %v4831_v0, %v3050_v41  ;;  %v3075_v33 = vld [vmem:[#allocation3 + $0x21] sm:$0xf]  ;;  %v4864_v18 = vld [vmem:[%s5102_s10 + $0x18] ss:$0 sm:$0xff] }
 0x2dc   :  { %v3041_v61 = vadd.f32 %v3033_v10, %v3016_v5  ;;  %v3009_v10 = vmul.f32 %v4798_v50, %v3000_v23  ;;  %v2818_v12 = vadd.f32 %v2810_v40, %v2793_v51  ;;  %v2935_v39 = vmul.f32 %v4782_v9, %v2926_v21  ;;  %v3001_v35 = vld [vmem:[#allocation3 + $0x2b] sm:$0xf]  ;;  %v3100_v28 = vld [vmem:[#allocation3 + $0x22] sm:$0xf] }
 0x2dd   :  { %v2992_v57 = vadd.f32 %v2984_v25, %v2967_v62  ;;  %v2917_v56 = vadd.f32 %v2909_v34, %v2892_v11  ;;  %v3034_v55 = vmul.f32 %v4808_v49, %v3025_v16  ;;  %v3076_v47 = vld [vmem:[#allocation3 + $0x29] sm:$0xf]  ;;  %v4852_v58 = vperm.slane %v4768_v17, 5  ;;  %v3125_v21 = vld [vmem:[#allocation3 + $0x23] sm:$0xf] }
 0x2de   :  { %v3067_v5 = vadd.f32 %v3059_v26, %v3041_v61  ;;  %v4855_v27 = vperm.slane %v4768_v17, 6  ;;  %v2843_v54 = vadd.f32 %v2835_v3, %v2818_v12  ;;  %v2960_v37 = vmul.f32 %v4785_v24, %v2951_v36  ;;  %v3101_v40 = vld [vmem:[#allocation3 + $0x2a] sm:$0xf]  ;;  %v3150_v62 = vld [vmem:[#allocation3 + $0x24] sm:$0xf] }
 0x2df   :  { %v3017_v15 = vadd.f32 %v3009_v10, %v2992_v57  ;;  %v2943_v4 = vadd.f32 %v2935_v39, %v2917_v56  ;;  %v4859_v38 = vperm.slane %v4768_v17, 7  ;;  %v2910_v34 = vmul.f32 %v4774_v46, %v2901_v44  ;;  %v2559_v3 = vld [vmem:[#allocation3 + $0x40] sm:$0xf]  ;;  %v2560_v10 = vld [vmem:[#allocation3 + $0x48] sm:$0xf] }
 0x2e0   :  { %v3060_v41 = vmul.f32 %v4831_v0, %v3051_v1  ;;  %v3084_v61 = vmul.f32 %v4852_v58, %v3075_v33  ;;  %v2868_v25 = vadd.f32 %v2860_v48, %v2843_v54  ;;  %v2985_v17 = vmul.f32 %v4791_v42, %v2976_v43  ;;  %v2576_v26 = vld [vmem:[#allocation3 + $0x41] sm:$0xf]  ;;  %v2577_v12 = vld [vmem:[#allocation3 + $0x49] sm:$0xf]  ;;  %v2977_v33 = vld [vmem:[#allocation3 + $0x32] sm:$0xf] }
 0x2e1   :  { %v3042_v23 = vadd.f32 %v3034_v55, %v3017_v15  ;;  %v2968_v16 = vadd.f32 %v2960_v37, %v2943_v4  ;;  %v3010_v51 = vmul.f32 %v4798_v50, %v3001_v35  ;;  %v3085_v36 = vmul.f32 %v4852_v58, %v3076_v47  ;;  %v3126_v55 = vld [vmem:[#allocation3 + $0x2b] sm:$0xf]  ;;  %v2601_v1 = vld [vmem:[#allocation3 + $0x42] sm:$0xf] }
 0x2e2   :  { %v3092_v57 = vadd.f32 %v3084_v61, %v3067_v5  ;;  %v3109_v44 = vmul.f32 %v4855_v27, %v3100_v28  ;;  %v2893_v56 = vadd.f32 %v2885_v45, %v2868_v25  ;;  %v3110_v39 = vmul.f32 %v4855_v27, %v3101_v40  ;;  %v3151_v47 = vld [vmem:[#allocation3 + $0x2c] sm:$0xf]  ;;  %v2626_v28 = vld [vmem:[#allocation3 + $0x43] sm:$0xf] }
 0x2e3   :  { %v3068_v11 = vadd.f32 %v3060_v41, %v3042_v23  ;;  %v3134_v48 = vmul.f32 %v4859_v38, %v3125_v21  ;;  %v3159_v43 = vmul.f32 %v4864_v18, %v3150_v62  ;;  %v2993_v60 = vadd.f32 %v2985_v17, %v2968_v16  ;;  %v3026_v23 = vld [vmem:[#allocation3 + $0x2c] sm:$0xf]  ;;  %v4884_v21 = vld [vmem:[%s5103_s11] ss:$0 sm:$0xff] }
 0x2e4   :  { %v3117_v15 = vadd.f32 %v3109_v44, %v3092_v57  ;;  %v2568_v5 = vmul.f32 %v4696_v30, %v2559_v3  ;;  %v2918_v54 = vadd.f32 %v2910_v34, %v2893_v56  ;;  %v2569_v4 = vmul.f32 %v4696_v30, %v2560_v10  ;;  %v2602_v62 = vld [vmem:[#allocation3 + $0x4a] sm:$0xf]  ;;  %v3052_v57 = vld [vmem:[#allocation3 + $0x30] sm:$0xf] }
 0x2e5   :  { %v3093_v35 = vadd.f32 %v3085_v36, %v3068_v11  ;;  %v2585_v45 = vmul.f32 %v4698_v29, %v2576_v26  ;;  %v2586_v37 = vmul.f32 %v4698_v29, %v2577_v12  ;;  %v3135_v61 = vmul.f32 %v4859_v38, %v3126_v55  ;;  %v2651_v11 = vld [vmem:[#allocation3 + $0x44] sm:$0xf] }
 0x2e6   :  { %v3142_v40 = vadd.f32 %v3134_v48, %v3117_v15  ;;  %v2610_v34 = vmul.f32 %v4702_v8, %v2601_v1  ;;  %v2944_v25 = vadd.f32 %v4823_v59, %v2918_v54  ;;  %v2986_v16 = vmul.f32 %v4791_v42, %v2977_v33  ;;  %v2677_v48 = vld [vmem:[#allocation3 + $0x48] sm:$0xf]  ;;  %v3002_v1 = vld [vmem:[#allocation3 + $0x33] sm:$0xf] }
 0x2e7   :  { %v3118_v41 = vadd.f32 %v3110_v39, %v3093_v35  ;;  %v3160_v17 = vmul.f32 %v4864_v18, %v3151_v47  ;;  %v2593_v3 = vadd.f32 %v2585_v45, %v2568_v5  ;;  %v3018_v36 = vadd.f32 %v3010_v51, %v2993_v60  ;;  %v2627_v51 = vld [vmem:[#allocation3 + $0x4b] sm:$0xf] }
 0x2e8   :  { %v3167_v10 = vadd.f32 %v3159_v43, %v3142_v40  ;;  %v2635_v26 = vmul.f32 %v4705_v14, %v2626_v28  ;;  %v3035_v12 = vmul.f32 %v4808_v49, %v3026_v23  ;;  %v2594_v56 = vadd.f32 %v2586_v37, %v2569_v4  ;;  %v2702_v54 = vld [vmem:[#allocation3 + $0x49] sm:$0xf]  ;;  %v3077_v23 = vld [vmem:[#allocation3 + $0x31] sm:$0xf] }
 0x2e9   :  { %v3143_v44 = vadd.f32 %v3135_v61, %v3118_v41  ;;  %v2611_v39 = vmul.f32 %v4702_v8, %v2602_v62  ;;  %v2618_v55 = vadd.f32 %v2610_v34, %v2593_v3  ;;  %v2969_v59 = vadd.f32 %v4828_v19, %v2944_v25  ;;  %v2727_v62 = vld [vmem:[#allocation3 + $0x4a] sm:$0xf]  ;;  %v3027_v25 = vld [vmem:[#allocation3 + $0x34] sm:$0xf] }
 0x2ea   :  { %v3178_v35 = vadd.f32 %v4884_v21, %v3167_v10  ;;  %v2660_v60 = vmul.f32 %v4708_v53, %v2651_v11  ;;  %v3061_v43 = vmul.f32 %v4831_v0, %v3052_v57  ;;  %v3043_v4 = vadd.f32 %v3035_v12, %v3018_v36  ;;  %v2652_v57 = vld [vmem:[#allocation3 + $0x4c] sm:$0xf] }
 0x2eb   :  { %v3168_v33 = vadd.f32 %v3160_v17, %v3143_v44  ;;  %v2478_v15 = vpop.f32.mrf.mxu2  ;;  %v2643_v5 = vadd.f32 %v2635_v26, %v2618_v55  ;;  %v2686_v19 = vmul.f32 %v4711_v52, %v2677_v48  ;;  %v3011_v28 = vmul.f32 %v4798_v50, %v3002_v1  ;;  %v3102_v55 = vld [vmem:[#allocation3 + $0x32] sm:$0xf] }
 0x2ec   :  { %v2479_v47 = vadd.f32 %v4718_v7, %v2478_v15  ;;  %v3186_v37 = vmax.f32 %v3178_v35, 0.0  ;;  %v2636_v61 = vmul.f32 %v4705_v14, %v2627_v51  ;;  %v2994_v34 = vadd.f32 %v2986_v16, %v2969_v59  ;;  %v2752_v16 = vld [vmem:[#allocation3 + $0x4b] sm:$0xf]  ;;  %v3053_v35 = vld [vmem:[#allocation3 + $0x38] sm:$0xf] }
 0x2ed   :  { %v3179_v45 = vadd.f32 %v4884_v21, %v3168_v33  ;;  %v2668_v40 = vadd.f32 %v2660_v60, %v2643_v5  ;;  %v2619_v3 = vadd.f32 %v2611_v39, %v2594_v56  ;;  %v2711_v11 = vmul.f32 %v4721_v22, %v2702_v54  ;;  %v3490_v33 = vld [vmem:[%s5105_s12 + $0x30] sm:$0xff]  ;;  %v3489_v5 = vld [vmem:[%s5105_s12 + $0x28] sm:$0xff] }
 0x2ee   :  { %v2485_v41 = vmax.f32 %v2479_v47, 0.0  ;;  %3202 = vst [vmem:[#allocation1] ss:$2 sm:$0xff] %v3186_v37  ;;  %v3069_v10 = vadd.f32 %v3061_v43, %v3043_v4  ;;  %v3086_v26 = vmul.f32 %v4852_v58, %v3077_v23  ;;  %v2736_v12 = vmul.f32 %v4726_v32, %v2727_v62  ;;  %3279 = vmatpush.bf16.msrb.mxu3 %v3490_v33  ;;  %v2777_v54 = vld [vmem:[#allocation3 + $0x4c] sm:$0xf] }
 0x2ef   :  { %v3187_v17 = vmax.f32 %v3179_v45, 0.0  ;;  %v2694_v44 = vadd.f32 %v2686_v19, %v2668_v40  ;;  %v3019_v59 = vadd.f32 %v3011_v28, %v2994_v34  ;;  %v3036_v1 = vmul.f32 %v4808_v49, %v3027_v25 }
 0x2f0   :  { %v2519_v36 = vrot.slane %v2485_v41, 4  ;;  %2529 = vst [vmem:[#allocation3 + $0x52] sm:$0xf] %v2485_v41  ;;  %v2644_v56 = vadd.f32 %v2636_v61, %v2619_v3  ;;  %v2661_v39 = vmul.f32 %v4708_v53, %v2652_v57  ;;  %v3094_v51 = vadd.f32 %v3086_v26, %v3069_v10 }
 0x2f1   :  { %3204 = vst [vmem:[#allocation1 + $0x1] ss:$2 sm:$0xff] %v3187_v17  ;;  %v2719_v48 = vadd.f32 %v2711_v11, %v2694_v44  ;;  %v3111_v60 = vmul.f32 %v4855_v27, %v3102_v55  ;;  %v2761_v47 = vmul.f32 %v4736_v2, %v2752_v16  ;;  %v3044_v4 = vadd.f32 %v3036_v1, %v3019_v59 }
 0x2f2   :  { %2530 = vst [vmem:[#allocation3 + $0x5a] sm:$0xf] %v2519_v36  ;;  %v3062_v45 = vmul.f32 %v4831_v0, %v3053_v35  ;;  %v2669_v23 = vadd.f32 %v2661_v39, %v2644_v56  ;;  %v2786_v44 = vmul.f32 %v4741_v31, %v2777_v54  ;;  %3280 = vmatpush.bf16.msrb.mxu3 %v3489_v5 }
 0x2f3   :  { %v2480_v15 = vpop.f32.mrf.mxu2  ;;  %v2744_v43 = vadd.f32 %v2736_v12, %v2719_v48  ;;  %v4921_v25 = vadd.f32 %v3111_v60, %v3094_v51 }
 0x2f4   :  { %v4917_v41 = vadd.f32 %v4718_v7, %v2480_v15  ;;  %v4928_v59 = vadd.f32 %v3062_v45, %v3044_v4 }
 0x2f5   :  { %v2769_v57 = vadd.f32 %v2761_v47, %v2744_v43 }
 0x2f6   :  { %v2486_v35 = vmax.f32 %v4917_v41, 0.0 }
 0x2f7   :  { %v2561_v37 = vld [vmem:[#allocation3 + $0x50] sm:$0xf]  ;;  %v2653_v48 = vld [vmem:[#allocation3 + $0x54] sm:$0xf] }
 0x2f8   :  { %v2578_v19 = vld [vmem:[#allocation3 + $0x51] sm:$0xf]  ;;  %v2570_v61 = vmul.f32 %v4696_v30, %v2561_v37  ;;  %v2662_v54 = vmul.f32 %v4708_v53, %v2653_v48  ;;  %v2794_v37 = vadd.f32 %v2786_v44, %v2769_v57  ;;  %2531 = vst [vmem:[#allocation3 + $0x62] sm:$0xf] %v2486_v35 }
 0x2f9   :  { %v2603_v28 = vld [vmem:[#allocation3 + $0x52] sm:$0xf]  ;;  %v2587_v40 = vmul.f32 %v4698_v29, %v2578_v19  ;;  %v2562_v17 = vld [vmem:[#allocation3 + $0x58] sm:$0xf]  ;;  %v2654_v16 = vld [vmem:[#allocation3 + $0x5c] sm:$0xf] }
 0x2fa   :  { %v2628_v62 = vld [vmem:[#allocation3 + $0x53] sm:$0xf]  ;;  %v2579_v3 = vld [vmem:[#allocation3 + $0x59] sm:$0xf]  ;;  %v2571_v7 = vmul.f32 %v4696_v30, %v2562_v17  ;;  %v2612_v12 = vmul.f32 %v4702_v8, %v2603_v28  ;;  %v2663_v4 = vmul.f32 %v4708_v53, %v2654_v16 }
 0x2fb   :  { %v2678_v34 = vld [vmem:[#allocation3 + $0x50] sm:$0xf]  ;;  %v2604_v11 = vld [vmem:[#allocation3 + $0x5a] sm:$0xf]  ;;  %v2588_v10 = vmul.f32 %v4698_v29, %v2579_v3  ;;  %v2595_v26 = vadd.f32 %v2587_v40, %v2570_v61  ;;  %v2637_v1 = vmul.f32 %v4705_v14, %v2628_v62  ;;  %v2778_v62 = vld [vmem:[#allocation3 + $0x54] sm:$0xf] }
 0x2fc   :  { %v2687_v36 = vmul.f32 %v4711_v52, %v2678_v34  ;;  %v2629_v55 = vld [vmem:[#allocation3 + $0x5b] sm:$0xf]  ;;  %v2703_v39 = vld [vmem:[#allocation3 + $0x51] sm:$0xf]  ;;  %v2613_v30 = vmul.f32 %v4702_v8, %v2604_v11  ;;  %v2787_v16 = vmul.f32 %v4741_v31, %v2778_v62 }
 0x2fd   :  { %v2728_v33 = vld [vmem:[#allocation3 + $0x52] sm:$0xf]  ;;  %v2596_v15 = vadd.f32 %v2588_v10, %v2571_v7  ;;  %v2620_v51 = vadd.f32 %v2612_v12, %v2595_v26  ;;  %v2679_v29 = vld [vmem:[#allocation3 + $0x58] sm:$0xf]  ;;  %v2712_v43 = vmul.f32 %v4721_v22, %v2703_v39  ;;  %v2638_v5 = vmul.f32 %v4705_v14, %v2629_v55  ;;  %v2779_v11 = vld [vmem:[#allocation3 + $0x5c] sm:$0xf] }
 0x2fe   :  { %v2695_v56 = vadd.f32 %v2687_v36, %v2669_v23  ;;  %v2704_v60 = vld [vmem:[#allocation3 + $0x59] sm:$0xf]  ;;  %v2753_v45 = vld [vmem:[#allocation3 + $0x53] sm:$0xf]  ;;  %v2737_v8 = vmul.f32 %v4726_v32, %v2728_v33  ;;  %v2688_v17 = vmul.f32 %v4711_v52, %v2679_v29 }
 0x2ff   :  { %v2729_v47 = vld [vmem:[#allocation3 + $0x5a] sm:$0xf]  ;;  %v2802_v19 = vld [vmem:[#allocation3 + $0x50] sm:$0xf]  ;;  %v2621_v28 = vadd.f32 %v2613_v30, %v2596_v15  ;;  %v2645_v23 = vadd.f32 %v2637_v1, %v2620_v51  ;;  %v2713_v3 = vmul.f32 %v4721_v22, %v2704_v60  ;;  %v2762_v10 = vmul.f32 %v4736_v2, %v2753_v45  ;;  %v2902_v60 = vld [vmem:[#allocation3 + $0x54] sm:$0xf] }
 0x300   :  { %v2720_v61 = vadd.f32 %v2712_v43, %v2695_v56  ;;  %v2754_v40 = vld [vmem:[#allocation3 + $0x5b] sm:$0xf]  ;;  %v2827_v34 = vld [vmem:[#allocation3 + $0x51] sm:$0xf]  ;;  %v2738_v14 = vmul.f32 %v4726_v32, %v2729_v47  ;;  %v2811_v53 = vmul.f32 %v4744_v6, %v2802_v19  ;;  %v2788_v51 = vmul.f32 %v4741_v31, %v2779_v11 }
 0x301   :  { %v2803_v36 = vld [vmem:[#allocation3 + $0x58] sm:$0xf]  ;;  %v2646_v57 = vadd.f32 %v2638_v5, %v2621_v28  ;;  %v2670_v44 = vadd.f32 %v2662_v54, %v2645_v23  ;;  %v2852_v12 = vld [vmem:[#allocation3 + $0x52] sm:$0xf]  ;;  %v2763_v48 = vmul.f32 %v4736_v2, %v2754_v40  ;;  %v2836_v56 = vmul.f32 %v4747_v13, %v2827_v34  ;;  %v2903_v43 = vld [vmem:[#allocation3 + $0x5c] sm:$0xf] }
 0x302   :  { %v2745_v7 = vadd.f32 %v2737_v8, %v2720_v61  ;;  %v2828_v26 = vld [vmem:[#allocation3 + $0x59] sm:$0xf]  ;;  %v2819_v1 = vadd.f32 %v2811_v53, %v2794_v37  ;;  %v2877_v39 = vld [vmem:[#allocation3 + $0x53] sm:$0xf]  ;;  %v2812_v29 = vmul.f32 %v4744_v6, %v2803_v36  ;;  %v2861_v54 = vmul.f32 %v4752_v63, %v2852_v12 }
 0x303   :  { %v2853_v55 = vld [vmem:[#allocation3 + $0x5a] sm:$0xf]  ;;  %v2696_v15 = vadd.f32 %v2688_v17, %v2670_v44  ;;  %v2837_v47 = vmul.f32 %v4747_v13, %v2828_v26  ;;  %v2671_v23 = vadd.f32 %v2663_v4, %v2646_v57  ;;  %v2886_v40 = vmul.f32 %v4755_v20, %v2877_v39  ;;  %v2956_v4 = vld [vmem:[#allocation3 + $0x71] sm:$0xf] }
 0x304   :  { %v2878_v33 = vld [vmem:[#allocation3 + $0x5b] sm:$0xf]  ;;  %v2770_v30 = vadd.f32 %v2762_v10, %v2745_v7  ;;  %v2844_v5 = vadd.f32 %v2836_v56, %v2819_v1  ;;  %v2862_v45 = vmul.f32 %v4752_v63, %v2853_v55  ;;  %v2911_v53 = vmul.f32 %v4774_v46, %v2902_v60  ;;  %v2931_v7 = vld [vmem:[#allocation3 + $0x70] sm:$0xf]  ;;  %v3486_v60 = vld [vmem:[%s5105_s12 + $0x10] sm:$0xff] }
 0x305   :  { %v2928_v37 = vld [vmem:[#allocation3 + $0x58] sm:$0xf]  ;;  %v2721_v61 = vadd.f32 %v2713_v3, %v2696_v15  ;;  %v3028_v34 = vld [vmem:[#allocation3 + $0x5c] sm:$0xf]  ;;  %v2887_v36 = vmul.f32 %v4755_v20, %v2878_v33  ;;  %v2520_v44 = vrot.slane %v2486_v35, 4  ;;  %v2912_v10 = vmul.f32 %v4774_v46, %v2903_v43 }
 0x306   :  { %v2953_v19 = vld [vmem:[#allocation3 + $0x59] sm:$0xf]  ;;  %v2795_v8 = vadd.f32 %v2787_v16, %v2770_v30  ;;  %v2869_v11 = vadd.f32 %v2861_v54, %v2844_v5  ;;  %v2937_v26 = vmul.f32 %v4782_v9, %v2928_v37  ;;  %v2981_v12 = vld [vmem:[#allocation3 + $0x72] sm:$0xf]  ;;  %v4972_v15 = vmul.f32 %v4808_v49, %v3028_v34  ;;  %v2680_v54 = vld [vmem:[#allocation3 + $0x60] sm:$0xf] }
 0x307   :  { %v2978_v28 = vld [vmem:[#allocation3 + $0x5a] sm:$0xf]  ;;  %v2746_v3 = vadd.f32 %v2738_v14, %v2721_v61  ;;  %v3006_v55 = vld [vmem:[#allocation3 + $0x73] sm:$0xf]  ;;  %v2962_v56 = vmul.f32 %v4785_v24, %v2953_v19  ;;  %2532 = vst [vmem:[#allocation3 + $0x6a] sm:$0xf] %v2520_v44  ;;  %v4975_v30 = vmul.f32 %v4782_v9, %v2931_v7 }
 0x308   :  { %v3003_v62 = vld [vmem:[#allocation3 + $0x5b] sm:$0xf]  ;;  %v2820_v57 = vadd.f32 %v2812_v29, %v2795_v8  ;;  %v3487_v16 = vld [vmem:[%s5105_s12 + $0x18] sm:$0xff]  ;;  %v2894_v1 = vadd.f32 %v2886_v40, %v2869_v11  ;;  %v2987_v41 = vmul.f32 %v4791_v42, %v2978_v28  ;;  %v2705_v37 = vld [vmem:[#allocation3 + $0x61] sm:$0xf]  ;;  %v4981_v28 = vmul.f32 %v4785_v24, %v2956_v4 }
 0x309   :  { %v3488_v17 = vld [vmem:[%s5105_s12 + $0x20] sm:$0xff]  ;;  %v4969_v35 = vmul.f32 %v4798_v50, %v3003_v62  ;;  %v2771_v39 = vadd.f32 %v2763_v48, %v2746_v3  ;;  %v3056_v29 = vld [vmem:[#allocation3 + $0x70] sm:$0xf]  ;;  %v2730_v19 = vld [vmem:[#allocation3 + $0x62] sm:$0xf]  ;;  %v4984_v48 = vmul.f32 %v4791_v42, %v2981_v12  ;;  %v2689_v40 = vmul.f32 %v4711_v52, %v2680_v54 }
 0x30a   :  { %3281 = vmatpush.bf16.msrb.mxu3 %v3488_v17  ;;  %v3078_v14 = vld [vmem:[#allocation3 + $0x39] sm:$0xf]  ;;  %v2845_v33 = vadd.f32 %v2837_v47, %v2820_v57  ;;  %v2919_v5 = vadd.f32 %v2911_v53, %v2894_v1  ;;  %v4987_v47 = vmul.f32 %v4798_v50, %v3006_v55  ;;  %v2755_v62 = vld [vmem:[#allocation3 + $0x63] sm:$0xf]  ;;  %v2714_v44 = vmul.f32 %v4721_v22, %v2705_v37 }
 0x30b   :  { %v3103_v43 = vld [vmem:[#allocation3 + $0x3a] sm:$0xf]  ;;  %v2796_v61 = vadd.f32 %v2788_v51, %v2771_v39  ;;  %v2780_v34 = vld [vmem:[#allocation3 + $0x64] sm:$0xf]  ;;  %v2804_v17 = vld [vmem:[#allocation3 + $0x60] sm:$0xf]  ;;  %v4991_v11 = vmul.f32 %v4852_v58, %v3078_v14  ;;  %v4995_v3 = vmul.f32 %v4831_v0, %v3056_v29  ;;  %v2697_v52 = vadd.f32 %v2689_v40, %v2671_v23 }
 0x30c   :  { %v2870_v8 = vadd.f32 %v2862_v45, %v2845_v33  ;;  %v2945_v53 = vadd.f32 %v2937_v26, %v2919_v5  ;;  %v2829_v7 = vld [vmem:[#allocation3 + $0x61] sm:$0xf]  ;;  %v4998_v51 = vmul.f32 %v4855_v27, %v3103_v43  ;;  %v2739_v57 = vmul.f32 %v4726_v32, %v2730_v19 }
 0x30d   :  { %v2854_v4 = vld [vmem:[#allocation3 + $0x62] sm:$0xf]  ;;  %v2813_v12 = vmul.f32 %v4744_v6, %v2804_v17  ;;  %v2764_v22 = vmul.f32 %v4736_v2, %v2755_v62  ;;  %v2789_v14 = vmul.f32 %v4741_v31, %v2780_v34  ;;  %v2838_v39 = vmul.f32 %v4747_v13, %v2829_v7 }
 0x30e   :  { %3282 = vmatpush.bf16.msrb.mxu3 %v3487_v16  ;;  %v2895_v45 = vadd.f32 %v2887_v36, %v2870_v8  ;;  %v2879_v55 = vld [vmem:[#allocation3 + $0x63] sm:$0xf]  ;;  %v2970_v26 = vadd.f32 %v2962_v56, %v2945_v53  ;;  %v2722_v29 = vadd.f32 %v2714_v44, %v2697_v52  ;;  %v2805_v32 = vld [vmem:[#allocation3 + $0x68] sm:$0xf]  ;;  %v2863_v37 = vmul.f32 %v4752_v63, %v2854_v4  ;;  %v2905_v19 = vld [vmem:[#allocation3 + $0x6c] sm:$0xf] }
 0x30f   :  { %v2904_v16 = vld [vmem:[#allocation3 + $0x64] sm:$0xf]  ;;  %v2929_v1 = vld [vmem:[#allocation3 + $0x60] sm:$0xf]  ;;  %v2821_v43 = vadd.f32 %v2813_v12, %v2796_v61  ;;  %v2830_v5 = vld [vmem:[#allocation3 + $0x69] sm:$0xf]  ;;  %v2888_v31 = vmul.f32 %v4755_v20, %v2879_v55 }
 0x310   :  { %v2954_v33 = vld [vmem:[#allocation3 + $0x61] sm:$0xf]  ;;  %v2920_v23 = vadd.f32 %v2912_v10, %v2895_v45  ;;  %v2855_v54 = vld [vmem:[#allocation3 + $0x6a] sm:$0xf]  ;;  %v2995_v56 = vadd.f32 %v2987_v41, %v2970_v26  ;;  %v2913_v8 = vmul.f32 %v4774_v46, %v2904_v16  ;;  %v2938_v40 = vmul.f32 %v4782_v9, %v2929_v1 }
 0x311   :  { %v3485_v36 = vld [vmem:[%s5105_s12 + $0x8] sm:$0xff]  ;;  %v2880_v2 = vld [vmem:[#allocation3 + $0x6b] sm:$0xf]  ;;  %v2747_v62 = vadd.f32 %v2739_v57, %v2722_v29  ;;  %v2814_v10 = vmul.f32 %v4744_v6, %v2805_v32  ;;  %v2839_v34 = vmul.f32 %v4747_v13, %v2830_v5  ;;  %v2846_v61 = vadd.f32 %v2838_v39, %v2821_v43 }
 0x312   :  { %3283 = vmatpush.bf16.msrb.mxu3 %v3486_v60  ;;  %v2930_v17 = vld [vmem:[#allocation3 + $0x68] sm:$0xf]  ;;  %v2979_v53 = vld [vmem:[#allocation3 + $0x62] sm:$0xf]  ;;  %v3020_v44 = vadd.f32 %v4969_v35, %v2995_v56  ;;  %v2864_v41 = vmul.f32 %v4752_v63, %v2855_v54  ;;  %v2946_v60 = vadd.f32 %v2938_v40, %v2920_v23  ;;  %v2963_v4 = vmul.f32 %v4785_v24, %v2954_v33  ;;  %v3030_v33 = vld [vmem:[#allocation3 + $0x6c] sm:$0xf] }
 0x313   :  { %v2955_v7 = vld [vmem:[#allocation3 + $0x69] sm:$0xf]  ;;  %v2772_v52 = vadd.f32 %v2764_v22, %v2747_v62  ;;  %v2871_v12 = vadd.f32 %v2863_v37, %v2846_v61  ;;  %v2889_v57 = vmul.f32 %v4755_v20, %v2880_v2  ;;  %v5019_v6 = vmul.f32 %v4774_v46, %v2905_v19  ;;  %v3004_v13 = vld [vmem:[#allocation3 + $0x63] sm:$0xf] }
 0x314   :  { %v2980_v45 = vld [vmem:[#allocation3 + $0x6a] sm:$0xf]  ;;  %v3054_v16 = vld [vmem:[#allocation3 + $0x60] sm:$0xf]  ;;  %v3045_v35 = vadd.f32 %v4972_v15, %v3020_v44  ;;  %v2939_v63 = vmul.f32 %v4782_v9, %v2930_v17  ;;  %v2971_v1 = vadd.f32 %v2963_v4, %v2946_v60  ;;  %v2988_v26 = vmul.f32 %v4791_v42, %v2979_v53  ;;  %v3029_v39 = vld [vmem:[#allocation3 + $0x64] sm:$0xf] }
 0x315   :  { %v3005_v55 = vld [vmem:[#allocation3 + $0x6b] sm:$0xf]  ;;  %v2797_v22 = vadd.f32 %v2789_v14, %v2772_v52  ;;  %v2896_v23 = vadd.f32 %v2888_v31, %v2871_v12  ;;  %v2964_v20 = vmul.f32 %v4785_v24, %v2955_v7  ;;  %v2989_v46 = vmul.f32 %v4791_v42, %v2980_v45  ;;  %v3079_v32 = vld [vmem:[#allocation3 + $0x61] sm:$0xf]  ;;  %v3152_v60 = vld [vmem:[#allocation3 + $0x34] sm:$0xf] }
 0x316   :  { %3284 = vmatpush.bf16.msrb.mxu3 %v3485_v36  ;;  %v3055_v29 = vld [vmem:[#allocation3 + $0x68] sm:$0xf]  ;;  %v3484_v36 = vld [vmem:[%s5105_s12] sm:$0xff]  ;;  %v2996_v15 = vadd.f32 %v2988_v26, %v2971_v1  ;;  %v3013_v9 = vmul.f32 %v4798_v50, %v3004_v13  ;;  %v3014_v43 = vmul.f32 %v4798_v50, %v3005_v55  ;;  %v3063_v5 = vmul.f32 %v4831_v0, %v3054_v16  ;;  %v3104_v14 = vld [vmem:[#allocation3 + $0x62] sm:$0xf] }
 0x317   :  { %v3080_v54 = vld [vmem:[#allocation3 + $0x69] sm:$0xf]  ;;  %v2822_v37 = vadd.f32 %v2814_v10, %v2797_v22  ;;  %v2921_v56 = vadd.f32 %v2913_v8, %v2896_v23  ;;  %v3038_v24 = vmul.f32 %v4808_v49, %v3029_v39  ;;  %v3039_v42 = vmul.f32 %v4808_v49, %v3030_v33  ;;  %v3129_v31 = vld [vmem:[#allocation3 + $0x63] sm:$0xf]  ;;  %v3127_v50 = vld [vmem:[#allocation3 + $0x33] sm:$0xf] }
 0x318   :  { %v3105_v2 = vld [vmem:[#allocation3 + $0x6a] sm:$0xf]  ;;  %v3021_v19 = vadd.f32 %v3013_v9, %v2996_v15  ;;  %v3064_v40 = vmul.f32 %v4831_v0, %v3055_v29  ;;  %v3071_v62 = vadd.f32 %v3063_v5, %v3045_v35  ;;  %v3088_v61 = vmul.f32 %v4852_v58, %v3079_v32  ;;  %v3128_v10 = vld [vmem:[#allocation3 + $0x3b] sm:$0xf]  ;;  %v3154_v55 = vld [vmem:[#allocation3 + $0x64] sm:$0xf] }
 0x319   :  { %v2847_v17 = vadd.f32 %v2839_v34, %v2822_v37  ;;  %v2947_v53 = vadd.f32 %v2939_v63, %v2921_v56  ;;  %v3089_v44 = vmul.f32 %v4852_v58, %v3080_v54  ;;  %v3113_v8 = vmul.f32 %v4855_v27, %v3104_v14  ;;  %v3153_v35 = vld [vmem:[#allocation3 + $0x3c] sm:$0xf]  ;;  %v3081_v23 = vld [vmem:[#allocation3 + $0x71] sm:$0xf]  ;;  %v3130_v29 = vld [vmem:[#allocation3 + $0x6b] sm:$0xf] }
 0x31a   :  { %3285 = vmatpush.bf16.msrb.mxu3 %v3484_v36  ;;  %v3046_v7 = vadd.f32 %v3038_v24, %v3021_v19  ;;  %v3096_v4 = vadd.f32 %v3088_v61, %v3071_v62  ;;  %v3114_v45 = vmul.f32 %v4855_v27, %v3105_v2  ;;  %v3138_v52 = vmul.f32 %v4859_v38, %v3129_v31  ;;  %v3106_v5 = vld [vmem:[#allocation3 + $0x72] sm:$0xf]  ;;  %v3155_v54 = vld [vmem:[#allocation3 + $0x6c] sm:$0xf] }
 0x31b   :  { %v2872_v12 = vadd.f32 %v2864_v41, %v2847_v17  ;;  %v2972_v13 = vadd.f32 %v2964_v20, %v2947_v53  ;;  %v3095_v16 = vadd.f32 %v4991_v11, %v4928_v59  ;;  %v3136_v34 = vmul.f32 %v4859_v38, %v3127_v50  ;;  %v3031_v24 = vld [vmem:[#allocation3 + $0x74] sm:$0xf] }
 0x31c   :  { %v3072_v63 = vadd.f32 %v3064_v40, %v3046_v7  ;;  %v3121_v1 = vadd.f32 %v3113_v8, %v3096_v4  ;;  %v3137_v26 = vmul.f32 %v4859_v38, %v3128_v10  ;;  %v3161_v39 = vmul.f32 %v4864_v18, %v3152_v60  ;;  %v3131_v61 = vld [vmem:[#allocation3 + $0x73] sm:$0xf]  ;;  %v3057_v10 = vld [vmem:[#allocation3 + $0x78] sm:$0xf] }
 0x31d   :  { %v2897_v33 = vadd.f32 %v2889_v57, %v2872_v12  ;;  %v2997_v22 = vadd.f32 %v2989_v46, %v2972_v13  ;;  %v3120_v41 = vadd.f32 %v4998_v51, %v3095_v16  ;;  %v3144_v20 = vadd.f32 %v3136_v34, %v4921_v25  ;;  %v3156_v60 = vld [vmem:[#allocation3 + $0x74] sm:$0xf]  ;;  %v3107_v34 = vld [vmem:[#allocation3 + $0x7a] sm:$0xf] }
 0x31e   :  { %v3097_v32 = vadd.f32 %v3089_v44, %v3072_v63  ;;  %v3146_v36 = vadd.f32 %v3138_v52, %v3121_v1  ;;  %v3163_v59 = vmul.f32 %v4864_v18, %v3154_v55  ;;  %v3162_v11 = vmul.f32 %v4864_v18, %v3153_v35  ;;  %v3132_v1 = vld [vmem:[#allocation3 + $0x7b] sm:$0xf] }
 0x31f   :  { %v2922_v15 = vadd.f32 %v5019_v6, %v2897_v33  ;;  %v3022_v9 = vadd.f32 %v3014_v43, %v2997_v22  ;;  %v3145_v14 = vadd.f32 %v3137_v26, %v3120_v41  ;;  %v3169_v57 = vadd.f32 %v3161_v39, %v3144_v20  ;;  %v3157_v22 = vld [vmem:[#allocation3 + $0x7c] sm:$0xf] }
 0x320   :  { %v3090_v46 = vmul.f32 %v4852_v58, %v3081_v23  ;;  %v3122_v37 = vadd.f32 %v3114_v45, %v3097_v32  ;;  %v3139_v51 = vmul.f32 %v4859_v38, %v3130_v29  ;;  %v3171_v56 = vadd.f32 %v3163_v59, %v3146_v36  ;;  %v3217_v29 = vld.sshfl [vmem:[#allocation1] sm:$0xff pattern:$0x75316420] }
 0x321   :  { %v2948_v25 = vadd.f32 %v4975_v30, %v2922_v15  ;;  %v3047_v2 = vadd.f32 %v3039_v42, %v3022_v9  ;;  %v3170_v31 = vadd.f32 %v3162_v11, %v3145_v14  ;;  %v3180_v19 = vadd.f32 %v4884_v21, %v3169_v57 }
 0x322   :  { %v3115_v6 = vmul.f32 %v4855_v27, %v3106_v5  ;;  %v3147_v43 = vadd.f32 %v3139_v51, %v3122_v37  ;;  %v3164_v40 = vmul.f32 %v4864_v18, %v3155_v54  ;;  %v3182_v62 = vadd.f32 %v4884_v21, %v3171_v56  ;;  %v3510_v54 = vld [vmem:[%s5104_s13] ss:$0 sm:$0xff] }
 0x323   :  { %v2973_v50 = vadd.f32 %v4981_v28, %v2948_v25  ;;  %v3073_v17 = vadd.f32 %v4995_v3, %v3047_v2  ;;  %v3181_v53 = vadd.f32 %v4884_v21, %v3170_v31  ;;  %v3188_v30 = vmax.f32 %v3180_v19, 0.0  ;;  %v3082_v3 = vld [vmem:[#allocation3 + $0x79] sm:$0xf] }
 0x324   :  { %v3040_v42 = vmul.f32 %v4808_v49, %v3031_v24  ;;  %v3172_v44 = vadd.f32 %v3164_v40, %v3147_v43  ;;  %v3190_v8 = vmax.f32 %v3182_v62, 0.0  ;;  %v3140_v52 = vmul.f32 %v4859_v38, %v3131_v61 }
 0x325   :  { %v2998_v7 = vadd.f32 %v4984_v48, %v2973_v50  ;;  %v3098_v4 = vadd.f32 %v3090_v46, %v3073_v17  ;;  %v3189_v45 = vmax.f32 %v3181_v53, 0.0  ;;  %3206 = vst [vmem:[#allocation1 + $0x10] ss:$2 sm:$0xff] %v3188_v30  ;;  %v3066_v49 = vmul.f32 %v4831_v0, %v3057_v10 }
 0x326   :  { %v3183_v28 = vadd.f32 %v4884_v21, %v3172_v44  ;;  %3210 = vst [vmem:[#allocation1 + $0x20] ss:$2 sm:$0xff] %v3190_v8  ;;  %v3165_v55 = vmul.f32 %v4864_v18, %v3156_v60  ;;  %v3091_v35 = vmul.f32 %v4852_v58, %v3082_v3  ;;  %v3116_v39 = vmul.f32 %v4855_v27, %v3107_v34 }
 0x327   :  { %v3023_v12 = vadd.f32 %v4987_v47, %v2998_v7  ;;  %v3123_v13 = vadd.f32 %v3115_v6, %v3098_v4  ;;  %3208 = vst [vmem:[#allocation1 + $0x11] ss:$2 sm:$0xff] %v3189_v45  ;;  %v3141_v23 = vmul.f32 %v4859_v38, %v3132_v1  ;;  %v3166_v36 = vmul.f32 %v4864_v18, %v3157_v22 }
 0x328   :  { %v3191_v16 = vmax.f32 %v3183_v28, 0.0 }
 0x329   :  { %v3048_v48 = vadd.f32 %v3040_v42, %v3023_v12  ;;  %v3148_v63 = vadd.f32 %v3140_v52, %v3123_v13 }
 0x32a   :  { %3212 = vst [vmem:[#allocation1 + $0x21] ss:$2 sm:$0xff] %v3191_v16 }
 0x32b   :  { %v3074_v26 = vadd.f32 %v3066_v49, %v3048_v48  ;;  %v3173_v33 = vadd.f32 %v3165_v55, %v3148_v63 }
 0x32d   :  { %v3099_v47 = vadd.f32 %v3091_v35, %v3074_v26  ;;  %v3184_v0 = vadd.f32 %v4884_v21, %v3173_v33 }
 0x32e   :  { %v3218_v41 = vld.sshfl [vmem:[#allocation1 + $0x10] sm:$0xff pattern:$0x75316420] }
 0x32f   :  { %v3225_v20 = vpack.c.bf16 %v3218_v41, %v3217_v29  ;;  %v3124_v32 = vadd.f32 %v3116_v39, %v3099_v47  ;;  %v3192_v58 = vmax.f32 %v3184_v0, 0.0 }
 0x331   :  { %3286 = vmatmul.bf16.vlgmr.msrb.gmra.mxu3 %v3225_v20  ;;  %v3149_v59 = vadd.f32 %v3141_v23, %v3124_v32  ;;  %3214 = vst [vmem:[#allocation1 + $0x30] ss:$2 sm:$0xff] %v3192_v58  ;;  %v3219_v9 = vld.sshfl [vmem:[#allocation1 + $0x20] sm:$0xff pattern:$0x75316420] }
 0x333   :  { %v3174_v11 = vadd.f32 %v3166_v36, %v3149_v59 }
 0x335   :  { %v3185_v27 = vadd.f32 %v4884_v21, %v3174_v11 }
 0x337   :  { %v3193_v15 = vmax.f32 %v3185_v27, 0.0 }
 0x339   :  { %3216 = vst [vmem:[#allocation1 + $0x31] ss:$2 sm:$0xff] %v3193_v15 }
 0x340   :  { %v3220_v5 = vld.sshfl [vmem:[#allocation1 + $0x30] sm:$0xff pattern:$0x75316420] }
 0x341   :  { %v3226_v38 = vpack.c.bf16 %v3220_v5, %v3219_v9 }
 0x343   :  { %3291 = vmatmul.bf16.gmra.mxu3 %v3226_v38 }
 0x3b4   :  { %v3287_v14 = vpop.f32.mrf.mxu3 }
 0x3b5   :  { %v3288_v57 = vadd.f32 %v3510_v54, %v3287_v14 }
 0x3b7   :  { %3297 = vst.msk [vmem:[%s5106_s14] sm:$0xff] %vm2457_vm3, %v3288_v57 }
 0x3bc   :  { %v3289_v18 = vpop.f32.mrf.mxu3 }
 0x3bd   :  { %v3290_v46 = vadd.f32 %v3510_v54, %v3289_v18 }
 0x3bf   :  { %3298 = vst.msk [vmem:[%s5106_s14 + $0x8] sm:$0xff] %vm2457_vm3, %v3290_v46 }
 0x3c6   :  { %v3292_v21 = vpop.f32.mrf.mxu3 }
 0x3c7   :  { %v3293_v37 = vadd.f32 %v3510_v54, %v3292_v21 }
 0x3c9   :  { %3299 = vst.msk [vmem:[%s5106_s14 + $0x10] sm:$0xff] %vm2457_vm3, %v3293_v37 }
 0x3ce   :  { %v3294_v51 = vpop.f32.mrf.mxu3 }
 0x3cf   :  { %v3295_v56 = vadd.f32 %v3510_v54, %v3294_v51 }
 0x3d1   :  { %3300 = vst.msk [vmem:[%s5106_s14 + $0x18] sm:$0xff] %vm2457_vm3, %v3295_v56 }

</bundles_post_ra>
